<compile_context>
chip_gen: v7x
topology: tpu7x:2x2x1
jax: 0.10.0
libtpu: 0.0.40
codegen_flags: <defaults>
</compile_context>

<pallas_src>
import functools

import jax
import jax.numpy as jnp
import numpy as np
from jax import lax
from jax.experimental import pallas as pl
from jax.experimental.pallas import tpu as pltpu

EPS = 1e-5            # nn.BatchNorm2d default
LANE = 128            # MXU N / lane width
SUBLANE_BF16 = 16     # bf16 sublane packing


def _rup(c, m):
    return ((c + m - 1) // m) * m


def _cost(flops, bytes_accessed):
    return pl.CostEstimate(flops=int(flops), transcendentals=0,
                           bytes_accessed=int(bytes_accessed))


# --------------------------------------------------------------------------- #
# in-kernel helpers
# --------------------------------------------------------------------------- #
def _zero_halo(pad_ref):
    """Zero the 1-pixel halo of a (Hp, Wp, C) padded scratch buffer.

    Done every grid step (not only step 0): with the batch axis marked
    "parallel", the second TensorCore on v7x never executes program_id == 0,
    so a once-only init would leave its (per-core) scratch halo uninitialised.
    """
    hp, wp, c = pad_ref.shape
    zrow = jnp.zeros((1, wp, c), pad_ref.dtype)
    pad_ref[0:1, :, :] = zrow
    pad_ref[hp - 1:hp, :, :] = zrow
    zcol = jnp.zeros((hp, 1, c), pad_ref.dtype)
    pad_ref[:, 0:1, :] = zcol
    pad_ref[:, wp - 1:wp, :] = zcol


def _tap(pad_ref, kh, kw, ho, wo, stride):
    """(Ho, Wo, C) tap of the halo-padded scratch for kernel offset (kh, kw)."""
    if stride == 1:
        return pad_ref[kh:kh + ho, kw:kw + wo, :]
    return pad_ref[pl.ds(kh, ho, stride), pl.ds(kw, wo, stride), :]


def _im2col_matmul(pad_ref, w_ref, ho, wo, stride):
    """3x3 conv as im2col MXU matmul(s); bf16 operands, f32 accumulation.

    Small C: one (Ho*Wo, 9*C) patch and a single matmul.
    C >= 128: contraction split per kernel row (3 matmuls of K = 3*C) so the
    full packed patch is never materialised in VMEM.
    """
    c = pad_ref.shape[-1]

    def row_patch(kh):
        taps = [_tap(pad_ref, kh, kw, ho, wo, stride).reshape(ho * wo, c)
                for kw in range(3)]
        return jnp.concatenate(taps, axis=-1)            # (Ho*Wo, 3*C)

    if c >= LANE:
        acc = None
        for kh in range(3):
            part = jnp.dot(row_patch(kh),
                           w_ref[kh * 3 * c:(kh + 1) * 3 * c, :],
                           preferred_element_type=jnp.float32)
            acc = part if acc is None else acc + part
        return acc
    patch = jnp.concatenate([row_patch(kh) for kh in range(3)], axis=-1)
    return jnp.dot(patch, w_ref[...], preferred_element_type=jnp.float32)


def _stats(acc):
    """Per-channel (sum, sum-of-squares) partials for cross-image BN reduction."""
    s = jnp.sum(acc, axis=0, keepdims=True)
    sq = jnp.sum(acc * acc, axis=0, keepdims=True)
    return jnp.concatenate([s, sq], axis=0)              # (2, C) f32


# --------------------------------------------------------------------------- #
# kernel A: conv1 (+ fused 1x1 projection shortcut) + BN partial stats
# --------------------------------------------------------------------------- #
def conv1_kernel(*refs, h, w, ho, wo, stride, has_sc):
    if has_sc:
        x_ref, w_ref, y1_ref, st1_ref, sc_ref, stsc_ref, xpad_ref = refs
    else:
        x_ref, w_ref, y1_ref, st1_ref, xpad_ref = refs
    cpo = y1_ref.shape[-1]

    _zero_halo(xpad_ref)
    xpad_ref[1:h + 1, 1:w + 1, :] = x_ref[0].astype(xpad_ref.dtype)

    # Fused weight = [w1 | wsc-in-centre-tap] -> one MXU push per image gives
    # (Ho*Wo, {1,2}*Cpo) in f32 accumulation.
    acc = _im2col_matmul(xpad_ref, w_ref, ho, wo, stride)
    y1 = acc[:, :cpo]
    y1_ref[...] = y1.reshape(1, ho, wo, cpo).astype(y1_ref.dtype)      # bf16 out
    st1_ref[...] = _stats(y1).reshape(1, 2, cpo)                       # f32 stats
    if has_sc:
        sc = acc[:, cpo:]
        sc_ref[...] = sc.reshape(1, ho, wo, cpo).astype(sc_ref.dtype)
        stsc_ref[...] = _stats(sc).reshape(1, 2, cpo)


# --------------------------------------------------------------------------- #
# kernel B: bn1(affine) + relu + conv2 + BN partial stats
# --------------------------------------------------------------------------- #
def conv2_kernel(y1_ref, s1_ref, t1_ref, w2_ref, y2_ref, st2_ref, mpad_ref, *,
                 ho, wo):
    cpo = y2_ref.shape[-1]
    y1 = jnp.maximum(y1_ref[0].astype(jnp.float32) * s1_ref[...] + t1_ref[...],
                     0.0)

    _zero_halo(mpad_ref)
    mpad_ref[1:ho + 1, 1:wo + 1, :] = y1.astype(mpad_ref.dtype)

    acc = _im2col_matmul(mpad_ref, w2_ref, ho, wo, 1)                  # f32
    y2_ref[...] = acc.reshape(1, ho, wo, cpo).astype(y2_ref.dtype)     # bf16 out
    st2_ref[...] = _stats(acc).reshape(1, 2, cpo)


# --------------------------------------------------------------------------- #
# kernel C: bn2(affine) [+ bn_sc(affine)] + residual add + relu
# --------------------------------------------------------------------------- #
def finalize_kernel(*refs, has_sc):
    if has_sc:
        y2_ref, sc_ref, s2_ref, t2_ref, ssc_ref, tsc_ref, o_ref = refs
    else:
        y2_ref, sc_ref, s2_ref, t2_ref, o_ref = refs
    f32 = jnp.float32
    y2 = y2_ref[0].astype(f32) * s2_ref[...] + t2_ref[...]
    sc = sc_ref[0].astype(f32)
    if has_sc:
        sc = sc * ssc_ref[...] + tsc_ref[...]
    else:
        cpo = y2_ref.shape[-1]
        csc = sc.shape[-1]
        if csc < cpo:        # identity shortcut: pad up to the lane-dense width
            sc = jnp.concatenate(
                [sc, jnp.zeros(sc.shape[:-1] + (cpo - csc,), f32)], axis=-1)
    o_ref[...] = jnp.maximum(y2 + sc, 0.0)[None].astype(o_ref.dtype)


# --------------------------------------------------------------------------- #
# wrapper
# --------------------------------------------------------------------------- #
def _bn_affine(stats, gamma_p, beta_p, count):
    """Fold training-mode BN (per-image sum / sumsq partials) into scale & shift."""
    s = jnp.sum(stats, axis=0)                           # (2, Cp)
    mean = s[0] / count
    var = jnp.maximum(s[1] / count - mean * mean, 0.0)   # biased variance
    scale = gamma_p * lax.rsqrt(var + EPS)
    shift = beta_p - mean * scale
    return scale.reshape(1, -1), shift.reshape(1, -1)


@functools.partial(jax.jit, static_argnames=("stride", "slice_output"))
def basic_block(x, params, stride=1, slice_output=True):
    n, h, w, cin = x.shape
    cout = params["w1"].shape[-1]
    ho = (h - 1) // stride + 1                           # PyTorch k=3, pad=1
    wo = (w - 1) // stride + 1
    has_sc = (stride != 1) or (cin != cout)
    cpi = _rup(cin, SUBLANE_BF16)    # contraction dim: sublane-rounded only
    cpo = _rup(cout, LANE)           # output dim: lane-dense (MXU N)
    f32, bf16 = jnp.float32, jnp.bfloat16
    count = float(n * ho * wo)

    cparams = pltpu.CompilerParams(
        dimension_semantics=("parallel",),               # batch -> megacore on v7x
        vmem_limit_bytes=32 * 1024 * 1024)               # safe under v7x 64 MiB

    # ---- weight / channel prep (K rounded to sublane, N padded to lane) ------
    xp = x.astype(f32) if cpi == cin else jnp.pad(
        x.astype(f32), ((0, 0), (0, 0), (0, 0), (0, cpi - cin)))
    w1p = jnp.pad(params["w1"].astype(f32),
                  ((0, 0), (0, 0), (0, cpi - cin), (0, cpo - cout)))
    w1p = w1p.reshape(9 * cpi, cpo)
    if has_sc:
        # Fuse the 1x1 projection into conv1: its weight lives in the centre-tap
        # (kh=kw=1) rows of a second Cout block -> one matmul emits [y1 | sc].
        wsc_rows = jnp.zeros((9 * cpi, cpo), f32)
        wsc_rows = wsc_rows.at[4 * cpi:4 * cpi + cin, :cout].set(
            params["wsc"].astype(f32))
        wa = jnp.concatenate([w1p, wsc_rows], axis=1).astype(bf16)  # (9*cpi, 2*cpo)
    else:
        wa = w1p.astype(bf16)
    ncols = wa.shape[-1]
    w2p = jnp.pad(params["w2"].astype(f32),
                  ((0, 0), (0, 0), (0, cpo - cout), (0, cpo - cout)))
    w2p = w2p.reshape(9 * cpo, cpo).astype(bf16)

    def pad_c(v, cp):
        return jnp.pad(v.astype(f32), (0, cp - v.shape[0]))

    g1, b1 = pad_c(params["g1"], cpo), pad_c(params["b1"], cpo)
    g2, b2 = pad_c(params["g2"], cpo), pad_c(params["b2"], cpo)

    # ------------------------------ kernel A ----------------------------------
    out_shape_a = [jax.ShapeDtypeStruct((n, ho, wo, cpo), bf16),
                   jax.ShapeDtypeStruct((n, 2, cpo), f32)]
    out_specs_a = [pl.BlockSpec((1, ho, wo, cpo), lambda i: (i, 0, 0, 0)),
                   pl.BlockSpec((1, 2, cpo), lambda i: (i, 0, 0))]
    if has_sc:
        out_shape_a += [jax.ShapeDtypeStruct((n, ho, wo, cpo), bf16),
                        jax.ShapeDtypeStruct((n, 2, cpo), f32)]
        out_specs_a += [pl.BlockSpec((1, ho, wo, cpo), lambda i: (i, 0, 0, 0)),
                        pl.BlockSpec((1, 2, cpo), lambda i: (i, 0, 0))]
    flops_a = 2 * n * ho * wo * (9 * cpi) * ncols
    bytes_a = 4 * xp.size + 2 * wa.size + sum(
        int(np.prod(s.shape)) * s.dtype.itemsize for s in out_shape_a)

    res_a = pl.pallas_call(
        functools.partial(conv1_kernel, h=h, w=w, ho=ho, wo=wo,
                          stride=stride, has_sc=has_sc),
        grid=(n,),
        in_specs=[pl.BlockSpec((1, h, w, cpi), lambda i: (i, 0, 0, 0)),
                  pl.BlockSpec((9 * cpi, ncols), lambda i: (0, 0))],
        out_specs=tuple(out_specs_a),
        out_shape=tuple(out_shape_a),
        scratch_shapes=[pltpu.VMEM((h + 2, w + 2, cpi), bf16)],
        compiler_params=cparams,
        cost_estimate=_cost(flops_a, bytes_a),
    )(xp, wa)

    if has_sc:
        y1raw, st1, scraw, stsc = res_a
    else:
        y1raw, st1 = res_a

    s1, t1 = _bn_affine(st1, g1, b1, count)

    # ------------------------------ kernel B ----------------------------------
    flops_b = 2 * n * ho * wo * (9 * cpo) * cpo
    bytes_b = (2 * y1raw.size + 2 * w2p.size + 2 * n * ho * wo * cpo
               + 4 * n * 2 * cpo + 4 * 2 * cpo)
    y2raw, st2 = pl.pallas_call(
        functools.partial(conv2_kernel, ho=ho, wo=wo),
        grid=(n,),
        in_specs=[
            pl.BlockSpec((1, ho, wo, cpo), lambda i: (i, 0, 0, 0)),
            pl.BlockSpec((1, cpo), lambda i: (0, 0)),
            pl.BlockSpec((1, cpo), lambda i: (0, 0)),
            pl.BlockSpec((9 * cpo, cpo), lambda i: (0, 0)),
        ],
        out_specs=(pl.BlockSpec((1, ho, wo, cpo), lambda i: (i, 0, 0, 0)),
                   pl.BlockSpec((1, 2, cpo), lambda i: (i, 0, 0))),
        out_shape=(jax.ShapeDtypeStruct((n, ho, wo, cpo), bf16),
                   jax.ShapeDtypeStruct((n, 2, cpo), f32)),
        scratch_shapes=[pltpu.VMEM((ho + 2, wo + 2, cpo), bf16)],
        compiler_params=cparams,
        cost_estimate=_cost(flops_b, bytes_b),
    )(y1raw, s1, t1, w2p)

    s2, t2 = _bn_affine(st2, g2, b2, count)

    # ------------------------------ kernel C ----------------------------------
    in_specs_c = [pl.BlockSpec((1, ho, wo, cpo), lambda i: (i, 0, 0, 0))]
    args_c = [y2raw]
    if has_sc:
        gsc, bsc = pad_c(params["gsc"], cpo), pad_c(params["bsc"], cpo)
        ssc, tsc = _bn_affine(stsc, gsc, bsc, count)
        in_specs_c += [pl.BlockSpec((1, ho, wo, cpo), lambda i: (i, 0, 0, 0)),
                       pl.BlockSpec((1, cpo), lambda i: (0, 0)),
                       pl.BlockSpec((1, cpo), lambda i: (0, 0)),
                       pl.BlockSpec((1, cpo), lambda i: (0, 0)),
                       pl.BlockSpec((1, cpo), lambda i: (0, 0))]
        args_c += [scraw, s2, t2, ssc, tsc]
    else:
        # identity shortcut (stride==1, cin==cout): raw input, padded in-kernel
        in_specs_c += [pl.BlockSpec((1, ho, wo, cpi), lambda i: (i, 0, 0, 0)),
                       pl.BlockSpec((1, cpo), lambda i: (0, 0)),
                       pl.BlockSpec((1, cpo), lambda i: (0, 0))]
        args_c += [xp, s2, t2]

    bytes_c = (2 * y2raw.size + args_c[1].size * args_c[1].dtype.itemsize
               + 4 * n * ho * wo * cpo)
    out_p = pl.pallas_call(
        functools.partial(finalize_kernel, has_sc=has_sc),
        grid=(n,),
        in_specs=in_specs_c,
        out_specs=pl.BlockSpec((1, ho, wo, cpo), lambda i: (i, 0, 0, 0)),
        out_shape=jax.ShapeDtypeStruct((n, ho, wo, cpo), f32),
        compiler_params=cparams,
        cost_estimate=_cost(6 * n * ho * wo * cpo, bytes_c),
    )(*args_c)

    # TODO(synk): chained BasicBlocks should pass slice_output=False and keep the
    #             lane-padded NHWC layout; slice only at the network boundary.
    return out_p[..., :cout] if slice_output else out_p


# ---------------------- pure-JAX f32 reference (for checking) ----------------
def _conv_ref(x, w, stride, pad):
    return lax.conv_general_dilated(
        x, w, window_strides=(stride, stride), padding=pad,
        dimension_numbers=("NHWC", "HWIO", "NHWC"))


def _bn_ref(x, gamma, beta):
    mu = x.mean(axis=(0, 1, 2), keepdims=True)
    var = ((x - mu) ** 2).mean(axis=(0, 1, 2), keepdims=True)
    return (x - mu) * lax.rsqrt(var + EPS) * gamma + beta


def ref_forward(x, p, stride):
    cin, cout = x.shape[-1], p["w1"].shape[-1]
    out = jnp.maximum(_bn_ref(_conv_ref(x, p["w1"], stride, ((1, 1), (1, 1))),
                              p["g1"], p["b1"]), 0.0)
    out = _bn_ref(_conv_ref(out, p["w2"], 1, ((1, 1), (1, 1))), p["g2"], p["b2"])
    if stride != 1 or cin != cout:
        sc = _bn_ref(_conv_ref(x, p["wsc"][None, None], stride, ((0, 0), (0, 0))),
                     p["gsc"], p["bsc"])
    else:
        sc = x
    return jnp.maximum(out + sc, 0.0)


if __name__ == "__main__":
    def make_params(key, cin, cout, has_sc):
        ks = jax.random.split(key, 9)
        p = {
            "w1": 0.1 * jax.random.normal(ks[0], (3, 3, cin, cout), jnp.float32),
            "g1": 1.0 + 0.1 * jax.random.normal(ks[1], (cout,), jnp.float32),
            "b1": 0.1 * jax.random.normal(ks[2], (cout,), jnp.float32),
            "w2": 0.1 * jax.random.normal(ks[3], (3, 3, cout, cout), jnp.float32),
            "g2": 1.0 + 0.1 * jax.random.normal(ks[4], (cout,), jnp.float32),
            "b2": 0.1 * jax.random.normal(ks[5], (cout,), jnp.float32),
        }
        if has_sc:
            p["wsc"] = 0.1 * jax.random.normal(ks[6], (cin, cout), jnp.float32)
            p["gsc"] = 1.0 + 0.1 * jax.random.normal(ks[7], (cout,), jnp.float32)
            p["bsc"] = 0.1 * jax.random.normal(ks[8], (cout,), jnp.float32)
        return p

    k1, k2, k3, k4 = jax.random.split(jax.random.PRNGKey(0), 4)

    # Config 1: projection shortcut (in_planes=8 != planes=16), stride=1.
    x1 = jax.random.normal(k1, (2, 16, 16, 8), jnp.float32)
    p1 = make_params(k2, 8, 16, has_sc=True)
    out1 = jax.block_until_ready(basic_block(x1, p1, stride=1))
    ref1 = jax.block_until_ready(ref_forward(x1, p1, 1))
    assert out1.shape == ref1.shape, (out1.shape, ref1.shape)
    # Tolerance: bf16 MXU operands + bf16 inter-kernel activations (f32 accum /
    # f32 BN math) vs a pure-f32 reference.
    np.testing.assert_allclose(np.asarray(out1), np.asarray(ref1),
                               atol=5e-2, rtol=5e-2)

    # Config 2: identity shortcut (in_planes == planes == 16), stride=1.
    x2 = jax.random.normal(k3, (2, 16, 16, 16), jnp.float32)
    p2 = make_params(k4, 16, 16, has_sc=False)
    out2 = jax.block_until_ready(basic_block(x2, p2, stride=1))
    ref2 = jax.block_until_ready(ref_forward(x2, p2, 1))
    assert out2.shape == ref2.shape, (out2.shape, ref2.shape)
    np.testing.assert_allclose(np.asarray(out2), np.asarray(ref2),
                               atol=5e-2, rtol=5e-2)

    print("KERNEL_OK")
</pallas_src>

<mosaic_0001>
module attributes {stable_mosaic.version = 11 : i64} {
  func.func @conv1_kernel(%arg0: i32, %arg1: memref<1x16x16x16xf32, #tpu.memory_space<vmem>>, %arg2: memref<144x256xbf16, #tpu.memory_space<vmem>>, %arg3: memref<1x16x16x128xbf16, #tpu.memory_space<vmem>>, %arg4: memref<1x2x128xf32, #tpu.memory_space<vmem>>, %arg5: memref<1x16x16x128xbf16, #tpu.memory_space<vmem>>, %arg6: memref<1x2x128xf32, #tpu.memory_space<vmem>>, %arg7: memref<18x18x16xbf16, #tpu.memory_space<vmem>>) attributes {dimension_semantics = [#tpu.dimension_semantics<parallel>], iteration_bounds = array<i64: 2>, scalar_prefetch = 0 : i64, scratch_operands = 1 : i64, tpu.core_type = #tpu.core_type<tc>, window_params = [{transform_indices = @transform_0, window_bounds = array<i64: 1, 16, 16, 16>}, {pipeline_mode = #tpu.pipeline_mode<synchronous>, transform_indices = @transform_1, window_bounds = array<i64: 144, 256>}, {transform_indices = @transform_2, window_bounds = array<i64: 1, 16, 16, 128>}, {transform_indices = @transform_3, window_bounds = array<i64: 1, 2, 128>}, {transform_indices = @transform_4, window_bounds = array<i64: 1, 16, 16, 128>}, {transform_indices = @transform_5, window_bounds = array<i64: 1, 2, 128>}]} {
    %cst = arith.constant 0.000000e+00 : bf16
    %0 = vector.broadcast %cst : bf16 to vector<1x18x16xbf16>
    %c0 = arith.constant 0 : index
    %c0_0 = arith.constant 0 : index
    %c0_1 = arith.constant 0 : index
    %1 = vector.load %arg7[%c0, %c0_0, %c0_1] : memref<18x18x16xbf16, #tpu.memory_space<vmem>>, vector<1x18x16xbf16>
    tpu.vector_store %arg7[%c0, %c0_0, %c0_1], %0 {strides = array<i32>} : memref<18x18x16xbf16, #tpu.memory_space<vmem>>, vector<1x18x16xbf16>,
    %c17 = arith.constant 17 : index
    %c0_2 = arith.constant 0 : index
    %c0_3 = arith.constant 0 : index
    %2 = vector.load %arg7[%c17, %c0_2, %c0_3] : memref<18x18x16xbf16, #tpu.memory_space<vmem>>, vector<1x18x16xbf16>
    tpu.vector_store %arg7[%c17, %c0_2, %c0_3], %0 {strides = array<i32>} : memref<18x18x16xbf16, #tpu.memory_space<vmem>>, vector<1x18x16xbf16>,
    %cst_4 = arith.constant 0.000000e+00 : bf16
    %3 = vector.broadcast %cst_4 : bf16 to vector<18x1x16xbf16>
    %c0_5 = arith.constant 0 : index
    %c0_6 = arith.constant 0 : index
    %c0_7 = arith.constant 0 : index
    %4 = vector.load %arg7[%c0_5, %c0_6, %c0_7] : memref<18x18x16xbf16, #tpu.memory_space<vmem>>, vector<18x1x16xbf16>
    tpu.vector_store %arg7[%c0_5, %c0_6, %c0_7], %3 {strides = array<i32>} : memref<18x18x16xbf16, #tpu.memory_space<vmem>>, vector<18x1x16xbf16>,
    %c0_8 = arith.constant 0 : index
    %c17_9 = arith.constant 17 : index
    %c0_10 = arith.constant 0 : index
    %5 = vector.load %arg7[%c0_8, %c17_9, %c0_10] : memref<18x18x16xbf16, #tpu.memory_space<vmem>>, vector<18x1x16xbf16>
    tpu.vector_store %arg7[%c0_8, %c17_9, %c0_10], %3 {strides = array<i32>} : memref<18x18x16xbf16, #tpu.memory_space<vmem>>, vector<18x1x16xbf16>,
    %c0_11 = arith.constant 0 : index
    %c0_12 = arith.constant 0 : index
    %c0_13 = arith.constant 0 : index
    %c0_14 = arith.constant 0 : index
    %6 = vector.load %arg1[%c0_11, %c0_12, %c0_13, %c0_14] : memref<1x16x16x16xf32, #tpu.memory_space<vmem>>, vector<1x16x16x16xf32>
    %7 = vector.shape_cast %6 : vector<1x16x16x16xf32> to vector<16x16x16xf32>
    %8 = arith.truncf %7 : vector<16x16x16xf32> to vector<16x16x16xbf16>
    %c1 = arith.constant 1 : index
    %c1_15 = arith.constant 1 : index
    %c0_16 = arith.constant 0 : index
    %9 = vector.load %arg7[%c1, %c1_15, %c0_16] : memref<18x18x16xbf16, #tpu.memory_space<vmem>>, vector<16x16x16xbf16>
    tpu.vector_store %arg7[%c1, %c1_15, %c0_16], %8 {strides = array<i32>} : memref<18x18x16xbf16, #tpu.memory_space<vmem>>, vector<16x16x16xbf16>,
    %c0_17 = arith.constant 0 : index
    %c0_18 = arith.constant 0 : index
    %c0_19 = arith.constant 0 : index
    %10 = vector.load %arg7[%c0_17, %c0_18, %c0_19] : memref<18x18x16xbf16, #tpu.memory_space<vmem>>, vector<16x16x16xbf16>
    %11 = vector.shape_cast %10 : vector<16x16x16xbf16> to vector<256x16xbf16>
    %c0_20 = arith.constant 0 : index
    %c1_21 = arith.constant 1 : index
    %c0_22 = arith.constant 0 : index
    %12 = vector.load %arg7[%c0_20, %c1_21, %c0_22] : memref<18x18x16xbf16, #tpu.memory_space<vmem>>, vector<16x16x16xbf16>
    %13 = vector.shape_cast %12 : vector<16x16x16xbf16> to vector<256x16xbf16>
    %c0_23 = arith.constant 0 : index
    %c2 = arith.constant 2 : index
    %c0_24 = arith.constant 0 : index
    %14 = vector.load %arg7[%c0_23, %c2, %c0_24] : memref<18x18x16xbf16, #tpu.memory_space<vmem>>, vector<16x16x16xbf16>
    %15 = vector.shape_cast %14 : vector<16x16x16xbf16> to vector<256x16xbf16>
    %16 = tpu.concatenate %11, %13, %15 in 1 : vector<256x16xbf16>, vector<256x16xbf16>, vector<256x16xbf16> -> vector<256x48xbf16>
    %c1_25 = arith.constant 1 : index
    %c0_26 = arith.constant 0 : index
    %c0_27 = arith.constant 0 : index
    %17 = vector.load %arg7[%c1_25, %c0_26, %c0_27] : memref<18x18x16xbf16, #tpu.memory_space<vmem>>, vector<16x16x16xbf16>
    %18 = vector.shape_cast %17 : vector<16x16x16xbf16> to vector<256x16xbf16>
    %c1_28 = arith.constant 1 : index
    %c1_29 = arith.constant 1 : index
    %c0_30 = arith.constant 0 : index
    %19 = vector.load %arg7[%c1_28, %c1_29, %c0_30] : memref<18x18x16xbf16, #tpu.memory_space<vmem>>, vector<16x16x16xbf16>
    %20 = vector.shape_cast %19 : vector<16x16x16xbf16> to vector<256x16xbf16>
    %c1_31 = arith.constant 1 : index
    %c2_32 = arith.constant 2 : index
    %c0_33 = arith.constant 0 : index
    %21 = vector.load %arg7[%c1_31, %c2_32, %c0_33] : memref<18x18x16xbf16, #tpu.memory_space<vmem>>, vector<16x16x16xbf16>
    %22 = vector.shape_cast %21 : vector<16x16x16xbf16> to vector<256x16xbf16>
    %23 = tpu.concatenate %18, %20, %22 in 1 : vector<256x16xbf16>, vector<256x16xbf16>, vector<256x16xbf16> -> vector<256x48xbf16>
    %c2_34 = arith.constant 2 : index
    %c0_35 = arith.constant 0 : index
    %c0_36 = arith.constant 0 : index
    %24 = vector.load %arg7[%c2_34, %c0_35, %c0_36] : memref<18x18x16xbf16, #tpu.memory_space<vmem>>, vector<16x16x16xbf16>
    %25 = vector.shape_cast %24 : vector<16x16x16xbf16> to vector<256x16xbf16>
    %c2_37 = arith.constant 2 : index
    %c1_38 = arith.constant 1 : index
    %c0_39 = arith.constant 0 : index
    %26 = vector.load %arg7[%c2_37, %c1_38, %c0_39] : memref<18x18x16xbf16, #tpu.memory_space<vmem>>, vector<16x16x16xbf16>
    %27 = vector.shape_cast %26 : vector<16x16x16xbf16> to vector<256x16xbf16>
    %c2_40 = arith.constant 2 : index
    %c2_41 = arith.constant 2 : index
    %c0_42 = arith.constant 0 : index
    %28 = vector.load %arg7[%c2_40, %c2_41, %c0_42] : memref<18x18x16xbf16, #tpu.memory_space<vmem>>, vector<16x16x16xbf16>
    %29 = vector.shape_cast %28 : vector<16x16x16xbf16> to vector<256x16xbf16>
    %30 = tpu.concatenate %25, %27, %29 in 1 : vector<256x16xbf16>, vector<256x16xbf16>, vector<256x16xbf16> -> vector<256x48xbf16>
    %31 = tpu.concatenate %16, %23, %30 in 1 : vector<256x48xbf16>, vector<256x48xbf16>, vector<256x48xbf16> -> vector<256x144xbf16>
    %c0_43 = arith.constant 0 : index
    %c0_44 = arith.constant 0 : index
    %32 = vector.load %arg2[%c0_43, %c0_44] : memref<144x256xbf16, #tpu.memory_space<vmem>>, vector<144x256xbf16>
    %cst_45 = arith.constant dense<0.000000e+00> : vector<256x256xf32>
    %33 = tpu.matmul %31, %32, %cst_45 {dimension_numbers = #tpu.dot_dimension_numbers<[1], [0], [0], [1], [0, 0, 1, 1], [], []>} : vector<256x144xbf16>, vector<144x256xbf16>, vector<256x256xf32> -> vector<256x256xf32>
    %34 = vector.extract_strided_slice %33 {offsets = [0, 0], sizes = [256, 128], strides = [1, 1]} : vector<256x256xf32> to vector<256x128xf32>
    %35 = vector.shape_cast %34 : vector<256x128xf32> to vector<1x16x16x128xf32>
    %36 = arith.truncf %35 : vector<1x16x16x128xf32> to vector<1x16x16x128xbf16>
    %c0_46 = arith.constant 0 : index
    %c0_47 = arith.constant 0 : index
    %c0_48 = arith.constant 0 : index
    %c0_49 = arith.constant 0 : index
    %37 = vector.load %arg3[%c0_46, %c0_47, %c0_48, %c0_49] : memref<1x16x16x128xbf16, #tpu.memory_space<vmem>>, vector<1x16x16x128xbf16>
    tpu.vector_store %arg3[%c0_46, %c0_47, %c0_48, %c0_49], %36 {strides = array<i32>} : memref<1x16x16x128xbf16, #tpu.memory_space<vmem>>, vector<1x16x16x128xbf16>,
    %cst_50 = arith.constant dense<0.000000e+00> : vector<128xf32>
    %38 = vector.multi_reduction <add>, %34, %cst_50 [0] : vector<256x128xf32> to vector<128xf32>
    %39 = vector.shape_cast %38 : vector<128xf32> to vector<1x128xf32>
    %40 = arith.mulf %34, %34 : vector<256x128xf32>
    %cst_51 = arith.constant dense<0.000000e+00> : vector<128xf32>
    %41 = vector.multi_reduction <add>, %40, %cst_51 [0] : vector<256x128xf32> to vector<128xf32>
    %42 = vector.shape_cast %41 : vector<128xf32> to vector<1x128xf32>
    %43 = tpu.concatenate %39, %42 in 0 : vector<1x128xf32>, vector<1x128xf32> -> vector<2x128xf32>
    %44 = vector.shape_cast %43 : vector<2x128xf32> to vector<1x2x128xf32>
    %c0_52 = arith.constant 0 : index
    %c0_53 = arith.constant 0 : index
    %c0_54 = arith.constant 0 : index
    %45 = vector.load %arg4[%c0_52, %c0_53, %c0_54] : memref<1x2x128xf32, #tpu.memory_space<vmem>>, vector<1x2x128xf32>
    tpu.vector_store %arg4[%c0_52, %c0_53, %c0_54], %44 {strides = array<i32>} : memref<1x2x128xf32, #tpu.memory_space<vmem>>, vector<1x2x128xf32>,
    %46 = vector.extract_strided_slice %33 {offsets = [0, 128], sizes = [256, 128], strides = [1, 1]} : vector<256x256xf32> to vector<256x128xf32>
    %47 = vector.shape_cast %46 : vector<256x128xf32> to vector<1x16x16x128xf32>
    %48 = arith.truncf %47 : vector<1x16x16x128xf32> to vector<1x16x16x128xbf16>
    %c0_55 = arith.constant 0 : index
    %c0_56 = arith.constant 0 : index
    %c0_57 = arith.constant 0 : index
    %c0_58 = arith.constant 0 : index
    %49 = vector.load %arg5[%c0_55, %c0_56, %c0_57, %c0_58] : memref<1x16x16x128xbf16, #tpu.memory_space<vmem>>, vector<1x16x16x128xbf16>
    tpu.vector_store %arg5[%c0_55, %c0_56, %c0_57, %c0_58], %48 {strides = array<i32>} : memref<1x16x16x128xbf16, #tpu.memory_space<vmem>>, vector<1x16x16x128xbf16>,
    %cst_59 = arith.constant dense<0.000000e+00> : vector<128xf32>
    %50 = vector.multi_reduction <add>, %46, %cst_59 [0] : vector<256x128xf32> to vector<128xf32>
    %51 = vector.shape_cast %50 : vector<128xf32> to vector<1x128xf32>
    %52 = arith.mulf %46, %46 : vector<256x128xf32>
    %cst_60 = arith.constant dense<0.000000e+00> : vector<128xf32>
    %53 = vector.multi_reduction <add>, %52, %cst_60 [0] : vector<256x128xf32> to vector<128xf32>
    %54 = vector.shape_cast %53 : vector<128xf32> to vector<1x128xf32>
    %55 = tpu.concatenate %51, %54 in 0 : vector<1x128xf32>, vector<1x128xf32> -> vector<2x128xf32>
    %56 = vector.shape_cast %55 : vector<2x128xf32> to vector<1x2x128xf32>
    %c0_61 = arith.constant 0 : index
    %c0_62 = arith.constant 0 : index
    %c0_63 = arith.constant 0 : index
    %57 = vector.load %arg6[%c0_61, %c0_62, %c0_63] : memref<1x2x128xf32, #tpu.memory_space<vmem>>, vector<1x2x128xf32>
    tpu.vector_store %arg6[%c0_61, %c0_62, %c0_63], %56 {strides = array<i32>} : memref<1x2x128xf32, #tpu.memory_space<vmem>>, vector<1x2x128xf32>,
    return
  }
  func.func @transform_0(%arg0: i32) -> (i32, i32, i32, i32) {
    %c0_i32 = arith.constant 0 : i32
    %c0_i32_0 = arith.constant 0 : i32
    %c0_i32_1 = arith.constant 0 : i32
    %c0_i32_2 = arith.constant 0 : i32
    return %arg0, %c0_i32, %c0_i32_0, %c0_i32_1 : i32, i32, i32, i32
  }
  func.func @transform_1(%arg0: i32) -> (i32, i32) {
    %c0_i32 = arith.constant 0 : i32
    %c0_i32_0 = arith.constant 0 : i32
    %c0_i32_1 = arith.constant 0 : i32
    return %c0_i32, %c0_i32_0 : i32, i32
  }
  func.func @transform_2(%arg0: i32) -> (i32, i32, i32, i32) {
    %c0_i32 = arith.constant 0 : i32
    %c0_i32_0 = arith.constant 0 : i32
    %c0_i32_1 = arith.constant 0 : i32
    %c0_i32_2 = arith.constant 0 : i32
    return %arg0, %c0_i32, %c0_i32_0, %c0_i32_1 : i32, i32, i32, i32
  }
  func.func @transform_3(%arg0: i32) -> (i32, i32, i32) {
    %c0_i32 = arith.constant 0 : i32
    %c0_i32_0 = arith.constant 0 : i32
    %c0_i32_1 = arith.constant 0 : i32
    return %arg0, %c0_i32, %c0_i32_0 : i32, i32, i32
  }
  func.func @transform_4(%arg0: i32) -> (i32, i32, i32, i32) {
    %c0_i32 = arith.constant 0 : i32
    %c0_i32_0 = arith.constant 0 : i32
    %c0_i32_1 = arith.constant 0 : i32
    %c0_i32_2 = arith.constant 0 : i32
    return %arg0, %c0_i32, %c0_i32_0, %c0_i32_1 : i32, i32, i32, i32
  }
  func.func @transform_5(%arg0: i32) -> (i32, i32, i32) {
    %c0_i32 = arith.constant 0 : i32
    %c0_i32_0 = arith.constant 0 : i32
    %c0_i32_1 = arith.constant 0 : i32
    return %arg0, %c0_i32, %c0_i32_0 : i32, i32, i32
  }
}

module attributes {stable_mosaic.version = 11 : i64} {
  func.func @finalize_kernel(%arg0: i32, %arg1: memref<1x16x16x128xbf16, #tpu.memory_space<vmem>>, %arg2: memref<1x16x16x128xbf16, #tpu.memory_space<vmem>>, %arg3: memref<1x128xf32, #tpu.memory_space<vmem>>, %arg4: memref<1x128xf32, #tpu.memory_space<vmem>>, %arg5: memref<1x128xf32, #tpu.memory_space<vmem>>, %arg6: memref<1x128xf32, #tpu.memory_space<vmem>>, %arg7: memref<1x16x16x128xf32, #tpu.memory_space<vmem>>) attributes {dimension_semantics = [#tpu.dimension_semantics<parallel>], iteration_bounds = array<i64: 2>, scalar_prefetch = 0 : i64, scratch_operands = 0 : i64, tpu.core_type = #tpu.core_type<tc>, window_params = [{transform_indices = @transform_0, window_bounds = array<i64: 1, 16, 16, 128>}, {transform_indices = @transform_1, window_bounds = array<i64: 1, 16, 16, 128>}, {pipeline_mode = #tpu.pipeline_mode<synchronous>, transform_indices = @transform_2, window_bounds = array<i64: 1, 128>}, {pipeline_mode = #tpu.pipeline_mode<synchronous>, transform_indices = @transform_3, window_bounds = array<i64: 1, 128>}, {pipeline_mode = #tpu.pipeline_mode<synchronous>, transform_indices = @transform_4, window_bounds = array<i64: 1, 128>}, {pipeline_mode = #tpu.pipeline_mode<synchronous>, transform_indices = @transform_5, window_bounds = array<i64: 1, 128>}, {transform_indices = @transform_6, window_bounds = array<i64: 1, 16, 16, 128>}]} {
    %c0 = arith.constant 0 : index
    %c0_0 = arith.constant 0 : index
    %c0_1 = arith.constant 0 : index
    %c0_2 = arith.constant 0 : index
    %0 = vector.load %arg1[%c0, %c0_0, %c0_1, %c0_2] : memref<1x16x16x128xbf16, #tpu.memory_space<vmem>>, vector<1x16x16x128xbf16>
    %1 = vector.shape_cast %0 : vector<1x16x16x128xbf16> to vector<16x16x128xbf16>
    %2 = arith.extf %1 : vector<16x16x128xbf16> to vector<16x16x128xf32>
    %c0_3 = arith.constant 0 : index
    %c0_4 = arith.constant 0 : index
    %3 = vector.load %arg3[%c0_3, %c0_4] : memref<1x128xf32, #tpu.memory_space<vmem>>, vector<1x128xf32>
    %4 = vector.shape_cast %3 : vector<1x128xf32> to vector<1x1x128xf32>
    %5 = vector.broadcast %4 : vector<1x1x128xf32> to vector<16x16x128xf32>
    %6 = arith.mulf %2, %5 : vector<16x16x128xf32>
    %c0_5 = arith.constant 0 : index
    %c0_6 = arith.constant 0 : index
    %7 = vector.load %arg4[%c0_5, %c0_6] : memref<1x128xf32, #tpu.memory_space<vmem>>, vector<1x128xf32>
    %8 = vector.shape_cast %7 : vector<1x128xf32> to vector<1x1x128xf32>
    %9 = vector.broadcast %8 : vector<1x1x128xf32> to vector<16x16x128xf32>
    %10 = arith.addf %6, %9 : vector<16x16x128xf32>
    %c0_7 = arith.constant 0 : index
    %c0_8 = arith.constant 0 : index
    %c0_9 = arith.constant 0 : index
    %c0_10 = arith.constant 0 : index
    %11 = vector.load %arg2[%c0_7, %c0_8, %c0_9, %c0_10] : memref<1x16x16x128xbf16, #tpu.memory_space<vmem>>, vector<1x16x16x128xbf16>
    %12 = vector.shape_cast %11 : vector<1x16x16x128xbf16> to vector<16x16x128xbf16>
    %13 = arith.extf %12 : vector<16x16x128xbf16> to vector<16x16x128xf32>
    %c0_11 = arith.constant 0 : index
    %c0_12 = arith.constant 0 : index
    %14 = vector.load %arg5[%c0_11, %c0_12] : memref<1x128xf32, #tpu.memory_space<vmem>>, vector<1x128xf32>
    %15 = vector.shape_cast %14 : vector<1x128xf32> to vector<1x1x128xf32>
    %16 = vector.broadcast %15 : vector<1x1x128xf32> to vector<16x16x128xf32>
    %17 = arith.mulf %13, %16 : vector<16x16x128xf32>
    %c0_13 = arith.constant 0 : index
    %c0_14 = arith.constant 0 : index
    %18 = vector.load %arg6[%c0_13, %c0_14] : memref<1x128xf32, #tpu.memory_space<vmem>>, vector<1x128xf32>
    %19 = vector.shape_cast %18 : vector<1x128xf32> to vector<1x1x128xf32>
    %20 = vector.broadcast %19 : vector<1x1x128xf32> to vector<16x16x128xf32>
    %21 = arith.addf %17, %20 : vector<16x16x128xf32>
    %22 = arith.addf %10, %21 : vector<16x16x128xf32>
    %cst = arith.constant 0.000000e+00 : f32
    %23 = vector.broadcast %cst : f32 to vector<16x16x128xf32>
    %24 = arith.maximumf %22, %23 : vector<16x16x128xf32>
    %25 = vector.shape_cast %24 : vector<16x16x128xf32> to vector<1x16x16x128xf32>
    %c0_15 = arith.constant 0 : index
    %c0_16 = arith.constant 0 : index
    %c0_17 = arith.constant 0 : index
    %c0_18 = arith.constant 0 : index
    %26 = vector.load %arg7[%c0_15, %c0_16, %c0_17, %c0_18] : memref<1x16x16x128xf32, #tpu.memory_space<vmem>>, vector<1x16x16x128xf32>
    tpu.vector_store %arg7[%c0_15, %c0_16, %c0_17, %c0_18], %25 {strides = array<i32>} : memref<1x16x16x128xf32, #tpu.memory_space<vmem>>, vector<1x16x16x128xf32>,
    return
  }
  func.func @transform_0(%arg0: i32) -> (i32, i32, i32, i32) {
    %c0_i32 = arith.constant 0 : i32
    %c0_i32_0 = arith.constant 0 : i32
    %c0_i32_1 = arith.constant 0 : i32
    %c0_i32_2 = arith.constant 0 : i32
    return %arg0, %c0_i32, %c0_i32_0, %c0_i32_1 : i32, i32, i32, i32
  }
  func.func @transform_1(%arg0: i32) -> (i32, i32, i32, i32) {
    %c0_i32 = arith.constant 0 : i32
    %c0_i32_0 = arith.constant 0 : i32
    %c0_i32_1 = arith.constant 0 : i32
    %c0_i32_2 = arith.constant 0 : i32
    return %arg0, %c0_i32, %c0_i32_0, %c0_i32_1 : i32, i32, i32, i32
  }
  func.func @transform_2(%arg0: i32) -> (i32, i32) {
    %c0_i32 = arith.constant 0 : i32
    %c0_i32_0 = arith.constant 0 : i32
    %c0_i32_1 = arith.constant 0 : i32
    return %c0_i32, %c0_i32_0 : i32, i32
  }
  func.func @transform_3(%arg0: i32) -> (i32, i32) {
    %c0_i32 = arith.constant 0 : i32
    %c0_i32_0 = arith.constant 0 : i32
    %c0_i32_1 = arith.constant 0 : i32
    return %c0_i32, %c0_i32_0 : i32, i32
  }
  func.func @transform_4(%arg0: i32) -> (i32, i32) {
    %c0_i32 = arith.constant 0 : i32
    %c0_i32_0 = arith.constant 0 : i32
    %c0_i32_1 = arith.constant 0 : i32
    return %c0_i32, %c0_i32_0 : i32, i32
  }
  func.func @transform_5(%arg0: i32) -> (i32, i32) {
    %c0_i32 = arith.constant 0 : i32
    %c0_i32_0 = arith.constant 0 : i32
    %c0_i32_1 = arith.constant 0 : i32
    return %c0_i32, %c0_i32_0 : i32, i32
  }
  func.func @transform_6(%arg0: i32) -> (i32, i32, i32, i32) {
    %c0_i32 = arith.constant 0 : i32
    %c0_i32_0 = arith.constant 0 : i32
    %c0_i32_1 = arith.constant 0 : i32
    %c0_i32_2 = arith.constant 0 : i32
    return %arg0, %c0_i32, %c0_i32_0, %c0_i32_1 : i32, i32, i32, i32
  }
}

module attributes {stable_mosaic.version = 11 : i64} {
  func.func @conv2_kernel(%arg0: i32, %arg1: memref<1x16x16x128xbf16, #tpu.memory_space<vmem>>, %arg2: memref<1x128xf32, #tpu.memory_space<vmem>>, %arg3: memref<1x128xf32, #tpu.memory_space<vmem>>, %arg4: memref<1152x128xbf16, #tpu.memory_space<vmem>>, %arg5: memref<1x16x16x128xbf16, #tpu.memory_space<vmem>>, %arg6: memref<1x2x128xf32, #tpu.memory_space<vmem>>, %arg7: memref<18x18x128xbf16, #tpu.memory_space<vmem>>) attributes {dimension_semantics = [#tpu.dimension_semantics<parallel>], iteration_bounds = array<i64: 2>, scalar_prefetch = 0 : i64, scratch_operands = 1 : i64, tpu.core_type = #tpu.core_type<tc>, window_params = [{transform_indices = @transform_0, window_bounds = array<i64: 1, 16, 16, 128>}, {pipeline_mode = #tpu.pipeline_mode<synchronous>, transform_indices = @transform_1, window_bounds = array<i64: 1, 128>}, {pipeline_mode = #tpu.pipeline_mode<synchronous>, transform_indices = @transform_2, window_bounds = array<i64: 1, 128>}, {pipeline_mode = #tpu.pipeline_mode<synchronous>, transform_indices = @transform_3, window_bounds = array<i64: 1152, 128>}, {transform_indices = @transform_4, window_bounds = array<i64: 1, 16, 16, 128>}, {transform_indices = @transform_5, window_bounds = array<i64: 1, 2, 128>}]} {
    %c0 = arith.constant 0 : index
    %c0_0 = arith.constant 0 : index
    %c0_1 = arith.constant 0 : index
    %c0_2 = arith.constant 0 : index
    %0 = vector.load %arg1[%c0, %c0_0, %c0_1, %c0_2] : memref<1x16x16x128xbf16, #tpu.memory_space<vmem>>, vector<1x16x16x128xbf16>
    %1 = vector.shape_cast %0 : vector<1x16x16x128xbf16> to vector<16x16x128xbf16>
    %2 = arith.extf %1 : vector<16x16x128xbf16> to vector<16x16x128xf32>
    %c0_3 = arith.constant 0 : index
    %c0_4 = arith.constant 0 : index
    %3 = vector.load %arg2[%c0_3, %c0_4] : memref<1x128xf32, #tpu.memory_space<vmem>>, vector<1x128xf32>
    %4 = vector.shape_cast %3 : vector<1x128xf32> to vector<1x1x128xf32>
    %5 = vector.broadcast %4 : vector<1x1x128xf32> to vector<16x16x128xf32>
    %6 = arith.mulf %2, %5 : vector<16x16x128xf32>
    %c0_5 = arith.constant 0 : index
    %c0_6 = arith.constant 0 : index
    %7 = vector.load %arg3[%c0_5, %c0_6] : memref<1x128xf32, #tpu.memory_space<vmem>>, vector<1x128xf32>
    %8 = vector.shape_cast %7 : vector<1x128xf32> to vector<1x1x128xf32>
    %9 = vector.broadcast %8 : vector<1x1x128xf32> to vector<16x16x128xf32>
    %10 = arith.addf %6, %9 : vector<16x16x128xf32>
    %cst = arith.constant 0.000000e+00 : f32
    %11 = vector.broadcast %cst : f32 to vector<16x16x128xf32>
    %12 = arith.maximumf %10, %11 : vector<16x16x128xf32>
    %cst_7 = arith.constant 0.000000e+00 : bf16
    %13 = vector.broadcast %cst_7 : bf16 to vector<1x18x128xbf16>
    %c0_8 = arith.constant 0 : index
    %c0_9 = arith.constant 0 : index
    %c0_10 = arith.constant 0 : index
    %14 = vector.load %arg7[%c0_8, %c0_9, %c0_10] : memref<18x18x128xbf16, #tpu.memory_space<vmem>>, vector<1x18x128xbf16>
    tpu.vector_store %arg7[%c0_8, %c0_9, %c0_10], %13 {strides = array<i32>} : memref<18x18x128xbf16, #tpu.memory_space<vmem>>, vector<1x18x128xbf16>,
    %c17 = arith.constant 17 : index
    %c0_11 = arith.constant 0 : index
    %c0_12 = arith.constant 0 : index
    %15 = vector.load %arg7[%c17, %c0_11, %c0_12] : memref<18x18x128xbf16, #tpu.memory_space<vmem>>, vector<1x18x128xbf16>
    tpu.vector_store %arg7[%c17, %c0_11, %c0_12], %13 {strides = array<i32>} : memref<18x18x128xbf16, #tpu.memory_space<vmem>>, vector<1x18x128xbf16>,
    %cst_13 = arith.constant 0.000000e+00 : bf16
    %16 = vector.broadcast %cst_13 : bf16 to vector<18x1x128xbf16>
    %c0_14 = arith.constant 0 : index
    %c0_15 = arith.constant 0 : index
    %c0_16 = arith.constant 0 : index
    %17 = vector.load %arg7[%c0_14, %c0_15, %c0_16] : memref<18x18x128xbf16, #tpu.memory_space<vmem>>, vector<18x1x128xbf16>
    tpu.vector_store %arg7[%c0_14, %c0_15, %c0_16], %16 {strides = array<i32>} : memref<18x18x128xbf16, #tpu.memory_space<vmem>>, vector<18x1x128xbf16>,
    %c0_17 = arith.constant 0 : index
    %c17_18 = arith.constant 17 : index
    %c0_19 = arith.constant 0 : index
    %18 = vector.load %arg7[%c0_17, %c17_18, %c0_19] : memref<18x18x128xbf16, #tpu.memory_space<vmem>>, vector<18x1x128xbf16>
    tpu.vector_store %arg7[%c0_17, %c17_18, %c0_19], %16 {strides = array<i32>} : memref<18x18x128xbf16, #tpu.memory_space<vmem>>, vector<18x1x128xbf16>,
    %19 = arith.truncf %12 : vector<16x16x128xf32> to vector<16x16x128xbf16>
    %c1 = arith.constant 1 : index
    %c1_20 = arith.constant 1 : index
    %c0_21 = arith.constant 0 : index
    %20 = vector.load %arg7[%c1, %c1_20, %c0_21] : memref<18x18x128xbf16, #tpu.memory_space<vmem>>, vector<16x16x128xbf16>
    tpu.vector_store %arg7[%c1, %c1_20, %c0_21], %19 {strides = array<i32>} : memref<18x18x128xbf16, #tpu.memory_space<vmem>>, vector<16x16x128xbf16>,
    %c0_22 = arith.constant 0 : index
    %c0_23 = arith.constant 0 : index
    %c0_24 = arith.constant 0 : index
    %21 = vector.load %arg7[%c0_22, %c0_23, %c0_24] : memref<18x18x128xbf16, #tpu.memory_space<vmem>>, vector<16x16x128xbf16>
    %22 = vector.shape_cast %21 : vector<16x16x128xbf16> to vector<256x128xbf16>
    %c0_25 = arith.constant 0 : index
    %c1_26 = arith.constant 1 : index
    %c0_27 = arith.constant 0 : index
    %23 = vector.load %arg7[%c0_25, %c1_26, %c0_27] : memref<18x18x128xbf16, #tpu.memory_space<vmem>>, vector<16x16x128xbf16>
    %24 = vector.shape_cast %23 : vector<16x16x128xbf16> to vector<256x128xbf16>
    %c0_28 = arith.constant 0 : index
    %c2 = arith.constant 2 : index
    %c0_29 = arith.constant 0 : index
    %25 = vector.load %arg7[%c0_28, %c2, %c0_29] : memref<18x18x128xbf16, #tpu.memory_space<vmem>>, vector<16x16x128xbf16>
    %26 = vector.shape_cast %25 : vector<16x16x128xbf16> to vector<256x128xbf16>
    %27 = tpu.concatenate %22, %24, %26 in 1 : vector<256x128xbf16>, vector<256x128xbf16>, vector<256x128xbf16> -> vector<256x384xbf16>
    %c0_30 = arith.constant 0 : index
    %c0_31 = arith.constant 0 : index
    %28 = vector.load %arg4[%c0_30, %c0_31] : memref<1152x128xbf16, #tpu.memory_space<vmem>>, vector<384x128xbf16>
    %cst_32 = arith.constant dense<0.000000e+00> : vector<256x128xf32>
    %29 = tpu.matmul %27, %28, %cst_32 {dimension_numbers = #tpu.dot_dimension_numbers<[1], [0], [0], [1], [0, 0, 1, 1], [], []>} : vector<256x384xbf16>, vector<384x128xbf16>, vector<256x128xf32> -> vector<256x128xf32>
    %c1_33 = arith.constant 1 : index
    %c0_34 = arith.constant 0 : index
    %c0_35 = arith.constant 0 : index
    %30 = vector.load %arg7[%c1_33, %c0_34, %c0_35] : memref<18x18x128xbf16, #tpu.memory_space<vmem>>, vector<16x16x128xbf16>
    %31 = vector.shape_cast %30 : vector<16x16x128xbf16> to vector<256x128xbf16>
    %c1_36 = arith.constant 1 : index
    %c1_37 = arith.constant 1 : index
    %c0_38 = arith.constant 0 : index
    %32 = vector.load %arg7[%c1_36, %c1_37, %c0_38] : memref<18x18x128xbf16, #tpu.memory_space<vmem>>, vector<16x16x128xbf16>
    %33 = vector.shape_cast %32 : vector<16x16x128xbf16> to vector<256x128xbf16>
    %c1_39 = arith.constant 1 : index
    %c2_40 = arith.constant 2 : index
    %c0_41 = arith.constant 0 : index
    %34 = vector.load %arg7[%c1_39, %c2_40, %c0_41] : memref<18x18x128xbf16, #tpu.memory_space<vmem>>, vector<16x16x128xbf16>
    %35 = vector.shape_cast %34 : vector<16x16x128xbf16> to vector<256x128xbf16>
    %36 = tpu.concatenate %31, %33, %35 in 1 : vector<256x128xbf16>, vector<256x128xbf16>, vector<256x128xbf16> -> vector<256x384xbf16>
    %c384 = arith.constant 384 : index
    %c0_42 = arith.constant 0 : index
    %37 = vector.load %arg4[%c384, %c0_42] : memref<1152x128xbf16, #tpu.memory_space<vmem>>, vector<384x128xbf16>
    %cst_43 = arith.constant dense<0.000000e+00> : vector<256x128xf32>
    %38 = tpu.matmul %36, %37, %cst_43 {dimension_numbers = #tpu.dot_dimension_numbers<[1], [0], [0], [1], [0, 0, 1, 1], [], []>} : vector<256x384xbf16>, vector<384x128xbf16>, vector<256x128xf32> -> vector<256x128xf32>
    %39 = arith.addf %29, %38 : vector<256x128xf32>
    %c2_44 = arith.constant 2 : index
    %c0_45 = arith.constant 0 : index
    %c0_46 = arith.constant 0 : index
    %40 = vector.load %arg7[%c2_44, %c0_45, %c0_46] : memref<18x18x128xbf16, #tpu.memory_space<vmem>>, vector<16x16x128xbf16>
    %41 = vector.shape_cast %40 : vector<16x16x128xbf16> to vector<256x128xbf16>
    %c2_47 = arith.constant 2 : index
    %c1_48 = arith.constant 1 : index
    %c0_49 = arith.constant 0 : index
    %42 = vector.load %arg7[%c2_47, %c1_48, %c0_49] : memref<18x18x128xbf16, #tpu.memory_space<vmem>>, vector<16x16x128xbf16>
    %43 = vector.shape_cast %42 : vector<16x16x128xbf16> to vector<256x128xbf16>
    %c2_50 = arith.constant 2 : index
    %c2_51 = arith.constant 2 : index
    %c0_52 = arith.constant 0 : index
    %44 = vector.load %arg7[%c2_50, %c2_51, %c0_52] : memref<18x18x128xbf16, #tpu.memory_space<vmem>>, vector<16x16x128xbf16>
    %45 = vector.shape_cast %44 : vector<16x16x128xbf16> to vector<256x128xbf16>
    %46 = tpu.concatenate %41, %43, %45 in 1 : vector<256x128xbf16>, vector<256x128xbf16>, vector<256x128xbf16> -> vector<256x384xbf16>
    %c768 = arith.constant 768 : index
    %c0_53 = arith.constant 0 : index
    %47 = vector.load %arg4[%c768, %c0_53] : memref<1152x128xbf16, #tpu.memory_space<vmem>>, vector<384x128xbf16>
    %cst_54 = arith.constant dense<0.000000e+00> : vector<256x128xf32>
    %48 = tpu.matmul %46, %47, %cst_54 {dimension_numbers = #tpu.dot_dimension_numbers<[1], [0], [0], [1], [0, 0, 1, 1], [], []>} : vector<256x384xbf16>, vector<384x128xbf16>, vector<256x128xf32> -> vector<256x128xf32>
    %49 = arith.addf %39, %48 : vector<256x128xf32>
    %50 = vector.shape_cast %49 : vector<256x128xf32> to vector<1x16x16x128xf32>
    %51 = arith.truncf %50 : vector<1x16x16x128xf32> to vector<1x16x16x128xbf16>
    %c0_55 = arith.constant 0 : index
    %c0_56 = arith.constant 0 : index
    %c0_57 = arith.constant 0 : index
    %c0_58 = arith.constant 0 : index
    %52 = vector.load %arg5[%c0_55, %c0_56, %c0_57, %c0_58] : memref<1x16x16x128xbf16, #tpu.memory_space<vmem>>, vector<1x16x16x128xbf16>
    tpu.vector_store %arg5[%c0_55, %c0_56, %c0_57, %c0_58], %51 {strides = array<i32>} : memref<1x16x16x128xbf16, #tpu.memory_space<vmem>>, vector<1x16x16x128xbf16>,
    %cst_59 = arith.constant dense<0.000000e+00> : vector<128xf32>
    %53 = vector.multi_reduction <add>, %49, %cst_59 [0] : vector<256x128xf32> to vector<128xf32>
    %54 = vector.shape_cast %53 : vector<128xf32> to vector<1x128xf32>
    %55 = arith.mulf %49, %49 : vector<256x128xf32>
    %cst_60 = arith.constant dense<0.000000e+00> : vector<128xf32>
    %56 = vector.multi_reduction <add>, %55, %cst_60 [0] : vector<256x128xf32> to vector<128xf32>
    %57 = vector.shape_cast %56 : vector<128xf32> to vector<1x128xf32>
    %58 = tpu.concatenate %54, %57 in 0 : vector<1x128xf32>, vector<1x128xf32> -> vector<2x128xf32>
    %59 = vector.shape_cast %58 : vector<2x128xf32> to vector<1x2x128xf32>
    %c0_61 = arith.constant 0 : index
    %c0_62 = arith.constant 0 : index
    %c0_63 = arith.constant 0 : index
    %60 = vector.load %arg6[%c0_61, %c0_62, %c0_63] : memref<1x2x128xf32, #tpu.memory_space<vmem>>, vector<1x2x128xf32>
    tpu.vector_store %arg6[%c0_61, %c0_62, %c0_63], %59 {strides = array<i32>} : memref<1x2x128xf32, #tpu.memory_space<vmem>>, vector<1x2x128xf32>,
    return
  }
  func.func @transform_0(%arg0: i32) -> (i32, i32, i32, i32) {
    %c0_i32 = arith.constant 0 : i32
    %c0_i32_0 = arith.constant 0 : i32
    %c0_i32_1 = arith.constant 0 : i32
    %c0_i32_2 = arith.constant 0 : i32
    return %arg0, %c0_i32, %c0_i32_0, %c0_i32_1 : i32, i32, i32, i32
  }
  func.func @transform_1(%arg0: i32) -> (i32, i32) {
    %c0_i32 = arith.constant 0 : i32
    %c0_i32_0 = arith.constant 0 : i32
    %c0_i32_1 = arith.constant 0 : i32
    return %c0_i32, %c0_i32_0 : i32, i32
  }
  func.func @transform_2(%arg0: i32) -> (i32, i32) {
    %c0_i32 = arith.constant 0 : i32
    %c0_i32_0 = arith.constant 0 : i32
    %c0_i32_1 = arith.constant 0 : i32
    return %c0_i32, %c0_i32_0 : i32, i32
  }
  func.func @transform_3(%arg0: i32) -> (i32, i32) {
    %c0_i32 = arith.constant 0 : i32
    %c0_i32_0 = arith.constant 0 : i32
    %c0_i32_1 = arith.constant 0 : i32
    return %c0_i32, %c0_i32_0 : i32, i32
  }
  func.func @transform_4(%arg0: i32) -> (i32, i32, i32, i32) {
    %c0_i32 = arith.constant 0 : i32
    %c0_i32_0 = arith.constant 0 : i32
    %c0_i32_1 = arith.constant 0 : i32
    %c0_i32_2 = arith.constant 0 : i32
    return %arg0, %c0_i32, %c0_i32_0, %c0_i32_1 : i32, i32, i32, i32
  }
  func.func @transform_5(%arg0: i32) -> (i32, i32, i32) {
    %c0_i32 = arith.constant 0 : i32
    %c0_i32_0 = arith.constant 0 : i32
    %c0_i32_1 = arith.constant 0 : i32
    return %arg0, %c0_i32, %c0_i32_0 : i32, i32, i32
  }
}

</mosaic_0001>

<bundles_post_ra>
// kernel: basic_block.5
= control target key start
LH: loop header
LB: loop body
LE: loop exit
PB: predicated region body
PF: predicated region fallthrough
CT: control target
= control target key end

     0   :  { %11 = vsyncpa [#allocation3], 0  ;;  %s1389_s0 = inlined_call_operand.vmem [shape: bf16[2,16,16,128], index: 0, kind: input, shape index: {}]   ;;  %s1390_s1 = inlined_call_operand.vmem [shape: bf16[2,16,16,128], index: 1, kind: input, shape index: {}]   ;;  %s1391_s2 = inlined_call_operand.vmem [shape: f32[1,128], index: 2, kind: input, shape index: {}]   ;;  %s1392_s3 = inlined_call_operand.vmem [shape: f32[1,128], index: 3, kind: input, shape index: {}]   ;;  %s1393_s4 = inlined_call_operand.vmem [shape: f32[1,128], index: 4, kind: input, shape index: {}]   ;;  %s1394_s5 = inlined_call_operand.vmem [shape: f32[1,128], index: 5, kind: input, shape index: {}]   ;;  %s1395_s6 = inlined_call_operand.hbm [shape: f32[2,16,16,128], index: 6, kind: output, shape index: {}]  }
   0x1   :  { %13 = vsyncpa [#allocation3 + $0x1], 0  ;;  %s1060_s21 = smov 0   ;;  %s1062_s22 = smov 0  }
   0x2   :  { %s1064_s23 = smov 0   ;;  %s1066_s24 = smov 0  }
   0x3 LB: > { %s1081_s25 = sadd.s32 4294967295, %s1020_s24   ;;  %s738_s26 = sadd.s32 4294967294, %s1020_s24   ;;  %s1020_s24 = sphi %s1066_s24, %s1401_s24   ;;  %s1016_s23 = sphi %s1064_s23, %s1400_s23   ;;  %s1012_s22 = sphi %s1062_s22, %s1399_s22   ;;  %s1008_s21 = sphi %s1060_s21, %s1398_s21  }
   0x4   : > { %s1085_s27 = sadd.s32 1, %s1020_s24   ;;  %s162_s28 = sadd.s32 1, %s1016_s23 }
   0x5   : > { %s159_s29 = ssub.s32 %s1020_s24, %s1085_s27  ;;  %p172_p0 = scmp.ne.s32.totalorder %s1016_s23, %s1012_s22 }
   0x6   : > { %p160_p1 = scmp.eq.s32.totalorder %s159_s29, 0  ;;  %p173_p2 = scmp.eq.s32.totalorder %s1081_s25, 1 }
   0x7   : > { %p178_p3 = scmp.ne.s32.totalorder %s1012_s22, %s1008_s21  ;;  %p179_p4 = scmp.eq.s32.totalorder %s738_s26, 1 }
   0x8   : > { %s1096_s30 = scalar_select %p160_p1, %s1016_s23, %s162_s28  }
   0x9   : > { %p1098_p5 = por %p173_p2, %p172_p0  ;;  %p1102_p6 = por %p179_p4, %p178_p3 }
   0xa   : > { %p741_p7 = scmp.ge.s32.totalorder %s1020_s24, 1  ;;  %p225_p8 = scmp.lt.s32.totalorder %s1020_s24, 3 }
   0xc   : > { %p226_p9 = pnand %p741_p7, %p225_p8 }
   0xd   : > { %p260_p10 = scmp.lt.s32.totalorder (!%p226_p9), %s1081_s25, 1  ;;  %v1123_v0 = vld [vmem:[%s1391_s2] ss:$0 sm:$0xff] (!%p226_p9)  ;;  %s257_s26 = sand.u32 (!%p226_p9), 1, %s1012_s22  }
   0xe   : > { %229 = sbr.rel (%p226_p9) target bundleno = 111 (0x6f), region = 44  ;;  %v1128_v1 = vld [vmem:[%s1393_s4] ss:$0 sm:$0xff] (!%p226_p9)  ;;  %s742_s11 = sshll.u32 (!%p226_p9), %s257_s26, 8 }
   0xf   : > { %v1138_v10 = vld [vmem:[%s1392_s3] ss:$0 sm:$0xff] (!%p226_p9)  ;;  %s1172_s12 = scalar_lea.vmem (!%p226_p9), [#allocation2], %s742_s11  ;;  %s1348_s18 = scalar_lea.sflag (!%p226_p9), [#allocation3], %s257_s26 }
  0x10   : > { %v1143_v11 = vld [vmem:[%s1394_s5] ss:$0 sm:$0xff] (!%p226_p9)  ;;  %s664_s14 = sshll.u32 (!%p226_p9), %s1172_s12, 4  ;;  %s1022_s19 = smov (!%p226_p9), [#allocation2]   ;;  %s1343_s14 = int_to_ptr.vmem [resolvable:$true] %s664_s14 }
  0x11   : > { %s962_s20 = sshll.u32 (!%p226_p9), %s1022_s19, 4  ;;  %s963_s20 = int_to_ptr.vmem [resolvable:$false] %s962_s20 }
  0x12   : > { %s964_s28 = scalar_lea.vmem (!%p226_p9), %s963_s20, 8192  ;;  %p965_p0 = scmp.lt.s32.totalorder (!%p226_p9), %s1343_s14, %s963_s20 }
  0x15   : > { %s261_s9 = scalar_select %p260_p10, %s1081_s25, 1 }
  0x17   : > { %s756_s10 = sshll.u32 %s261_s9, 7 }
  0x18   : > { %s1113_s13 = scalar_lea.vmem %s1389_s0, %s756_s10  ;;  %s1118_s16 = scalar_lea.vmem %s1390_s1, %s756_s10 }
  0x19   : > { %v760_v2 = vld [vmem:[%s1113_s13] sm:$0xff]   ;;  %v887_v4 = vld [vmem:[%s1113_s13 + $0x8] sm:$0xff]   ;;  %v888_v24 = vld [vmem:[%s1113_s13 + $0x10] sm:$0xff]  }
  0x1a   : > { %v824_v3 = vld [vmem:[%s1118_s16] sm:$0xff]   ;;  %v761_v5 = vunpack.c.l.bf16 %v760_v2  ;;  %v762_v7 = vunpack.c.h.bf16 %v760_v2  ;;  %v902_v9 = vld [vmem:[%s1118_s16 + $0x8] sm:$0xff]   ;;  %v765_v12 = vunpack.c.l.bf16 %v887_v4  ;;  %v766_v14 = vunpack.c.h.bf16 %v887_v4  ;;  %v903_v25 = vld [vmem:[%s1118_s16 + $0x10] sm:$0xff]  }
  0x1b   : > { %v825_v6 = vunpack.c.l.bf16 %v824_v3  ;;  %v826_v8 = vunpack.c.h.bf16 %v824_v3  ;;  %v829_v13 = vunpack.c.l.bf16 %v902_v9  ;;  %v830_v15 = vunpack.c.h.bf16 %v902_v9  ;;  %v889_v42 = vld [vmem:[%s1113_s13 + $0x18] sm:$0xff]   ;;  %v890_v52 = vld [vmem:[%s1113_s13 + $0x20] sm:$0xff]  }
  0x1c   : > { %v341_v16 = vmul.f32 %v761_v5, %v1123_v0  ;;  %v342_v18 = vmul.f32 %v762_v7, %v1123_v0  ;;  %v343_v20 = vmul.f32 %v765_v12, %v1123_v0  ;;  %v344_v22 = vmul.f32 %v766_v14, %v1123_v0  ;;  %v904_v43 = vld [vmem:[%s1118_s16 + $0x18] sm:$0xff]   ;;  %v905_v57 = vld [vmem:[%s1118_s16 + $0x20] sm:$0xff]   ;;  %v891_v14 = vld [vmem:[%s1113_s13 + $0x28] sm:$0xff]  }
  0x1d   : > { %v483_v17 = vmul.f32 %v825_v6, %v1128_v1  ;;  %v484_v19 = vmul.f32 %v826_v8, %v1128_v1  ;;  %v485_v21 = vmul.f32 %v829_v13, %v1128_v1  ;;  %v486_v23 = vmul.f32 %v830_v15, %v1128_v1  ;;  %v906_v15 = vld [vmem:[%s1118_s16 + $0x28] sm:$0xff]  }
  0x1e   : > { %v380_v26 = vadd.f32 %v1138_v10, %v341_v16  ;;  %v381_v28 = vadd.f32 %v1138_v10, %v342_v18  ;;  %v382_v30 = vadd.f32 %v1138_v10, %v343_v20  ;;  %v383_v32 = vadd.f32 %v1138_v10, %v344_v22 }
  0x1f   : > { %v522_v27 = vadd.f32 %v1143_v11, %v483_v17  ;;  %v523_v29 = vadd.f32 %v1143_v11, %v484_v19  ;;  %v524_v31 = vadd.f32 %v1143_v11, %v485_v21  ;;  %v525_v33 = vadd.f32 %v1143_v11, %v486_v23 }
  0x20   : > { %v769_v36 = vunpack.c.l.bf16 %v888_v24  ;;  %v833_v37 = vunpack.c.l.bf16 %v903_v25  ;;  %v770_v40 = vunpack.c.h.bf16 %v888_v24  ;;  %v834_v41 = vunpack.c.h.bf16 %v903_v25 }
  0x21   : > { %v554_v34 = vadd.f32 %v522_v27, %v380_v26  ;;  %v555_v35 = vadd.f32 %v523_v29, %v381_v28  ;;  %v556_v38 = vadd.f32 %v524_v31, %v382_v30  ;;  %v557_v39 = vadd.f32 %v525_v33, %v383_v32  ;;  %v892_v32 = vld [vmem:[%s1113_s13 + $0x30] sm:$0xff]  }
  0x22   : > { %v345_v46 = vmul.f32 %v769_v36, %v1123_v0  ;;  %v487_v47 = vmul.f32 %v833_v37, %v1128_v1  ;;  %v346_v50 = vmul.f32 %v770_v40, %v1123_v0  ;;  %v488_v51 = vmul.f32 %v834_v41, %v1128_v1  ;;  %v907_v37 = vld [vmem:[%s1118_s16 + $0x30] sm:$0xff]  }
  0x23   : > { %v586_v44 = vmax.f32 %v554_v34, 0.0  ;;  %v587_v45 = vmax.f32 %v555_v35, 0.0  ;;  %v588_v48 = vmax.f32 %v556_v38, 0.0  ;;  %v589_v49 = vmax.f32 %v557_v39, 0.0 }
  0x24   : > { %v384_v53 = vadd.f32 %v1138_v10, %v345_v46  ;;  %v526_v54 = vadd.f32 %v1143_v11, %v487_v47  ;;  %v773_v55 = vunpack.c.l.bf16 %v889_v42  ;;  %v837_v56 = vunpack.c.l.bf16 %v904_v43  ;;  %v893_v46 = vld [vmem:[%s1113_s13 + $0x38] sm:$0xff]  }
  0x25   : > { %618 = vst [vmem:[%s1172_s12] sm:$0xff] %v586_v44  ;;  %619 = vst [vmem:[%s1172_s12 + $0x8] sm:$0xff] %v587_v45  ;;  %v385_v58 = vadd.f32 %v1138_v10, %v346_v50  ;;  %v527_v59 = vadd.f32 %v1143_v11, %v488_v51  ;;  %v774_v60 = vunpack.c.h.bf16 %v889_v42  ;;  %v838_v61 = vunpack.c.h.bf16 %v904_v43 }
  0x26   : > { %620 = vst [vmem:[%s1172_s12 + $0x10] sm:$0xff] %v588_v48  ;;  %621 = vst [vmem:[%s1172_s12 + $0x18] sm:$0xff] %v589_v49  ;;  %v558_v62 = vadd.f32 %v526_v54, %v384_v53  ;;  %v347_v63 = vmul.f32 %v773_v55, %v1123_v0  ;;  %v489_v2 = vmul.f32 %v837_v56, %v1128_v1  ;;  %v777_v3 = vunpack.c.l.bf16 %v890_v52  ;;  %v908_v55 = vld [vmem:[%s1118_s16 + $0x38] sm:$0xff]  }
  0x27   : > { %v559_v4 = vadd.f32 %v527_v59, %v385_v58  ;;  %v348_v5 = vmul.f32 %v774_v60, %v1123_v0  ;;  %v490_v6 = vmul.f32 %v838_v61, %v1128_v1  ;;  %v841_v7 = vunpack.c.l.bf16 %v905_v57 }
  0x28   : > { %v590_v8 = vmax.f32 %v558_v62, 0.0  ;;  %v386_v9 = vadd.f32 %v1138_v10, %v347_v63  ;;  %v528_v12 = vadd.f32 %v1143_v11, %v489_v2  ;;  %v349_v13 = vmul.f32 %v777_v3, %v1123_v0 }
  0x29   : > { %v591_v16 = vmax.f32 %v559_v4, 0.0  ;;  %v387_v17 = vadd.f32 %v1138_v10, %v348_v5  ;;  %v529_v18 = vadd.f32 %v1143_v11, %v490_v6  ;;  %v491_v19 = vmul.f32 %v841_v7, %v1128_v1  ;;  %v894_v6 = vld [vmem:[%s1113_s13 + $0x40] sm:$0xff]  }
  0x2a   : > { %622 = vst [vmem:[%s1172_s12 + $0x20] sm:$0xff] %v590_v8  ;;  %v560_v20 = vadd.f32 %v528_v12, %v386_v9  ;;  %v388_v21 = vadd.f32 %v1138_v10, %v349_v13  ;;  %v778_v22 = vunpack.c.h.bf16 %v890_v52  ;;  %v842_v23 = vunpack.c.h.bf16 %v905_v57  ;;  %v909_v13 = vld [vmem:[%s1118_s16 + $0x40] sm:$0xff]  }
  0x2b   : > { %623 = vst [vmem:[%s1172_s12 + $0x28] sm:$0xff] %v591_v16  ;;  %v561_v24 = vadd.f32 %v529_v18, %v387_v17  ;;  %v530_v25 = vadd.f32 %v1143_v11, %v491_v19  ;;  %v781_v26 = vunpack.c.l.bf16 %v891_v14  ;;  %v845_v27 = vunpack.c.l.bf16 %v906_v15 }
  0x2c   : > { %v592_v28 = vmax.f32 %v560_v20, 0.0  ;;  %v350_v29 = vmul.f32 %v778_v22, %v1123_v0  ;;  %v492_v30 = vmul.f32 %v842_v23, %v1128_v1  ;;  %v782_v31 = vunpack.c.h.bf16 %v891_v14 }
  0x2d   : > { %v593_v33 = vmax.f32 %v561_v24, 0.0  ;;  %v562_v34 = vadd.f32 %v530_v25, %v388_v21  ;;  %v351_v35 = vmul.f32 %v781_v26, %v1123_v0  ;;  %v493_v36 = vmul.f32 %v845_v27, %v1128_v1  ;;  %v895_v26 = vld [vmem:[%s1113_s13 + $0x48] sm:$0xff]  }
  0x2e   : > { %624 = vst [vmem:[%s1172_s12 + $0x30] sm:$0xff] %v592_v28  ;;  %v389_v38 = vadd.f32 %v1138_v10, %v350_v29  ;;  %v531_v39 = vadd.f32 %v1143_v11, %v492_v30  ;;  %v352_v40 = vmul.f32 %v782_v31, %v1123_v0  ;;  %v846_v41 = vunpack.c.h.bf16 %v906_v15  ;;  %v910_v27 = vld [vmem:[%s1118_s16 + $0x48] sm:$0xff]  }
  0x2f   : > { %625 = vst [vmem:[%s1172_s12 + $0x38] sm:$0xff] %v593_v33  ;;  %v594_v42 = vmax.f32 %v562_v34, 0.0  ;;  %v390_v43 = vadd.f32 %v1138_v10, %v351_v35  ;;  %v532_v44 = vadd.f32 %v1143_v11, %v493_v36  ;;  %v785_v45 = vunpack.c.l.bf16 %v892_v32 }
  0x30   : > { %v563_v47 = vadd.f32 %v531_v39, %v389_v38  ;;  %v391_v48 = vadd.f32 %v1138_v10, %v352_v40  ;;  %v494_v49 = vmul.f32 %v846_v41, %v1128_v1  ;;  %v849_v50 = vunpack.c.l.bf16 %v907_v37  ;;  %v896_v40 = vld [vmem:[%s1113_s13 + $0x50] sm:$0xff]  }
  0x31   : > { %626 = vst [vmem:[%s1172_s12 + $0x40] sm:$0xff] %v594_v42  ;;  %v564_v51 = vadd.f32 %v532_v44, %v390_v43  ;;  %v353_v52 = vmul.f32 %v785_v45, %v1123_v0  ;;  %v786_v53 = vunpack.c.h.bf16 %v892_v32  ;;  %v850_v54 = vunpack.c.h.bf16 %v907_v37  ;;  %v911_v45 = vld [vmem:[%s1118_s16 + $0x50] sm:$0xff]  }
  0x32   : > { %v595_v56 = vmax.f32 %v563_v47, 0.0  ;;  %v533_v57 = vadd.f32 %v1143_v11, %v494_v49  ;;  %v495_v58 = vmul.f32 %v849_v50, %v1128_v1  ;;  %v789_v59 = vunpack.c.l.bf16 %v893_v46 }
  0x33   : > { %v596_v60 = vmax.f32 %v564_v51, 0.0  ;;  %v392_v61 = vadd.f32 %v1138_v10, %v353_v52  ;;  %v354_v62 = vmul.f32 %v786_v53, %v1123_v0  ;;  %v496_v63 = vmul.f32 %v850_v54, %v1128_v1 }
  0x34   : > { %627 = vst [vmem:[%s1172_s12 + $0x48] sm:$0xff] %v595_v56  ;;  %v565_v2 = vadd.f32 %v533_v57, %v391_v48  ;;  %v534_v3 = vadd.f32 %v1143_v11, %v495_v58  ;;  %v355_v4 = vmul.f32 %v789_v59, %v1123_v0  ;;  %v853_v5 = vunpack.c.l.bf16 %v908_v55 }
  0x35   : > { %628 = vst [vmem:[%s1172_s12 + $0x50] sm:$0xff] %v596_v60  ;;  %v393_v7 = vadd.f32 %v1138_v10, %v354_v62  ;;  %v535_v8 = vadd.f32 %v1143_v11, %v496_v63  ;;  %v790_v9 = vunpack.c.h.bf16 %v893_v46  ;;  %v854_v12 = vunpack.c.h.bf16 %v908_v55  ;;  %v897_v62 = vld [vmem:[%s1113_s13 + $0x58] sm:$0xff]  }
  0x36   : > { %v597_v14 = vmax.f32 %v565_v2, 0.0  ;;  %v566_v15 = vadd.f32 %v534_v3, %v392_v61  ;;  %v394_v16 = vadd.f32 %v1138_v10, %v355_v4  ;;  %v497_v17 = vmul.f32 %v853_v5, %v1128_v1  ;;  %v912_v5 = vld [vmem:[%s1118_s16 + $0x58] sm:$0xff]  }
  0x37   : > { %v567_v18 = vadd.f32 %v535_v8, %v393_v7  ;;  %v356_v19 = vmul.f32 %v790_v9, %v1123_v0  ;;  %v498_v20 = vmul.f32 %v854_v12, %v1128_v1  ;;  %v793_v21 = vunpack.c.l.bf16 %v894_v6 }
  0x38   : > { %629 = vst [vmem:[%s1172_s12 + $0x58] sm:$0xff] %v597_v14  ;;  %v598_v22 = vmax.f32 %v566_v15, 0.0  ;;  %v536_v23 = vadd.f32 %v1143_v11, %v497_v17  ;;  %v857_v24 = vunpack.c.l.bf16 %v909_v13  ;;  %v794_v25 = vunpack.c.h.bf16 %v894_v6 }
  0x39   : > { %v599_v28 = vmax.f32 %v567_v18, 0.0  ;;  %v395_v29 = vadd.f32 %v1138_v10, %v356_v19  ;;  %v537_v30 = vadd.f32 %v1143_v11, %v498_v20  ;;  %v357_v31 = vmul.f32 %v793_v21, %v1123_v0  ;;  %v898_v20 = vld [vmem:[%s1113_s13 + $0x60] sm:$0xff]  }
  0x3a   : > { %630 = vst [vmem:[%s1172_s12 + $0x60] sm:$0xff] %v598_v22  ;;  %v568_v32 = vadd.f32 %v536_v23, %v394_v16  ;;  %v499_v33 = vmul.f32 %v857_v24, %v1128_v1  ;;  %v358_v34 = vmul.f32 %v794_v25, %v1123_v0  ;;  %v858_v35 = vunpack.c.h.bf16 %v909_v13  ;;  %v913_v25 = vld [vmem:[%s1118_s16 + $0x60] sm:$0xff]  }
  0x3b   : > { %631 = vst [vmem:[%s1172_s12 + $0x68] sm:$0xff] %v599_v28  ;;  %v569_v36 = vadd.f32 %v537_v30, %v395_v29  ;;  %v396_v37 = vadd.f32 %v1138_v10, %v357_v31  ;;  %v797_v38 = vunpack.c.l.bf16 %v895_v26  ;;  %v861_v39 = vunpack.c.l.bf16 %v910_v27 }
  0x3c   : > { %v600_v41 = vmax.f32 %v568_v32, 0.0  ;;  %v538_v42 = vadd.f32 %v1143_v11, %v499_v33  ;;  %v397_v43 = vadd.f32 %v1138_v10, %v358_v34  ;;  %v500_v44 = vmul.f32 %v858_v35, %v1128_v1  ;;  %v899_v34 = vld [vmem:[%s1113_s13 + $0x68] sm:$0xff]  }
  0x3d   : > { %v601_v46 = vmax.f32 %v569_v36, 0.0  ;;  %v359_v47 = vmul.f32 %v797_v38, %v1123_v0  ;;  %v501_v48 = vmul.f32 %v861_v39, %v1128_v1  ;;  %v798_v49 = vunpack.c.h.bf16 %v895_v26 }
  0x3e   : > { %632 = vst [vmem:[%s1172_s12 + $0x70] sm:$0xff] %v600_v41  ;;  %v570_v50 = vadd.f32 %v538_v42, %v396_v37  ;;  %v539_v51 = vadd.f32 %v1143_v11, %v500_v44  ;;  %v862_v52 = vunpack.c.h.bf16 %v910_v27  ;;  %v801_v53 = vunpack.c.l.bf16 %v896_v40 }
  0x3f   : > { %633 = vst [vmem:[%s1172_s12 + $0x78] sm:$0xff] %v601_v46  ;;  %v398_v54 = vadd.f32 %v1138_v10, %v359_v47  ;;  %v540_v55 = vadd.f32 %v1143_v11, %v501_v48  ;;  %v360_v56 = vmul.f32 %v798_v49, %v1123_v0  ;;  %v865_v57 = vunpack.c.l.bf16 %v911_v45 }
  0x40   : > { %v602_v58 = vmax.f32 %v570_v50, 0.0  ;;  %v571_v59 = vadd.f32 %v539_v51, %v397_v43  ;;  %v502_v60 = vmul.f32 %v862_v52, %v1128_v1  ;;  %v361_v61 = vmul.f32 %v801_v53, %v1123_v0  ;;  %v914_v43 = vld [vmem:[%s1118_s16 + $0x68] sm:$0xff]  }
  0x41   : > { %v572_v63 = vadd.f32 %v540_v55, %v398_v54  ;;  %v399_v2 = vadd.f32 %v1138_v10, %v360_v56  ;;  %v503_v3 = vmul.f32 %v865_v57, %v1128_v1  ;;  %v802_v4 = vunpack.c.h.bf16 %v896_v40  ;;  %v900_v56 = vld [vmem:[%s1113_s13 + $0x70] sm:$0xff]  }
  0x42   : > { %634 = vst [vmem:[%s1172_s12 + $0x80] sm:$0xff] %v602_v58  ;;  %v603_v6 = vmax.f32 %v571_v59, 0.0  ;;  %v541_v7 = vadd.f32 %v1143_v11, %v502_v60  ;;  %v400_v8 = vadd.f32 %v1138_v10, %v361_v61  ;;  %v866_v9 = vunpack.c.h.bf16 %v911_v45  ;;  %v915_v57 = vld [vmem:[%s1118_s16 + $0x70] sm:$0xff]  }
  0x43   : > { %v604_v12 = vmax.f32 %v572_v63, 0.0  ;;  %v542_v13 = vadd.f32 %v1143_v11, %v503_v3  ;;  %v362_v14 = vmul.f32 %v802_v4, %v1123_v0  ;;  %v805_v15 = vunpack.c.l.bf16 %v897_v62 }
  0x44   : > { %635 = vst [vmem:[%s1172_s12 + $0x88] sm:$0xff] %v603_v6  ;;  %v573_v16 = vadd.f32 %v541_v7, %v399_v2  ;;  %v504_v17 = vmul.f32 %v866_v9, %v1128_v1  ;;  %v869_v18 = vunpack.c.l.bf16 %v912_v5  ;;  %v806_v19 = vunpack.c.h.bf16 %v897_v62 }
  0x45   : > { %636 = vst [vmem:[%s1172_s12 + $0x90] sm:$0xff] %v604_v12  ;;  %v574_v21 = vadd.f32 %v542_v13, %v400_v8  ;;  %v401_v22 = vadd.f32 %v1138_v10, %v362_v14  ;;  %v363_v23 = vmul.f32 %v805_v15, %v1123_v0  ;;  %v870_v24 = vunpack.c.h.bf16 %v912_v5  ;;  %v901_v14 = vld [vmem:[%s1113_s13 + $0x78] sm:$0xff]   ;;  %s758_s13 = sshll.u32 %s1081_s25, 12  ;;  %s958_s25 = scalar_lea.vmem %s1343_s14, 4096 }
  0x46   : > { %v605_v26 = vmax.f32 %v573_v16, 0.0  ;;  %v543_v27 = vadd.f32 %v1143_v11, %v504_v17  ;;  %v505_v28 = vmul.f32 %v869_v18, %v1128_v1  ;;  %v364_v29 = vmul.f32 %v806_v19, %v1123_v0  ;;  %v916_v15 = vld [vmem:[%s1118_s16 + $0x78] sm:$0xff]   ;;  %s1341_s17 = scalar_lea.hbm %s1395_s6, %s758_s13  ;;  %p959_p11 = scmp.ne.s32.totalorder %s1343_s14, %s958_s25 }
  0x47   : > { %v606_v30 = vmax.f32 %v574_v21, 0.0  ;;  %v402_v31 = vadd.f32 %v1138_v10, %v363_v23  ;;  %v506_v32 = vmul.f32 %v870_v24, %v1128_v1  ;;  %v809_v33 = vunpack.c.l.bf16 %v898_v20  ;;  %p966_p1 = scmp.lt.s32.totalorder %s964_s28, %s958_s25 }
  0x48   : > { %637 = vst [vmem:[%s1172_s12 + $0x98] sm:$0xff] %v605_v26  ;;  %v575_v35 = vadd.f32 %v543_v27, %v401_v22  ;;  %v544_v36 = vadd.f32 %v1143_v11, %v505_v28  ;;  %v403_v37 = vadd.f32 %v1138_v10, %v364_v29  ;;  %v873_v38 = vunpack.c.l.bf16 %v913_v25  ;;  %p960_p12 = pnand %p959_p11, %p1098_p5 }
  0x49   : > { %638 = vst [vmem:[%s1172_s12 + $0xa0] sm:$0xff] %v606_v30  ;;  %v545_v39 = vadd.f32 %v1143_v11, %v506_v32  ;;  %v365_v40 = vmul.f32 %v809_v33, %v1123_v0  ;;  %v810_v41 = vunpack.c.h.bf16 %v898_v20  ;;  %v874_v42 = vunpack.c.h.bf16 %v913_v25  ;;  %p967_p2 = por %p966_p1, %p965_p0 }
  0x4a   : > { %v607_v44 = vmax.f32 %v575_v35, 0.0  ;;  %v576_v45 = vadd.f32 %v544_v36, %v402_v31  ;;  %v507_v46 = vmul.f32 %v873_v38, %v1128_v1  ;;  %v813_v47 = vunpack.c.l.bf16 %v899_v34  ;;  %p961_p13 = pneg %p960_p12 }
  0x4b   : > { %v577_v48 = vadd.f32 %v545_v39, %v403_v37  ;;  %v404_v49 = vadd.f32 %v1138_v10, %v365_v40  ;;  %v366_v50 = vmul.f32 %v810_v41, %v1123_v0  ;;  %v508_v51 = vmul.f32 %v874_v42, %v1128_v1 }
  0x4c   : > { %639 = vst [vmem:[%s1172_s12 + $0xa8] sm:$0xff] %v607_v44  ;;  %v608_v52 = vmax.f32 %v576_v45, 0.0  ;;  %v546_v53 = vadd.f32 %v1143_v11, %v507_v46  ;;  %v367_v54 = vmul.f32 %v813_v47, %v1123_v0  ;;  %v877_v55 = vunpack.c.l.bf16 %v914_v43  ;;  %p968_p3 = pnand %p967_p2, %p961_p13 }
  0x4d   : > { %v609_v58 = vmax.f32 %v577_v48, 0.0  ;;  %v405_v59 = vadd.f32 %v1138_v10, %v366_v50  ;;  %v547_v60 = vadd.f32 %v1143_v11, %v508_v51  ;;  %v814_v61 = vunpack.c.h.bf16 %v899_v34 }
  0x4e   : > { %640 = vst [vmem:[%s1172_s12 + $0xb0] sm:$0xff] %v608_v52  ;;  %v578_v62 = vadd.f32 %v546_v53, %v404_v49  ;;  %v406_v63 = vadd.f32 %v1138_v10, %v367_v54  ;;  %v509_v2 = vmul.f32 %v877_v55, %v1128_v1  ;;  %v878_v3 = vunpack.c.h.bf16 %v914_v43 }
  0x4f   : > { %641 = vst [vmem:[%s1172_s12 + $0xb8] sm:$0xff] %v609_v58  ;;  %v579_v4 = vadd.f32 %v547_v60, %v405_v59  ;;  %v368_v5 = vmul.f32 %v814_v61, %v1123_v0  ;;  %v817_v6 = vunpack.c.l.bf16 %v900_v56  ;;  %v881_v7 = vunpack.c.l.bf16 %v915_v57 }
  0x50   : > { %v610_v8 = vmax.f32 %v578_v62, 0.0  ;;  %v548_v9 = vadd.f32 %v1143_v11, %v509_v2  ;;  %v510_v12 = vmul.f32 %v878_v3, %v1128_v1  ;;  %v818_v13 = vunpack.c.h.bf16 %v900_v56 }
  0x51   : > { %v611_v16 = vmax.f32 %v579_v4, 0.0  ;;  %v407_v17 = vadd.f32 %v1138_v10, %v368_v5  ;;  %v369_v18 = vmul.f32 %v817_v6, %v1123_v0  ;;  %v511_v19 = vmul.f32 %v881_v7, %v1128_v1 }
  0x52   : > { %642 = vst [vmem:[%s1172_s12 + $0xc0] sm:$0xff] %v610_v8  ;;  %v580_v20 = vadd.f32 %v548_v9, %v406_v63  ;;  %v549_v21 = vadd.f32 %v1143_v11, %v510_v12  ;;  %v370_v22 = vmul.f32 %v818_v13, %v1123_v0  ;;  %v882_v23 = vunpack.c.h.bf16 %v915_v57 }
  0x53   : > { %643 = vst [vmem:[%s1172_s12 + $0xc8] sm:$0xff] %v611_v16  ;;  %v408_v24 = vadd.f32 %v1138_v10, %v369_v18  ;;  %v550_v25 = vadd.f32 %v1143_v11, %v511_v19  ;;  %v821_v26 = vunpack.c.l.bf16 %v901_v14  ;;  %v885_v27 = vunpack.c.l.bf16 %v916_v15 }
  0x54   : > { %v612_v28 = vmax.f32 %v580_v20, 0.0  ;;  %v581_v29 = vadd.f32 %v549_v21, %v407_v17  ;;  %v409_v30 = vadd.f32 %v1138_v10, %v370_v22  ;;  %v512_v31 = vmul.f32 %v882_v23, %v1128_v1 }
  0x55   : > { %v582_v32 = vadd.f32 %v550_v25, %v408_v24  ;;  %v371_v33 = vmul.f32 %v821_v26, %v1123_v0  ;;  %v513_v34 = vmul.f32 %v885_v27, %v1128_v1  ;;  %v822_v35 = vunpack.c.h.bf16 %v901_v14 }
  0x56   : > { %644 = vst [vmem:[%s1172_s12 + $0xd0] sm:$0xff] %v612_v28  ;;  %v613_v36 = vmax.f32 %v581_v29, 0.0  ;;  %v551_v37 = vadd.f32 %v1143_v11, %v512_v31  ;;  %v886_v38 = vunpack.c.h.bf16 %v916_v15 }
  0x57   : > { %v614_v39 = vmax.f32 %v582_v32, 0.0  ;;  %v410_v40 = vadd.f32 %v1138_v10, %v371_v33  ;;  %v552_v41 = vadd.f32 %v1143_v11, %v513_v34  ;;  %v372_v42 = vmul.f32 %v822_v35, %v1123_v0 }
  0x58   : > { %645 = vst [vmem:[%s1172_s12 + $0xd8] sm:$0xff] %v613_v36  ;;  %v583_v43 = vadd.f32 %v551_v37, %v409_v30  ;;  %v514_v44 = vmul.f32 %v886_v38, %v1128_v1 }
  0x59   : > { %646 = vst [vmem:[%s1172_s12 + $0xe0] sm:$0xff] %v614_v39  ;;  %v584_v45 = vadd.f32 %v552_v41, %v410_v40  ;;  %v411_v46 = vadd.f32 %v1138_v10, %v372_v42 }
  0x5a   : > { %v615_v47 = vmax.f32 %v583_v43, 0.0  ;;  %v553_v48 = vadd.f32 %v1143_v11, %v514_v44 }
  0x5b   : > { %v616_v49 = vmax.f32 %v584_v45, 0.0 }
  0x5c   : > { %647 = vst [vmem:[%s1172_s12 + $0xe8] sm:$0xff] %v615_v47  ;;  %v585_v50 = vadd.f32 %v553_v48, %v411_v46 }
  0x5d   : > { %648 = vst [vmem:[%s1172_s12 + $0xf0] sm:$0xff] %v616_v49 }
  0x5e   : > { %v617_v0 = vmax.f32 %v585_v50, 0.0 }
  0x60   : > { %649 = vst [vmem:[%s1172_s12 + $0xf8] sm:$0xff] %v617_v0 }
  0x61   : > { %971 = shalt.err (!%p968_p3)
}
  0x62   : > { %s972_s26 = scalar_lea.hbm %s1341_s17, 4096  ;;  %s976_s10 = scalar_lea.hbm %s1395_s6, 8192 }
  0x63   : > { %p973_p4 = scmp.ne.s32.totalorder %s1341_s17, %s972_s26  ;;  %p977_p9 = scmp.lt.u32.totalorder %s1341_s17, %s1395_s6 }
  0x64   : > { %p978_p10 = scmp.lt.u32.totalorder %s976_s10, %s972_s26  ;;  %p980_p12 = scmp.lt.u32.totalorder %s972_s26, %s1341_s17 }
  0x65   : > { %p974_p7 = pnand %p973_p4, %p1098_p5 }
  0x66   : > { %p979_p11 = por %p978_p10, %p977_p9 }
  0x67   : > { %p975_p8 = pneg %p974_p7 }
  0x68   : > { %p981_p13 = por %p980_p12, %p979_p11 }
  0x6a   : > { %p982_p0 = pnand %p981_p13, %p975_p8 }
  0x6c   : > { %985 = shalt.err (!%p982_p0)
}
  0x6d   : > { %s1023_s13 = smov 128   ;;  %s1024_s15 = smov 8  }
  0x6e   : > { %917 = dma.vmem_to_hbm [thread:$0]  (%p1098_p5), %s1343_s14, 4096, %s1341_s17, %s1348_s18, %s1023_s13, %s1023_s13, %s1024_s15  }
  0x6f PF: > { %p923_p1 = scmp.ge.s32.totalorder %s1020_s24, 2  ;;  %s679_s16 = sand.u32 1, %s1008_s21  }
  0x70   : > { %s680_s25 = scalar_lea.sflag [#allocation3], %s679_s16 }
  0x71   : > { %p920_p2 = pnand %p923_p1, %p1102_p6 }
  0x73   : > { %1003 = dma.done.wait (!%p920_p2), %s680_s25, 4096  }
  0x74   : > { %1005 = vsyncadd (!%p920_p2), %s680_s25, 4294963200  ;;  %p16_p3 = scmp.ge.s32.totalorder %s1085_s27, 4   ;;  %s1398_s21 = smov %s1012_s22 }
  0x75   : > { %s1399_s22 = smov %s1016_s23  ;;  %s1400_s23 = smov %s1096_s30 }
  0x76   : > { %s1401_s24 = smov %s1085_s27  ;;  %18 = sbr.rel (!%p16_p3) target bundleno = 3 (0x3), region = 82 }
  0x7d   :  { %685 = vsyncpa [#allocation3], 1 }
  0x7e   :  { %687 = vsyncpa [#allocation3 + $0x1], 1 }

// kernel: basic_block.3
= control target key start
LH: loop header
LB: loop body
LE: loop exit
PB: predicated region body
PF: predicated region fallthrough
CT: control target
= control target key end

     0   :  { %s5710_s18 = smov 0   ;;  %s7615_s0 = inlined_call_operand.vmem [shape: f32[2,16,16,16], index: 0, kind: input, shape index: {}]   ;;  %s7616_s1 = inlined_call_operand.vmem [shape: bf16[144,256], index: 1, kind: input, shape index: {}]   ;;  %s7617_s2 = inlined_call_operand.vmem [shape: bf16[2,16,16,128], index: 2, kind: output, shape index: {0}]   ;;  %s7618_s3 = inlined_call_operand.vmem [shape: f32[2,2,128], index: 3, kind: output, shape index: {1}]   ;;  %s7619_s4 = inlined_call_operand.vmem [shape: bf16[2,16,16,128], index: 4, kind: output, shape index: {2}]   ;;  %s7620_s5 = inlined_call_operand.vmem [shape: f32[2,2,128], index: 5, kind: output, shape index: {3}]  }
   0x1 LB: > { %s4889_s19 = sadd.s32 4294967295, %s5673_s18   ;;  %p4893_p0 = scmp.ge.s32.totalorder %s5673_s18, 1  ;;  %s5673_s18 = sphi %s5710_s18, %s16_s18  }
   0x2   : > { %p194_p1 = scmp.lt.s32.totalorder %s5673_s18, 3 }
   0x4   : > { %p195_p2 = pnand %p4893_p0, %p194_p1 }
   0x5   : > { %p235_p3 = scmp.lt.s32.totalorder (!%p195_p2), %s4889_s19, 1  ;;  %vm262_vm0 = vcmask (!%p195_p2), 122880   ;;  %vm269_vm1 = vsmask.f32 (!%p195_p2), 256  ;;  %v277_v1 = vld [vmem:[#allocation2 + $0x18] sm:$0x1] (!%p195_p2) }
   0x6   : > { %198 = sbr.rel (%p195_p2) target bundleno = 797 (0x31d), region = 28  ;;  %vm5720_vm2 = vmand (!%p195_p2), %vm262_vm0, %vm269_vm1  ;;  %vm325_vm3 = vsmask.f32 (!%p195_p2), 7938  ;;  %v333_v2 = vld [vmem:[#allocation2 + $0x20] sm:$0x1] (!%p195_p2)  ;;  %vm259_vm5 = vcmask (!%p195_p2), 125952  }
   0x7   : > { %v278_v3 = vsel (!%p195_p2), %vm5720_vm2, 0, %v277_v1  ;;  %vm5730_vm4 = vmand (!%p195_p2), %vm262_vm0, %vm325_vm3  ;;  %v274_v6 = vld [vmem:[#allocation2 + $0xc] sm:$0x1] (!%p195_p2)  ;;  %v330_v7 = vld [vmem:[#allocation2 + $0x14] sm:$0x1] (!%p195_p2)  ;;  %vm1445_vm7 = vcmask (!%p195_p2), 1042432  }
   0x8   : > { %279 = vst [vmem:[#allocation2 + $0x18] sm:$0x1] (!%p195_p2), %v278_v3  ;;  %v334_v5 = vsel (!%p195_p2), %vm5730_vm4, 0, %v333_v2  ;;  %v275_v8 = vsel (!%p195_p2), %vm5720_vm2, 0, %v274_v6  ;;  %v331_v9 = vsel (!%p195_p2), %vm5730_vm4, 0, %v330_v7  ;;  %vm1446_vm8 = vcmask (!%p195_p2), 1046532   ;;  %vm5772_vm10 = vmand (!%p195_p2), %vm259_vm5, %vm325_vm3 }
   0x9   : > { %335 = vst [vmem:[#allocation2 + $0x20] sm:$0x1] (!%p195_p2), %v334_v5  ;;  %276 = vst [vmem:[#allocation2 + $0xc] sm:$0x1] (!%p195_p2), %v275_v8  ;;  %v280_v10 = vld [vmem:[#allocation2 + $0x24] sm:$0x1] (!%p195_p2) }
   0xa   : > { %332 = vst [vmem:[#allocation2 + $0x14] sm:$0x1] (!%p195_p2), %v331_v9  ;;  %v336_v11 = vld [vmem:[#allocation2 + $0x2c] sm:$0x1] (!%p195_p2)  ;;  %v281_v15 = vsel (!%p195_p2), %vm5720_vm2, 0, %v280_v10  ;;  %vm5813_vm11 = vmor (!%p195_p2), %vm1445_vm7, %vm1446_vm8  ;;  %s5675_s24 = smov (!%p195_p2), 32  }
   0xb   : > { %v337_v16 = vsel (!%p195_p2), %vm5730_vm4, 0, %v336_v11  ;;  %282 = vst [vmem:[#allocation2 + $0x24] sm:$0x1] (!%p195_p2), %v281_v15  ;;  %vm509_vm6 = vsmask.f32 (!%p195_p2), 4368  ;;  %s5676_s25 = smov (!%p195_p2), 16  }
   0xc   : > { %338 = vst [vmem:[#allocation2 + $0x2c] sm:$0x1] (!%p195_p2), %v337_v16  ;;  %vm5762_vm9 = vmor (!%p195_p2), %vm269_vm1, %vm509_vm6  ;;  %v283_v57 = vld [vmem:[#allocation2 + $0x30] sm:$0x1] (!%p195_p2)  ;;  %v339_v62 = vld [vmem:[#allocation2 + $0x38] sm:$0x1] (!%p195_p2) }
   0xd   : > { %s7636_s19 = smov (!%p235_p3, %s4889_s19), 1  ;;  %v286_v5 = vld [vmem:[#allocation2 + $0x3c] sm:$0x1]  ;;  %v342_v6 = vld [vmem:[#allocation2 + $0x44] sm:$0x1]  ;;  %vm1784_vm15 = vcmask 130048  }
   0xe   : > { %s5226_s20 = sshll.u32 %s7636_s19, 8  ;;  %vm994_vm12 = vsmask.f32 3328  ;;  %vm995_vm13 = vsmask.f32 7440  ;;  %s5678_s16 = smov 96  }
   0xf   : > { %s5744_s23 = scalar_lea.vmem %s7615_s0, %s5226_s20  ;;  %v841_v40 = vld [vmem:[#allocation2 + $0x18] sm:$0xf]  ;;  %vm5877_vm14 = vmor %vm994_vm12, %vm995_vm13  ;;  %v5575_v0 = vld [vmem:[%s7616_s1 + $0x80] ss:$8 sps:$4 sm:$0xff]   ;;  %s5679_s17 = smov 48   ;;  %vm3787_vm1 = vcmask 392192  }
  0x10   : > { %v383_v12 = vld [vmem:[%s5744_s23 + $0x10] sm:$0xff]  ;;  %v384_v13 = vld [vmem:[%s5744_s23 + $0x18] sm:$0xff]  ;;  %v381_v14 = vld [vmem:[%s5744_s23] sm:$0xff]  ;;  %s4898_s27 = sshll.u32 %s7636_s19, 1  ;;  %vm4468_vm3 = vcmask 1040384  }
  0x11   : > { %v5231_v17 = vpack.c.bf16 %v383_v12, %v383_v12  ;;  %v5232_v18 = vpack.c.bf16 %v384_v13, %v384_v13  ;;  %v382_v19 = vld [vmem:[%s5744_s23 + $0x8] sm:$0xff]  ;;  %v5229_v20 = vpack.c.bf16 %v381_v14, %v381_v14  ;;  %v385_v21 = vld [vmem:[%s5744_s23 + $0x20] sm:$0xff]  ;;  %v387_v29 = vld [vmem:[%s5744_s23 + $0x30] sm:$0xff]  ;;  %v284_v12 = vsel %vm5720_vm2, 0, %v283_v57  ;;  %s248_s30 = scalar_lea.vmem %s7618_s3, %s4898_s27  ;;  %s257_s8 = scalar_lea.vmem %s7620_s5, %s4898_s27 }
  0x12   : > { %v5230_v22 = vpack.c.bf16 %v382_v19, %v382_v19  ;;  %v386_v23 = vld [vmem:[%s5744_s23 + $0x28] sm:$0xff]  ;;  %v5233_v24 = vpack.c.bf16 %v385_v21, %v385_v21  ;;  %v388_v30 = vld [vmem:[%s5744_s23 + $0x38] sm:$0xff]  ;;  %v845_v41 = vld [vmem:[#allocation2 + $0x20] sm:$0x1]  ;;  %v5766_v44 = vpack.c.bf16 %v387_v29, %v387_v29  ;;  %285 = vst [vmem:[#allocation2 + $0x30] sm:$0x1] %v284_v12 }
  0x13   : > { %v529_v25 = vshrl.u32 %v5231_v17, 16  ;;  %v532_v26 = vshll.u32 %v5231_v17, 16  ;;  %v537_v27 = vshrl.u32 %v5232_v18, 16  ;;  %v540_v28 = vshll.u32 %v5232_v18, 16  ;;  %v834_v51 = vld [vmem:[#allocation2 + $0xc] sm:$0xf] }
  0x14   : > { %v512_v31 = vshrl.u32 %v5229_v20, 16  ;;  %v515_v32 = vshll.u32 %v5229_v20, 16  ;;  %v520_v33 = vshrl.u32 %v5230_v22, 16  ;;  %v523_v34 = vshll.u32 %v5230_v22, 16  ;;  %v838_v52 = vld [vmem:[#allocation2 + $0x14] sm:$0x1] }
  0x15   : > { %v531_v35 = vrot.slane %v529_v25, 7  ;;  %v539_v36 = vrot.slane %v537_v27, 7  ;;  %v5758_v37 = vpack.c.bf16 %v386_v23, %v386_v23  ;;  %v546_v38 = vshrl.u32 %v5233_v24, 16  ;;  %v389_v7 = vld [vmem:[%s5744_s23 + $0x40] sm:$0xff]  ;;  %v390_v17 = vld [vmem:[%s5744_s23 + $0x48] sm:$0xff] }
  0x16   : > { %v514_v42 = vrot.slane %v512_v31, 7  ;;  %v522_v43 = vrot.slane %v520_v33, 7  ;;  %v5768_v45 = vpack.c.bf16 %v388_v30, %v388_v30  ;;  %v549_v3 = vshll.u32 %v5233_v24, 16  ;;  %v848_v11 = vld [vmem:[#allocation2 + $0x24] sm:$0xf] }
  0x17   : > { %v534_v46 = vor.u32 %v532_v26, %v531_v35  ;;  %v535_v47 = vrot.slane %v531_v35, 4  ;;  %v542_v48 = vor.u32 %v540_v28, %v539_v36  ;;  %v544_v49 = vrot.slane %v539_v36, 4  ;;  %v852_v23 = vld [vmem:[#allocation2 + $0x2c] sm:$0x1]  ;;  %v397_v27 = vld [vmem:[%s5744_s23 + $0x80] sm:$0xff] }
  0x18   : > { %v517_v53 = vor.u32 %v515_v32, %v514_v42  ;;  %v518_v54 = vrot.slane %v514_v42, 4  ;;  %v525_v55 = vor.u32 %v523_v34, %v522_v43  ;;  %v527_v56 = vrot.slane %v522_v43, 4 }
  0x19   : > { %v543_v58 = vsel %vm5762_vm9, %v535_v47, %v542_v48  ;;  %v842_v59 = vsel %vm5772_vm10, %v534_v46, %v841_v40  ;;  %v846_v60 = vsel %vm5720_vm2, %v544_v49, %v845_v41  ;;  %v548_v61 = vrot.slane %v546_v38, 7  ;;  %v391_v38 = vld [vmem:[%s5744_s23 + $0x50] sm:$0xff]  ;;  %v392_v40 = vld [vmem:[%s5744_s23 + $0x58] sm:$0xff] }
  0x1a   : > { %843 = vst [vmem:[#allocation2 + $0x18] sm:$0xf] %v842_v59  ;;  %844 = vst.msk [vmem:[#allocation2 + $0x1c] sm:$0xf] %vm259_vm5, %v543_v58  ;;  %v526_v63 = vsel %vm5762_vm9, %v518_v54, %v525_v55  ;;  %v835_v1 = vsel %vm5772_vm10, %v517_v53, %v834_v51  ;;  %v839_v2 = vsel %vm5720_vm2, %v527_v56, %v838_v52  ;;  %v554_v9 = vshrl.u32 %v5758_v37, 16 }
  0x1b   : > { %847 = vst [vmem:[#allocation2 + $0x20] sm:$0x1] %v846_v60  ;;  %836 = vst [vmem:[#allocation2 + $0xc] sm:$0xf] %v835_v1  ;;  %v552_v8 = vrot.slane %v548_v61, 4  ;;  %v557_v10 = vshll.u32 %v5758_v37, 16  ;;  %v551_v13 = vor.u32 %v549_v3, %v548_v61  ;;  %v5808_v26 = vpack.c.bf16 %v389_v7, %v389_v7 }
  0x1c   : > { %837 = vst.msk [vmem:[#allocation2 + $0x10] sm:$0xf] %vm259_vm5, %v526_v63  ;;  %840 = vst [vmem:[#allocation2 + $0x14] sm:$0x1] %v839_v2  ;;  %v340_v14 = vsel %vm5730_vm4, 0, %v339_v62  ;;  %v563_v15 = vshrl.u32 %v5766_v44, 16  ;;  %v5819_v32 = vpack.c.bf16 %v390_v17, %v390_v17  ;;  %v5837_v47 = vpack.c.bf16 %v397_v27, %v397_v27 }
  0x1d   : > { %v566_v16 = vshll.u32 %v5766_v44, 16  ;;  %v556_v18 = vrot.slane %v554_v9, 7  ;;  %341 = vst [vmem:[#allocation2 + $0x38] sm:$0x1] %v340_v14  ;;  %v571_v19 = vshrl.u32 %v5768_v45, 16  ;;  %v574_v20 = vshll.u32 %v5768_v45, 16 }
  0x1e   : > { %v287_v21 = vsel %vm5720_vm2, 0, %v286_v5  ;;  %v849_v22 = vsel %vm5772_vm10, %v551_v13, %v848_v11  ;;  %v565_v24 = vrot.slane %v563_v15, 7  ;;  %v343_v25 = vsel %vm5730_vm4, 0, %v342_v6  ;;  %v398_v37 = vld [vmem:[%s5744_s23 + $0x88] sm:$0xff] }
  0x1f   : > { %288 = vst [vmem:[#allocation2 + $0x3c] sm:$0x1] %v287_v21  ;;  %v559_v29 = vor.u32 %v557_v10, %v556_v18  ;;  %v561_v30 = vrot.slane %v556_v18, 4  ;;  %850 = vst [vmem:[#allocation2 + $0x24] sm:$0xf] %v849_v22  ;;  %v5817_v31 = vrot.slane %v571_v19, 7  ;;  %v5845_v59 = vpack.c.bf16 %v398_v37, %v398_v37 }
  0x20   : > { %344 = vst [vmem:[#allocation2 + $0x44] sm:$0x1] %v343_v25  ;;  %v5821_v33 = vor.u32 %v566_v16, %v565_v24  ;;  %v569_v34 = vrot.slane %v565_v24, 4  ;;  %v580_v35 = vshrl.u32 %v5808_v26, 16  ;;  %v583_v36 = vshll.u32 %v5808_v26, 16 }
  0x21   : > { %v5828_v41 = vld [vmem:[#allocation2 + $0x1c] sm:$0xf]  ;;  %v3211_v43 = vld [vmem:[#allocation2 + $0x18] sm:$0xe]  ;;  %v560_v44 = vsel %vm5762_vm9, %v552_v8, %v559_v29  ;;  %v853_v45 = vsel %vm5720_vm2, %v561_v30, %v852_v23  ;;  %v576_v46 = vor.u32 %v574_v20, %v5817_v31  ;;  %v5850_v7 = vpack.c.bf16 %v391_v38, %v391_v38 }
  0x22   : > { %v5830_v42 = vld [vmem:[#allocation2 + $0x20] sm:$0x1]  ;;  %v5062_v49 = vrot.slane %v3211_v43, 9  ;;  %v3277_v51 = vrot.slane %v5828_v41, 5  ;;  %851 = vst.msk [vmem:[#allocation2 + $0x28] sm:$0xf] %vm259_vm5, %v560_v44  ;;  %v5852_v8 = vpack.c.bf16 %v392_v40, %v392_v40 }
  0x23   : > { %v2847_v48 = vshll.u32 %v5830_v42, 16  ;;  %v3280_v52 = vrot.slane %v5830_v42, 5  ;;  %v1867_v53 = vld [vmem:[#allocation2 + $0x10] sm:$0xf]  ;;  %854 = vst [vmem:[#allocation2 + $0x2c] sm:$0x1] %v853_v45  ;;  %v577_v58 = vsel %vm5762_vm9, %v569_v34, %v576_v46 }
  0x24   : > { %v1898_v54 = vld [vmem:[#allocation2 + $0x14] sm:$0x1]  ;;  %v2298_v55 = vld [vmem:[#allocation2 + $0xc] sm:$0xe]  ;;  %v2364_v56 = vrot.slane %v1867_v53, 5  ;;  %v1924_v57 = vshll.u32 %v1867_v53, 16  ;;  %v3278_v60 = vsel %vm5813_vm11, %v5062_v49, %v3277_v51 }
  0x25   : > { %v3279_v61 = vrot.slane %v3277_v51, 4  ;;  %v1934_v62 = vshll.u32 %v1898_v54, 16  ;;  %v4998_v63 = vrot.slane %v2298_v55, 9  ;;  %v1869_v1 = vld [vmem:[#allocation2 + $0x1c] sm:$0xf]  ;;  %v2367_v3 = vrot.slane %v1898_v54, 5 }
  0x26   : > { %858 = vst.msk [vmem:[#allocation2 + $0x34] sm:$0xf] %vm259_vm5, %v577_v58  ;;  %v2366_v2 = vrot.slane %v2364_v56, 4  ;;  %v1899_v5 = vld [vmem:[#allocation2 + $0x20] sm:$0x1]  ;;  %v2371_v12 = vrot.slane %v1869_v1, 5 }
  0x27   : > { %v2299_v6 = vld [vmem:[#allocation2 + $0x18] sm:$0xe]  ;;  %v3281_v9 = vsel %vm5813_vm11, %v3279_v61, %v3280_v52  ;;  %v2365_v10 = vsel %vm5813_vm11, %v4998_v63, %v2364_v56  ;;  %v1866_v13 = vld [vmem:[#allocation2 + $0xc] sm:$0xf]  ;;  %v2374_v16 = vrot.slane %v1899_v5, 5  ;;  %v1926_v25 = vrot.slane %v1924_v57, 5 }
  0x28   : > { %v4999_v11 = vrot.slane %v2299_v6, 9  ;;  %v5110_v14 = vcombine.low %v3278_v60, %v3281_v9  ;;  %v2368_v15 = vsel %vm5813_vm11, %v2366_v2, %v2367_v3  ;;  %v1915_v17 = vshrl.u32 %v1866_v13, 16  ;;  %v3212_v18 = vld [vmem:[#allocation2 + $0x24] sm:$0xe]  ;;  %v1868_v23 = vld [vmem:[#allocation2 + $0x18] sm:$0xf] }
  0x29   : > { %v5046_v19 = vcombine.low %v2365_v10, %v2368_v15  ;;  %v2373_v21 = vrot.slane %v2371_v12, 4  ;;  %v1918_v22 = vshll.u32 %v1866_v13, 16  ;;  %v1928_v27 = vshrl.u32 %v1867_v53, 16  ;;  %v5863_v30 = vld [vmem:[#allocation2 + $0x28] sm:$0xf] }
  0x2a   : > { %v2372_v20 = vsel %vm5813_vm11, %v4999_v11, %v2371_v12  ;;  %3579 = vrot.lane.b32.xlu1 %v5110_v14, %s5675_s24  ;;  %v1917_v24 = vrot.slane %v1915_v17, 4  ;;  %v1936_v29 = vrot.slane %v1934_v62, 5  ;;  %v5868_v38 = vld [vmem:[#allocation2 + $0x2c] sm:$0x1]  ;;  %v5063_v40 = vrot.slane %v3212_v18, 9 }
  0x2b   : > { %2666 = vrot.lane.b32.xlu0 %v5046_v19, %s5675_s24  ;;  %v2375_v34 = vsel %vm5813_vm11, %v2373_v21, %v2374_v16  ;;  %v1920_v37 = vrot.slane %v1918_v22, 5  ;;  %v3284_v43 = vrot.slane %v5863_v30, 5  ;;  %v1930_v45 = vrot.slane %v1928_v27, 4  ;;  %v2300_v55 = vld [vmem:[#allocation2 + $0x24] sm:$0xe] }
  0x2c   : > { %v5047_v44 = vcombine.low %v2372_v20, %v2375_v34  ;;  %v3287_v46 = vrot.slane %v5868_v38, 5  ;;  %v1939_v49 = vshrl.u32 %v1868_v23, 16  ;;  %v1942_v54 = vshll.u32 %v1868_v23, 16  ;;  %v5881_v62 = vld [vmem:[#allocation2 + $0x28] sm:$0xf] }
  0x2d   : > { %v1921_v51 = vor.u32 %v1920_v37, %v1917_v24  ;;  %v3285_v52 = vsel %vm5813_vm11, %v5063_v40, %v3284_v43  ;;  %v3286_v53 = vrot.slane %v3284_v43, 4  ;;  %v1931_v57 = vor.u32 %v1930_v45, %v1926_v25  ;;  %v5885_v9 = vld [vmem:[#allocation2 + $0x2c] sm:$0x1]  ;;  %v2781_v14 = vld [vmem:[#allocation2 + $0x24] sm:$0xf] }
  0x2e   : > { %2668 = vrot.lane.b32.xlu1 %v5047_v44, %s5675_s24  ;;  %v1941_v58 = vrot.slane %v1939_v49, 4  ;;  %v1948_v60 = vshll.u32 %v1869_v1, 16  ;;  %v1952_v61 = vshrl.u32 %v1869_v1, 16  ;;  %v1944_v3 = vrot.slane %v1942_v54, 5  ;;  %v855_v40 = vld [vmem:[#allocation2 + $0x30] sm:$0xf] }
  0x2f   : > { %v1922_v63 = vrot.slane %v1921_v51, 4  ;;  %v3288_v2 = vsel %vm5813_vm11, %v3286_v53, %v3287_v46  ;;  %v1958_v6 = vshll.u32 %v1899_v5, 16  ;;  %v1932_v10 = vrot.slane %v1931_v57, 4  ;;  %v859_v46 = vld [vmem:[#allocation2 + $0x38] sm:$0x1] }
  0x30   : > { %v5111_v11 = vcombine.low %v3285_v52, %v3288_v2  ;;  %v1950_v12 = vrot.slane %v1948_v60, 5  ;;  %v1954_v13 = vrot.slane %v1952_v61, 4  ;;  %v1945_v16 = vor.u32 %v1944_v3, %v1941_v58  ;;  %v5901_v49 = vld [vmem:[#allocation2 + $0x34] sm:$0xf]  ;;  %v1384_v50 = vld [vmem:[#allocation2 + $0x24] sm:$0xe] }
  0x31   : > { %v1927_v15 = vsel %vm5877_vm14, %v1922_v63, %v1926_v25  ;;  %v1960_v1 = vrot.slane %v1958_v6, 5  ;;  %v5000_v17 = vrot.slane %v2300_v55, 9  ;;  %v1937_v18 = vsel %vm5877_vm14, %v1932_v10, %v1936_v29  ;;  %v1870_v55 = vld [vmem:[#allocation2 + $0x24] sm:$0xf]  ;;  %v5908_v63 = vld [vmem:[#allocation2 + $0x34] sm:$0xf] }
  0x32   : > { %3581 = vrot.lane.b32.xlu1 %v5111_v11, %s5675_s24  ;;  %v1955_v19 = vor.u32 %v1954_v13, %v1950_v12  ;;  %v2378_v5 = vrot.slane %v5881_v62, 5  ;;  %v2381_v20 = vrot.slane %v5885_v9, 5  ;;  %v5030_v21 = vcombine.low %v1927_v15, %v1937_v18 }
  0x33   : > { %v1946_v22 = vrot.slane %v1945_v16, 4  ;;  %v2852_v23 = vshrl.u32 %v2781_v14, 16  ;;  %v2855_v24 = vshll.u32 %v2781_v14, 16  ;;  %v2861_v37 = vshll.u32 %v5863_v30, 16 }
  0x34   : > { %v1956_v27 = vrot.slane %v1955_v19, 4  ;;  %v2379_v25 = vsel %vm5813_vm11, %v5000_v17, %v2378_v5  ;;  %v2380_v34 = vrot.slane %v2378_v5, 4  ;;  %2586 = vrot.lane.b32.xlu0 %v5030_v21, %s5676_s25  ;;  %v2865_v45 = vshrl.u32 %v5863_v30, 16 }
  0x35   : > { %v1951_v29 = vsel %vm5877_vm14, %v1946_v22, %v1950_v12  ;;  %v2854_v43 = vrot.slane %v2852_v23, 4  ;;  %v2857_v44 = vrot.slane %v2855_v24, 5  ;;  %v2863_v53 = vrot.slane %v2861_v37, 5  ;;  %v399_v24 = vld [vmem:[%s5744_s23 + $0x90] sm:$0xff] }
  0x36   : > { %v1961_v51 = vsel %vm5877_vm14, %v1956_v27, %v1960_v1  ;;  %v2382_v52 = vsel %vm5813_vm11, %v2380_v34, %v2381_v20  ;;  %v2871_v54 = vshll.u32 %v5868_v38, 16  ;;  %v2867_v61 = vrot.slane %v2865_v45, 4  ;;  %v400_v27 = vld [vmem:[%s5744_s23 + $0x98] sm:$0xff] }
  0x37   : > { %v5031_v57 = vcombine.low %v1951_v29, %v1961_v51  ;;  %v5048_v58 = vcombine.low %v2379_v25, %v2382_v52  ;;  %v2858_v60 = vor.u32 %v2857_v44, %v2854_v43  ;;  %v578_v2 = vrot.slane %v5817_v31, 4 }
  0x38   : > { %v2873_v30 = vrot.slane %v2871_v54, 5  ;;  %v856_v3 = vsel %vm5772_vm10, %v5821_v33, %v855_v40  ;;  %v3291_v6 = vrot.slane %v5901_v49, 5  ;;  %v2868_v10 = vor.u32 %v2867_v61, %v2863_v53 }
  0x39   : > { %2588 = vrot.lane.b32.xlu0 %v5031_v57, %s5676_s25  ;;  %2670 = vrot.lane.b32.xlu1 %v5048_v58, %s5675_s24  ;;  %v2859_v38 = vrot.slane %v2858_v60, 4  ;;  %857 = vst [vmem:[#allocation2 + $0x30] sm:$0xf] %v856_v3  ;;  %v1963_v11 = vshrl.u32 %v1870_v55, 16  ;;  %v1966_v12 = vshll.u32 %v1870_v55, 16  ;;  %v860_v13 = vsel %vm5720_vm2, %v578_v2, %v859_v46 }
  0x3a   : > { %v3293_v14 = vrot.slane %v3291_v6, 4  ;;  %v1972_v31 = vshll.u32 %v5881_v62, 16  ;;  %v1976_v33 = vshrl.u32 %v5881_v62, 16  ;;  %v2869_v16 = vrot.slane %v2868_v10, 4  ;;  %861 = vst [vmem:[#allocation2 + $0x38] sm:$0x1] %v860_v13 }
  0x3b   : > { %v2864_v15 = vsel %vm5877_vm14, %v2859_v38, %v2863_v53  ;;  %v1965_v1 = vrot.slane %v1963_v11, 4  ;;  %v1968_v17 = vrot.slane %v1966_v12, 5  ;;  %v1982_v5 = vshll.u32 %v5885_v9, 16 }
  0x3c   : > { %v1974_v18 = vrot.slane %v1972_v31, 5  ;;  %v1978_v19 = vrot.slane %v1976_v33, 4  ;;  %v2385_v20 = vrot.slane %v5908_v63, 5  ;;  %v2874_v21 = vsel %vm5877_vm14, %v2869_v16, %v2873_v30 }
  0x3d   : > { %v1969_v22 = vor.u32 %v1968_v17, %v1965_v1  ;;  %v2885_v23 = vshll.u32 %v5901_v49, 16  ;;  %v2889_v62 = vshrl.u32 %v5901_v49, 16  ;;  %v5095_v25 = vcombine.low %v2864_v15, %v2874_v21  ;;  %v862_v1 = vld [vmem:[#allocation2 + $0x3c] sm:$0xf] }
  0x3e   : > { %v1979_v34 = vor.u32 %v1978_v19, %v1974_v18  ;;  %v1984_v37 = vrot.slane %v1982_v5, 5  ;;  %v2387_v40 = vrot.slane %v2385_v20, 4  ;;  %v582_v9 = vrot.slane %v580_v35, 7 }
  0x3f   : > { %v1970_v29 = vrot.slane %v1969_v22, 4  ;;  %v2887_v43 = vrot.slane %v2885_v23, 5  ;;  %v2891_v44 = vrot.slane %v2889_v62, 4  ;;  %3501 = vrot.lane.b32.xlu0 %v5095_v25, %s5676_s25  ;;  %v588_v52 = vshrl.u32 %v5819_v32, 16  ;;  %v866_v22 = vld [vmem:[#allocation2 + $0x44] sm:$0x1] }
  0x40   : > { %v3213_v45 = vld [vmem:[#allocation2 + $0x30] sm:$0xe]  ;;  %v1980_v46 = vrot.slane %v1979_v34, 4  ;;  %v5935_v49 = vpack.c.bf16 %v399_v24, %v399_v24  ;;  %v5937_v53 = vpack.c.bf16 %v400_v27, %v400_v27  ;;  %v585_v38 = vor.u32 %v583_v36, %v582_v9 }
  0x41   : > { %v2301_v51 = vld [vmem:[#allocation2 + $0x30] sm:$0xe]  ;;  %v5064_v54 = vrot.slane %v3213_v45, 9  ;;  %v1975_v55 = vsel %vm5877_vm14, %v1970_v29, %v1974_v18  ;;  %v2892_v60 = vor.u32 %v2891_v44, %v2887_v43  ;;  %v2813_v61 = vld [vmem:[#allocation2 + $0x38] sm:$0x1]  ;;  %v586_v36 = vrot.slane %v582_v9, 4 }
  0x42   : > { %v5001_v57 = vrot.slane %v2301_v51, 9  ;;  %v2783_v58 = vld [vmem:[#allocation2 + $0x30] sm:$0xf]  ;;  %v1985_v35 = vsel %vm5877_vm14, %v1980_v46, %v1984_v37  ;;  %v1901_v30 = vld [vmem:[#allocation2 + $0x38] sm:$0x1]  ;;  %v3294_v11 = vrot.slane %v2813_v61, 5 }
  0x43   : > { %v2876_v2 = vshrl.u32 %v2783_v58, 16  ;;  %v2879_v3 = vshll.u32 %v2783_v58, 16  ;;  %v3292_v10 = vsel %vm5813_vm11, %v5064_v54, %v3291_v6  ;;  %v5032_v12 = vcombine.low %v1975_v55, %v1985_v35  ;;  %v1872_v19 = vld [vmem:[#allocation2 + $0x30] sm:$0xf]  ;;  %v2779_v9 = vld [vmem:[#allocation2 + $0x18] sm:$0xf] }
  0x44   : > { %v2386_v13 = vsel %vm5813_vm11, %v5001_v57, %v2385_v20  ;;  %v2388_v31 = vrot.slane %v1901_v30, 5  ;;  %v2893_v16 = vrot.slane %v2892_v60, 4  ;;  %v3295_v17 = vsel %vm5813_vm11, %v3293_v14, %v3294_v11  ;;  %v393_v35 = vld [vmem:[%s5744_s23 + $0x60] sm:$0xff] }
  0x45   : > { %v2878_v33 = vrot.slane %v2876_v2, 4  ;;  %v2881_v15 = vrot.slane %v2879_v3, 5  ;;  %2590 = vrot.lane.b32.xlu0 %v5032_v12, %s5676_s25  ;;  %v2895_v26 = vshll.u32 %v2813_v61, 16  ;;  %v590_v18 = vrot.slane %v588_v52, 7  ;;  %v394_v2 = vld [vmem:[%s5744_s23 + $0x68] sm:$0xff] }
  0x46   : > { %v5112_v6 = vcombine.low %v3292_v10, %v3295_v17  ;;  %v2389_v5 = vsel %vm5813_vm11, %v2387_v40, %v2388_v31  ;;  %v591_v20 = vshll.u32 %v5819_v32, 16  ;;  %v863_v14 = vsel %vm5772_vm10, %v585_v38, %v862_v1 }
  0x47   : > { %v2882_v21 = vor.u32 %v2881_v15, %v2878_v33  ;;  %v5049_v23 = vcombine.low %v2386_v13, %v2389_v5  ;;  %v2897_v62 = vrot.slane %v2895_v26, 5  ;;  %v595_v24 = vrot.slane %v590_v18, 4  ;;  %864 = vst [vmem:[#allocation2 + $0x3c] sm:$0xf] %v863_v14 }
  0x48   : > { %3583 = vrot.lane.b32.xlu1 %v5112_v6, %s5675_s24  ;;  %v593_v25 = vor.u32 %v591_v20, %v590_v18  ;;  %v1987_v34 = vshrl.u32 %v1872_v19, 16  ;;  %v1990_v37 = vshll.u32 %v1872_v19, 16  ;;  %v1996_v29 = vshll.u32 %v5908_v63, 16 }
  0x49   : > { %v2883_v27 = vrot.slane %v2882_v21, 4  ;;  %v2898_v40 = vsel %vm5877_vm14, %v2893_v16, %v2897_v62  ;;  %v867_v32 = vsel %vm5720_vm2, %v595_v24, %v866_v22  ;;  %v2000_v44 = vshrl.u32 %v5908_v63, 16 }
  0x4a   : > { %v594_v46 = vsel %vm5762_vm9, %v586_v36, %v593_v25  ;;  %868 = vst [vmem:[#allocation2 + $0x44] sm:$0x1] %v867_v32  ;;  %v1989_v51 = vrot.slane %v1987_v34, 4  ;;  %v1992_v52 = vrot.slane %v1990_v37, 5  ;;  %v1998_v55 = vrot.slane %v1996_v29, 5 }
  0x4b   : > { %v2888_v45 = vsel %vm5877_vm14, %v2883_v27, %v2887_v43  ;;  %865 = vst.msk [vmem:[#allocation2 + $0x40] sm:$0xf] %vm259_vm5, %v594_v46  ;;  %v2002_v57 = vrot.slane %v2000_v44, 4  ;;  %v2006_v58 = vshll.u32 %v1901_v30, 16  ;;  %v2828_v60 = vshrl.u32 %v2779_v9, 16 }
  0x4c   : > { %v5096_v54 = vcombine.low %v2888_v45, %v2898_v40  ;;  %2672 = vrot.lane.b32.xlu1 %v5049_v23, %s5675_s24  ;;  %v1993_v63 = vor.u32 %v1992_v52, %v1989_v51  ;;  %v2831_v61 = vshll.u32 %v2779_v9, 16  ;;  %v2837_v43 = vshll.u32 %v5828_v41, 16 }
  0x4d   : > { %v2003_v3 = vor.u32 %v2002_v57, %v1998_v55  ;;  %v2008_v38 = vrot.slane %v2006_v58, 5  ;;  %v2841_v10 = vshrl.u32 %v5828_v41, 16  ;;  %v2849_v11 = vrot.slane %v2847_v48, 5 }
  0x4e   : > { %3503 = vrot.lane.b32.xlu0 %v5096_v54, %s5676_s25  ;;  %v1994_v12 = vrot.slane %v1993_v63, 4  ;;  %v2830_v30 = vrot.slane %v2828_v60, 4  ;;  %v2833_v13 = vrot.slane %v2831_v61, 5  ;;  %v2839_v31 = vrot.slane %v2837_v43, 5  ;;  %v3214_v33 = vld [vmem:[#allocation2 + $0x3c] sm:$0xe] }
  0x4f   : > { %v2004_v15 = vrot.slane %v2003_v3, 4  ;;  %v2843_v16 = vrot.slane %v2841_v10, 4  ;;  %v2785_v1 = vld [vmem:[#allocation2 + $0x3c] sm:$0xf]  ;;  %v5977_v17 = vpack.c.bf16 %v393_v35, %v393_v35  ;;  %v5979_v26 = vpack.c.bf16 %v394_v2, %v394_v2  ;;  %v298_v60 = vld [vmem:[#allocation2 + $0x6c] sm:$0x1] }
  0x50   : > { %v5065_v36 = vrot.slane %v3214_v33, 9  ;;  %v1999_v18 = vsel %vm5877_vm14, %v1994_v12, %v1998_v55  ;;  %v2834_v41 = vor.u32 %v2833_v13, %v2830_v30  ;;  %v2900_v19 = vshrl.u32 %v2785_v1, 16  ;;  %v1874_v42 = vld [vmem:[#allocation2 + $0x3c] sm:$0xf]  ;;  %v354_v3 = vld [vmem:[#allocation2 + $0x74] sm:$0x1] }
  0x51   : > { %v2814_v48 = vld [vmem:[#allocation2 + $0x44] sm:$0x1]  ;;  %v2009_v6 = vsel %vm5877_vm14, %v2004_v15, %v2008_v38  ;;  %v2844_v5 = vor.u32 %v2843_v16, %v2839_v31  ;;  %v2903_v21 = vshll.u32 %v2785_v1, 16  ;;  %v2011_v20 = vshrl.u32 %v1874_v42, 16  ;;  %v2302_v15 = vld [vmem:[#allocation2 + $0x3c] sm:$0xe] }
  0x52   : > { %v2786_v22 = vld [vmem:[#allocation2 + $0x40] sm:$0xf]  ;;  %v3301_v23 = vrot.slane %v2814_v48, 5  ;;  %v5033_v62 = vcombine.low %v1999_v18, %v2009_v6  ;;  %v2835_v24 = vrot.slane %v2834_v41, 4  ;;  %v2902_v14 = vrot.slane %v2900_v19, 4 }
  0x53   : > { %v3298_v27 = vrot.slane %v2786_v22, 5  ;;  %v2845_v25 = vrot.slane %v2844_v5, 4  ;;  %v2905_v34 = vrot.slane %v2903_v21, 5  ;;  %v2909_v37 = vshll.u32 %v2786_v22, 16  ;;  %v1875_v44 = vld [vmem:[#allocation2 + $0x40] sm:$0xf] }
  0x54   : > { %2592 = vrot.lane.b32.xlu0 %v5033_v62, %s5676_s25  ;;  %v2840_v40 = vsel %vm5877_vm14, %v2835_v24, %v2839_v31  ;;  %v2913_v32 = vshrl.u32 %v2786_v22, 16  ;;  %v2919_v29 = vshll.u32 %v2814_v48, 16  ;;  %v2013_v9 = vrot.slane %v2011_v20, 4  ;;  %v5992_v54 = vld [vmem:[#allocation2 + $0x44] sm:$0x1] }
  0x55   : > { %v3299_v45 = vsel %vm5813_vm11, %v5065_v36, %v3298_v27  ;;  %v3300_v46 = vrot.slane %v3298_v27, 4  ;;  %v2850_v51 = vsel %vm5877_vm14, %v2845_v25, %v2849_v11  ;;  %v2906_v52 = vor.u32 %v2905_v34, %v2902_v14  ;;  %v289_v6 = vld [vmem:[#allocation2 + $0x48] sm:$0x1] }
  0x56   : > { %v5094_v55 = vcombine.low %v2840_v40, %v2850_v51  ;;  %v2911_v57 = vrot.slane %v2909_v37, 5  ;;  %v2915_v58 = vrot.slane %v2913_v32, 4  ;;  %v2921_v63 = vrot.slane %v2919_v29, 5  ;;  %v345_v37 = vld [vmem:[#allocation2 + $0x50] sm:$0x1] }
  0x57   : > { %v3302_v61 = vsel %vm5813_vm11, %v3300_v46, %v3301_v23  ;;  %v2907_v43 = vrot.slane %v2906_v52, 4  ;;  %v2014_v35 = vshll.u32 %v1874_v42, 16  ;;  %v2020_v2 = vshll.u32 %v1875_v44, 16  ;;  %v301_v51 = vld [vmem:[#allocation2 + $0x78] sm:$0x1] }
  0x58   : > { %v5113_v38 = vcombine.low %v3299_v45, %v3302_v61  ;;  %v2916_v10 = vor.u32 %v2915_v58, %v2911_v57  ;;  %v2024_v12 = vshrl.u32 %v1875_v44, 16  ;;  %v2030_v11 = vshll.u32 %v5992_v54, 16 }
  0x59   : > { %v2912_v30 = vsel %vm5877_vm14, %v2907_v43, %v2911_v57  ;;  %v2016_v13 = vrot.slane %v2014_v35, 5  ;;  %v2022_v31 = vrot.slane %v2020_v2, 5  ;;  %v299_v33 = vsel %vm5720_vm2, 0, %v298_v60 }
  0x5a   : > { %3585 = vrot.lane.b32.xlu1 %v5113_v38, %s5675_s24  ;;  %v2917_v16 = vrot.slane %v2916_v10, 4  ;;  %v2026_v1 = vrot.slane %v2024_v12, 4  ;;  %v2032_v36 = vrot.slane %v2030_v11, 5  ;;  %300 = vst [vmem:[#allocation2 + $0x6c] sm:$0x1] %v299_v33  ;;  %v355_v18 = vsel %vm5730_vm4, 0, %v354_v3 }
  0x5b   : > { %v2017_v41 = vor.u32 %v2016_v13, %v2013_v9  ;;  %356 = vst [vmem:[#allocation2 + $0x74] sm:$0x1] %v355_v18  ;;  %v648_v19 = vshrl.u32 %v5837_v47, 16  ;;  %v651_v42 = vshll.u32 %v5837_v47, 16  ;;  %v656_v48 = vshrl.u32 %v5845_v59, 16 }
  0x5c   : > { %v2922_v5 = vsel %vm5877_vm14, %v2917_v16, %v2921_v63  ;;  %v2027_v21 = vor.u32 %v2026_v1, %v2022_v31  ;;  %v659_v20 = vshll.u32 %v5845_v59, 16  ;;  %v5002_v22 = vrot.slane %v2302_v15, 9  ;;  %v357_v63 = vld [vmem:[#allocation2 + $0x80] sm:$0x1]  ;;  %v292_v11 = vld [vmem:[#allocation2 + $0x54] sm:$0x1] }
  0x5d   : > { %v5097_v23 = vcombine.low %v2912_v30, %v2922_v5  ;;  %v2018_v62 = vrot.slane %v2017_v41, 4  ;;  %v650_v24 = vrot.slane %v648_v19, 7  ;;  %v658_v14 = vrot.slane %v656_v48, 7  ;;  %v348_v33 = vld [vmem:[#allocation2 + $0x5c] sm:$0x1]  ;;  %v401_v48 = vld [vmem:[%s5744_s23 + $0xa0] sm:$0xff] }
  0x5e   : > { %3499 = vrot.lane.b32.xlu1 %v5094_v55, %s5676_s25  ;;  %v2028_v27 = vrot.slane %v2027_v21, 4  ;;  %v2392_v25 = vrot.slane %v1875_v44, 5  ;;  %v2395_v47 = vrot.slane %v5992_v54, 5  ;;  %v290_v34 = vsel %vm5720_vm2, 0, %v289_v6 }
  0x5f   : > { %3505 = vrot.lane.b32.xlu0 %v5097_v23, %s5676_s25  ;;  %v2023_v59 = vsel %vm5877_vm14, %v2018_v62, %v2022_v31  ;;  %v653_v40 = vor.u32 %v651_v42, %v650_v24  ;;  %v654_v32 = vrot.slane %v650_v24, 4  ;;  %v661_v29 = vor.u32 %v659_v20, %v658_v14  ;;  %291 = vst [vmem:[#allocation2 + $0x48] sm:$0x1] %v290_v34  ;;  %v402_v20 = vld [vmem:[%s5744_s23 + $0xa8] sm:$0xff] }
  0x60   : > { %v2033_v9 = vsel %vm5877_vm14, %v2028_v27, %v2032_v36  ;;  %v663_v45 = vrot.slane %v658_v14, 4  ;;  %v2393_v44 = vsel %vm5813_vm11, %v5002_v22, %v2392_v25  ;;  %v2394_v46 = vrot.slane %v2392_v25, 4 }
  0x61   : > { %v5034_v52 = vcombine.low %v2023_v59, %v2033_v9  ;;  %v662_v54 = vsel %vm5762_vm9, %v654_v32, %v661_v29  ;;  %v890_v55 = vld [vmem:[#allocation2 + $0x6c] sm:$0xf]  ;;  %v346_v57 = vsel %vm5730_vm4, 0, %v345_v37  ;;  %v597_v58 = vshrl.u32 %v5850_v7, 16 }
  0x62   : > { %v891_v60 = vsel %vm5772_vm10, %v653_v40, %v890_v55  ;;  %893 = vst.msk [vmem:[#allocation2 + $0x70] sm:$0xf] %vm259_vm5, %v662_v54  ;;  %v894_v61 = vld [vmem:[#allocation2 + $0x74] sm:$0x1]  ;;  %v2396_v43 = vsel %vm5813_vm11, %v2394_v46, %v2395_v47  ;;  %347 = vst [vmem:[#allocation2 + $0x50] sm:$0x1] %v346_v57  ;;  %v6059_v34 = vpack.c.bf16 %v401_v48, %v401_v48 }
  0x63   : > { %v600_v35 = vshll.u32 %v5850_v7, 16  ;;  %v605_v2 = vshrl.u32 %v5852_v8, 16  ;;  %2594 = vrot.lane.b32.xlu0 %v5034_v52, %s5676_s25  ;;  %892 = vst [vmem:[#allocation2 + $0x6c] sm:$0xf] %v891_v60  ;;  %v895_v3 = vsel %vm5720_vm2, %v663_v45, %v894_v61  ;;  %v5050_v38 = vcombine.low %v2393_v44, %v2396_v43  ;;  %v395_v45 = vld [vmem:[%s5744_s23 + $0x70] sm:$0xff] }
  0x64   : > { %v599_v10 = vrot.slane %v597_v58, 7  ;;  %v608_v12 = vshll.u32 %v5852_v8, 16  ;;  %896 = vst [vmem:[#allocation2 + $0x74] sm:$0x1] %v895_v3  ;;  %v302_v13 = vsel %vm5720_vm2, 0, %v301_v51  ;;  %v358_v7 = vsel %vm5730_vm4, 0, %v357_v63 }
  0x65   : > { %v607_v30 = vrot.slane %v605_v2, 7  ;;  %v665_v31 = vshrl.u32 %v5935_v49, 16  ;;  %303 = vst [vmem:[#allocation2 + $0x78] sm:$0x1] %v302_v13  ;;  %359 = vst [vmem:[#allocation2 + $0x80] sm:$0x1] %v358_v7  ;;  %v6063_v9 = vpack.c.bf16 %v402_v20, %v402_v20 }
  0x66   : > { %v602_v15 = vor.u32 %v600_v35, %v599_v10  ;;  %v603_v16 = vrot.slane %v599_v10, 4  ;;  %v668_v8 = vshll.u32 %v5935_v49, 16  ;;  %v673_v1 = vshrl.u32 %v5937_v53, 16  ;;  %v869_v41 = vld [vmem:[#allocation2 + $0x48] sm:$0xf] }
  0x67   : > { %v610_v36 = vor.u32 %v608_v12, %v607_v30  ;;  %v612_v18 = vrot.slane %v607_v30, 4  ;;  %v667_v19 = vrot.slane %v665_v31, 7  ;;  %v676_v42 = vshll.u32 %v5937_v53, 16  ;;  %2674 = vrot.lane.b32.xlu0 %v5050_v38, %s5675_s24 }
  0x68   : > { %v870_v6 = vsel %vm5772_vm10, %v602_v15, %v869_v41  ;;  %v675_v5 = vrot.slane %v673_v1, 7  ;;  %v293_v21 = vsel %vm5720_vm2, 0, %v292_v11  ;;  %v349_v49 = vsel %vm5730_vm4, 0, %v348_v33 }
  0x69   : > { %v611_v22 = vsel %vm5762_vm9, %v603_v16, %v610_v36  ;;  %871 = vst [vmem:[#allocation2 + $0x48] sm:$0xf] %v870_v6  ;;  %v670_v23 = vor.u32 %v668_v8, %v667_v19  ;;  %v671_v53 = vrot.slane %v667_v19, 4  ;;  %294 = vst [vmem:[#allocation2 + $0x54] sm:$0x1] %v293_v21  ;;  %v614_v62 = vshrl.u32 %v5977_v17, 16 }
  0x6a   : > { %350 = vst [vmem:[#allocation2 + $0x5c] sm:$0x1] %v349_v49  ;;  %v1883_v24 = vld [vmem:[#allocation2 + $0x70] sm:$0xf]  ;;  %872 = vst.msk [vmem:[#allocation2 + $0x4c] sm:$0xf] %vm259_vm5, %v611_v22  ;;  %v678_v27 = vor.u32 %v676_v42, %v675_v5  ;;  %v6079_v15 = vpack.c.bf16 %v395_v45, %v395_v45 }
  0x6b   : > { %v873_v14 = vld [vmem:[#allocation2 + $0x50] sm:$0x1]  ;;  %v680_v25 = vrot.slane %v675_v5, 4  ;;  %v617_v47 = vshll.u32 %v5977_v17, 16  ;;  %v1882_v37 = vld [vmem:[#allocation2 + $0x6c] sm:$0xf] }
  0x6c   : > { %v2116_v59 = vshll.u32 %v1883_v24, 16  ;;  %v2120_v40 = vshrl.u32 %v1883_v24, 16  ;;  %v2306_v32 = vld [vmem:[#allocation2 + $0x6c] sm:$0xe]  ;;  %v874_v29 = vsel %vm5720_vm2, %v612_v18, %v873_v14  ;;  %v1906_v44 = vld [vmem:[#allocation2 + $0x74] sm:$0x1]  ;;  %v679_v12 = vsel %vm5762_vm9, %v671_v53, %v678_v27 }
  0x6d   : > { %v2107_v46 = vshrl.u32 %v1882_v37, 16  ;;  %v2110_v51 = vshll.u32 %v1882_v37, 16  ;;  %v5006_v52 = vrot.slane %v2306_v32, 9  ;;  %v2420_v54 = vrot.slane %v1883_v24, 5  ;;  %875 = vst [vmem:[#allocation2 + $0x50] sm:$0x1] %v874_v29 }
  0x6e   : > { %v2118_v55 = vrot.slane %v2116_v59, 5  ;;  %v2122_v57 = vrot.slane %v2120_v40, 4  ;;  %v2126_v58 = vshll.u32 %v1906_v44, 16  ;;  %v2423_v63 = vrot.slane %v1906_v44, 5  ;;  %v897_v60 = vld [vmem:[#allocation2 + $0x78] sm:$0xf] }
  0x6f   : > { %v2109_v61 = vrot.slane %v2107_v46, 4  ;;  %v2112_v43 = vrot.slane %v2110_v51, 5  ;;  %v6068_v35 = vsel %vm5813_vm11, %v5006_v52, %v2420_v54  ;;  %v2422_v2 = vrot.slane %v2420_v54, 4  ;;  %v901_v3 = vld [vmem:[#allocation2 + $0x80] sm:$0x1]  ;;  %v396_v27 = vld [vmem:[%s5744_s23 + $0x78] sm:$0xff] }
  0x70   : > { %v2123_v38 = vor.u32 %v2122_v57, %v2118_v55  ;;  %v2128_v10 = vrot.slane %v2126_v58, 5  ;;  %v898_v11 = vsel %vm5772_vm10, %v670_v23, %v897_v60  ;;  %v2787_v7 = vld [vmem:[#allocation2 + $0x48] sm:$0xf]  ;;  %900 = vst.msk [vmem:[#allocation2 + $0x7c] sm:$0xf] %vm259_vm5, %v679_v12  ;;  %v902_v31 = vsel %vm5720_vm2, %v680_v25, %v901_v3  ;;  %v403_v25 = vld [vmem:[%s5744_s23 + $0xb0] sm:$0xff] }
  0x71   : > { %v2113_v30 = vor.u32 %v2112_v43, %v2109_v61  ;;  %v2424_v13 = vsel %vm5813_vm11, %v2422_v2, %v2423_v63  ;;  %899 = vst [vmem:[#allocation2 + $0x78] sm:$0xf] %v898_v11  ;;  %v3215_v33 = vld [vmem:[#allocation2 + $0x48] sm:$0xe]  ;;  %v2788_v1 = vld [vmem:[#allocation2 + $0x4c] sm:$0xf]  ;;  %v6091_v57 = vpack.c.bf16 %v396_v27, %v396_v27  ;;  %v6093_v58 = vpack.c.bf16 %v403_v25, %v403_v25 }
  0x72   : > { %v2124_v16 = vrot.slane %v2123_v38, 4  ;;  %v5054_v8 = vcombine.low %v6068_v35, %v2424_v13  ;;  %v2924_v36 = vshrl.u32 %v2787_v7, 16  ;;  %v2927_v18 = vshll.u32 %v2787_v7, 16  ;;  %903 = vst [vmem:[#allocation2 + $0x80] sm:$0x1] %v902_v31 }
  0x73   : > { %v2114_v41 = vrot.slane %v2113_v30, 4  ;;  %v2933_v19 = vshll.u32 %v2788_v1, 16  ;;  %v2937_v42 = vshrl.u32 %v2788_v1, 16  ;;  %v5066_v48 = vrot.slane %v3215_v33, 9  ;;  %v1876_v6 = vld [vmem:[#allocation2 + $0x48] sm:$0xf] }
  0x74   : > { %v2129_v5 = vsel %vm5877_vm14, %v2124_v16, %v2128_v10  ;;  %v2815_v21 = vld [vmem:[#allocation2 + $0x50] sm:$0x1]  ;;  %v2926_v49 = vrot.slane %v2924_v36, 4  ;;  %v2929_v20 = vrot.slane %v2927_v18, 5  ;;  %v3305_v22 = vrot.slane %v2788_v1, 5 }
  0x75   : > { %v2119_v23 = vsel %vm5877_vm14, %v2114_v41, %v2118_v55  ;;  %v2935_v53 = vrot.slane %v2933_v19, 5  ;;  %v2939_v24 = vrot.slane %v2937_v42, 4  ;;  %v2943_v14 = vshll.u32 %v2815_v21, 16  ;;  %v1877_v31 = vld [vmem:[#allocation2 + $0x4c] sm:$0xf] }
  0x76   : > { %v5038_v37 = vcombine.low %v2119_v23, %v2129_v5  ;;  %v2930_v59 = vor.u32 %v2929_v20, %v2926_v49  ;;  %v3306_v40 = vsel %vm5813_vm11, %v5066_v48, %v3305_v22  ;;  %v3307_v32 = vrot.slane %v3305_v22, 4  ;;  %v1903_v48 = vld [vmem:[#allocation2 + $0x50] sm:$0x1] }
  0x77   : > { %v2940_v29 = vor.u32 %v2939_v24, %v2935_v53  ;;  %v2945_v45 = vrot.slane %v2943_v14, 5  ;;  %v3308_v44 = vrot.slane %v2815_v21, 5  ;;  %v2035_v46 = vshrl.u32 %v1876_v6, 16  ;;  %v2796_v54 = vld [vmem:[#allocation2 + $0x7c] sm:$0xf] }
  0x78   : > { %2602 = vrot.lane.b32.xlu1 %v5038_v37, %s5676_s25  ;;  %v2931_v51 = vrot.slane %v2930_v59, 4  ;;  %v2795_v52 = vld [vmem:[#allocation2 + $0x78] sm:$0xf]  ;;  %v2038_v55 = vshll.u32 %v1876_v6, 16  ;;  %v3029_v35 = vshll.u32 %v2796_v54, 16  ;;  %v3033_v3 = vshrl.u32 %v2796_v54, 16 }
  0x79   : > { %v2941_v63 = vrot.slane %v2940_v29, 4  ;;  %v2819_v60 = vld [vmem:[#allocation2 + $0x80] sm:$0x1]  ;;  %v3020_v61 = vshrl.u32 %v2795_v52, 16  ;;  %v3023_v43 = vshll.u32 %v2795_v52, 16  ;;  %v3309_v10 = vsel %vm5813_vm11, %v3307_v32, %v3308_v44 }
  0x7a   : > { %v2936_v2 = vsel %vm5877_vm14, %v2931_v51, %v2935_v53  ;;  %v3039_v38 = vshll.u32 %v2819_v60, 16  ;;  %v3219_v12 = vld [vmem:[#allocation2 + $0x78] sm:$0xe]  ;;  %v3031_v7 = vrot.slane %v3029_v35, 5  ;;  %v3035_v16 = vrot.slane %v3033_v3, 4 }
  0x7b   : > { %v2946_v11 = vsel %vm5877_vm14, %v2941_v63, %v2945_v45  ;;  %v3022_v30 = vrot.slane %v3020_v61, 4  ;;  %v3025_v13 = vrot.slane %v3023_v43, 5  ;;  %v5114_v36 = vcombine.low %v3306_v40, %v3309_v10  ;;  %v1884_v20 = vld [vmem:[#allocation2 + $0x78] sm:$0xf]  ;;  %v1885_v32 = vld [vmem:[#allocation2 + $0x7c] sm:$0xf] }
  0x7c   : > { %2682 = vrot.lane.b32.xlu1 %v5054_v8, %s5675_s24  ;;  %v5098_v33 = vcombine.low %v2936_v2, %v2946_v11  ;;  %v3041_v1 = vrot.slane %v3039_v38, 5  ;;  %v5070_v41 = vrot.slane %v3219_v12, 9  ;;  %v3333_v19 = vrot.slane %v2796_v54, 5  ;;  %v1907_v29 = vld [vmem:[#allocation2 + $0x80] sm:$0x1] }
  0x7d   : > { %v3026_v18 = vor.u32 %v3025_v13, %v3022_v30  ;;  %v3336_v42 = vrot.slane %v2819_v60, 5  ;;  %v3036_v6 = vor.u32 %v3035_v16, %v3031_v7  ;;  %v2037_v5 = vrot.slane %v2035_v46, 4  ;;  %v2303_v54 = vld [vmem:[#allocation2 + $0x48] sm:$0xe]  ;;  %v2307_v30 = vld [vmem:[#allocation2 + $0x78] sm:$0xe] }
  0x7e   : > { %3507 = vrot.lane.b32.xlu0 %v5098_v33, %s5676_s25  ;;  %v2040_v21 = vrot.slane %v2038_v55, 5  ;;  %v2044_v49 = vshll.u32 %v1877_v31, 16  ;;  %v3334_v8 = vsel %vm5813_vm11, %v5070_v41, %v3333_v19  ;;  %v3335_v23 = vrot.slane %v3333_v19, 4 }
  0x7f   : > { %v3027_v22 = vrot.slane %v3026_v18, 4  ;;  %v2048_v53 = vshrl.u32 %v1877_v31, 16  ;;  %v3037_v24 = vrot.slane %v3036_v6, 4  ;;  %v2054_v25 = vshll.u32 %v1903_v48, 16 }
  0x80   : > { %v2041_v14 = vor.u32 %v2040_v21, %v2037_v5  ;;  %v2046_v27 = vrot.slane %v2044_v49, 5  ;;  %v3337_v59 = vsel %vm5813_vm11, %v3335_v23, %v3336_v42  ;;  %v2131_v45 = vshrl.u32 %v1884_v20, 16 }
  0x81   : > { %v3032_v37 = vsel %vm5877_vm14, %v3027_v22, %v3031_v7  ;;  %v2050_v40 = vrot.slane %v2048_v53, 4  ;;  %v3042_v44 = vsel %vm5877_vm14, %v3037_v24, %v3041_v1  ;;  %v5118_v46 = vcombine.low %v3334_v8, %v3337_v59  ;;  %v876_v24 = vld [vmem:[#allocation2 + $0x54] sm:$0xf] }
  0x82   : > { %3587 = vrot.lane.b32.xlu0 %v5114_v36, %s5675_s24  ;;  %v2042_v51 = vrot.slane %v2041_v14, 4  ;;  %v2056_v52 = vrot.slane %v2054_v25, 5  ;;  %v5102_v55 = vcombine.low %v3032_v37, %v3042_v44  ;;  %v2133_v60 = vrot.slane %v2131_v45, 4  ;;  %v295_v45 = vld [vmem:[#allocation2 + $0x60] sm:$0x1] }
  0x83   : > { %v2051_v63 = vor.u32 %v2050_v40, %v2046_v27  ;;  %v2134_v61 = vshll.u32 %v1884_v20, 16  ;;  %v2140_v35 = vshll.u32 %v1885_v32, 16  ;;  %v2144_v2 = vshrl.u32 %v1885_v32, 16  ;;  %v304_v20 = vld [vmem:[#allocation2 + $0x84] sm:$0x1] }
  0x84   : > { %v2047_v43 = vsel %vm5877_vm14, %v2042_v51, %v2046_v27  ;;  %v2150_v3 = vshll.u32 %v1907_v29, 16  ;;  %3515 = vrot.lane.b32.xlu1 %v5102_v55, %s5676_s25  ;;  %v5003_v12 = vrot.slane %v2303_v54, 9  ;;  %v2399_v11 = vrot.slane %v1877_v31, 5  ;;  %v351_v51 = vld [vmem:[#allocation2 + $0x68] sm:$0x1] }
  0x85   : > { %v2052_v38 = vrot.slane %v2051_v63, 4  ;;  %v2136_v10 = vrot.slane %v2134_v61, 5  ;;  %v2142_v13 = vrot.slane %v2140_v35, 5  ;;  %v2146_v7 = vrot.slane %v2144_v2, 4 }
  0x86   : > { %v2152_v33 = vrot.slane %v2150_v3, 5  ;;  %v2402_v16 = vrot.slane %v1903_v48, 5  ;;  %v2400_v18 = vsel %vm5813_vm11, %v5003_v12, %v2399_v11  ;;  %v2401_v41 = vrot.slane %v2399_v11, 4 }
  0x87   : > { %v2057_v1 = vsel %vm5877_vm14, %v2052_v38, %v2056_v52  ;;  %v2137_v36 = vor.u32 %v2136_v10, %v2133_v60  ;;  %v2147_v42 = vor.u32 %v2146_v7, %v2142_v13  ;;  %v5007_v6 = vrot.slane %v2307_v30, 9  ;;  %v880_v52 = vld [vmem:[#allocation2 + $0x5c] sm:$0x1]  ;;  %v307_v10 = vld [vmem:[#allocation2 + $0x90] sm:$0x1] }
  0x88   : > { %v5035_v19 = vcombine.low %v2047_v43, %v2057_v1  ;;  %v2427_v5 = vrot.slane %v1885_v32, 5  ;;  %3595 = vrot.lane.b32.xlu1 %v5118_v46, %s5675_s24  ;;  %v2403_v21 = vsel %vm5813_vm11, %v2401_v41, %v2402_v16  ;;  %v2430_v49 = vrot.slane %v1907_v29, 5 }
  0x89   : > { %v2138_v31 = vrot.slane %v2137_v36, 4  ;;  %v616_v48 = vrot.slane %v614_v62, 7  ;;  %v2148_v22 = vrot.slane %v2147_v42, 4  ;;  %v5051_v8 = vcombine.low %v2400_v18, %v2403_v21  ;;  %v360_v62 = vld [vmem:[#allocation2 + $0x8c] sm:$0x1] }
  0x8a   : > { %2596 = vrot.lane.b32.xlu0 %v5035_v19, %s5676_s25  ;;  %v2428_v23 = vsel %vm5813_vm11, %v5007_v6, %v2427_v5  ;;  %v2429_v53 = vrot.slane %v2427_v5, 4  ;;  %v622_v37 = vshrl.u32 %v5979_v26, 16  ;;  %v625_v32 = vshll.u32 %v5979_v26, 16  ;;  %v404_v5 = vld [vmem:[%s5744_s23 + $0xb8] sm:$0xff] }
  0x8b   : > { %v2143_v14 = vsel %vm5877_vm14, %v2138_v31, %v2142_v13  ;;  %v619_v27 = vor.u32 %v617_v47, %v616_v48  ;;  %v620_v25 = vrot.slane %v616_v48, 4  ;;  %v2153_v59 = vsel %vm5877_vm14, %v2148_v22, %v2152_v33  ;;  %v363_v13 = vld [vmem:[#allocation2 + $0x98] sm:$0x1] }
  0x8c   : > { %v2431_v40 = vsel %vm5813_vm11, %v2429_v53, %v2430_v49  ;;  %v305_v29 = vsel %vm5720_vm2, 0, %v304_v20  ;;  %v5039_v44 = vcombine.low %v2143_v14, %v2153_v59  ;;  %v624_v17 = vrot.slane %v622_v37, 7 }
  0x8d   : > { %v5055_v46 = vcombine.low %v2428_v23, %v2431_v40  ;;  %v877_v47 = vsel %vm5772_vm10, %v619_v27, %v876_v24  ;;  %306 = vst [vmem:[#allocation2 + $0x84] sm:$0x1] %v305_v29  ;;  %v361_v54 = vsel %vm5730_vm4, 0, %v360_v62  ;;  %v682_v26 = vshrl.u32 %v6059_v34, 16 }
  0x8e   : > { %2676 = vrot.lane.b32.xlu0 %v5051_v8, %s5675_s24  ;;  %878 = vst [vmem:[#allocation2 + $0x54] sm:$0xf] %v877_v47  ;;  %v685_v55 = vshll.u32 %v6059_v34, 16  ;;  %v690_v63 = vshrl.u32 %v6063_v9, 16  ;;  %2604 = vrot.lane.b32.xlu1 %v5039_v44, %s5676_s25  ;;  %v627_v60 = vor.u32 %v625_v32, %v624_v17  ;;  %v629_v61 = vrot.slane %v624_v17, 4 }
  0x8f   : > { %362 = vst [vmem:[#allocation2 + $0x8c] sm:$0x1] %v361_v54  ;;  %v693_v43 = vshll.u32 %v6063_v9, 16  ;;  %v296_v35 = vsel %vm5720_vm2, 0, %v295_v45  ;;  %v684_v2 = vrot.slane %v682_v26, 7  ;;  %v352_v38 = vsel %vm5730_vm4, 0, %v351_v51 }
  0x90   : > { %v692_v3 = vrot.slane %v690_v63, 7  ;;  %297 = vst [vmem:[#allocation2 + $0x60] sm:$0x1] %v296_v35  ;;  %v631_v34 = vshrl.u32 %v6079_v15, 16  ;;  %v628_v12 = vsel %vm5762_vm9, %v620_v25, %v627_v60  ;;  %v881_v11 = vsel %vm5720_vm2, %v629_v61, %v880_v52  ;;  %353 = vst [vmem:[#allocation2 + $0x68] sm:$0x1] %v352_v38 }
  0x91   : > { %v634_v9 = vshll.u32 %v6079_v15, 16  ;;  %v639_v30 = vshrl.u32 %v6091_v57, 16  ;;  %879 = vst.msk [vmem:[#allocation2 + $0x58] sm:$0xf] %vm259_vm5, %v628_v12  ;;  %882 = vst [vmem:[#allocation2 + $0x5c] sm:$0x1] %v881_v11  ;;  %v687_v7 = vor.u32 %v685_v55, %v684_v2  ;;  %v6189_v54 = vpack.c.bf16 %v404_v5, %v404_v5 }
  0x92   : > { %v688_v33 = vrot.slane %v684_v2, 4  ;;  %v695_v16 = vor.u32 %v693_v43, %v692_v3  ;;  %v697_v1 = vrot.slane %v692_v3, 4  ;;  %2684 = vrot.lane.b32.xlu1 %v5055_v46, %s5675_s24  ;;  %v633_v36 = vrot.slane %v631_v34, 7 }
  0x93   : > { %v6162_v18 = vrot.slane %v639_v30, 7  ;;  %v642_v41 = vshll.u32 %v6091_v57, 16  ;;  %v308_v15 = vsel %vm5720_vm2, 0, %v307_v10  ;;  %v364_v6 = vsel %vm5730_vm4, 0, %v363_v13 }
  0x94   : > { %v696_v19 = vsel %vm5762_vm9, %v688_v33, %v695_v16  ;;  %v904_v42 = vld [vmem:[#allocation2 + $0x84] sm:$0xf]  ;;  %309 = vst [vmem:[#allocation2 + $0x90] sm:$0x1] %v308_v15  ;;  %v699_v31 = vshrl.u32 %v6093_v58, 16  ;;  %v636_v20 = vor.u32 %v634_v9, %v633_v36  ;;  %v637_v62 = vrot.slane %v633_v36, 4 }
  0x95   : > { %v2789_v21 = vld [vmem:[#allocation2 + $0x54] sm:$0xf]  ;;  %v905_v49 = vsel %vm5772_vm10, %v687_v7, %v904_v42  ;;  %907 = vst.msk [vmem:[#allocation2 + $0x88] sm:$0xf] %vm259_vm5, %v696_v19  ;;  %v644_v22 = vor.u32 %v642_v41, %v6162_v18  ;;  %365 = vst [vmem:[#allocation2 + $0x98] sm:$0x1] %v364_v6 }
  0x96   : > { %v3216_v57 = vld [vmem:[#allocation2 + $0x54] sm:$0xe]  ;;  %v2948_v8 = vshrl.u32 %v2789_v21, 16  ;;  %v2951_v23 = vshll.u32 %v2789_v21, 16  ;;  %906 = vst [vmem:[#allocation2 + $0x84] sm:$0xf] %v905_v49 }
  0x97   : > { %v1878_v48 = vld [vmem:[#allocation2 + $0x54] sm:$0xf]  ;;  %v908_v53 = vld [vmem:[#allocation2 + $0x8c] sm:$0x1]  ;;  %v5067_v24 = vrot.slane %v3216_v57, 9  ;;  %v646_v59 = vrot.slane %v6162_v18, 4  ;;  %v645_v51 = vsel %vm5762_vm9, %v637_v62, %v644_v22 }
  0x98   : > { %v2059_v14 = vshrl.u32 %v1878_v48, 16  ;;  %v909_v27 = vsel %vm5720_vm2, %v697_v1, %v908_v53  ;;  %v2062_v25 = vshll.u32 %v1878_v48, 16  ;;  %v6179_v37 = vld [vmem:[#allocation2 + $0x54] sm:$0xe]  ;;  %v2950_v40 = vrot.slane %v2948_v8, 4 }
  0x99   : > { %v2953_v32 = vrot.slane %v2951_v23, 5  ;;  %910 = vst [vmem:[#allocation2 + $0x8c] sm:$0x1] %v909_v27  ;;  %v5004_v45 = vrot.slane %v6179_v37, 9  ;;  %v883_v44 = vld [vmem:[#allocation2 + $0x60] sm:$0xf] }
  0x9a   : > { %v2061_v29 = vrot.slane %v2059_v14, 4  ;;  %v2790_v46 = vld [vmem:[#allocation2 + $0x58] sm:$0xf]  ;;  %v2816_v17 = vld [vmem:[#allocation2 + $0x5c] sm:$0x1]  ;;  %v884_v52 = vsel %vm5772_vm10, %v636_v20, %v883_v44  ;;  %v2064_v35 = vrot.slane %v2062_v25, 5 }
  0x9b   : > { %v6183_v47 = vld [vmem:[#allocation2 + $0x58] sm:$0xf]  ;;  %v2954_v26 = vor.u32 %v2953_v32, %v2950_v40  ;;  %v2957_v55 = vshll.u32 %v2790_v46, 16  ;;  %v2961_v63 = vshrl.u32 %v2790_v46, 16  ;;  %v2967_v60 = vshll.u32 %v2816_v17, 16 }
  0x9c   : > { %885 = vst [vmem:[#allocation2 + $0x60] sm:$0xf] %v884_v52  ;;  %886 = vst.msk [vmem:[#allocation2 + $0x64] sm:$0xf] %vm259_vm5, %v645_v51  ;;  %v3312_v61 = vrot.slane %v2790_v46, 5  ;;  %v3315_v43 = vrot.slane %v2816_v17, 5  ;;  %v2065_v25 = vor.u32 %v2064_v35, %v2061_v29 }
  0x9d   : > { %v2068_v2 = vshll.u32 %v6183_v47, 16  ;;  %v2955_v3 = vrot.slane %v2954_v26, 4  ;;  %v2959_v38 = vrot.slane %v2957_v55, 5  ;;  %v2963_v34 = vrot.slane %v2961_v63, 4  ;;  %v2798_v12 = vld [vmem:[#allocation2 + $0x88] sm:$0xf] }
  0x9e   : > { %v2969_v10 = vrot.slane %v2967_v60, 5  ;;  %v2797_v11 = vld [vmem:[#allocation2 + $0x84] sm:$0xf]  ;;  %v3053_v9 = vshll.u32 %v2798_v12, 16  ;;  %v3057_v30 = vshrl.u32 %v2798_v12, 16  ;;  %v3313_v13 = vsel %vm5813_vm11, %v5067_v24, %v3312_v61 }
  0x9f   : > { %v3314_v7 = vrot.slane %v3312_v61, 4  ;;  %v2960_v33 = vsel %vm5877_vm14, %v2955_v3, %v2959_v38  ;;  %v2964_v16 = vor.u32 %v2963_v34, %v2959_v38  ;;  %v3044_v1 = vshrl.u32 %v2797_v11, 16  ;;  %v3220_v41 = vld [vmem:[#allocation2 + $0x84] sm:$0xe]  ;;  %v1904_v27 = vld [vmem:[#allocation2 + $0x5c] sm:$0x1] }
  0xa0   : > { %v3047_v36 = vshll.u32 %v2797_v11, 16  ;;  %v2820_v15 = vld [vmem:[#allocation2 + $0x8c] sm:$0x1]  ;;  %v3055_v19 = vrot.slane %v3053_v9, 5  ;;  %v3059_v42 = vrot.slane %v3057_v30, 4  ;;  %v5071_v5 = vrot.slane %v3220_v41, 9 }
  0xa1   : > { %v3316_v6 = vsel %vm5813_vm11, %v3314_v7, %v3315_v43  ;;  %v2965_v21 = vrot.slane %v2964_v16, 4  ;;  %v3046_v49 = vrot.slane %v3044_v1, 4  ;;  %v3063_v48 = vshll.u32 %v2820_v15, 16  ;;  %v1886_v62 = vld [vmem:[#allocation2 + $0x84] sm:$0xf] }
  0xa2   : > { %v3049_v57 = vrot.slane %v3047_v36, 5  ;;  %v3060_v20 = vor.u32 %v3059_v42, %v3055_v19  ;;  %v5115_v22 = vcombine.low %v3313_v13, %v3316_v6  ;;  %v3340_v8 = vrot.slane %v2798_v12, 5  ;;  %v1887_v60 = vld [vmem:[#allocation2 + $0x88] sm:$0xf]  ;;  %v1908_v61 = vld [vmem:[#allocation2 + $0x8c] sm:$0x1] }
  0xa3   : > { %v3343_v23 = vrot.slane %v2820_v15, 5  ;;  %v2970_v53 = vsel %vm5877_vm14, %v2965_v21, %v2969_v10  ;;  %v3065_v14 = vrot.slane %v3063_v48, 5  ;;  %v2066_v51 = vrot.slane %v2065_v25, 4  ;;  %v2308_v34 = vld [vmem:[#allocation2 + $0x84] sm:$0xe] }
  0xa4   : > { %v3050_v24 = vor.u32 %v3049_v57, %v3046_v49  ;;  %v5099_v40 = vcombine.low %v2960_v33, %v2970_v53  ;;  %v3061_v32 = vrot.slane %v3060_v20, 4  ;;  %v3341_v44 = vsel %vm5813_vm11, %v5071_v5, %v3340_v8  ;;  %v887_v15 = vld [vmem:[#allocation2 + $0x68] sm:$0x1]  ;;  %v2791_v20 = vld [vmem:[#allocation2 + $0x60] sm:$0xf] }
  0xa5   : > { %v3342_v46 = vrot.slane %v3340_v8, 4  ;;  %v2070_v52 = vrot.slane %v2068_v2, 5  ;;  %v2072_v26 = vshrl.u32 %v6183_v47, 16  ;;  %v2078_v63 = vshll.u32 %v1904_v27, 16  ;;  %v2792_v53 = vld [vmem:[#allocation2 + $0x64] sm:$0xf] }
  0xa6   : > { %v3051_v17 = vrot.slane %v3050_v24, 4  ;;  %3509 = vrot.lane.b32.xlu0 %v5099_v40, %s5676_s25  ;;  %v3066_v55 = vsel %vm5877_vm14, %v3061_v32, %v3065_v14  ;;  %v2155_v43 = vshrl.u32 %v1886_v62, 16  ;;  %v2158_v9 = vshll.u32 %v1886_v62, 16 }
  0xa7   : > { %v3344_v29 = vsel %vm5813_vm11, %v3342_v46, %v3343_v23  ;;  %v2071_v2 = vsel %vm5877_vm14, %v2066_v51, %v2070_v52  ;;  %v2074_v38 = vrot.slane %v2072_v26, 4  ;;  %v2080_v12 = vrot.slane %v2078_v63, 5  ;;  %v3217_v26 = vld [vmem:[#allocation2 + $0x60] sm:$0xe] }
  0xa8   : > { %v3056_v35 = vsel %vm5877_vm14, %v3051_v17, %v3055_v19  ;;  %v5119_v3 = vcombine.low %v3341_v44, %v3344_v29  ;;  %v2157_v11 = vrot.slane %v2155_v43, 4  ;;  %v2164_v13 = vshll.u32 %v1887_v60, 16 }
  0xa9   : > { %v5103_v10 = vcombine.low %v3056_v35, %v3066_v55  ;;  %v2075_v30 = vor.u32 %v2074_v38, %v2070_v52  ;;  %v2168_v7 = vshrl.u32 %v1887_v60, 16  ;;  %v2174_v33 = vshll.u32 %v1908_v61, 16 }
  0xaa   : > { %3589 = vrot.lane.b32.xlu0 %v5115_v22, %s5675_s24  ;;  %v2160_v16 = vrot.slane %v2158_v9, 5  ;;  %v2406_v1 = vrot.slane %v6183_v47, 5  ;;  %v2409_v36 = vrot.slane %v1904_v27, 5  ;;  %v5008_v41 = vrot.slane %v2308_v34, 9 }
  0xab   : > { %3517 = vrot.lane.b32.xlu1 %v5103_v10, %s5676_s25  ;;  %v2076_v19 = vrot.slane %v2075_v30, 4  ;;  %v2166_v42 = vrot.slane %v2164_v13, 5  ;;  %v2170_v6 = vrot.slane %v2168_v7, 4  ;;  %v2176_v5 = vrot.slane %v2174_v33, 5  ;;  %v915_v7 = vld [vmem:[#allocation2 + $0x98] sm:$0x1] }
  0xac   : > { %v2161_v21 = vor.u32 %v2160_v16, %v2157_v11  ;;  %v2407_v49 = vsel %vm5813_vm11, %v5004_v45, %v2406_v1  ;;  %v2408_v57 = vrot.slane %v2406_v1, 4  ;;  %v2434_v48 = vrot.slane %v1887_v60, 5 }
  0xad   : > { %v2081_v22 = vsel %vm5877_vm14, %v2076_v19, %v2080_v12  ;;  %v2171_v47 = vor.u32 %v2170_v6, %v2166_v42  ;;  %v2437_v8 = vrot.slane %v1908_v61, 5  ;;  %v888_v23 = vsel %vm5720_vm2, %v646_v59, %v887_v15  ;;  %v1880_v61 = vld [vmem:[#allocation2 + $0x60] sm:$0xf] }
  0xae   : > { %v5036_v37 = vcombine.low %v2071_v2, %v2081_v22  ;;  %v2162_v24 = vrot.slane %v2161_v21, 4  ;;  %v2410_v45 = vsel %vm5813_vm11, %v2408_v57, %v2409_v36  ;;  %v2435_v14 = vsel %vm5813_vm11, %v5008_v41, %v2434_v48  ;;  %889 = vst [vmem:[#allocation2 + $0x68] sm:$0x1] %v888_v23  ;;  %v1881_v41 = vld [vmem:[#allocation2 + $0x64] sm:$0xf] }
  0xaf   : > { %3597 = vrot.lane.b32.xlu1 %v5119_v3, %s5675_s24  ;;  %v2172_v27 = vrot.slane %v2171_v47, 4  ;;  %v5052_v25 = vcombine.low %v2407_v49, %v2410_v45  ;;  %v2436_v62 = vrot.slane %v2434_v48, 4  ;;  %v2972_v40 = vshrl.u32 %v2791_v20, 16  ;;  %v405_v23 = vld [vmem:[%s5744_s23 + $0xc0] sm:$0xff] }
  0xb0   : > { %2598 = vrot.lane.b32.xlu0 %v5036_v37, %s5676_s25  ;;  %v2167_v18 = vsel %vm5877_vm14, %v2162_v24, %v2166_v42  ;;  %v2975_v59 = vshll.u32 %v2791_v20, 16  ;;  %v2981_v32 = vshll.u32 %v2792_v53, 16  ;;  %v2985_v44 = vshrl.u32 %v2792_v53, 16 }
  0xb1   : > { %v2177_v46 = vsel %vm5877_vm14, %v2172_v27, %v2176_v5  ;;  %v2438_v17 = vsel %vm5813_vm11, %v2436_v62, %v2437_v8  ;;  %v2974_v51 = vrot.slane %v2972_v40, 4  ;;  %v701_v52 = vrot.slane %v699_v31, 7  ;;  %v911_v31 = vld [vmem:[#allocation2 + $0x90] sm:$0xf]  ;;  %v2305_v8 = vld [vmem:[#allocation2 + $0x60] sm:$0xe] }
  0xb2   : > { %v5040_v55 = vcombine.low %v2167_v18, %v2177_v46  ;;  %v5056_v29 = vcombine.low %v2435_v14, %v2438_v17  ;;  %v2977_v63 = vrot.slane %v2975_v59, 5  ;;  %v2983_v60 = vrot.slane %v2981_v32, 5  ;;  %v6262_v14 = vld [vmem:[#allocation2 + $0x6c] sm:$0xf]  ;;  %v407_v46 = vld [vmem:[%s5744_s23 + $0xd0] sm:$0xff] }
  0xb3   : > { %v2987_v43 = vrot.slane %v2985_v44, 4  ;;  %v702_v35 = vshll.u32 %v6093_v58, 16  ;;  %v705_v3 = vrot.slane %v701_v52, 4  ;;  %v707_v2 = vshrl.u32 %v6189_v54, 16  ;;  %v406_v40 = vld [vmem:[%s5744_s23 + $0xc8] sm:$0xff] }
  0xb4   : > { %2606 = vrot.lane.b32.xlu1 %v5040_v55, %s5676_s25  ;;  %2678 = vrot.lane.b32.xlu0 %v5052_v25, %s5675_s24  ;;  %v2978_v38 = vor.u32 %v2977_v63, %v2974_v51  ;;  %v710_v34 = vshll.u32 %v6189_v54, 16  ;;  %v5068_v10 = vrot.slane %v3217_v26, 9  ;;  %v3319_v12 = vrot.slane %v2792_v53, 5  ;;  %v6269_v26 = vld [vmem:[#allocation2 + $0x70] sm:$0xf] }
  0xb5   : > { %v2817_v11 = vld [vmem:[#allocation2 + $0x68] sm:$0x1]  ;;  %v2988_v9 = vor.u32 %v2987_v43, %v2983_v60  ;;  %v704_v30 = vor.u32 %v702_v35, %v701_v52  ;;  %v709_v13 = vrot.slane %v707_v2, 7  ;;  %v2083_v33 = vshrl.u32 %v1880_v61, 16 }
  0xb6   : > { %v2979_v58 = vrot.slane %v2978_v38, 4  ;;  %v2991_v16 = vshll.u32 %v2817_v11, 16  ;;  %v3320_v1 = vsel %vm5813_vm11, %v5068_v10, %v3319_v12  ;;  %v3321_v36 = vrot.slane %v3319_v12, 4  ;;  %v1905_v6 = vld [vmem:[#allocation2 + $0x68] sm:$0x1] }
  0xb7   : > { %v2989_v15 = vrot.slane %v2988_v9, 4  ;;  %v712_v19 = vor.u32 %v710_v34, %v709_v13  ;;  %v714_v54 = vrot.slane %v709_v13, 4  ;;  %v912_v42 = vsel %vm5772_vm10, %v704_v30, %v911_v31 }
  0xb8   : > { %2686 = vrot.lane.b32.xlu1 %v5056_v29, %s5675_s24  ;;  %v2984_v5 = vsel %vm5877_vm14, %v2979_v58, %v2983_v60  ;;  %v2993_v21 = vrot.slane %v2991_v16, 5  ;;  %913 = vst [vmem:[#allocation2 + $0x90] sm:$0xf] %v912_v42  ;;  %v3322_v49 = vrot.slane %v2817_v11, 5  ;;  %v2085_v57 = vrot.slane %v2083_v33, 4 }
  0xb9   : > { %v713_v48 = vsel %vm5762_vm9, %v705_v3, %v712_v19  ;;  %v916_v20 = vsel %vm5720_vm2, %v714_v54, %v915_v7  ;;  %v2086_v22 = vshll.u32 %v1880_v61, 16  ;;  %v2092_v47 = vshll.u32 %v1881_v41, 16 }
  0xba   : > { %v2994_v53 = vsel %vm5877_vm14, %v2989_v15, %v2993_v21  ;;  %914 = vst.msk [vmem:[#allocation2 + $0x94] sm:$0xf] %vm259_vm5, %v713_v48  ;;  %917 = vst [vmem:[#allocation2 + $0x98] sm:$0x1] %v916_v20  ;;  %v3323_v37 = vsel %vm5813_vm11, %v3321_v36, %v3322_v49  ;;  %v2096_v24 = vshrl.u32 %v1881_v41, 16  ;;  %v2102_v45 = vshll.u32 %v1905_v6, 16 }
  0xbb   : > { %v5100_v27 = vcombine.low %v2984_v5, %v2994_v53  ;;  %v2088_v25 = vrot.slane %v2086_v22, 5  ;;  %v2094_v62 = vrot.slane %v2092_v47, 5  ;;  %v5005_v59 = vrot.slane %v2305_v8, 9 }
  0xbc   : > { %v2098_v18 = vrot.slane %v2096_v24, 4  ;;  %v2413_v32 = vrot.slane %v1881_v41, 5  ;;  %v6265_v44 = vpack.c.bf16 %v405_v23, %v405_v23  ;;  %v5116_v17 = vcombine.low %v3320_v1, %v3323_v37 }
  0xbd   : > { %3511 = vrot.lane.b32.xlu0 %v5100_v27, %s5676_s25  ;;  %v2089_v51 = vor.u32 %v2088_v25, %v2085_v57  ;;  %v2416_v52 = vrot.slane %v1905_v6, 5  ;;  %v2996_v55 = vshrl.u32 %v6262_v14, 16  ;;  %v2104_v63 = vrot.slane %v2102_v45, 5 }
  0xbe   : > { %v2099_v29 = vor.u32 %v2098_v18, %v2094_v62  ;;  %v2415_v60 = vrot.slane %v2413_v32, 4  ;;  %v6272_v61 = vpack.c.bf16 %v406_v40, %v406_v40  ;;  %v2414_v2 = vsel %vm5813_vm11, %v5005_v59, %v2413_v32 }
  0xbf   : > { %v2799_v43 = vld [vmem:[#allocation2 + $0x90] sm:$0xf]  ;;  %v2090_v3 = vrot.slane %v2089_v51, 4  ;;  %v2999_v38 = vshll.u32 %v6262_v14, 16  ;;  %v6277_v34 = vpack.c.bf16 %v407_v46, %v407_v46  ;;  %v3005_v11 = vshll.u32 %v6269_v26, 16 }
  0xc0   : > { %v3221_v35 = vld [vmem:[#allocation2 + $0x90] sm:$0xe]  ;;  %v3068_v31 = vshrl.u32 %v2799_v43, 16  ;;  %v3071_v10 = vshll.u32 %v2799_v43, 16  ;;  %v2100_v12 = vrot.slane %v2099_v29, 4  ;;  %v2417_v33 = vsel %vm5813_vm11, %v2415_v60, %v2416_v52 }
  0xc1   : > { %v2800_v9 = vld [vmem:[#allocation2 + $0x94] sm:$0xf]  ;;  %v2821_v30 = vld [vmem:[#allocation2 + $0x98] sm:$0x1]  ;;  %3591 = vrot.lane.b32.xlu0 %v5116_v17, %s5675_s24  ;;  %v5072_v13 = vrot.slane %v3221_v35, 9  ;;  %v2095_v7 = vsel %vm5877_vm14, %v2090_v3, %v2094_v62  ;;  %v6285_v58 = vrot.slane %v2996_v55, 4  ;;  %v5053_v55 = vcombine.low %v2414_v2, %v2417_v33 }
  0xc2   : > { %v3070_v16 = vrot.slane %v3068_v31, 4  ;;  %v3073_v1 = vrot.slane %v3071_v10, 5  ;;  %v3077_v36 = vshll.u32 %v2800_v9, 16  ;;  %v3081_v41 = vshrl.u32 %v2800_v9, 16  ;;  %v1888_v15 = vld [vmem:[#allocation2 + $0x90] sm:$0xf] }
  0xc3   : > { %v3087_v19 = vshll.u32 %v2821_v30, 16  ;;  %v3347_v54 = vrot.slane %v2800_v9, 5  ;;  %v3350_v42 = vrot.slane %v2821_v30, 5  ;;  %v2105_v6 = vsel %vm5877_vm14, %v2100_v12, %v2104_v63  ;;  %v1889_v5 = vld [vmem:[#allocation2 + $0x94] sm:$0xf] }
  0xc4   : > { %v3074_v21 = vor.u32 %v3073_v1, %v3070_v16  ;;  %v3079_v49 = vrot.slane %v3077_v36, 5  ;;  %v3083_v57 = vrot.slane %v3081_v41, 4  ;;  %v5037_v48 = vcombine.low %v2095_v7, %v2105_v6  ;;  %v1909_v20 = vld [vmem:[#allocation2 + $0x98] sm:$0x1]  ;;  %v2309_v40 = vld [vmem:[#allocation2 + $0x90] sm:$0xe] }
  0xc5   : > { %v3089_v22 = vrot.slane %v3087_v19, 5  ;;  %v3348_v47 = vsel %vm5813_vm11, %v5072_v13, %v3347_v54  ;;  %v3349_v8 = vrot.slane %v3347_v54, 4  ;;  %v2179_v23 = vshrl.u32 %v1888_v15, 16  ;;  %v6298_v35 = vld [vmem:[#allocation2 + $0x74] sm:$0x1]  ;;  %v408_v16 = vld [vmem:[%s5744_s23 + $0xd8] sm:$0xff] }
  0xc6   : > { %v3075_v53 = vrot.slane %v3074_v21, 4  ;;  %v3084_v37 = vor.u32 %v3083_v57, %v3079_v49  ;;  %2600 = vrot.lane.b32.xlu0 %v5037_v48, %s5676_s25  ;;  %v2182_v24 = vshll.u32 %v1888_v15, 16  ;;  %v2188_v45 = vshll.u32 %v1889_v5, 16  ;;  %v310_v9 = vld [vmem:[#allocation2 + $0x9c] sm:$0x1] }
  0xc7   : > { %v3351_v14 = vsel %vm5813_vm11, %v3349_v8, %v3350_v42  ;;  %v2181_v27 = vrot.slane %v2179_v23, 4  ;;  %v2192_v25 = vshrl.u32 %v1889_v5, 16  ;;  %v2198_v62 = vshll.u32 %v1909_v20, 16  ;;  %v366_v30 = vld [vmem:[#allocation2 + $0xa4] sm:$0x1] }
  0xc8   : > { %v3080_v18 = vsel %vm5877_vm14, %v3075_v53, %v3079_v49  ;;  %v3085_v59 = vrot.slane %v3084_v37, 4  ;;  %v5120_v32 = vcombine.low %v3348_v47, %v3351_v14  ;;  %v2184_v46 = vrot.slane %v2182_v24, 5  ;;  %v369_v14 = vld [vmem:[#allocation2 + $0xb0] sm:$0x1] }
  0xc9   : > { %v2190_v17 = vrot.slane %v2188_v45, 5  ;;  %v2194_v51 = vrot.slane %v2192_v25, 4  ;;  %v2200_v52 = vrot.slane %v2198_v62, 5  ;;  %v5009_v60 = vrot.slane %v2309_v40, 9 }
  0xca   : > { %v3090_v29 = vsel %vm5877_vm14, %v3085_v59, %v3089_v22  ;;  %v2185_v63 = vor.u32 %v2184_v46, %v2181_v27  ;;  %v2441_v43 = vrot.slane %v1889_v5, 5  ;;  %2680 = vrot.lane.b32.xlu0 %v5053_v55, %s5675_s24  ;;  %v2444_v10 = vrot.slane %v1909_v20, 5  ;;  %v6328_v20 = vld [vmem:[#allocation2 + $0x6c] sm:$0xe]  ;;  %v313_v22 = vld [vmem:[#allocation2 + $0xa8] sm:$0x1] }
  0xcb   : > { %v5104_v3 = vcombine.low %v3080_v18, %v3090_v29  ;;  %v2195_v31 = vor.u32 %v2194_v51, %v2190_v17  ;;  %v3001_v12 = vrot.slane %v2999_v38, 5  ;;  %v3007_v33 = vrot.slane %v3005_v11, 5  ;;  %v6352_v55 = vld [vmem:[#allocation2 + $0xc] sm:$0xf]  ;;  %v6354_v29 = vld [vmem:[#allocation2 + $0x10] sm:$0xf] }
  0xcc   : > { %v2186_v13 = vrot.slane %v2185_v63, 4  ;;  %v6303_v2 = vsel %vm5813_vm11, %v5009_v60, %v2441_v43  ;;  %v2443_v7 = vrot.slane %v2441_v43, 4  ;;  %v3009_v41 = vshrl.u32 %v6269_v26, 16 }
  0xcd   : > { %3519 = vrot.lane.b32.xlu1 %v5104_v3, %s5676_s25  ;;  %v2196_v1 = vrot.slane %v2195_v31, 4  ;;  %v3002_v36 = vor.u32 %v3001_v12, %v6285_v58  ;;  %v3015_v15 = vshll.u32 %v6298_v35, 16  ;;  %v311_v11 = vsel %vm5720_vm2, 0, %v310_v9  ;;  %v410_v9 = vld [vmem:[%s5744_s23 + $0xe8] sm:$0xff] }
  0xce   : > { %v2191_v38 = vsel %vm5877_vm14, %v2186_v13, %v2190_v17  ;;  %v6314_v19 = vsel %vm5813_vm11, %v2443_v7, %v2444_v10  ;;  %v367_v54 = vsel %vm5730_vm4, 0, %v366_v30  ;;  %v3011_v6 = vrot.slane %v3009_v41, 4  ;;  %312 = vst [vmem:[#allocation2 + $0x9c] sm:$0x1] %v311_v11  ;;  %v6374_v7 = vld [vmem:[#allocation2 + $0x14] sm:$0x1] }
  0xcf   : > { %v2201_v58 = vsel %vm5877_vm14, %v2196_v1, %v2200_v52  ;;  %v3003_v42 = vrot.slane %v3002_v36, 4  ;;  %368 = vst [vmem:[#allocation2 + $0xa4] sm:$0x1] %v367_v54  ;;  %v6322_v5 = vpack.c.bf16 %v408_v16, %v408_v16  ;;  %v5057_v49 = vcombine.low %v6303_v2, %v6314_v19 }
  0xd0   : > { %v5041_v21 = vcombine.low %v2191_v38, %v2201_v58  ;;  %v716_v57 = vshrl.u32 %v6265_v44, 16  ;;  %v719_v48 = vshll.u32 %v6265_v44, 16  ;;  %v3012_v47 = vor.u32 %v3011_v6, %v3007_v33 }
  0xd1   : > { %3599 = vrot.lane.b32.xlu1 %v5120_v32, %s5675_s24  ;;  %v3017_v8 = vrot.slane %v3015_v15, 5  ;;  %v724_v23 = vshrl.u32 %v6272_v61, 16  ;;  %v727_v53 = vshll.u32 %v6272_v61, 16  ;;  %v3008_v37 = vsel %vm5877_vm14, %v3003_v42, %v3007_v33  ;;  %v409_v32 = vld [vmem:[%s5744_s23 + $0xe0] sm:$0xff] }
  0xd2   : > { %v718_v24 = vrot.slane %v716_v57, 7  ;;  %v3326_v45 = vrot.slane %v6269_v26, 5  ;;  %v3013_v27 = vrot.slane %v3012_v47, 4  ;;  %v5677_v25 = vmov 0  }
  0xd3   : > { %v726_v44 = vrot.slane %v724_v23, 7  ;;  %260 = vst.msk [vmem:[#allocation2] sm:$0xf] %vm259_vm5, %v5677_v25  ;;  %261 = vst.msk [vmem:[#allocation2 + $0x4] sm:$0xf] %vm259_vm5, %v5677_v25  ;;  %v5069_v61 = vrot.slane %v6328_v20, 9  ;;  %v6370_v13 = vpack.c.bf16 %v409_v32, %v409_v32  ;;  %v6388_v54 = vpack.c.bf16 %v410_v9, %v410_v9 }
  0xd4   : > { %263 = vst.msk [vmem:[#allocation2 + $0x8] sm:$0x1] %vm262_vm0, %v5677_v25  ;;  %267 = vst.msk [vmem:[#allocation2 + $0xd4] sm:$0x1] %vm262_vm0, %v5677_v25  ;;  %v314_v26 = vsel %vm5720_vm2, 0, %v313_v22  ;;  %v721_v62 = vor.u32 %v719_v48, %v718_v24  ;;  %v722_v40 = vrot.slane %v718_v24, 4  ;;  %v3018_v46 = vsel %vm5877_vm14, %v3013_v27, %v3017_v8 }
  0xd5   : > { %265 = vst.msk [vmem:[#allocation2 + $0xcc] sm:$0xf] %vm259_vm5, %v5677_v25  ;;  %266 = vst.msk [vmem:[#allocation2 + $0xd0] sm:$0xf] %vm259_vm5, %v5677_v25  ;;  %v3328_v18 = vrot.slane %v3326_v45, 4  ;;  %v3329_v59 = vrot.slane %v6298_v35, 5  ;;  %2608 = vrot.lane.b32.xlu1 %v5041_v21, %s5676_s25  ;;  %v729_v17 = vor.u32 %v727_v53, %v726_v44  ;;  %v5101_v63 = vcombine.low %v3008_v37, %v3018_v46  ;;  %v6402_v37 = vpop.permute.xlu1 %3579 }
  0xd6   : > { %315 = vst [vmem:[#allocation2 + $0xa8] sm:$0x1] %v314_v26  ;;  %v731_v51 = vrot.slane %v726_v44, 4  ;;  %v370_v52 = vsel %vm5730_vm4, 0, %v369_v14  ;;  %v918_v60 = vld [vmem:[#allocation2 + $0x9c] sm:$0xf]  ;;  %v6381_v38 = vsel %vm5813_vm11, %v5069_v61, %v3326_v45 }
  0xd7   : > { %v922_v43 = vld [vmem:[#allocation2 + $0xa4] sm:$0x1]  ;;  %371 = vst [vmem:[#allocation2 + $0xb0] sm:$0x1] %v370_v52  ;;  %v733_v35 = vshrl.u32 %v6277_v34, 16  ;;  %v736_v3 = vshll.u32 %v6277_v34, 16  ;;  %v730_v31 = vsel %vm5762_vm9, %v722_v40, %v729_v17  ;;  %v919_v10 = vsel %vm5772_vm10, %v721_v62, %v918_v60  ;;  %3513 = vrot.lane.b32.xlu0 %v5101_v63, %s5676_s25 }
  0xd8   : > { %v923_v12 = vsel %vm5720_vm2, %v731_v51, %v922_v43  ;;  %920 = vst [vmem:[#allocation2 + $0x9c] sm:$0xf] %v919_v10  ;;  %921 = vst.msk [vmem:[#allocation2 + $0xa0] sm:$0xf] %vm259_vm5, %v730_v31  ;;  %v741_v34 = vshrl.u32 %v6322_v5, 16  ;;  %v744_v2 = vshll.u32 %v6322_v5, 16  ;;  %v6385_v19 = vsel %vm5813_vm11, %v3328_v18, %v3329_v59  ;;  %v6416_v59 = vpop.permute.xlu0 %2666 }
  0xd9   : > { %924 = vst [vmem:[#allocation2 + $0xa4] sm:$0x1] %v923_v12  ;;  %v6367_v30 = vrot.slane %v733_v35, 7  ;;  %2688 = vrot.lane.b32.xlu1 %v5057_v49, %s5675_s24  ;;  %v1022_v33 = vshrl.u32 %v6352_v55, 16  ;;  %v1025_v16 = vshll.u32 %v6352_v55, 16  ;;  %v1031_v1 = vshll.u32 %v6354_v29, 16 }
  0xda   : > { %v271_v36 = vld [vmem:[#allocation2] sm:$0x1]  ;;  %v947_v15 = vld [vmem:[#allocation2 + $0x4] sm:$0xf]  ;;  %v1381_v21 = vld [vmem:[#allocation2] sm:$0xe]  ;;  %v5117_v62 = vcombine.low %v6381_v38, %v6385_v19 }
  0xdb   : > { %v327_v41 = vld [vmem:[#allocation2 + $0x8] sm:$0x1]  ;;  %v738_v11 = vor.u32 %v736_v3, %v6367_v30  ;;  %v272_v58 = vsel %vm5720_vm2, 0, %v271_v36  ;;  %v1007_v6 = vshll.u32 %v947_v15, 16  ;;  %v1011_v5 = vshrl.u32 %v947_v15, 16 }
  0xdc   : > { %v328_v42 = vsel %vm5730_vm4, 0, %v327_v41  ;;  %273 = vst [vmem:[#allocation2] sm:$0x1] %v272_v58  ;;  %v4934_v49 = vrot.slane %v1381_v21, 9  ;;  %v1450_v57 = vrot.slane %v947_v15, 5  ;;  %v6394_v48 = vrot.slane %v741_v34, 7  ;;  %v6426_v15 = vpop.permute.xlu1 %2668 }
  0xdd   : > { %329 = vst [vmem:[#allocation2 + $0x8] sm:$0x1] %v328_v42  ;;  %v925_v20 = vld [vmem:[#allocation2 + $0xa8] sm:$0xf]  ;;  %v1035_v22 = vshrl.u32 %v6354_v29, 16  ;;  %v6397_v47 = vrot.slane %v1007_v6, 5 }
  0xde   : > { %v1013_v8 = vrot.slane %v1011_v5, 4  ;;  %v926_v23 = vsel %vm5772_vm10, %v738_v11, %v925_v20  ;;  %v1041_v53 = vshll.u32 %v6374_v7, 16  ;;  %v1452_v24 = vrot.slane %v1450_v57, 4  ;;  %v6429_v20 = vpop.permute.xlu0 %2586 }
  0xdf   : > { %v739_v45 = vrot.slane %v6367_v30, 4  ;;  %v748_v14 = vrot.slane %v6394_v48, 4  ;;  %927 = vst [vmem:[#allocation2 + $0xa8] sm:$0xf] %v926_v23  ;;  %v6406_v27 = vrot.slane %v1022_v33, 4  ;;  %v6413_v40 = vsel %vm5813_vm11, %v4934_v49, %v1450_v57 }
  0xe0   : > { %v2801_v44 = vld [vmem:[#allocation2 + $0x9c] sm:$0xf]  ;;  %v2802_v25 = vld [vmem:[#allocation2 + $0xa0] sm:$0xf]  ;;  %v2822_v61 = vld [vmem:[#allocation2 + $0xa4] sm:$0x1]  ;;  %v1014_v26 = vor.u32 %v1013_v8, %v6397_v47  ;;  %v746_v18 = vor.u32 %v744_v2, %v6394_v48 }
  0xe1   : > { %v3092_v32 = vshrl.u32 %v2801_v44, 16  ;;  %v3095_v46 = vshll.u32 %v2801_v44, 16  ;;  %v3101_v17 = vshll.u32 %v2802_v25, 16  ;;  %v3105_v51 = vshrl.u32 %v2802_v25, 16  ;;  %v3222_v52 = vld [vmem:[#allocation2 + $0x9c] sm:$0xe] }
  0xe2   : > { %v3111_v63 = vshll.u32 %v2822_v61, 16  ;;  %v6418_v60 = vrot.slane %v1014_v26, 4  ;;  %v5073_v43 = vrot.slane %v3222_v52, 9  ;;  %v3354_v35 = vrot.slane %v2802_v25, 5  ;;  %v1890_v9 = vld [vmem:[#allocation2 + $0x9c] sm:$0xf] }
  0xe3   : > { %v3094_v3 = vrot.slane %v3092_v32, 4  ;;  %v3097_v31 = vrot.slane %v3095_v46, 5  ;;  %v3103_v10 = vrot.slane %v3101_v17, 5  ;;  %v3107_v12 = vrot.slane %v3105_v51, 4  ;;  %v946_v34 = vld [vmem:[#allocation2] sm:$0xf] }
  0xe4   : > { %v3113_v30 = vrot.slane %v3111_v63, 5  ;;  %v978_v2 = vld [vmem:[#allocation2 + $0x8] sm:$0x1]  ;;  %v6422_v33 = vsel %vm5813_vm11, %v5073_v43, %v3354_v35  ;;  %v3356_v36 = vrot.slane %v3354_v35, 4  ;;  %v747_v41 = vsel %vm5762_vm9, %v739_v45, %v746_v18  ;;  %v1891_v32 = vld [vmem:[#allocation2 + $0xa0] sm:$0xf] }
  0xe5   : > { %v3098_v11 = vor.u32 %v3097_v31, %v3094_v3  ;;  %v3108_v58 = vor.u32 %v3107_v12, %v3103_v10  ;;  %v998_v42 = vshrl.u32 %v946_v34, 16  ;;  %v1001_v6 = vshll.u32 %v946_v34, 16  ;;  %928 = vst.msk [vmem:[#allocation2 + $0xac] sm:$0xf] %vm259_vm5, %v747_v41  ;;  %v1910_v46 = vld [vmem:[#allocation2 + $0xa4] sm:$0x1]  ;;  %v6450_v12 = vpop.permute.xlu1 %3581 }
  0xe6   : > { %v1017_v5 = vshll.u32 %v978_v2, 16  ;;  %v3357_v21 = vrot.slane %v2822_v61, 5  ;;  %v1453_v49 = vrot.slane %v978_v2, 5  ;;  %v2203_v57 = vshrl.u32 %v1890_v9, 16  ;;  %v2310_v43 = vld [vmem:[#allocation2 + $0x9c] sm:$0xe] }
  0xe7   : > { %v3099_v8 = vrot.slane %v3098_v11, 4  ;;  %v3109_v23 = vrot.slane %v3108_v58, 4  ;;  %v1000_v44 = vrot.slane %v998_v42, 4  ;;  %v1003_v25 = vrot.slane %v1001_v6, 5  ;;  %v2803_v42 = vld [vmem:[#allocation2 + $0xa8] sm:$0xf]  ;;  %v6453_v6 = vpop.permute.xlu0 %2588 }
  0xe8   : > { %v1019_v26 = vrot.slane %v1017_v5, 5  ;;  %v6433_v45 = vsel %vm5813_vm11, %v3356_v36, %v3357_v21  ;;  %v6437_v18 = vsel %vm5813_vm11, %v1452_v24, %v1453_v49  ;;  %v2205_v61 = vrot.slane %v2203_v57, 4  ;;  %v929_v36 = vld [vmem:[#allocation2 + $0xb0] sm:$0x1]  ;;  %v3223_v19 = vld [vmem:[#allocation2 + $0xa8] sm:$0xe] }
  0xe9   : > { %v3104_v17 = vsel %vm5877_vm14, %v3099_v8, %v3103_v10  ;;  %v3114_v51 = vsel %vm5877_vm14, %v3109_v23, %v3113_v30  ;;  %v1004_v52 = vor.u32 %v1003_v25, %v1000_v44  ;;  %v5121_v63 = vcombine.low %v6422_v33, %v6433_v45  ;;  %v6471_v48 = vpop.permute.xlu1 %2670 }
  0xea   : > { %v5105_v35 = vcombine.low %v3104_v17, %v3114_v51  ;;  %v1020_v24 = vsel %vm5877_vm14, %v6418_v60, %v1019_v26  ;;  %v4982_v3 = vcombine.low %v6413_v40, %v6437_v18  ;;  %v2206_v31 = vshll.u32 %v1890_v9, 16 }
  0xeb   : > { %v1005_v10 = vrot.slane %v1004_v52, 4  ;;  %v2212_v34 = vshll.u32 %v1891_v32, 16  ;;  %v2216_v2 = vshrl.u32 %v1891_v32, 16  ;;  %v2222_v30 = vshll.u32 %v1910_v46, 16 }
  0xec   : > { %3521 = vrot.lane.b32.xlu1 %v5105_v35, %s5676_s25  ;;  %v2208_v33 = vrot.slane %v2206_v31, 5  ;;  %v5010_v41 = vrot.slane %v2310_v43, 9  ;;  %v2448_v11 = vrot.slane %v1891_v32, 5  ;;  %v2451_v58 = vrot.slane %v1910_v46, 5  ;;  %v2804_v21 = vld [vmem:[#allocation2 + $0xac] sm:$0xf] }
  0xed   : > { %v1010_v40 = vsel %vm5877_vm14, %v1005_v10, %v6397_v47  ;;  %v2214_v60 = vrot.slane %v2212_v34, 5  ;;  %v2218_v9 = vrot.slane %v2216_v2, 4  ;;  %v2224_v5 = vrot.slane %v2222_v30, 5  ;;  %v1382_v2 = vld [vmem:[#allocation2 + $0xc] sm:$0xe] }
  0xee   : > { %v4966_v49 = vcombine.low %v1010_v40, %v1020_v24  ;;  %v2209_v57 = vor.u32 %v2208_v33, %v2205_v61  ;;  %v2449_v8 = vsel %vm5813_vm11, %v5010_v41, %v2448_v11  ;;  %v2450_v23 = vrot.slane %v2448_v11, 4 }
  0xef   : > { %v2219_v44 = vor.u32 %v2218_v9, %v2214_v60  ;;  %v930_v25 = vsel %vm5720_vm2, %v748_v14, %v929_v36  ;;  %v3116_v26 = vshrl.u32 %v2803_v42, 16  ;;  %v3119_v45 = vshll.u32 %v2803_v42, 16 }
  0xf0   : > { %1672 = vrot.lane.b32.xlu0 %v4966_v49, %s5676_s25  ;;  %3593 = vrot.lane.b32.xlu1 %v5117_v62, %s5675_s24  ;;  %v2210_v47 = vrot.slane %v2209_v57, 4  ;;  %v2452_v18 = vsel %vm5813_vm11, %v2450_v23, %v2451_v58  ;;  %931 = vst [vmem:[#allocation2 + $0xb0] sm:$0x1] %v930_v25  ;;  %v3125_v32 = vshll.u32 %v2804_v21, 16  ;;  %v3129_v46 = vshrl.u32 %v2804_v21, 16  ;;  %v6477_v62 = vpop.permute.xlu0 %3501 }
  0xf1   : > { %v2220_v61 = vrot.slane %v2219_v44, 4  ;;  %v5058_v14 = vcombine.low %v2449_v8, %v2452_v18  ;;  %v3118_v17 = vrot.slane %v3116_v26, 4  ;;  %v3121_v51 = vrot.slane %v3119_v45, 5  ;;  %v1893_v8 = vld [vmem:[#allocation2 + $0xac] sm:$0xf] }
  0xf2   : > { %v2215_v52 = vsel %vm5877_vm14, %v2210_v47, %v2214_v60  ;;  %v3127_v43 = vrot.slane %v3125_v32, 5  ;;  %v3131_v35 = vrot.slane %v3129_v46, 4  ;;  %v1027_v38 = vrot.slane %v1025_v16, 5  ;;  %v1892_v60 = vld [vmem:[#allocation2 + $0xa8] sm:$0xf] }
  0xf3   : > { %v2225_v24 = vsel %vm5877_vm14, %v2220_v61, %v2224_v5  ;;  %v3122_v31 = vor.u32 %v3121_v51, %v3118_v17  ;;  %v1033_v10 = vrot.slane %v1031_v1, 5  ;;  %v1037_v34 = vrot.slane %v1035_v22, 4 }
  0xf4   : > { %3601 = vrot.lane.b32.xlu0 %v5121_v63, %s5675_s24  ;;  %1752 = vrot.lane.b32.xlu1 %v4982_v3, %s5675_s24  ;;  %v5042_v55 = vcombine.low %v2215_v52, %v2225_v24  ;;  %v3132_v16 = vor.u32 %v3131_v35, %v3127_v43  ;;  %v1028_v30 = vor.u32 %v1027_v38, %v6406_v27  ;;  %v1043_v36 = vrot.slane %v1041_v53, 5  ;;  %v6491_v63 = vpop.permute.xlu1 %3583  ;;  %v6505_v23 = vpop.permute.xlu0 %2590  ;;  %v316_v24 = vld [vmem:[#allocation2 + $0xb4] sm:$0x1] }
  0xf5   : > { %v3123_v33 = vrot.slane %v3122_v31, 4  ;;  %v1038_v41 = vor.u32 %v1037_v34, %v1033_v10  ;;  %v5074_v11 = vrot.slane %v3223_v19, 9  ;;  %v3361_v58 = vrot.slane %v2804_v21, 5  ;;  %v372_v31 = vld [vmem:[#allocation2 + $0xbc] sm:$0x1] }
  0xf6   : > { %v3133_v1 = vrot.slane %v3132_v16, 4  ;;  %v1029_v42 = vrot.slane %v1028_v30, 4  ;;  %v4935_v40 = vrot.slane %v1382_v2, 9  ;;  %v1457_v22 = vrot.slane %v6354_v29, 5 }
  0xf7   : > { %v2823_v3 = vld [vmem:[#allocation2 + $0xb0] sm:$0x1]  ;;  %v3128_v9 = vsel %vm5877_vm14, %v3123_v33, %v3127_v43  ;;  %v1039_v27 = vrot.slane %v1038_v41, 4  ;;  %v6497_v53 = vsel %vm5813_vm11, %v5074_v11, %v3361_v58  ;;  %v3363_v5 = vrot.slane %v3361_v58, 4 }
  0xf8   : > { %2610 = vrot.lane.b32.xlu0 %v5042_v55, %s5676_s25  ;;  %2690 = vrot.lane.b32.xlu1 %v5058_v14, %s5675_s24  ;;  %v3135_v21 = vshll.u32 %v2823_v3, 16  ;;  %v1034_v29 = vsel %vm5877_vm14, %v1029_v42, %v1033_v10  ;;  %v3364_v49 = vrot.slane %v2823_v3, 5  ;;  %v1458_v57 = vsel %vm5813_vm11, %v4935_v40, %v1457_v22  ;;  %v1911_v46 = vld [vmem:[#allocation2 + $0xb0] sm:$0x1]  ;;  %v2311_v14 = vld [vmem:[#allocation2 + $0xa8] sm:$0xe]  ;;  %v6518_v10 = vpop.permute.xlu1 %2672  ;;  %v6520_v11 = vpop.permute.xlu0 %3503 }
  0xf9   : > { %v1044_v44 = vsel %vm5877_vm14, %v1039_v27, %v1043_v36  ;;  %v1459_v25 = vrot.slane %v1457_v22, 4  ;;  %v1460_v26 = vrot.slane %v6374_v7, 5  ;;  %v2227_v45 = vshrl.u32 %v1892_v60, 16  ;;  %v411_v27 = vld [vmem:[%s5744_s23 + $0xf0] sm:$0xff] }
  0xfa   : > { %v3137_v47 = vrot.slane %v3135_v21, 5  ;;  %v4967_v18 = vcombine.low %v1034_v29, %v1044_v44  ;;  %v3365_v32 = vsel %vm5813_vm11, %v3363_v5, %v3364_v49  ;;  %v2230_v61 = vshll.u32 %v1892_v60, 16  ;;  %v950_v49 = vld [vmem:[#allocation2 + $0x18] sm:$0xf] }
  0xfb   : > { %v5122_v17 = vcombine.low %v6497_v53, %v3365_v32  ;;  %v1461_v51 = vsel %vm5813_vm11, %v1459_v25, %v1460_v26  ;;  %v2229_v52 = vrot.slane %v2227_v45, 4  ;;  %v2236_v43 = vshll.u32 %v1893_v8, 16  ;;  %v951_v25 = vld [vmem:[#allocation2 + $0x1c] sm:$0xf] }
  0xfc   : > { %v3138_v35 = vsel %vm5877_vm14, %v3133_v1, %v3137_v47  ;;  %1674 = vrot.lane.b32.xlu1 %v4967_v18, %s5676_s25  ;;  %v4983_v7 = vcombine.low %v1458_v57, %v1461_v51  ;;  %v2232_v38 = vrot.slane %v2230_v61, 5  ;;  %v2240_v19 = vshrl.u32 %v1893_v8, 16  ;;  %v6539_v26 = vpop.permute.xlu1 %3585  ;;  %v980_v18 = vld [vmem:[#allocation2 + $0x20] sm:$0x1]  ;;  %v1383_v51 = vld [vmem:[#allocation2 + $0x18] sm:$0xe] }
  0xfd   : > { %v5106_v34 = vcombine.low %v3128_v9, %v3138_v35  ;;  %v2238_v2 = vrot.slane %v2236_v43, 5  ;;  %v2246_v55 = vshll.u32 %v1911_v46, 16  ;;  %v5011_v16 = vrot.slane %v2311_v14, 9  ;;  %v6547_v43 = vpop.permute.xlu0 %2592 }
  0xfe   : > { %v2233_v30 = vor.u32 %v2232_v38, %v2229_v52  ;;  %v2242_v36 = vrot.slane %v2240_v19, 4  ;;  %v2455_v33 = vrot.slane %v1893_v8, 5  ;;  %v2458_v41 = vrot.slane %v1911_v46, 5  ;;  %v412_v52 = vld [vmem:[%s5744_s23 + $0xf8] sm:$0xff]  ;;  %v319_v19 = vld [vmem:[#allocation2 + $0xc0] sm:$0x1] }
  0xff   : > { %3523 = vrot.lane.b32.xlu0 %v5106_v34, %s5676_s25  ;;  %v2248_v58 = vrot.slane %v2246_v55, 5  ;;  %v317_v1 = vsel %vm5720_vm2, 0, %v316_v24  ;;  %v373_v42 = vsel %vm5730_vm4, 0, %v372_v31  ;;  %v750_v40 = vshrl.u32 %v6370_v13, 16  ;;  %v375_v55 = vld [vmem:[#allocation2 + $0xc8] sm:$0x1] }
 0x100   : > { %1754 = vrot.lane.b32.xlu1 %v4983_v7, %s5675_s24  ;;  %v2234_v22 = vrot.slane %v2233_v30, 4  ;;  %v2243_v60 = vor.u32 %v2242_v36, %v2238_v2  ;;  %v2456_v3 = vsel %vm5813_vm11, %v5011_v16, %v2455_v33  ;;  %v2457_v9 = vrot.slane %v2455_v33, 4  ;;  %318 = vst [vmem:[#allocation2 + $0xb4] sm:$0x1] %v317_v1  ;;  %374 = vst [vmem:[#allocation2 + $0xbc] sm:$0x1] %v373_v42 }
 0x101   : > { %v752_v53 = vrot.slane %v750_v40, 7  ;;  %v753_v5 = vshll.u32 %v6370_v13, 16  ;;  %v758_v21 = vshrl.u32 %v6388_v54, 16  ;;  %v761_v29 = vshll.u32 %v6388_v54, 16 }
 0x102   : > { %v2239_v57 = vsel %vm5877_vm14, %v2234_v22, %v2238_v2  ;;  %v2244_v8 = vrot.slane %v2243_v60, 4  ;;  %v2459_v44 = vsel %vm5813_vm11, %v2457_v9, %v2458_v41  ;;  %v6542_v32 = vpack.c.bf16 %v411_v27, %v411_v27  ;;  %v6558_v60 = vpop.permute.xlu1 %3499 }
 0x103   : > { %3603 = vrot.lane.b32.xlu0 %v5122_v17, %s5675_s24  ;;  %v5059_v45 = vcombine.low %v2456_v3, %v2459_v44  ;;  %v756_v13 = vrot.slane %v752_v53, 4  ;;  %v760_v47 = vrot.slane %v758_v21, 7  ;;  %v755_v46 = vor.u32 %v753_v5, %v752_v53 }
 0x104   : > { %v2249_v54 = vsel %vm5877_vm14, %v2244_v8, %v2248_v58  ;;  %v1046_v61 = vshrl.u32 %v950_v49, 16  ;;  %v1049_v14 = vshll.u32 %v950_v49, 16  ;;  %v1055_v38 = vshll.u32 %v951_v25, 16  ;;  %v6564_v49 = vld [vmem:[#allocation2 + $0x24] sm:$0xf] }
 0x105   : > { %v5043_v35 = vcombine.low %v2239_v57, %v2249_v54  ;;  %2692 = vrot.lane.b32.xlu1 %v5059_v45, %s5675_s24  ;;  %v763_v17 = vor.u32 %v761_v29, %v760_v47  ;;  %v765_v7 = vrot.slane %v760_v47, 4  ;;  %v1059_v34 = vshrl.u32 %v951_v25, 16  ;;  %v6566_v57 = vpop.permute.xlu0 %3505 }
 0x106   : > { %v1048_v24 = vrot.slane %v1046_v61, 4  ;;  %v1051_v31 = vrot.slane %v1049_v14, 5  ;;  %v1065_v2 = vshll.u32 %v980_v18, 16  ;;  %v1057_v33 = vrot.slane %v1055_v38, 5 }
 0x107   : > { %2612 = vrot.lane.b32.xlu0 %v5043_v35, %s5676_s25  ;;  %v764_v16 = vsel %vm5762_vm9, %v756_v13, %v763_v17  ;;  %v932_v30 = vld [vmem:[#allocation2 + $0xb4] sm:$0xf]  ;;  %v936_v36 = vld [vmem:[#allocation2 + $0xbc] sm:$0x1]  ;;  %v4936_v41 = vrot.slane %v1383_v51, 9  ;;  %v5260_v58 = vpack.c.bf16 %v412_v52, %v412_v52  ;;  %v1061_v22 = vrot.slane %v1059_v34, 4 }
 0x108   : > { %v933_v1 = vsel %vm5772_vm10, %v755_v46, %v932_v30  ;;  %935 = vst.msk [vmem:[#allocation2 + $0xb8] sm:$0xf] %vm259_vm5, %v764_v16  ;;  %v937_v42 = vsel %vm5720_vm2, %v765_v7, %v936_v36  ;;  %v1052_v40 = vor.u32 %v1051_v31, %v1048_v24  ;;  %v1067_v3 = vrot.slane %v1065_v2, 5  ;;  %v6574_v46 = vpop.permute.xlu1 %2602 }
 0x109   : > { %934 = vst [vmem:[#allocation2 + $0xb4] sm:$0xf] %v933_v1  ;;  %938 = vst [vmem:[#allocation2 + $0xbc] sm:$0x1] %v937_v42  ;;  %v1464_v9 = vrot.slane %v951_v25, 5  ;;  %v1467_v27 = vrot.slane %v980_v18, 5  ;;  %v1062_v5 = vor.u32 %v1061_v22, %v1057_v33 }
 0x10a   : > { %v1053_v53 = vrot.slane %v1052_v40, 4  ;;  %v320_v21 = vsel %vm5720_vm2, 0, %v319_v19  ;;  %v376_v29 = vsel %vm5730_vm4, 0, %v375_v55  ;;  %v767_v25 = vshrl.u32 %v6542_v32, 16 }
 0x10b   : > { %v1465_v8 = vsel %vm5813_vm11, %v4936_v41, %v1464_v9  ;;  %v1466_v44 = vrot.slane %v1464_v9, 4  ;;  %321 = vst [vmem:[#allocation2 + $0xc0] sm:$0x1] %v320_v21  ;;  %377 = vst [vmem:[#allocation2 + $0xc8] sm:$0x1] %v376_v29  ;;  %v770_v45 = vshll.u32 %v6542_v32, 16 }
 0x10c   : > { %v1058_v13 = vsel %vm5877_vm14, %v1053_v53, %v1057_v33  ;;  %v1063_v47 = vrot.slane %v1062_v5, 4  ;;  %v775_v18 = vshrl.u32 %v5260_v58, 16  ;;  %v778_v54 = vshll.u32 %v5260_v58, 16  ;;  %v6597_v33 = vpop.permute.xlu0 %2594  ;;  %v6600_v5 = vpop.permute.xlu1 %2682 }
 0x10d   : > { %v1468_v61 = vsel %vm5813_vm11, %v1466_v44, %v1467_v27  ;;  %v6578_v14 = vrot.slane %v767_v25, 7  ;;  %v1070_v51 = vshrl.u32 %v6564_v49, 16  ;;  %v1073_v24 = vshll.u32 %v6564_v49, 16 }
 0x10e   : > { %v1068_v52 = vsel %vm5877_vm14, %v1063_v47, %v1067_v3  ;;  %v4984_v35 = vcombine.low %v1465_v8, %v1468_v61  ;;  %v6583_v32 = vrot.slane %v775_v18, 7  ;;  %vm1833_vm0 = vcmask 261120  }
 0x10f   : > { %v2806_v17 = vld [vmem:[#allocation2 + $0xb8] sm:$0xf]  ;;  %v4968_v7 = vcombine.low %v1058_v13, %v1068_v52  ;;  %v773_v38 = vrot.slane %v6578_v14, 4  ;;  %v6586_v19 = vrot.slane %v1070_v51, 4  ;;  %v6592_v30 = vor.u32 %v770_v45, %v6578_v14 }
 0x110   : > { %v2805_v31 = vld [vmem:[#allocation2 + $0xb4] sm:$0xf]  ;;  %v2824_v34 = vld [vmem:[#allocation2 + $0xbc] sm:$0x1]  ;;  %v3149_v2 = vshll.u32 %v2806_v17, 16  ;;  %v3153_v55 = vshrl.u32 %v2806_v17, 16  ;;  %v6595_v36 = vor.u32 %v778_v54, %v6583_v32 }
 0x111   : > { %v6589_v16 = vld [vmem:[#allocation2 + $0xb8] sm:$0xf]  ;;  %v3140_v41 = vshrl.u32 %v2805_v31, 16  ;;  %v3143_v58 = vshll.u32 %v2805_v31, 16  ;;  %v3159_v1 = vshll.u32 %v2824_v34, 16  ;;  %1676 = vrot.lane.b32.xlu1 %v4968_v7, %s5676_s25  ;;  %v3368_v40 = vrot.slane %v2806_v17, 5 }
 0x112   : > { %v3224_v42 = vld [vmem:[#allocation2 + $0xb4] sm:$0xe]  ;;  %v3151_v22 = vrot.slane %v3149_v2, 5  ;;  %v3155_v3 = vrot.slane %v3153_v55, 4  ;;  %v3371_v27 = vrot.slane %v2824_v34, 5  ;;  %v2260_v51 = vshll.u32 %v6589_v16, 16 }
 0x113   : > { %v5075_v9 = vrot.slane %v3224_v42, 9  ;;  %v1894_v53 = vld [vmem:[#allocation2 + $0xb4] sm:$0xf]  ;;  %v3142_v21 = vrot.slane %v3140_v41, 4  ;;  %v3145_v29 = vrot.slane %v3143_v58, 5  ;;  %v3161_v8 = vrot.slane %v3159_v1, 5  ;;  %v6618_v41 = vpop.permute.xlu0 %2674 }
 0x114   : > { %v3370_v44 = vrot.slane %v3368_v40, 4  ;;  %v3156_v25 = vor.u32 %v3155_v3, %v3151_v22  ;;  %v1912_v13 = vld [vmem:[#allocation2 + $0xbc] sm:$0x1]  ;;  %v2251_v47 = vshrl.u32 %v1894_v53, 16  ;;  %v2254_v18 = vshll.u32 %v1894_v53, 16 }
 0x115   : > { %v6604_v45 = vsel %vm5813_vm11, %v5075_v9, %v3368_v40  ;;  %v3146_v54 = vor.u32 %v3145_v29, %v3142_v21  ;;  %1756 = vrot.lane.b32.xlu1 %v4984_v35, %s5675_s24  ;;  %v2264_v52 = vshrl.u32 %v6589_v16, 16  ;;  %v2312_v17 = vld [vmem:[#allocation2 + $0xb4] sm:$0xe]  ;;  %v5546_v7 = vld [vmem:[%s7616_s1 + $0x4] ss:$8 sps:$4 sm:$0xff]   ;;  %v6623_v1 = vrot.slane %v2260_v51, 5 }
 0x116   : > { %v6608_v61 = vsel %vm5813_vm11, %v3370_v44, %v3371_v27  ;;  %v3157_v31 = vrot.slane %v3156_v25, 4  ;;  %v2253_v2 = vrot.slane %v2251_v47, 4  ;;  %v2256_v55 = vrot.slane %v2254_v18, 5  ;;  %v5548_v35 = vld [vmem:[%s7616_s1] ss:$8 sps:$4 sm:$0xff]   ;;  %4009 = vmatprep.subr.bf16.mxu0 %v5546_v7  ;;  %5515 = vmatprep.subr.bf16.mxu1 %v5546_v7  ;;  %v6631_v44 = vpop.permute.xlu1 %3515 }
 0x117   : > { %v5123_v34 = vcombine.low %v6604_v45, %v6608_v61  ;;  %v3147_v58 = vrot.slane %v3146_v54, 4  ;;  %v2266_v42 = vrot.slane %v2264_v52, 4  ;;  %v2270_v40 = vshll.u32 %v1912_v13, 16  ;;  %v5549_v3 = vld [vmem:[%s7616_s1 + $0x14] ss:$8 sps:$4 sm:$0xff]   ;;  %4010 = vmatpush1.bf16.msra.mxu0 %v5548_v35  ;;  %5524 = vmatpush1.bf16.msra.mxu1 %v5548_v35 }
 0x118   : > { %v3162_v9 = vsel %vm5877_vm14, %v3157_v31, %v3161_v8  ;;  %v2257_v27 = vor.u32 %v2256_v55, %v2253_v2  ;;  %v5012_v53 = vrot.slane %v2312_v17, 9  ;;  %v2462_v21 = vrot.slane %v6589_v16, 5  ;;  %v939_v29 = vld [vmem:[#allocation2 + $0xc0] sm:$0xf]  ;;  %v5551_v25 = vld [vmem:[%s7616_s1 + $0x10] ss:$8 sps:$4 sm:$0xff]   ;;  %4011 = vmatprep.subr.bf16.mxu0 %v5549_v3  ;;  %5516 = vmatprep.subr.bf16.mxu1 %v5549_v3 }
 0x119   : > { %v3152_v47 = vsel %vm5877_vm14, %v3147_v58, %v3151_v22  ;;  %v2267_v18 = vor.u32 %v2266_v42, %v6623_v1  ;;  %v2272_v54 = vrot.slane %v2270_v40, 5  ;;  %v2465_v8 = vrot.slane %v1912_v13, 5  ;;  %v6639_v51 = vld [vmem:[#allocation2 + $0x28] sm:$0xf]  ;;  %v5552_v16 = vld [vmem:[%s7616_s1 + $0x24] ss:$8 sps:$4 sm:$0xff]  }
 0x11a   : > { %v5107_v52 = vcombine.low %v3152_v47, %v3162_v9  ;;  %v2258_v17 = vrot.slane %v2257_v27, 4  ;;  %v2463_v7 = vsel %vm5813_vm11, %v5012_v53, %v2462_v21  ;;  %v2464_v31 = vrot.slane %v2462_v21, 4  ;;  %v943_v2 = vld [vmem:[#allocation2 + $0xc8] sm:$0x1]  ;;  %v981_v58 = vld [vmem:[#allocation2 + $0x2c] sm:$0x1]  ;;  %v6679_v53 = vpop.permute.xlu1 %3595 }
 0x11b   : > { %v2268_v22 = vrot.slane %v2267_v18, 4  ;;  %v781_v13 = vsel %vm5762_vm9, %v773_v38, %v6595_v36  ;;  %v782_v55 = vrot.slane %v6583_v32, 4  ;;  %v940_v35 = vsel %vm5772_vm10, %v6592_v30, %v939_v29  ;;  %v6665_v32 = vpop.permute.xlu0 %3507  ;;  %4012 = vmatpush1.bf16.msra.mxu0 %v5551_v25  ;;  %v5554_v38 = vld [vmem:[%s7616_s1 + $0x20] ss:$8 sps:$4 sm:$0xff]   ;;  %5525 = vmatpush1.bf16.msra.mxu1 %v5551_v25  ;;  %v6695_v45 = vld [vmem:[#allocation2 + $0xc] sm:$0xf] }
 0x11c   : > { %3525 = vrot.lane.b32.xlu0 %v5107_v52, %s5676_s25  ;;  %v2263_v42 = vsel %vm5877_vm14, %v2258_v17, %v6623_v1  ;;  %v2466_v40 = vsel %vm5813_vm11, %v2464_v31, %v2465_v8  ;;  %941 = vst [vmem:[#allocation2 + $0xc0] sm:$0xf] %v940_v35  ;;  %942 = vst.msk [vmem:[#allocation2 + $0xc4] sm:$0xf] %vm259_vm5, %v781_v13  ;;  %v1075_v39 = vrot.slane %v1073_v24, 5  ;;  %v1079_v14 = vshll.u32 %v6639_v51, 16 }
 0x11d   : > { %v2273_v30 = vsel %vm5877_vm14, %v2268_v22, %v2272_v54  ;;  %v5060_v36 = vcombine.low %v2463_v7, %v2466_v40  ;;  %v944_v1 = vsel %vm5720_vm2, %v782_v55, %v943_v2  ;;  %v1083_v49 = vshrl.u32 %v6639_v51, 16  ;;  %4013 = vmatprep.subr.bf16.mxu0 %v5552_v16  ;;  %v5555_v24 = vld [vmem:[%s7616_s1 + $0x34] ss:$8 sps:$4 sm:$0xff]   ;;  %5517 = vmatprep.subr.bf16.mxu1 %v5552_v16  ;;  %v6693_v17 = vld [vmem:[#allocation2 + $0x10] sm:$0xf] }
 0x11e   : > { %945 = vst [vmem:[#allocation2 + $0xc8] sm:$0x1] %v944_v1  ;;  %v1076_v3 = vor.u32 %v1075_v39, %v6586_v19  ;;  %v1081_v9 = vrot.slane %v1079_v14, 5  ;;  %v1089_v27 = vshll.u32 %v981_v58, 16  ;;  %v4937_v29 = vrot.slane %v1384_v50, 9 }
 0x11f   : > { %2694 = vrot.lane.b32.xlu1 %v5060_v36, %s5675_s24  ;;  %v1085_v21 = vrot.slane %v1083_v49, 4  ;;  %v1471_v47 = vrot.slane %v6639_v51, 5  ;;  %v1474_v18 = vrot.slane %v981_v58, 5  ;;  %v5044_v25 = vcombine.low %v2263_v42, %v2273_v30  ;;  %4014 = vmatpush1.bf16.msra.mxu0 %v5554_v38  ;;  %v5557_v19 = vld [vmem:[%s7616_s1 + $0x30] ss:$8 sps:$4 sm:$0xff]  }
 0x120   : > { %3605 = vrot.lane.b32.xlu0 %v5123_v34, %s5675_s24  ;;  %v1077_v54 = vrot.slane %v1076_v3, 4  ;;  %v1091_v16 = vrot.slane %v1089_v27, 5  ;;  %4015 = vmatprep.subr.bf16.mxu0 %v5555_v24  ;;  %v5558_v51 = vld [vmem:[%s7616_s1 + $0x44] ss:$8 sps:$4 sm:$0xff]   ;;  %v6699_v34 = vpop.permute.xlu0 %3587  ;;  %v5560_v7 = vld [vmem:[%s7616_s1 + $0x40] ss:$8 sps:$4 sm:$0xff]  }
 0x121   : > { %v1086_v8 = vor.u32 %v1085_v21, %v1081_v9  ;;  %v1473_v52 = vrot.slane %v1471_v47, 4  ;;  %5526 = vmatpush1.bf16.msra.mxu1 %v5554_v38  ;;  %v6708_v55 = vsel %vm5813_vm11, %v4937_v29, %v1471_v47  ;;  %v5563_v58 = vld [vmem:[%s7616_s1 + $0x54] ss:$8 sps:$4 sm:$0xff]   ;;  %v6718_v38 = vpop.permute.xlu1 %2604  ;;  %v6722_v36 = vld [vmem:[#allocation2 + $0x18] sm:$0xf] }
 0x122   : > { %5518 = vmatprep.subr.bf16.mxu1 %v5555_v24  ;;  %v1082_v22 = vsel %vm5877_vm14, %v1077_v54, %v1081_v9  ;;  %v6720_v30 = vld [vmem:[#allocation2 + $0x1c] sm:$0xf] }
 0x123   : > { %v2807_v31 = vld [vmem:[#allocation2 + $0xc0] sm:$0xf]  ;;  %v2808_v2 = vld [vmem:[#allocation2 + $0xc4] sm:$0xf]  ;;  %v1087_v13 = vrot.slane %v1086_v8, 4  ;;  %v6712_v35 = vsel %vm5813_vm11, %v1473_v52, %v1474_v18  ;;  %4016 = vmatpush1.bf16.msra.mxu0 %v5557_v19 }
 0x124   : > { %2614 = vrot.lane.b32.xlu0 %v5044_v25, %s5676_s25  ;;  %v3164_v42 = vshrl.u32 %v2807_v31, 16  ;;  %v3167_v40 = vshll.u32 %v2807_v31, 16  ;;  %v3173_v39 = vshll.u32 %v2808_v2, 16  ;;  %v3177_v14 = vshrl.u32 %v2808_v2, 16  ;;  %v3225_v50 = vld [vmem:[#allocation2 + $0xc0] sm:$0xe]  ;;  %4017 = vmatprep.subr.bf16.mxu0 %v5558_v51 }
 0x125   : > { %v2825_v49 = vld [vmem:[#allocation2 + $0xc8] sm:$0x1]  ;;  %v1092_v24 = vsel %vm5877_vm14, %v1087_v13, %v1091_v16  ;;  %v5076_v3 = vrot.slane %v3225_v50, 9  ;;  %v3375_v9 = vrot.slane %v2808_v2, 5  ;;  %v1896_v27 = vld [vmem:[#allocation2 + $0xc0] sm:$0xf]  ;;  %5527 = vmatpush1.bf16.msra.mxu1 %v5557_v19  ;;  %v4985_v31 = vcombine.low %v6708_v55, %v6712_v35 }
 0x126   : > { %v3166_v21 = vrot.slane %v3164_v42, 4  ;;  %v3169_v29 = vrot.slane %v3167_v40, 5  ;;  %v3175_v47 = vrot.slane %v3173_v39, 5  ;;  %v3179_v18 = vrot.slane %v3177_v14, 4  ;;  %v1897_v25 = vld [vmem:[#allocation2 + $0xc4] sm:$0xf]  ;;  %5519 = vmatprep.subr.bf16.mxu1 %v5558_v51  ;;  %v6732_v42 = vpop.permute.xlu0 %2596 }
 0x127   : > { %v3183_v54 = vshll.u32 %v2825_v49, 16  ;;  %v4969_v8 = vcombine.low %v1082_v22, %v1092_v24  ;;  %v3377_v52 = vrot.slane %v3375_v9, 4  ;;  %v6730_v1 = vld [vmem:[#allocation2 + $0xc8] sm:$0x1]  ;;  %v3378_v13 = vrot.slane %v2825_v49, 5  ;;  %4018 = vmatpush1.bf16.msra.mxu0 %v5560_v7 }
 0x128   : > { %v3170_v16 = vor.u32 %v3169_v29, %v3166_v21  ;;  %v3180_v2 = vor.u32 %v3179_v18, %v3175_v47  ;;  %v2275_v50 = vshrl.u32 %v1896_v27, 16  ;;  %v2313_v19 = vld [vmem:[#allocation2 + $0xc0] sm:$0xe]  ;;  %v5565_v51 = vld [vmem:[%s7616_s1 + $0x50] ss:$8 sps:$4 sm:$0xff]   ;;  %v2278_v22 = vshll.u32 %v1896_v27, 16  ;;  %4019 = vmatprep.subr.bf16.mxu0 %v5563_v58  ;;  %v6745_v29 = vpop.permute.xlu1 %2684 }
 0x129   : > { %v3185_v40 = vrot.slane %v3183_v54, 5  ;;  %1678 = vrot.lane.b32.xlu1 %v4969_v8, %s5676_s25  ;;  %v2284_v39 = vshll.u32 %v1897_v25, 16  ;;  %v2288_v55 = vshrl.u32 %v1897_v25, 16  ;;  %v5566_v35 = vld [vmem:[%s7616_s1 + $0x64] ss:$8 sps:$4 sm:$0xff]   ;;  %v6743_v24 = vsel %vm5813_vm11, %v5076_v3, %v3375_v9  ;;  %5528 = vmatpush1.bf16.msra.mxu1 %v5560_v7 }
 0x12a   : > { %v3171_v14 = vrot.slane %v3170_v16, 4  ;;  %v3181_v49 = vrot.slane %v3180_v2, 4  ;;  %v2277_v21 = vrot.slane %v2275_v50, 4  ;;  %v3379_v27 = vsel %vm5813_vm11, %v3377_v52, %v3378_v13  ;;  %5520 = vmatprep.subr.bf16.mxu1 %v5563_v58  ;;  %v5568_v7 = vld [vmem:[%s7616_s1 + $0x60] ss:$8 sps:$4 sm:$0xff]  }
 0x12b   : > { %v2280_v18 = vrot.slane %v2278_v22, 5  ;;  %v2286_v54 = vrot.slane %v2284_v39, 5  ;;  %v2290_v8 = vrot.slane %v2288_v55, 4  ;;  %v2294_v3 = vshll.u32 %v6730_v1, 16  ;;  %4020 = vmatpush1.bf16.msra.mxu0 %v5565_v51  ;;  %v5593_v22 = vld [vmem:[#allocation2 + $0x1c] sm:$0xf] }
 0x12c   : > { %v3176_v61 = vsel %vm5877_vm14, %v3171_v14, %v3175_v47  ;;  %v3186_v16 = vsel %vm5877_vm14, %v3181_v49, %v3185_v40  ;;  %v5013_v9 = vrot.slane %v2313_v19, 9  ;;  %v2469_v58 = vrot.slane %v1897_v25, 5  ;;  %4021 = vmatprep.subr.bf16.mxu0 %v5566_v35  ;;  %v5570_v47 = vld [vmem:[%s7616_s1 + $0x74] ss:$8 sps:$4 sm:$0xff]   ;;  %v5594_v39 = vld [vmem:[#allocation2 + $0x18] sm:$0xf]  ;;  %v6763_v14 = vpop.permute.xlu0 %2676 }
 0x12d   : > { %v5108_v2 = vcombine.low %v3176_v61, %v3186_v16  ;;  %1758 = vrot.lane.b32.xlu1 %v4985_v31, %s5675_s24  ;;  %v2281_v52 = vor.u32 %v2280_v18, %v2277_v21  ;;  %v2291_v13 = vor.u32 %v2290_v8, %v2286_v54  ;;  %v5124_v50 = vcombine.low %v6743_v24, %v3379_v27  ;;  %v5595_v21 = vld [vmem:[#allocation2 + $0x28] sm:$0xf]  ;;  %v5596_v24 = vld [vmem:[#allocation2 + $0x24] sm:$0xf]  ;;  %v322_v18 = vld [vmem:[#allocation2 + $0xcc] sm:$0x1] }
 0x12e   : > { %v2296_v40 = vrot.slane %v2294_v3, 5  ;;  %v2472_v19 = vrot.slane %v6730_v1, 5  ;;  %v5078_v55 = vcombine.low %v5594_v39, %v5593_v22  ;;  %5529 = vmatpush1.bf16.msra.mxu1 %v5565_v51  ;;  %v2470_v31 = vsel %vm5813_vm11, %v5013_v9, %v2469_v58  ;;  %v6768_v1 = vpop.permute.xlu1 %3517  ;;  %v5572_v51 = vld [vmem:[%s7616_s1 + $0x70] ss:$8 sps:$4 sm:$0xff]   ;;  %v5597_v8 = vld [vmem:[#allocation2 + $0x28] sm:$0xf] }
 0x12f   : > { %3527 = vrot.lane.b32.xlu0 %v5108_v2, %s5676_s25  ;;  %v2282_v61 = vrot.slane %v2281_v52, 4  ;;  %v2292_v25 = vrot.slane %v2291_v13, 4  ;;  %v2471_v49 = vrot.slane %v2469_v58, 4  ;;  %5521 = vmatprep.subr.bf16.mxu1 %v5566_v35  ;;  %v5079_v27 = vcombine.low %v5596_v24, %v5595_v21  ;;  %v5598_v16 = vld [vmem:[#allocation2 + $0x24] sm:$0xf] }
 0x130   : > { %4022 = vmatpush1.bf16.msra.mxu0 %v5568_v7  ;;  %v5016_v3 = vcombine.low %v5598_v16, %v5597_v8  ;;  %v378_v52 = vld [vmem:[#allocation2 + $0xd4] sm:$0x1]  ;;  %v6779_v13 = vld [vmem:[#allocation2 + $0xd0] sm:$0xf]  ;;  %v5573_v58 = vld [vmem:[%s7616_s1 + $0x84] ss:$8 sps:$4 sm:$0xff]   ;;  %v7633_v22 = vcombine.low %v6695_v45, %v6693_v17  ;;  %v7634_v21 = vcombine.low %v6722_v36, %v6720_v30 }
 0x131   : > { %v2287_v2 = vsel %vm5877_vm14, %v2282_v61, %v2286_v54  ;;  %v2297_v35 = vsel %vm5877_vm14, %v2292_v25, %v2296_v40  ;;  %v2473_v9 = vsel %vm5813_vm11, %v2471_v49, %v2472_v19  ;;  %4023 = vmatprep.subr.bf16.mxu0 %v5570_v47  ;;  %v5599_v39 = vld [vmem:[#allocation2 + $0x34] sm:$0xf]  ;;  %v5600_v61 = vld [vmem:[#allocation2 + $0x30] sm:$0xf]  ;;  %v3613_v19 = vsel %vm1784_vm15, %v5078_v55, %v6558_v60  ;;  %v962_v49 = vld [vmem:[#allocation2 + $0x60] sm:$0xf] }
 0x132   : > { %v2700_v54 = vsel %vm1784_vm15, %v7633_v22, %v6429_v20  ;;  %v5080_v40 = vcombine.low %v5600_v61, %v5599_v39  ;;  %v5061_v25 = vcombine.low %v2470_v31, %v2473_v9  ;;  %5530 = vmatpush1.bf16.msra.mxu1 %v5568_v7  ;;  %v2703_v24 = vsel %vm1784_vm15, %v7634_v21, %v6453_v6  ;;  %v6799_v45 = vld [vmem:[#allocation2 + $0x64] sm:$0xf]  ;;  %v954_v31 = vld [vmem:[#allocation2 + $0x30] sm:$0xf]  ;;  %v5601_v60 = vld [vmem:[#allocation2 + $0x3c] sm:$0xf] }
 0x133   : > { %3607 = vrot.lane.b32.xlu0 %v5124_v50, %s5675_s24  ;;  %v5045_v17 = vcombine.low %v2287_v2, %v2297_v35  ;;  %v323_v20 = vsel %vm5720_vm2, 0, %v322_v18  ;;  %5522 = vmatprep.subr.bf16.mxu1 %v5570_v47  ;;  %v5602_v7 = vld [vmem:[#allocation2 + $0x40] sm:$0xf]  ;;  %v379_v6 = vsel %vm5730_vm4, 0, %v378_v52  ;;  %v3197_v30 = vshll.u32 %v6779_v13, 16  ;;  %v6806_v50 = vpop.permute.xlu0 %3509 }
 0x134   : > { %2696 = vrot.lane.b32.xlu1 %v5061_v25, %s5675_s24  ;;  %v5081_v55 = vcombine.low %v5601_v60, %v5602_v7  ;;  %324 = vst [vmem:[#allocation2 + $0xcc] sm:$0x1] %v323_v20  ;;  %v3201_v36 = vshrl.u32 %v6779_v13, 16  ;;  %4024 = vmatpush1.bf16.msra.mxu0 %v5572_v51  ;;  %v3616_v47 = vsel %vm1784_vm15, %v5079_v27, %v6477_v62  ;;  %380 = vst [vmem:[#allocation2 + $0xd4] sm:$0x1] %v379_v6  ;;  %v6825_v62 = vpop.permute.xlu1 %3597  ;;  %vm3820_vm2 = vcmask 785408  }
 0x135   : > { %v3660_v18 = vsel %vm1833_vm0, %v3613_v19, %v6402_v37  ;;  %v1190_v4 = vshrl.u32 %v962_v49, 16  ;;  %v1193_v8 = vshll.u32 %v962_v49, 16  ;;  %4025 = vmatprep.subr.bf16.mxu0 %v5573_v58  ;;  %v6817_v16 = vsel %vm1784_vm15, %v5016_v3, %v6505_v23  ;;  %v6823_v52 = vld [vmem:[#allocation2 + $0x34] sm:$0xf]  ;;  %v5604_v27 = vld [vmem:[#allocation2 + $0x30] sm:$0xf] }
 0x136   : > { %v3619_v2 = vsel %vm1784_vm15, %v5080_v40, %v6520_v11  ;;  %v6821_v35 = vrot.slane %v3197_v30, 5  ;;  %v3203_v9 = vrot.slane %v3201_v36, 4  ;;  %5531 = vmatpush1.bf16.msra.mxu1 %v5572_v51  ;;  %v5603_v37 = vld [vmem:[#allocation2 + $0x34] sm:$0xf]  ;;  %v1199_v39 = vshll.u32 %v6799_v45, 16 }
 0x137   : > { %2616 = vrot.lane.b32.xlu0 %v5045_v17, %s5676_s25  ;;  %v5017_v22 = vcombine.low %v5604_v27, %v5603_v37  ;;  %v1203_v23 = vshrl.u32 %v6799_v45, 16  ;;  %v1094_v3 = vshrl.u32 %v954_v31, 16  ;;  %5523 = vmatprep.subr.bf16.mxu1 %v5573_v58  ;;  %v2747_v11 = vsel %vm1833_vm0, %v2700_v54, %v6416_v59  ;;  %v6837_v40 = vld [vmem:[#allocation2 + $0x38] sm:$0x1]  ;;  %v6843_v54 = vld [vmem:[#allocation2 + $0x68] sm:$0x1]  ;;  %v6846_v17 = vpop.permute.xlu0 %3589 }
 0x138   : > { %v3622_v61 = vsel %vm1784_vm15, %v5081_v55, %v6566_v57  ;;  %v2749_v51 = vsel %vm1833_vm0, %v2703_v24, %v6426_v15  ;;  %3755 = vrot.lane.b32.xlu1 %v3660_v18, %s5678_s16  ;;  %v1097_v25 = vshll.u32 %v954_v31, 16  ;;  %4026 = vmatpush1.bf16.msra.mxu0 %v5575_v0  ;;  %v1192_v19 = vrot.slane %v1190_v4, 4 }
 0x139   : > { %v1195_v49 = vrot.slane %v1193_v8, 5  ;;  %v1096_v21 = vrot.slane %v1094_v3, 4  ;;  %v1103_v58 = vshll.u32 %v6823_v52, 16  ;;  %v3662_v59 = vsel %vm1833_vm0, %v3616_v47, %v6450_v12 }
 0x13a   : > { %v3204_v57 = vor.u32 %v3203_v9, %v6821_v35  ;;  %v1099_v15 = vrot.slane %v1097_v25, 5  ;;  %v1107_v24 = vshrl.u32 %v6823_v52, 16  ;;  %5532 = vmatpush1.bf16.msra.mxu1 %v5575_v0  ;;  %v6849_v31 = vrot.slane %v1199_v39, 5  ;;  %v6855_v0 = vpop.permute.xlu1 %2606  ;;  %v3226_v25 = vld [vmem:[#allocation2 + $0xcc] sm:$0xe] }
 0x13b   : > { %3707 = vrot.lane.b32.xlu0 %v2747_v11, %s5679_s17  ;;  %v2809_v20 = vld [vmem:[#allocation2 + $0xcc] sm:$0xf]  ;;  %v1205_v60 = vrot.slane %v1203_v23, 4  ;;  %v1105_v7 = vrot.slane %v1103_v58, 5  ;;  %v1113_v12 = vshll.u32 %v6837_v40, 16  ;;  %v3664_v55 = vsel %vm1833_vm0, %v3619_v2, %v6491_v63  ;;  %v6866_v58 = vpop.permute.xlu0 %2598 }
 0x13c   : > { %3757 = vrot.lane.b32.xlu1 %v3662_v59, %s5678_s16  ;;  %v2826_v6 = vld [vmem:[#allocation2 + $0xd4] sm:$0x1]  ;;  %v3188_v30 = vshrl.u32 %v2809_v20, 16  ;;  %v3191_v36 = vshll.u32 %v2809_v20, 16  ;;  %v1100_v47 = vor.u32 %v1099_v15, %v1096_v21  ;;  %v1196_v4 = vor.u32 %v1195_v49, %v1192_v19 }
 0x13d   : > { %v3207_v18 = vshll.u32 %v2826_v6, 16  ;;  %v1209_v8 = vshll.u32 %v6843_v54, 16  ;;  %v1109_v9 = vrot.slane %v1107_v24, 4  ;;  %v3205_v39 = vrot.slane %v3204_v57, 4 }
 0x13e   : > { %v3190_v37 = vrot.slane %v3188_v30, 4  ;;  %v3193_v27 = vrot.slane %v3191_v36, 5  ;;  %v1101_v23 = vrot.slane %v1100_v47, 4  ;;  %v1206_v63 = vor.u32 %v1205_v60, %v6849_v31  ;;  %v1389_v60 = vld [vmem:[#allocation2 + $0x60] sm:$0xe] }
 0x13f   : > { %3709 = vrot.lane.b32.xlu0 %v2749_v51, %s5679_s17  ;;  %v3209_v3 = vrot.slane %v3207_v18, 5  ;;  %v1110_v2 = vor.u32 %v1109_v9, %v1105_v7  ;;  %v1115_v11 = vrot.slane %v1113_v12, 5  ;;  %v2709_v21 = vsel %vm1784_vm15, %v5017_v22, %v6547_v43 }
 0x140   : > { %v2751_v19 = vsel %vm1833_vm0, %v6817_v16, %v6471_v48  ;;  %3759 = vrot.lane.b32.xlu1 %v3664_v55, %s5678_s16  ;;  %v3194_v49 = vor.u32 %v3193_v27, %v3190_v37  ;;  %v3666_v51 = vsel %vm1833_vm0, %v3622_v61, %v6539_v26  ;;  %v1211_v59 = vrot.slane %v1209_v8, 5  ;;  %v6873_v48 = vpop.permute.xlu1 %2686  ;;  %v1385_v55 = vld [vmem:[#allocation2 + $0x30] sm:$0xe]  ;;  %v956_v8 = vld [vmem:[#allocation2 + $0x3c] sm:$0xf]  ;;  %v6898_v27 = vpop.permute.xlu0 %2678 }
 0x141   : > { %v1106_v57 = vsel %vm5877_vm14, %v1101_v23, %v1105_v7  ;;  %v1111_v15 = vrot.slane %v1110_v2, 4  ;;  %v1197_v20 = vrot.slane %v1196_v4, 4  ;;  %v5077_v43 = vrot.slane %v3226_v25, 9  ;;  %v6896_v37 = vld [vmem:[#allocation2 + $0x40] sm:$0xf] }
 0x142   : > { %v3195_v24 = vrot.slane %v3194_v49, 4  ;;  %v3382_v22 = vrot.slane %v6779_v13, 5  ;;  %v3210_v16 = vsel %vm5877_vm14, %v3205_v39, %v3209_v3  ;;  %v1207_v12 = vrot.slane %v1206_v63, 4  ;;  %v5606_v49 = vld [vmem:[#allocation2 + $0x40] sm:$0xf] }
 0x143   : > { %3711 = vrot.lane.b32.xlu0 %v2751_v19, %s5679_s17  ;;  %v1116_v26 = vsel %vm5877_vm14, %v1111_v15, %v1115_v11  ;;  %v3385_v61 = vrot.slane %v2826_v6, 5  ;;  %v1478_v30 = vrot.slane %v6823_v52, 5  ;;  %v2753_v47 = vsel %vm1833_vm0, %v2709_v21, %v6518_v10  ;;  %v5605_v19 = vld [vmem:[#allocation2 + $0x3c] sm:$0xf] }
 0x144   : > { %v3200_v7 = vsel %vm5877_vm14, %v3195_v24, %v6821_v35  ;;  %3761 = vrot.lane.b32.xlu1 %v3666_v51, %s5678_s16  ;;  %v4970_v13 = vcombine.low %v1106_v57, %v1116_v26  ;;  %v3384_v36 = vrot.slane %v3382_v22, 4  ;;  %v3383_v18 = vsel %vm5813_vm11, %v5077_v43, %v3382_v22  ;;  %v5608_v57 = vld [vmem:[#allocation2 + $0x6c] sm:$0xf] }
 0x145   : > { %v4942_v4 = vrot.slane %v1389_v60, 9  ;;  %v1202_v6 = vsel %vm5877_vm14, %v1197_v20, %v6849_v31  ;;  %v1506_v9 = vrot.slane %v6799_v45, 5  ;;  %v1509_v52 = vrot.slane %v6843_v54, 5  ;;  %v6905_v54 = vpop.permute.xlu1 %3519 }
 0x146   : > { %v3386_v35 = vsel %vm5813_vm11, %v3384_v36, %v3385_v61  ;;  %v5109_v10 = vcombine.low %v3200_v7, %v3210_v16  ;;  %v1212_v39 = vsel %vm5877_vm14, %v1207_v12, %v1211_v59  ;;  %v4938_v23 = vrot.slane %v1385_v55, 9  ;;  %v5607_v59 = vld [vmem:[#allocation2 + $0x70] sm:$0xf]  ;;  %v6916_v16 = vld [vmem:[#allocation2 + $0x6c] sm:$0xf]  ;;  %v6925_v55 = vpop.permute.xlu0 %3511 }
 0x147   : > { %3713 = vrot.lane.b32.xlu0 %v2753_v47, %s5679_s17  ;;  %v1481_v31 = vrot.slane %v6837_v40, 5  ;;  %v1480_v3 = vrot.slane %v1478_v30, 4  ;;  %v5125_v63 = vcombine.low %v3383_v18, %v3386_v35  ;;  %v1508_v45 = vrot.slane %v1506_v9, 4  ;;  %v6921_v61 = vld [vmem:[#allocation2 + $0x44] sm:$0x1] }
 0x148   : > { %1680 = vrot.lane.b32.xlu1 %v4970_v13, %s5676_s25  ;;  %v1118_v2 = vshrl.u32 %v956_v8, 16  ;;  %v1507_v11 = vsel %vm5813_vm11, %v4942_v4, %v1506_v9  ;;  %v1121_v25 = vshll.u32 %v956_v8, 16  ;;  %v1127_v21 = vshll.u32 %v6896_v37, 16  ;;  %v5609_v36 = vld [vmem:[#allocation2 + $0x48] sm:$0xf] }
 0x149   : > { %v5018_v51 = vcombine.low %v5605_v19, %v5606_v49  ;;  %v5022_v40 = vcombine.low %v5608_v57, %v5607_v59  ;;  %v1510_v15 = vsel %vm5813_vm11, %v1508_v45, %v1509_v52  ;;  %v1131_v24 = vshrl.u32 %v6896_v37, 16  ;;  %v5610_v47 = vld [vmem:[#allocation2 + $0x4c] sm:$0xf]  ;;  %v5611_v18 = vld [vmem:[#allocation2 + $0x78] sm:$0xf] }
 0x14a   : > { %v4974_v20 = vcombine.low %v1202_v6, %v1212_v39  ;;  %v1479_v43 = vsel %vm5813_vm11, %v4938_v23, %v1478_v30  ;;  %v1120_v22 = vrot.slane %v1118_v2, 4  ;;  %v1123_v60 = vrot.slane %v1121_v25, 5  ;;  %v5612_v4 = vld [vmem:[#allocation2 + $0x7c] sm:$0xf]  ;;  %v6927_v6 = vld [vmem:[#allocation2 + $0x70] sm:$0xf]  ;;  %v6936_v39 = vpop.permute.xlu1 %3599 }
 0x14b   : > { %3529 = vrot.lane.b32.xlu0 %v5109_v10, %s5676_s25  ;;  %v1482_v12 = vsel %vm5813_vm11, %v1480_v3, %v1481_v31  ;;  %v4990_v26 = vcombine.low %v1507_v11, %v1510_v15  ;;  %v6923_v7 = vrot.slane %v1127_v21, 5  ;;  %v1133_v13 = vrot.slane %v1131_v24, 4  ;;  %v6933_v52 = vld [vmem:[#allocation2 + $0x74] sm:$0x1]  ;;  %v6950_v49 = vld [vmem:[#allocation2 + $0x48] sm:$0xf] }
 0x14c   : > { %3609 = vrot.lane.b32.xlu1 %v5125_v63, %s5675_s24  ;;  %v5082_v30 = vcombine.low %v5609_v36, %v5610_v47  ;;  %v5086_v8 = vcombine.low %v5611_v18, %v5612_v4  ;;  %v2712_v35 = vsel %vm1784_vm15, %v5018_v51, %v6597_v33  ;;  %v2724_v9 = vsel %vm1784_vm15, %v5022_v40, %v6574_v46  ;;  %v6952_v51 = vld [vmem:[#allocation2 + $0x4c] sm:$0xf]  ;;  %v6956_v57 = vld [vmem:[#allocation2 + $0x78] sm:$0xf]  ;;  %v6958_v40 = vld [vmem:[#allocation2 + $0x7c] sm:$0xf] }
 0x14d   : > { %v1214_v10 = vshrl.u32 %v6916_v16, 16  ;;  %v4986_v23 = vcombine.low %v1479_v43, %v1482_v12  ;;  %v1124_v31 = vor.u32 %v1123_v60, %v1120_v22  ;;  %v1137_v3 = vshll.u32 %v6921_v61, 16  ;;  %v1386_v60 = vld [vmem:[#allocation2 + $0x3c] sm:$0xe] }
 0x14e   : > { %v1217_v63 = vshll.u32 %v6916_v16, 16  ;;  %v1134_v33 = vor.u32 %v1133_v13, %v6923_v7  ;;  %v1223_v46 = vshll.u32 %v6927_v6, 16  ;;  %v1227_v2 = vshrl.u32 %v6927_v6, 16  ;;  %v6969_v18 = vpop.permute.xlu1 %2608 }
 0x14f   : > { %1688 = vrot.lane.b32.xlu0 %v4974_v20, %s5676_s25  ;;  %v1216_v45 = vrot.slane %v1214_v10, 4  ;;  %v3625_v11 = vsel %vm1784_vm15, %v5082_v30, %v6665_v32  ;;  %v3637_v25 = vsel %vm1784_vm15, %v5086_v8, %v6631_v44  ;;  %v1233_v19 = vshll.u32 %v6933_v52, 16  ;;  %v1390_v44 = vld [vmem:[#allocation2 + $0x6c] sm:$0xe]  ;;  %v6962_v20 = vpop.permute.xlu0 %3591 }
 0x150   : > { %1768 = vrot.lane.b32.xlu1 %v4990_v26, %s5675_s24  ;;  %v1219_v21 = vrot.slane %v1217_v63, 5  ;;  %v5019_v59 = vcombine.low %v6950_v49, %v6952_v51  ;;  %v5023_v32 = vcombine.low %v6956_v57, %v6958_v40  ;;  %v1225_v15 = vrot.slane %v1223_v46, 5 }
 0x151   : > { %v1229_v24 = vrot.slane %v1227_v2, 4  ;;  %v2763_v43 = vsel %vm1833_vm0, %v2724_v9, %v6600_v5  ;;  %v1139_v22 = vrot.slane %v1137_v3, 5  ;;  %v1485_v12 = vrot.slane %v6896_v37, 5  ;;  %v6973_v5 = vld [vmem:[#allocation2 + $0x48] sm:$0xf] }
 0x152   : > { %v1220_v26 = vor.u32 %v1219_v21, %v1216_v45  ;;  %v1125_v13 = vrot.slane %v1124_v31, 4  ;;  %v1135_v36 = vrot.slane %v1134_v33, 4  ;;  %v1235_v30 = vrot.slane %v1233_v19, 5 }
 0x153   : > { %1760 = vrot.lane.b32.xlu0 %v4986_v23, %s5675_s24  ;;  %v1230_v47 = vor.u32 %v1229_v24, %v1225_v15  ;;  %v4943_v8 = vrot.slane %v1390_v44, 9  ;;  %v1513_v10 = vrot.slane %v6927_v6, 5  ;;  %v1516_v23 = vrot.slane %v6933_v52, 5  ;;  %v6983_v52 = vld [vmem:[#allocation2 + $0x4c] sm:$0xf]  ;;  %v6994_v2 = vpop.permute.xlu0 %2600 }
 0x154   : > { %3723 = vrot.lane.b32.xlu1 %v2763_v43, %s5679_s17  ;;  %v1221_v4 = vrot.slane %v1220_v26, 4  ;;  %v2755_v37 = vsel %vm1833_vm0, %v2712_v35, %v6618_v41  ;;  %v3676_v9 = vsel %vm1833_vm0, %v3637_v25, %v6679_v53  ;;  %v4939_v31 = vrot.slane %v1386_v60, 9  ;;  %v5618_v24 = vld [vmem:[#allocation2 + $0x58] sm:$0xf]  ;;  %v7005_v26 = vpop.permute.xlu1 %2688 }
 0x155   : > { %v1231_v3 = vrot.slane %v1230_v47, 4  ;;  %v1487_v63 = vrot.slane %v1485_v12, 4  ;;  %v1488_v33 = vrot.slane %v6921_v61, 5  ;;  %v1515_v46 = vrot.slane %v1513_v10, 4 }
 0x156   : > { %v1226_v45 = vsel %vm5877_vm14, %v1221_v4, %v1225_v15  ;;  %v1130_v41 = vsel %vm5877_vm14, %v1125_v13, %v6923_v7  ;;  %v1140_v53 = vsel %vm5877_vm14, %v1135_v36, %v1139_v22  ;;  %v1142_v61 = vshrl.u32 %v6973_v5, 16  ;;  %v5617_v15 = vld [vmem:[#allocation2 + $0x54] sm:$0xf]  ;;  %v7010_v4 = vld [vmem:[#allocation2 + $0x78] sm:$0xf] }
 0x157   : > { %3715 = vrot.lane.b32.xlu0 %v2755_v37, %s5679_s17  ;;  %v1236_v35 = vsel %vm5877_vm14, %v1231_v3, %v1235_v30  ;;  %v1514_v21 = vsel %vm5813_vm11, %v4943_v8, %v1513_v10  ;;  %v1517_v19 = vsel %vm5813_vm11, %v1515_v46, %v1516_v23  ;;  %v1145_v7 = vshll.u32 %v6973_v5, 16  ;;  %v5619_v37 = vld [vmem:[#allocation2 + $0x88] sm:$0xf] }
 0x158   : > { %3771 = vrot.lane.b32.xlu1 %v3676_v9, %s5678_s16  ;;  %v4975_v25 = vcombine.low %v1226_v45, %v1236_v35  ;;  %v5083_v44 = vcombine.low %v5617_v15, %v5618_v24  ;;  %v3668_v43 = vsel %vm1833_vm0, %v3625_v11, %v6699_v34  ;;  %v1151_v22 = vshll.u32 %v6983_v52, 16  ;;  %v7015_v11 = vld [vmem:[#allocation2 + $0x50] sm:$0x1]  ;;  %v5620_v9 = vld [vmem:[#allocation2 + $0x84] sm:$0xf] }
 0x159   : > { %v1155_v60 = vshrl.u32 %v6983_v52, 16  ;;  %v4971_v13 = vcombine.low %v1130_v41, %v1140_v53  ;;  %v1486_v36 = vsel %vm5813_vm11, %v4939_v31, %v1485_v12  ;;  %v1144_v47 = vrot.slane %v1142_v61, 4  ;;  %v7019_v45 = vld [vmem:[#allocation2 + $0x7c] sm:$0xf]  ;;  %v7036_v41 = vpop.permute.xlu0 %2680  ;;  %v7049_v35 = vld [vmem:[#allocation2 + $0x54] sm:$0xf] }
 0x15a   : > { %v1147_v30 = vrot.slane %v1145_v7, 5  ;;  %v1489_v8 = vsel %vm5813_vm11, %v1487_v63, %v1488_v33  ;;  %v4991_v34 = vcombine.low %v1514_v21, %v1517_v19  ;;  %v7017_v10 = vrot.slane %v1151_v22, 5  ;;  %v7033_v33 = vld [vmem:[#allocation2 + $0x80] sm:$0x1]  ;;  %v7051_v61 = vld [vmem:[#allocation2 + $0x58] sm:$0xf] }
 0x15b   : > { %3763 = vrot.lane.b32.xlu0 %v3668_v43, %s5678_s16  ;;  %v1157_v23 = vrot.slane %v1155_v60, 4  ;;  %v5087_v3 = vcombine.low %v5620_v9, %v5619_v37  ;;  %v2715_v12 = vsel %vm1784_vm15, %v5019_v59, %v6732_v42  ;;  %v2727_v31 = vsel %vm1784_vm15, %v5023_v32, %v6718_v38  ;;  %v5623_v7 = vld [vmem:[#allocation2 + $0x84] sm:$0xf]  ;;  %v5624_v15 = vld [vmem:[#allocation2 + $0x88] sm:$0xf] }
 0x15c   : > { %1690 = vrot.lane.b32.xlu1 %v4975_v25, %s5676_s25  ;;  %v3628_v63 = vsel %vm1784_vm15, %v5083_v44, %v6806_v50  ;;  %v1238_v46 = vshrl.u32 %v7010_v4, 16  ;;  %v4987_v49 = vcombine.low %v1486_v36, %v1489_v8  ;;  %v1148_v51 = vor.u32 %v1147_v30, %v1144_v47  ;;  %v1391_v60 = vld [vmem:[#allocation2 + $0x78] sm:$0xe]  ;;  %v7062_v30 = vld [vmem:[#allocation2 + $0x54] sm:$0xf] }
 0x15d   : > { %v1161_v42 = vshll.u32 %v7015_v11, 16  ;;  %v1241_v59 = vshll.u32 %v7010_v4, 16  ;;  %v1158_v38 = vor.u32 %v1157_v23, %v7017_v10  ;;  %v1247_v50 = vshll.u32 %v7019_v45, 16  ;;  %v1387_v23 = vld [vmem:[#allocation2 + $0x48] sm:$0xe]  ;;  %v7065_v9 = vpop.permute.xlu0 %3513 }
 0x15e   : > { %v1240_v57 = vrot.slane %v1238_v46, 4  ;;  %v1251_v40 = vshrl.u32 %v7019_v45, 16  ;;  %v7045_v32 = vpop.permute.xlu1 %3521  ;;  %v3640_v53 = vsel %vm1784_vm15, %v5087_v3, %v6768_v1  ;;  %v5020_v25 = vcombine.low %v7049_v35, %v7051_v61 }
 0x15f   : > { %1682 = vrot.lane.b32.xlu0 %v4971_v13, %s5676_s25  ;;  %v1243_v21 = vrot.slane %v1241_v59, 5  ;;  %v1257_v19 = vshll.u32 %v7033_v33, 16  ;;  %v5024_v24 = vcombine.low %v5623_v7, %v5624_v15  ;;  %v2757_v44 = vsel %vm1833_vm0, %v2715_v12, %v6763_v14 }
 0x160   : > { %1770 = vrot.lane.b32.xlu1 %v4991_v34, %s5675_s24  ;;  %v1249_v43 = vrot.slane %v1247_v50, 5  ;;  %v1253_v22 = vrot.slane %v1251_v40, 4  ;;  %v2765_v1 = vsel %vm1833_vm0, %v2727_v31, %v6745_v29  ;;  %v1163_v13 = vrot.slane %v1161_v42, 5  ;;  %v7079_v40 = vld [vmem:[#allocation2 + $0x58] sm:$0xf] }
 0x161   : > { %v1492_v36 = vrot.slane %v6983_v52, 5  ;;  %v1244_v47 = vor.u32 %v1243_v21, %v1240_v57  ;;  %v1149_v8 = vrot.slane %v1148_v51, 4  ;;  %v1159_v34 = vrot.slane %v1158_v38, 4 }
 0x162   : > { %v1254_v14 = vor.u32 %v1253_v22, %v1249_v43  ;;  %v1259_v37 = vrot.slane %v1257_v19, 5  ;;  %v1523_v12 = vrot.slane %v7033_v33, 5  ;;  %v4944_v46 = vrot.slane %v1391_v60, 9  ;;  %v7070_v42 = vpop.permute.xlu1 %3593 }
 0x163   : > { %1762 = vrot.lane.b32.xlu0 %v4987_v49, %s5675_s24  ;;  %v1245_v3 = vrot.slane %v1244_v47, 4  ;;  %v1520_v29 = vrot.slane %v7019_v45, 5  ;;  %v1495_v31 = vrot.slane %v7015_v11, 5  ;;  %v1166_v59 = vshrl.u32 %v7062_v30, 16  ;;  %v7101_v47 = vld [vmem:[#allocation2 + $0x84] sm:$0xf] }
 0x164   : > { %3725 = vrot.lane.b32.xlu1 %v2765_v1, %s5679_s17  ;;  %v1255_v49 = vrot.slane %v1254_v14, 4  ;;  %v1169_v51 = vshll.u32 %v7062_v30, 16  ;;  %v3678_v38 = vsel %vm1833_vm0, %v3640_v53, %v6825_v62  ;;  %v4940_v57 = vrot.slane %v1387_v23, 9 }
 0x165   : > { %v1250_v33 = vsel %vm5877_vm14, %v1245_v3, %v1249_v43  ;;  %v1522_v50 = vrot.slane %v1520_v29, 4  ;;  %v1154_v11 = vsel %vm5877_vm14, %v1149_v8, %v7017_v10  ;;  %v1164_v21 = vsel %vm5877_vm14, %v1159_v34, %v1163_v13  ;;  %v7095_v10 = vld [vmem:[#allocation2 + $0x5c] sm:$0x1]  ;;  %v7097_v43 = vpop.permute.xlu0 %1672  ;;  %v7108_v34 = vld [vmem:[#allocation2 + $0x88] sm:$0xf] }
 0x166   : > { %v1494_v19 = vrot.slane %v1492_v36, 4  ;;  %v1260_v62 = vsel %vm5877_vm14, %v1255_v49, %v1259_v37  ;;  %v3670_v53 = vsel %vm1833_vm0, %v3628_v63, %v6846_v17  ;;  %v1521_v15 = vsel %vm5813_vm11, %v4944_v46, %v1520_v29  ;;  %v989_v49 = vld [vmem:[#allocation2 + $0x8c] sm:$0x1] }
 0x167   : > { %3717 = vrot.lane.b32.xlu0 %v2757_v44, %s5679_s17  ;;  %v4976_v7 = vcombine.low %v1250_v33, %v1260_v62  ;;  %v1524_v44 = vsel %vm5813_vm11, %v1522_v50, %v1523_v12  ;;  %v1168_v22 = vrot.slane %v1166_v59, 4  ;;  %v1171_v60 = vrot.slane %v1169_v51, 5  ;;  %v7115_v12 = vpop.permute.xlu1 %1752  ;;  %v5627_v62 = vld [vmem:[#allocation2 + $0x60] sm:$0xf] }
 0x168   : > { %3773 = vrot.lane.b32.xlu1 %v3678_v38, %s5678_s16  ;;  %v1175_v1 = vshll.u32 %v7079_v40, 16  ;;  %v1179_v13 = vshrl.u32 %v7079_v40, 16  ;;  %v2730_v17 = vsel %vm1784_vm15, %v5024_v24, %v6855_v0  ;;  %v4972_v63 = vcombine.low %v1154_v11, %v1164_v21  ;;  %v5625_v0 = vld [vmem:[#allocation2 + $0x90] sm:$0xf]  ;;  %v5626_v24 = vld [vmem:[#allocation2 + $0x94] sm:$0xf] }
 0x169   : > { %v1493_v8 = vsel %vm5813_vm11, %v4940_v57, %v1492_v36  ;;  %v1496_v23 = vsel %vm5813_vm11, %v1494_v19, %v1495_v31  ;;  %v4992_v14 = vcombine.low %v1521_v15, %v1524_v44  ;;  %v5088_v46 = vcombine.low %v5625_v0, %v5626_v24 }
 0x16a   : > { %v7113_v37 = vrot.slane %v1175_v1, 5  ;;  %v1181_v3 = vrot.slane %v1179_v13, 4  ;;  %v1185_v29 = vshll.u32 %v7095_v10, 16  ;;  %v1262_v36 = vshrl.u32 %v7101_v47, 16 }
 0x16b   : > { %3765 = vrot.lane.b32.xlu0 %v3670_v53, %s5678_s16  ;;  %v1265_v59 = vshll.u32 %v7101_v47, 16  ;;  %v2718_v31 = vsel %vm1784_vm15, %v5020_v25, %v6866_v58  ;;  %v1172_v51 = vor.u32 %v1171_v60, %v1168_v22  ;;  %v1271_v57 = vshll.u32 %v7108_v34, 16  ;;  %v5628_v53 = vld [vmem:[#allocation2 + $0x64] sm:$0xf]  ;;  %v7132_v58 = vpop.permute.xlu0 %3601 }
 0x16c   : > { %1692 = vrot.lane.b32.xlu1 %v4976_v7, %s5676_s25  ;;  %v1182_v38 = vor.u32 %v1181_v3, %v7113_v37  ;;  %v4988_v33 = vcombine.low %v1493_v8, %v1496_v23  ;;  %v1264_v50 = vrot.slane %v1262_v36, 4  ;;  %v1275_v21 = vshrl.u32 %v7108_v34, 16  ;;  %v1392_v7 = vld [vmem:[#allocation2 + $0x84] sm:$0xe]  ;;  %v1388_v8 = vld [vmem:[#allocation2 + $0x54] sm:$0xe] }
 0x16d   : > { %v1267_v11 = vrot.slane %v1265_v59, 5  ;;  %v2767_v19 = vsel %vm1833_vm0, %v2730_v17, %v6873_v48  ;;  %v5084_v35 = vcombine.low %v5627_v62, %v5628_v53  ;;  %v1273_v61 = vrot.slane %v1271_v57, 5  ;;  %v7137_v17 = vpop.permute.xlu1 %2690  ;;  %v7152_v57 = vld [vmem:[#allocation2 + $0x94] sm:$0xf] }
 0x16e   : > { %v1281_v25 = vshll.u32 %v989_v49, 16  ;;  %v3643_v15 = vsel %vm1784_vm15, %v5088_v46, %v6905_v54  ;;  %v1187_v44 = vrot.slane %v1185_v29, 5  ;;  %v1277_v60 = vrot.slane %v1275_v21, 4 }
 0x16f   : > { %1684 = vrot.lane.b32.xlu0 %v4972_v63, %s5676_s25  ;;  %v1268_v22 = vor.u32 %v1267_v11, %v1264_v50  ;;  %v1173_v1 = vrot.slane %v1172_v51, 4  ;;  %v1183_v13 = vrot.slane %v1182_v38, 4  ;;  %v1499_v48 = vrot.slane %v7079_v40, 5  ;;  %v7150_v38 = vld [vmem:[#allocation2 + $0x90] sm:$0xf] }
 0x170   : > { %1772 = vrot.lane.b32.xlu1 %v4992_v14, %s5675_s24  ;;  %v1527_v63 = vrot.slane %v7108_v34, 5  ;;  %v1278_v14 = vor.u32 %v1277_v60, %v1273_v61  ;;  %v1283_v3 = vrot.slane %v1281_v25, 5  ;;  %v4945_v0 = vrot.slane %v1392_v7, 9  ;;  %v5629_v25 = vld [vmem:[#allocation2 + $0x60] sm:$0xf] }
 0x171   : > { %v1269_v23 = vrot.slane %v1268_v22, 4  ;;  %v2759_v54 = vsel %vm1833_vm0, %v2718_v31, %v6898_v27  ;;  %v1530_v46 = vrot.slane %v989_v49, 5  ;;  %v3631_v29 = vsel %vm1784_vm15, %v5084_v35, %v6925_v55  ;;  %v7158_v55 = vpop.permute.xlu0 %2610  ;;  %v5630_v7 = vld [vmem:[#allocation2 + $0x64] sm:$0xf]  ;;  %v5632_v22 = vld [vmem:[#allocation2 + $0x94] sm:$0xf] }
 0x172   : > { %v1529_v24 = vrot.slane %v1527_v63, 4  ;;  %v3680_v36 = vsel %vm1833_vm0, %v3643_v15, %v6936_v39  ;;  %v1279_v51 = vrot.slane %v1278_v14, 4  ;;  %v1178_v27 = vsel %vm5877_vm14, %v1173_v1, %v7113_v37  ;;  %v5633_v1 = vld [vmem:[#allocation2 + $0x6c] sm:$0xf] }
 0x173   : > { %1764 = vrot.lane.b32.xlu0 %v4988_v33, %s5675_s24  ;;  %v1274_v59 = vsel %vm5877_vm14, %v1269_v23, %v1273_v61  ;;  %v4941_v31 = vrot.slane %v1388_v8, 9  ;;  %v1501_v49 = vrot.slane %v1499_v48, 4  ;;  %v1502_v33 = vrot.slane %v7095_v10, 5  ;;  %v7170_v10 = vpop.permute.xlu1 %1674 }
 0x174   : > { %3727 = vrot.lane.b32.xlu1 %v2767_v19, %s5679_s17  ;;  %v1188_v39 = vsel %vm5877_vm14, %v1183_v13, %v1187_v44  ;;  %v1284_v50 = vsel %vm5877_vm14, %v1279_v51, %v1283_v3  ;;  %v1528_v11 = vsel %vm5813_vm11, %v4945_v0, %v1527_v63  ;;  %v1531_v37 = vsel %vm5813_vm11, %v1529_v24, %v1530_v46  ;;  %v5631_v44 = vld [vmem:[#allocation2 + $0x90] sm:$0xf]  ;;  %v7185_v0 = vld [vmem:[#allocation2 + $0xa0] sm:$0xf] }
 0x175   : > { %v4977_v21 = vcombine.low %v1274_v59, %v1284_v50  ;;  %v1286_v19 = vshrl.u32 %v7150_v38, 16  ;;  %v1289_v62 = vshll.u32 %v7150_v38, 16  ;;  %v1295_v53 = vshll.u32 %v7152_v57, 16  ;;  %v5634_v13 = vld [vmem:[#allocation2 + $0x70] sm:$0xf] }
 0x176   : > { %v1299_v35 = vshrl.u32 %v7152_v57, 16  ;;  %v3672_v61 = vsel %vm1833_vm0, %v3631_v29, %v6962_v20  ;;  %v5021_v15 = vcombine.low %v5629_v25, %v5630_v7  ;;  %v5025_v60 = vcombine.low %v5631_v44, %v5632_v22  ;;  %v7183_v20 = vld [vmem:[#allocation2 + $0x9c] sm:$0xf]  ;;  %v990_v59 = vld [vmem:[#allocation2 + $0x98] sm:$0x1] }
 0x177   : > { %3719 = vrot.lane.b32.xlu0 %v2759_v54, %s5679_s17  ;;  %v5085_v63 = vcombine.low %v5633_v1, %v5634_v13  ;;  %v4973_v8 = vcombine.low %v1178_v27, %v1188_v39  ;;  %v1500_v23 = vsel %vm5813_vm11, %v4941_v31, %v1499_v48  ;;  %v1503_v14 = vsel %vm5813_vm11, %v1501_v49, %v1502_v33  ;;  %v7188_v54 = vpop.permute.xlu0 %3523  ;;  %v7193_v51 = vpop.permute.xlu1 %1754  ;;  %v1393_v27 = vld [vmem:[#allocation2 + $0x90] sm:$0xe] }
 0x178   : > { %3775 = vrot.lane.b32.xlu1 %v3680_v36, %s5678_s16  ;;  %v4993_v3 = vcombine.low %v1528_v11, %v1531_v37  ;;  %v1288_v24 = vrot.slane %v1286_v19, 4  ;;  %v1291_v46 = vrot.slane %v1289_v62, 5  ;;  %v7190_v29 = vrot.slane %v1295_v53, 5  ;;  %v5635_v37 = vld [vmem:[#allocation2 + $0x9c] sm:$0xf] }
 0x179   : > { %v1301_v36 = vrot.slane %v1299_v35, 4  ;;  %v1534_v48 = vrot.slane %v7152_v57, 5  ;;  %v1310_v31 = vshrl.u32 %v7183_v20, 16  ;;  %v1313_v49 = vshll.u32 %v7183_v20, 16 }
 0x17a   : > { %v1319_v33 = vshll.u32 %v7185_v0, 16  ;;  %v1323_v39 = vshrl.u32 %v7185_v0, 16  ;;  %v2721_v50 = vsel %vm1784_vm15, %v5021_v15, %v6994_v2  ;;  %v2733_v11 = vsel %vm1784_vm15, %v5025_v60, %v6969_v18  ;;  %v7208_v18 = vld [vmem:[#allocation2 + $0xa4] sm:$0x1] }
 0x17b   : > { %3767 = vrot.lane.b32.xlu0 %v3672_v61, %s5678_s16  ;;  %v4989_v62 = vcombine.low %v1500_v23, %v1503_v14  ;;  %v3634_v53 = vsel %vm1784_vm15, %v5085_v63, %v7065_v9  ;;  %v1292_v35 = vor.u32 %v1291_v46, %v1288_v24  ;;  %v1302_v61 = vor.u32 %v1301_v36, %v7190_v29  ;;  %v3604_v44 = vpop.permute.xlu0 %3603  ;;  %v7221_v14 = vld [vmem:[#allocation2 + $0xa8] sm:$0xf]  ;;  %v5638_v24 = vld [vmem:[#allocation2 + $0xac] sm:$0xf] }
 0x17c   : > { %1694 = vrot.lane.b32.xlu1 %v4977_v21, %s5676_s25  ;;  %v5636_v21 = vld [vmem:[#allocation2 + $0xa0] sm:$0xf]  ;;  %v1305_v25 = vshll.u32 %v990_v59, 16  ;;  %v4946_v7 = vrot.slane %v1393_v27, 9  ;;  %v1536_v2 = vrot.slane %v1534_v48, 4  ;;  %v1537_v15 = vrot.slane %v990_v59, 5  ;;  %v7224_v27 = vpop.permute.xlu1 %2692 }
 0x17d   : > { %v5089_v19 = vcombine.low %v5635_v37, %v5636_v21  ;;  %v1312_v22 = vrot.slane %v1310_v31, 4  ;;  %v1315_v60 = vrot.slane %v1313_v49, 5  ;;  %v7210_v1 = vrot.slane %v1319_v33, 5 }
 0x17e   : > { %v1325_v13 = vrot.slane %v1323_v39, 4  ;;  %v2761_v9 = vsel %vm1833_vm0, %v2721_v50, %v7036_v41  ;;  %v2769_v63 = vsel %vm1833_vm0, %v2733_v11, %v7005_v26  ;;  %v3674_v23 = vsel %vm1833_vm0, %v3634_v53, %v7070_v42  ;;  %v7226_v26 = vld [vmem:[#allocation2 + $0xac] sm:$0xf]  ;;  %v1394_v50 = vld [vmem:[#allocation2 + $0x9c] sm:$0xe] }
 0x17f   : > { %1686 = vrot.lane.b32.xlu0 %v4973_v8, %s5676_s25  ;;  %v3646_v8 = vsel %vm1784_vm15, %v5089_v19, %v7045_v32  ;;  %v1293_v36 = vrot.slane %v1292_v35, 4  ;;  %v1303_v41 = vrot.slane %v1302_v61, 4  ;;  %v1307_v59 = vrot.slane %v1305_v25, 5  ;;  %v5639_v19 = vld [vmem:[#allocation2 + $0x9c] sm:$0xf] }
 0x180   : > { %1774 = vrot.lane.b32.xlu1 %v4993_v3, %s5675_s24  ;;  %v5637_v3 = vld [vmem:[#allocation2 + $0xa8] sm:$0xf]  ;;  %v1535_v32 = vsel %vm5813_vm11, %v4946_v7, %v1534_v48  ;;  %v1538_v42 = vsel %vm5813_vm11, %v1536_v2, %v1537_v15  ;;  %v1329_v31 = vshll.u32 %v7208_v18, 16  ;;  %v1541_v49 = vrot.slane %v7185_v0, 5  ;;  %v5640_v48 = vld [vmem:[#allocation2 + $0xa0] sm:$0xf] }
 0x181   : > { %v5090_v46 = vcombine.low %v5637_v3, %v5638_v24  ;;  %v1316_v33 = vor.u32 %v1315_v60, %v1312_v22  ;;  %v1326_v39 = vor.u32 %v1325_v13, %v7210_v1  ;;  %v1334_v11 = vshrl.u32 %v7221_v14, 16  ;;  %v992_v24 = vld [vmem:[#allocation2 + $0xb0] sm:$0x1] }
 0x182   : > { %v1337_v37 = vshll.u32 %v7221_v14, 16  ;;  %v3682_v21 = vsel %vm1833_vm0, %v3646_v8, %v7132_v58  ;;  %v1343_v53 = vshll.u32 %v7226_v26, 16  ;;  %v1347_v35 = vshrl.u32 %v7226_v26, 16  ;;  %v7250_v58 = vpop.permute.xlu0 %2612 }
 0x183   : > { %1766 = vrot.lane.b32.xlu0 %v4989_v62, %s5675_s24  ;;  %v5026_v62 = vcombine.low %v5639_v19, %v5640_v48  ;;  %v3649_v61 = vsel %vm1784_vm15, %v5090_v46, %v7188_v54  ;;  %v1298_v25 = vsel %vm5877_vm14, %v1293_v36, %v7190_v29  ;;  %v1308_v7 = vsel %vm5877_vm14, %v1303_v41, %v1307_v59  ;;  %v7253_v54 = vpop.permute.xlu1 %1676 }
 0x184   : > { %3729 = vrot.lane.b32.xlu1 %v2769_v63, %s5679_s17  ;;  %v4994_v2 = vcombine.low %v1535_v32, %v1538_v42  ;;  %v1331_v15 = vrot.slane %v1329_v31, 5  ;;  %v4947_v22 = vrot.slane %v1394_v50, 9  ;;  %v1543_v60 = vrot.slane %v1541_v49, 4  ;;  %v7262_v32 = vld [vmem:[#allocation2 + $0xb4] sm:$0xf] }
 0x185   : > { %v1544_v13 = vrot.slane %v7208_v18, 5  ;;  %v1327_v63 = vrot.slane %v1326_v39, 4  ;;  %v1336_v8 = vrot.slane %v1334_v11, 4  ;;  %v1339_v3 = vrot.slane %v1337_v37, 5  ;;  %v1395_v18 = vld [vmem:[#allocation2 + $0xa8] sm:$0xe] }
 0x186   : > { %v4978_v29 = vcombine.low %v1298_v25, %v1308_v7  ;;  %v7256_v46 = vrot.slane %v1343_v53, 5  ;;  %v1349_v36 = vrot.slane %v1347_v35, 4  ;;  %v2736_v41 = vsel %vm1784_vm15, %v5026_v62, %v7158_v55  ;;  %v5641_v42 = vld [vmem:[#allocation2 + $0xb8] sm:$0xf]  ;;  %v5642_v31 = vld [vmem:[#allocation2 + $0xb4] sm:$0xf] }
 0x187   : > { %3721 = vrot.lane.b32.xlu0 %v2761_v9, %s5679_s17  ;;  %v1317_v9 = vrot.slane %v1316_v33, 4  ;;  %v3684_v59 = vsel %vm1833_vm0, %v3649_v61, %v3604_v44  ;;  %v5091_v33 = vcombine.low %v5642_v31, %v5641_v42  ;;  %v1545_v39 = vsel %vm5813_vm11, %v1543_v60, %v1544_v13  ;;  %v7269_v11 = vld [vmem:[#allocation2 + $0xb8] sm:$0xf]  ;;  %v7281_v35 = vpop.permute.xlu1 %1756 }
 0x188   : > { %3777 = vrot.lane.b32.xlu1 %v3682_v21, %s5678_s16  ;;  %v1548_v50 = vrot.slane %v7226_v26, 5  ;;  %v1332_v37 = vsel %vm5877_vm14, %v1327_v63, %v1331_v15  ;;  %v1340_v21 = vor.u32 %v1339_v3, %v1336_v8  ;;  %v1353_v19 = vshll.u32 %v992_v24, 16  ;;  %v5644_v15 = vld [vmem:[#allocation2 + $0xac] sm:$0xf] }
 0x189   : > { %v1322_v44 = vsel %vm5877_vm14, %v1317_v9, %v7210_v1  ;;  %v4948_v48 = vrot.slane %v1395_v18, 9  ;;  %v1358_v62 = vshrl.u32 %v7262_v32, 16  ;;  %v1361_v53 = vshll.u32 %v7262_v32, 16 }
 0x18a   : > { %v1367_v1 = vshll.u32 %v7269_v11, 16  ;;  %v1371_v25 = vshrl.u32 %v7269_v11, 16  ;;  %v2771_v7 = vsel %vm1833_vm0, %v2736_v41, %v7137_v17  ;;  %v1550_v60 = vrot.slane %v1548_v50, 4 }
 0x18b   : > { %3769 = vrot.lane.b32.xlu0 %v3674_v23, %s5678_s16  ;;  %v1542_v23 = vsel %vm5813_vm11, %v4947_v22, %v1541_v49  ;;  %v1350_v49 = vor.u32 %v1349_v36, %v7256_v46  ;;  %v1551_v13 = vrot.slane %v992_v24, 5  ;;  %v4979_v63 = vcombine.low %v1322_v44, %v1332_v37 }
 0x18c   : > { %1776 = vrot.lane.b32.xlu1 %v4994_v2, %s5675_s24  ;;  %v4995_v61 = vcombine.low %v1542_v23, %v1545_v39  ;;  %v5643_v2 = vld [vmem:[#allocation2 + $0xa8] sm:$0xf]  ;;  %v1341_v8 = vrot.slane %v1340_v21, 4  ;;  %v1355_v3 = vrot.slane %v1353_v19, 5  ;;  %v1549_v36 = vsel %vm5813_vm11, %v4948_v48, %v1548_v50  ;;  %v993_v39 = vld [vmem:[#allocation2 + $0xbc] sm:$0x1] }
 0x18d   : > { %v5027_v22 = vcombine.low %v5643_v2, %v5644_v15  ;;  %v1363_v18 = vrot.slane %v1361_v53, 5  ;;  %v1369_v17 = vrot.slane %v1367_v1, 5  ;;  %v1373_v41 = vrot.slane %v1371_v25, 4  ;;  %v5646_v2 = vld [vmem:[#allocation2 + $0xb4] sm:$0xf] }
 0x18e   : > { %v3526_v55 = vpop.permute.xlu0 %3525  ;;  %v4956_v24 = vcombine.low %v6973_v5, %v6983_v52  ;;  %v4960_v31 = vcombine.low %v7010_v4, %v7019_v45  ;;  %v1552_v23 = vsel %vm5813_vm11, %v1550_v60, %v1551_v13  ;;  %v4957_v50 = vcombine.low %v7062_v30, %v7079_v40 }
 0x18f   : > { %1696 = vrot.lane.b32.xlu0 %v4978_v29, %s5676_s25  ;;  %v3652_v9 = vsel %vm1784_vm15, %v5091_v33, %v3526_v55  ;;  %v1351_v29 = vrot.slane %v1350_v49, 4  ;;  %v4961_v55 = vcombine.low %v7101_v47, %v7108_v34  ;;  %v4962_v37 = vcombine.low %v7150_v38, %v7152_v57 }
 0x190   : > { %3779 = vrot.lane.b32.xlu1 %v3684_v59, %s5678_s16  ;;  %v1360_v59 = vrot.slane %v1358_v62, 4  ;;  %v4963_v21 = vcombine.low %v7183_v20, %v7185_v0  ;;  %v4964_v19 = vcombine.low %v7221_v14, %v7226_v26  ;;  %v2739_v49 = vsel %vm1784_vm15, %v5027_v22, %v7250_v58 }
 0x191   : > { %v2695_v44 = vpop.permute.xlu1 %2694  ;;  %v1346_v48 = vsel %vm5877_vm14, %v1341_v8, %v7256_v46  ;;  %v1356_v62 = vsel %vm5877_vm14, %v1351_v29, %v1355_v3  ;;  %v4996_v53 = vcombine.low %v1549_v36, %v1552_v23  ;;  %v1374_v1 = vor.u32 %v1373_v41, %v1369_v17  ;;  %v1396_v3 = vld [vmem:[#allocation2 + $0xb4] sm:$0xe] }
 0x192   : > { %v3606_v42 = vpop.permute.xlu0 %3605  ;;  %v1377_v25 = vshll.u32 %v993_v39, 16  ;;  %v2773_v58 = vsel %vm1833_vm0, %v2739_v49, %v7224_v27  ;;  %v4980_v60 = vcombine.low %v1346_v48, %v1356_v62  ;;  %v4965_v46 = vcombine.low %v7262_v32, %v7269_v11  ;;  %v5647_v27 = vld [vmem:[#allocation2 + $0xc0] sm:$0xf] }
 0x193   : > { %3731 = vrot.lane.b32.xlu0 %v2771_v7, %s5679_s17  ;;  %v3686_v33 = vsel %vm1833_vm0, %v3652_v9, %v3606_v42  ;;  %v5645_v7 = vld [vmem:[#allocation2 + $0xb8] sm:$0xf]  ;;  %v1555_v29 = vrot.slane %v7269_v11, 5  ;;  %v4949_v42 = vrot.slane %v1396_v3, 9  ;;  %v1558_v41 = vrot.slane %v993_v39, 5 }
 0x194   : > { %1778 = vrot.lane.b32.xlu1 %v4995_v61, %s5675_s24  ;;  %v1364_v61 = vor.u32 %v1363_v18, %v1360_v59  ;;  %v5028_v15 = vcombine.low %v5646_v2, %v5645_v7  ;;  %v1379_v8 = vrot.slane %v1377_v25, 5  ;;  %v5648_v59 = vld [vmem:[#allocation2 + $0xc4] sm:$0xf]  ;;  %v5650_v7 = vld [vmem:[#allocation2] sm:$0xf] }
 0x195   : > { %v5092_v18 = vcombine.low %v5647_v27, %v5648_v59  ;;  %v1557_v48 = vrot.slane %v1555_v29, 4  ;;  %v1556_v39 = vsel %vm5813_vm11, %v4949_v42, %v1555_v29  ;;  %v5653_v59 = vld [vmem:[#allocation2 + $0xc] sm:$0xf] }
 0x196   : > { %v2615_v22 = vpop.permute.xlu0 %2614  ;;  %v1365_v9 = vrot.slane %v1364_v61, 4 }
 0x197   : > { %1698 = vrot.lane.b32.xlu0 %v4979_v63, %s5676_s25  ;;  %v1375_v63 = vrot.slane %v1374_v1, 4  ;;  %v2742_v36 = vsel %vm1784_vm15, %v5028_v15, %v2615_v22  ;;  %v5651_v15 = vld [vmem:[#allocation2 + $0xc0] sm:$0xf] }
 0x198   : > { %3781 = vrot.lane.b32.xlu1 %v3686_v33, %s5678_s16  ;;  %v2775_v33 = vsel %vm1833_vm0, %v2742_v36, %v2695_v44  ;;  %v1370_v23 = vsel %vm5877_vm14, %v1365_v9, %v1369_v17  ;;  %v1559_v44 = vsel %vm5813_vm11, %v1557_v48, %v1558_v41  ;;  %v5649_v17 = vld [vmem:[#allocation2 + $0x4] sm:$0xf] }
 0x199   : > { %v1380_v49 = vsel %vm5877_vm14, %v1375_v63, %v1379_v8  ;;  %v4950_v56 = vcombine.low %v5650_v7, %v5649_v17  ;;  %v4997_v9 = vcombine.low %v1556_v39, %v1559_v44 }
 0x19a   : > { %v4981_v1 = vcombine.low %v1370_v23, %v1380_v49 }
 0x19b   : > { %3733 = vrot.lane.b32.xlu0 %v2773_v58, %s5679_s17  ;;  %v7323_v13 = vpop.permute.xlu1 %1678  ;;  %v5652_v58 = vld [vmem:[#allocation2 + $0xc4] sm:$0xf]  ;;  %v1787_v28 = vsel %vm1784_vm15, %v4950_v56, %v7097_v43  ;;  %v5657_v56 = vld [vmem:[#allocation2 + $0xd0] sm:$0xf] }
 0x19c   : > { %1780 = vrot.lane.b32.xlu1 %v4996_v53, %s5675_s24  ;;  %v5029_v22 = vcombine.low %v5651_v15, %v5652_v58  ;;  %v1835_v36 = vsel %vm1833_vm0, %v1787_v28, %v7115_v12 }
 0x19f   : > { %1700 = vrot.lane.b32.xlu0 %v4980_v60, %s5676_s25  ;;  %v7334_v53 = vpop.permute.xlu1 %1758 }
 0x1a1   : > { %v3528_v62 = vpop.permute.xlu0 %3527 }
 0x1a2   : > { %v3655_v61 = vsel %vm1784_vm15, %v5092_v18, %v3528_v62  ;;  %v5654_v18 = vld [vmem:[#allocation2 + $0x10] sm:$0xf] }
 0x1a3   : > { %3735 = vrot.lane.b32.xlu0 %v2775_v33, %s5679_s17  ;;  %v4951_v43 = vcombine.low %v5653_v59, %v5654_v18 }
 0x1a5   : > { %v3608_v25 = vpop.permute.xlu0 %3607  ;;  %v1790_v49 = vsel %vm1784_vm15, %v4951_v43, %v7170_v10 }
 0x1a6   : > { %v3688_v2 = vsel %vm1833_vm0, %v3655_v61, %v3608_v25  ;;  %v2697_v60 = vpop.permute.xlu1 %2696  ;;  %v1837_v12 = vsel %vm1833_vm0, %v1790_v49, %v7193_v51  ;;  %v5655_v61 = vld [vmem:[#allocation2 + $0x18] sm:$0xf] }
 0x1a7   : > { %3783 = vrot.lane.b32.xlu1 %v3688_v2, %s5678_s16  ;;  %1702 = vrot.lane.b32.xlu0 %v4981_v1, %s5676_s25  ;;  %v5656_v1 = vld [vmem:[#allocation2 + $0x1c] sm:$0xf]  ;;  %v5658_v2 = vld [vmem:[#allocation2 + $0xcc] sm:$0xf] }
 0x1a8   : > { %v4952_v39 = vcombine.low %v5655_v61, %v5656_v1  ;;  %v5093_v15 = vcombine.low %v5658_v2, %v5657_v56  ;;  %v5664_v61 = vld [vmem:[#allocation2 + $0x34] sm:$0xf] }
 0x1a9   : > { %v2617_v63 = vpop.permute.xlu0 %2616 }
 0x1aa   : > { %v2745_v8 = vsel %vm1784_vm15, %v5029_v22, %v2617_v63  ;;  %v3756_v3 = vpop.permute.xlu1 %3755  ;;  %v1793_v10 = vsel %vm1784_vm15, %v4952_v39, %v7253_v54 }
 0x1ab   : > { %v2777_v29 = vsel %vm1833_vm0, %v2745_v8, %v2697_v60  ;;  %1782 = vrot.lane.b32.xlu1 %v4997_v9, %s5675_s24  ;;  %5144 = vmatprep.mubr.msk.bf16.mxu0 %vm1784_vm15, %v3756_v3  ;;  %v1839_v58 = vsel %vm1833_vm0, %v1793_v10, %v7281_v35  ;;  %v5659_v60 = vld [vmem:[#allocation2 + $0x24] sm:$0xf]  ;;  %v5660_v9 = vld [vmem:[#allocation2 + $0x28] sm:$0xf]  ;;  %s5227_s24 = sshll.u32 %s7636_s19, 7 }
 0x1ac   : > { %3737 = vrot.lane.b32.xlu0 %v2777_v29, %s5679_s17  ;;  %v4953_v63 = vcombine.low %v5659_v60, %v5660_v9  ;;  %v5665_v60 = vld [vmem:[#allocation2 + $0x3c] sm:$0xf]  ;;  %v5666_v9 = vld [vmem:[#allocation2 + $0x40] sm:$0xf]  ;;  %s7470_s21 = scalar_lea.vmem %s7617_s2, %s5227_s24  ;;  %s7475_s26 = scalar_lea.vmem %s7619_s4, %s5227_s24 }
 0x1ad   : > { %v3708_v27 = vpop.permute.xlu0 %3707 }
 0x1ae   : > { %v3789_v42 = vsel %vm3787_vm1, %v1835_v36, %v3708_v27  ;;  %v3758_v41 = vpop.permute.xlu1 %3757  ;;  %v5661_v36 = vld [vmem:[#allocation2 + $0x60] sm:$0xf]  ;;  %v5662_v27 = vld [vmem:[#allocation2 + $0x64] sm:$0xf]  ;;  %v1796_v18 = vsel %vm1784_vm15, %v4953_v63, %v7323_v13 }
 0x1af   : > { %v3822_v33 = vsel %vm3820_vm2, %v3789_v42, %v3756_v3  ;;  %v4958_v59 = vcombine.low %v5661_v36, %v5662_v27 }
 0x1b0   : > { %4042 = vmatmul.mubr.bf16.vlgmr.msra.gmra.mrb[0].mxu0 %v3822_v33 }
 0x1b1   : > { %v3710_v23 = vpop.permute.xlu0 %3709  ;;  %5145 = vmatprep.mubr.msk.bf16.mxu0 %vm1784_vm15, %v3758_v41 }
 0x1b2   : > { %v3760_v48 = vpop.permute.xlu1 %3759  ;;  %v3791_v44 = vsel %vm3787_vm1, %v1837_v12, %v3710_v23 }
 0x1b3   : > { %v3825_v17 = vsel %vm3820_vm2, %v3791_v44, %v3758_v41  ;;  %v1841_v41 = vsel %vm1833_vm0, %v1796_v18, %v7334_v53 }
 0x1b5   : > { %v3712_v62 = vpop.permute.xlu0 %3711 }
 0x1b6   : > { %v3762_v25 = vpop.permute.xlu1 %3761  ;;  %v3793_v28 = vsel %vm3787_vm1, %v1839_v58, %v3712_v62  ;;  %v5663_v62 = vld [vmem:[#allocation2 + $0x30] sm:$0xf] }
 0x1b7   : > { %v3828_v29 = vsel %vm3820_vm2, %v3793_v28, %v3760_v48  ;;  %v4954_v1 = vcombine.low %v5663_v62, %v5664_v61 }
 0x1b8   : > { %4052 = vmatmul.mubr.bf16.gmra.mrb[4].mxu0 %v3825_v17 }
 0x1b9   : > { %v3714_v7 = vpop.permute.xlu0 %3713  ;;  %5146 = vmatprep.mubr.msk.bf16.mxu0 %vm1784_vm15, %v3760_v48 }
 0x1ba   : > { %v1681_v51 = vpop.permute.xlu1 %1680  ;;  %v3795_v23 = vsel %vm3787_vm1, %v1841_v41, %v3714_v7 }
 0x1bb   : > { %v3831_v12 = vsel %vm3820_vm2, %v3795_v23, %v3762_v25  ;;  %v1799_v17 = vsel %vm1784_vm15, %v4954_v1, %v1681_v51  ;;  %v4955_v51 = vcombine.low %v5665_v60, %v5666_v9 }
 0x1bd   : > { %v3530_v22 = vpop.permute.xlu0 %3529 }
 0x1be   : > { %v3658_v8 = vsel %vm1784_vm15, %v5093_v15, %v3530_v22  ;;  %v3610_v3 = vpop.permute.xlu1 %3609  ;;  %v4959_v15 = vcombine.low %v6916_v16, %v6927_v6 }
 0x1bf   : > { %v3690_v54 = vsel %vm1833_vm0, %v3658_v8, %v3610_v3 }
 0x1c0   : > { %4062 = vmatmul.mubr.bf16.gmra.mrb[8].mxu0 %v3828_v29  ;;  %3785 = vrot.lane.b32.xlu1 %v3690_v54, %s5678_s16 }
 0x1c1   : > { %v1689_v35 = vpop.permute.xlu0 %1688  ;;  %5147 = vmatprep.mubr.msk.bf16.mxu0 %vm1784_vm15, %v3762_v25 }
 0x1c2   : > { %v1769_v43 = vpop.permute.xlu1 %1768  ;;  %v1811_v42 = vsel %vm1784_vm15, %v4958_v59, %v1689_v35 }
 0x1c3   : > { %v1851_v48 = vsel %vm1833_vm0, %v1811_v42, %v1769_v43 }
 0x1c5   : > { %v1761_v33 = vpop.permute.xlu0 %1760 }
 0x1c6   : > { %v3724_v49 = vpop.permute.xlu1 %3723  ;;  %v1843_v7 = vsel %vm1833_vm0, %v1799_v17, %v1761_v33 }
 0x1c7   : > { %v3805_v13 = vsel %vm3787_vm1, %v1851_v48, %v3724_v49 }
 0x1c8   : > { %4072 = vmatmul.mubr.bf16.gmra.mrb[12].mxu0 %v3831_v12 }
 0x1c9   : > { %v3716_v39 = vpop.permute.xlu0 %3715 }
 0x1ca   : > { %v3772_v44 = vpop.permute.xlu1 %3771  ;;  %v3797_v25 = vsel %vm3787_vm1, %v1843_v7, %v3716_v39 }
 0x1cb   : > { %5152 = vmatprep.mubr.msk.bf16.mxu1 %vm1784_vm15, %v3772_v44  ;;  %v3846_v53 = vsel %vm3820_vm2, %v3805_v13, %v3772_v44 }
 0x1cc   : > { %4122 = vmatmul.mubr.bf16.vlgmr.msra.gmra.mrb[0].mxu1 %v3846_v53 }
 0x1cd   : > { %v3764_v10 = vpop.permute.xlu0 %3763 }
 0x1ce   : > { %5148 = vmatprep.mubr.msk.bf16.mxu0 %vm1784_vm15, %v3764_v10  ;;  %v1691_v56 = vpop.permute.xlu1 %1690  ;;  %v3834_v2 = vsel %vm3820_vm2, %v3797_v25, %v3764_v10 }
 0x1cf   : > { %v1814_v63 = vsel %vm1784_vm15, %v4959_v15, %v1691_v56 }
 0x1d0   : > { %4082 = vmatmul.mubr.bf16.gmra.mrb[16].mxu0 %v3834_v2 }
 0x1d1   : > { %v1683_v58 = vpop.permute.xlu0 %1682 }
 0x1d2   : > { %v1771_v22 = vpop.permute.xlu1 %1770  ;;  %v1802_v3 = vsel %vm1784_vm15, %v4955_v51, %v1683_v58 }
 0x1d3   : > { %v1853_v29 = vsel %vm1833_vm0, %v1814_v63, %v1771_v22 }
 0x1d5   : > { %v1763_v28 = vpop.permute.xlu0 %1762 }
 0x1d6   : > { %v3726_v8 = vpop.permute.xlu1 %3725  ;;  %v1845_v36 = vsel %vm1833_vm0, %v1802_v3, %v1763_v28 }
 0x1d7   : > { %v3807_v27 = vsel %vm3787_vm1, %v1853_v29, %v3726_v8 }
 0x1d9   : > { %v3718_v54 = vpop.permute.xlu0 %3717 }
 0x1da   : > { %v3774_v59 = vpop.permute.xlu1 %3773  ;;  %v3799_v6 = vsel %vm3787_vm1, %v1845_v36, %v3718_v54 }
 0x1db   : > { %5153 = vmatprep.mubr.msk.bf16.mxu1 %vm1784_vm15, %v3774_v59  ;;  %v3849_v16 = vsel %vm3820_vm2, %v3807_v27, %v3774_v59 }
 0x1dc   : > { %4132 = vmatmul.mubr.bf16.gmra.mrb[4].mxu1 %v3849_v16 }
 0x1dd   : > { %v3766_v35 = vpop.permute.xlu0 %3765 }
 0x1de   : > { %5149 = vmatprep.mubr.msk.bf16.mxu0 %vm1784_vm15, %v3766_v35  ;;  %v3837_v18 = vsel %vm3820_vm2, %v3799_v6, %v3766_v35  ;;  %v1693_v43 = vpop.permute.xlu1 %1692 }
 0x1df   : > { %4092 = vmatmul.mubr.bf16.gmra.mrb[20].mxu0 %v3837_v18  ;;  %v1817_v33 = vsel %vm1784_vm15, %v4960_v31, %v1693_v43 }
 0x1e1   : > { %v1685_v42 = vpop.permute.xlu0 %1684 }
 0x1e2   : > { %v1773_v41 = vpop.permute.xlu1 %1772  ;;  %v1805_v48 = vsel %vm1784_vm15, %v4956_v24, %v1685_v42 }
 0x1e3   : > { %v1855_v12 = vsel %vm1833_vm0, %v1817_v33, %v1773_v41 }
 0x1e5   : > { %v1765_v23 = vpop.permute.xlu0 %1764 }
 0x1e6   : > { %v3728_v49 = vpop.permute.xlu1 %3727  ;;  %v1847_v61 = vsel %vm1833_vm0, %v1805_v48, %v1765_v23 }
 0x1e7   : > { %v3809_v1 = vsel %vm3787_vm1, %v1855_v12, %v3728_v49 }
 0x1e9   : > { %v3720_v62 = vpop.permute.xlu0 %3719 }
 0x1ea   : > { %v3776_v39 = vpop.permute.xlu1 %3775  ;;  %v3801_v45 = vsel %vm3787_vm1, %v1847_v61, %v3720_v62 }
 0x1eb   : > { %5154 = vmatprep.mubr.msk.bf16.mxu1 %vm1784_vm15, %v3776_v39  ;;  %v3852_v4 = vsel %vm3820_vm2, %v3809_v1, %v3776_v39 }
 0x1ec   : > { %4142 = vmatmul.mubr.bf16.gmra.mrb[8].mxu1 %v3852_v4 }
 0x1ed   : > { %v3768_v31 = vpop.permute.xlu0 %3767 }
 0x1ee   : > { %5150 = vmatprep.mubr.msk.bf16.mxu0 %vm1784_vm15, %v3768_v31  ;;  %v3840_v5 = vsel %vm3820_vm2, %v3801_v45, %v3768_v31  ;;  %v1695_v52 = vpop.permute.xlu1 %1694 }
 0x1ef   : > { %4102 = vmatmul.mubr.bf16.gmra.mrb[24].mxu0 %v3840_v5  ;;  %v1820_v44 = vsel %vm1784_vm15, %v4961_v55, %v1695_v52 }
 0x1f1   : > { %v1687_v24 = vpop.permute.xlu0 %1686 }
 0x1f2   : > { %v1775_v13 = vpop.permute.xlu1 %1774  ;;  %v1808_v7 = vsel %vm1784_vm15, %v4957_v50, %v1687_v24 }
 0x1f3   : > { %v1857_v10 = vsel %vm1833_vm0, %v1820_v44, %v1775_v13 }
 0x1f5   : > { %v1767_v53 = vpop.permute.xlu0 %1766 }
 0x1f6   : > { %v3730_v17 = vpop.permute.xlu1 %3729  ;;  %v1849_v56 = vsel %vm1833_vm0, %v1808_v7, %v1767_v53 }
 0x1f7   : > { %v3811_v2 = vsel %vm3787_vm1, %v1857_v10, %v3730_v17 }
 0x1f9   : > { %v3722_v25 = vpop.permute.xlu0 %3721 }
 0x1fa   : > { %v3778_v15 = vpop.permute.xlu1 %3777  ;;  %v3803_v34 = vsel %vm3787_vm1, %v1849_v56, %v3722_v25 }
 0x1fb   : > { %5155 = vmatprep.mubr.msk.bf16.mxu1 %vm1784_vm15, %v3778_v15  ;;  %v3855_v47 = vsel %vm3820_vm2, %v3811_v2, %v3778_v15 }
 0x1fc   : > { %4152 = vmatmul.mubr.bf16.gmra.mrb[12].mxu1 %v3855_v47 }
 0x1fd   : > { %v3770_v55 = vpop.permute.xlu0 %3769 }
 0x1fe   : > { %5151 = vmatprep.mubr.msk.bf16.mxu0 %vm1784_vm15, %v3770_v55  ;;  %v3843_v30 = vsel %vm3820_vm2, %v3803_v34, %v3770_v55  ;;  %v1777_v40 = vpop.permute.xlu1 %1776 }
 0x1ff   : > { %4112 = vmatmul.mubr.bf16.gmra.mrb[28].mxu0 %v3843_v30 }
 0x201   : > { %v1697_v50 = vpop.permute.xlu0 %1696 }
 0x202   : > { %v1823_v58 = vsel %vm1784_vm15, %v4962_v37, %v1697_v50  ;;  %v3780_v22 = vpop.permute.xlu1 %3779 }
 0x203   : > { %v1859_v60 = vsel %vm1833_vm0, %v1823_v58, %v1777_v40  ;;  %5156 = vmatprep.mubr.msk.bf16.mxu1 %vm1784_vm15, %v3780_v22 }
 0x205   : > { %v3732_v9 = vpop.permute.xlu0 %3731 }
 0x206   : > { %v3813_v51 = vsel %vm3787_vm1, %v1859_v60, %v3732_v9  ;;  %v1779_v63 = vpop.permute.xlu1 %1778 }
 0x207   : > { %v3858_v28 = vsel %vm3820_vm2, %v3813_v51, %v3780_v22 }
 0x208   : > { %4162 = vmatmul.mubr.bf16.gmra.mrb[16].mxu1 %v3858_v28 }
 0x209   : > { %v1699_v8 = vpop.permute.xlu0 %1698 }
 0x20a   : > { %v1826_v38 = vsel %vm1784_vm15, %v4963_v21, %v1699_v8  ;;  %v3782_v57 = vpop.permute.xlu1 %3781 }
 0x20b   : > { %v1861_v37 = vsel %vm1833_vm0, %v1826_v38, %v1779_v63  ;;  %5157 = vmatprep.mubr.msk.bf16.mxu1 %vm1784_vm15, %v3782_v57 }
 0x20d   : > { %v3734_v3 = vpop.permute.xlu0 %3733 }
 0x20e   : > { %v3815_v29 = vsel %vm3787_vm1, %v1861_v37, %v3734_v3  ;;  %v1781_v20 = vpop.permute.xlu1 %1780 }
 0x20f   : > { %v3861_v54 = vsel %vm3820_vm2, %v3815_v29, %v3782_v57 }
 0x210   : > { %4172 = vmatmul.mubr.bf16.gmra.mrb[20].mxu1 %v3861_v54 }
 0x211   : > { %v1701_v36 = vpop.permute.xlu0 %1700 }
 0x212   : > { %v1829_v27 = vsel %vm1784_vm15, %v4964_v19, %v1701_v36 }
 0x213   : > { %v1863_v21 = vsel %vm1833_vm0, %v1829_v27, %v1781_v20 }
 0x215   : > { %v3736_v0 = vpop.permute.xlu0 %3735 }
 0x216   : > { %v3817_v16 = vsel %vm3787_vm1, %v1863_v21, %v3736_v0 }
 0x219   : > { %v3784_v59 = vpop.permute.xlu1 %3783  ;;  %v1703_v35 = vpop.permute.xlu0 %1702 }
 0x21a   : > { %5158 = vmatprep.mubr.msk.bf16.mxu1 %vm1784_vm15, %v3784_v59  ;;  %v3864_v6 = vsel %vm3820_vm2, %v3817_v16, %v3784_v59  ;;  %v1832_v14 = vsel %vm1784_vm15, %v4965_v46, %v1703_v35 }
 0x21b   : > { %4182 = vmatmul.mubr.bf16.gmra.mrb[24].mxu1 %v3864_v6 }
 0x21d   : > { %v1783_v26 = vpop.permute.xlu1 %1782 }
 0x21e   : > { %v1865_v19 = vsel %vm1833_vm0, %v1832_v14, %v1783_v26  ;;  %v3738_v18 = vpop.permute.xlu0 %3737 }
 0x21f   : > { %v3819_v43 = vsel %vm3787_vm1, %v1865_v19, %v3738_v18 }
 0x232   : > { %v3786_v42 = vpop.permute.xlu1 %3785 }
 0x233   : > { %5159 = vmatprep.mubr.msk.bf16.mxu1 %vm1784_vm15, %v3786_v42  ;;  %v3867_v41 = vsel %vm3820_vm2, %v3819_v43, %v3786_v42 }
 0x234   : > { %4192 = vmatmul.mubr.bf16.gmra.mrb[28].mxu1 %v3867_v41 }
 0x283   : > { %v4043_v33 = vpop.f32.mrb[0].mxu0 }
 0x284   : > { %v4045_v23 = vpop.f32.mrb[1].mxu0  ;;  %v4399_v11 = vmul.f32 %v4043_v33, %v4043_v33 }
 0x285   : > { %v4047_v32 = vpop.f32.mrb[2].mxu0  ;;  %v4668_v62 = vmul.f32 %v4045_v23, %v4045_v23 }
 0x286   : > { %v5328_v46 = vpack.c.bf16 %v4047_v32, %v4043_v33  ;;  %v4362_v49 = vadd.f32 %v4047_v32, %v4043_v33  ;;  %v4400_v48 = vmul.f32 %v4047_v32, %v4047_v32  ;;  %v4049_v12 = vpop.f32.mrb[3].mxu0 }
 0x287   : > { %v5408_v61 = vpack.c.bf16 %v4049_v12, %v4045_v23  ;;  %v4631_v1 = vadd.f32 %v4049_v12, %v4045_v23  ;;  %v4669_v39 = vmul.f32 %v4049_v12, %v4049_v12 }
 0x288   : > { %5329 = vst [vmem:[%s7470_s21] sm:$0xff] %v5328_v46   ;;  %v4431_v4 = vadd.f32 %v4400_v48, %v4399_v11 }
 0x289   : > { %5409 = vst [vmem:[%s7475_s26] sm:$0xff] %v5408_v61   ;;  %v4700_v45 = vadd.f32 %v4669_v39, %v4668_v62 }
 0x28b   : > { %v4053_v31 = vpop.f32.mrb[4].mxu0 }
 0x28c   : > { %v4363_v5 = vadd.f32 %v4362_v49, %v4053_v31  ;;  %v4401_v52 = vmul.f32 %v4053_v31, %v4053_v31  ;;  %v4055_v24 = vpop.f32.mrb[5].mxu0 }
 0x28d   : > { %v4632_v13 = vadd.f32 %v4631_v1, %v4055_v24  ;;  %v4670_v44 = vmul.f32 %v4055_v24, %v4055_v24  ;;  %v4057_v53 = vpop.f32.mrb[6].mxu0 }
 0x28e   : > { %v4432_v17 = vadd.f32 %v4431_v4, %v4401_v52  ;;  %v5333_v7 = vpack.c.bf16 %v4057_v53, %v4053_v31  ;;  %v4364_v10 = vadd.f32 %v4363_v5, %v4057_v53  ;;  %v4402_v25 = vmul.f32 %v4057_v53, %v4057_v53  ;;  %v4059_v56 = vpop.f32.mrb[7].mxu0 }
 0x28f   : > { %v4701_v2 = vadd.f32 %v4700_v45, %v4670_v44  ;;  %v5413_v15 = vpack.c.bf16 %v4059_v56, %v4055_v24  ;;  %v4633_v47 = vadd.f32 %v4632_v13, %v4059_v56  ;;  %v4671_v34 = vmul.f32 %v4059_v56, %v4059_v56 }
 0x290   : > { %5485 = vst [vmem:[%s7470_s21 + $0x8] sm:$0xff] %v5333_v7   ;;  %v4433_v55 = vadd.f32 %v4432_v17, %v4402_v25 }
 0x291   : > { %5500 = vst [vmem:[%s7475_s26 + $0x8] sm:$0xff] %v5413_v15   ;;  %v4702_v30 = vadd.f32 %v4701_v2, %v4671_v34 }
 0x293   : > { %v4063_v40 = vpop.f32.mrb[8].mxu0 }
 0x294   : > { %v4365_v50 = vadd.f32 %v4364_v10, %v4063_v40  ;;  %v4403_v58 = vmul.f32 %v4063_v40, %v4063_v40  ;;  %v4065_v22 = vpop.f32.mrb[9].mxu0 }
 0x295   : > { %v4634_v60 = vadd.f32 %v4633_v47, %v4065_v22  ;;  %v4672_v9 = vmul.f32 %v4065_v22, %v4065_v22  ;;  %v4067_v51 = vpop.f32.mrb[10].mxu0 }
 0x296   : > { %v4434_v63 = vadd.f32 %v4433_v55, %v4403_v58  ;;  %v5338_v28 = vpack.c.bf16 %v4067_v51, %v4063_v40  ;;  %v4366_v8 = vadd.f32 %v4365_v50, %v4067_v51  ;;  %v4404_v38 = vmul.f32 %v4067_v51, %v4067_v51  ;;  %v4069_v57 = vpop.f32.mrb[11].mxu0 }
 0x297   : > { %v4703_v37 = vadd.f32 %v4702_v30, %v4672_v9  ;;  %v5418_v3 = vpack.c.bf16 %v4069_v57, %v4065_v22  ;;  %v4635_v29 = vadd.f32 %v4634_v60, %v4069_v57  ;;  %v4673_v54 = vmul.f32 %v4069_v57, %v4069_v57 }
 0x298   : > { %5486 = vst [vmem:[%s7470_s21 + $0x10] sm:$0xff] %v5338_v28   ;;  %v4435_v36 = vadd.f32 %v4434_v63, %v4404_v38 }
 0x299   : > { %5501 = vst [vmem:[%s7475_s26 + $0x10] sm:$0xff] %v5418_v3   ;;  %v4704_v27 = vadd.f32 %v4703_v37, %v4673_v54 }
 0x29b   : > { %v4073_v20 = vpop.f32.mrb[12].mxu0 }
 0x29c   : > { %v4367_v0 = vadd.f32 %v4366_v8, %v4073_v20  ;;  %v4405_v21 = vmul.f32 %v4073_v20, %v4073_v20  ;;  %v4075_v59 = vpop.f32.mrb[13].mxu0 }
 0x29d   : > { %v4636_v16 = vadd.f32 %v4635_v29, %v4075_v59  ;;  %v4674_v6 = vmul.f32 %v4075_v59, %v4075_v59  ;;  %v4077_v35 = vpop.f32.mrb[14].mxu0 }
 0x29e   : > { %v4436_v14 = vadd.f32 %v4435_v36, %v4405_v21  ;;  %v5343_v26 = vpack.c.bf16 %v4077_v35, %v4073_v20  ;;  %v4368_v19 = vadd.f32 %v4367_v0, %v4077_v35  ;;  %v4406_v18 = vmul.f32 %v4077_v35, %v4077_v35  ;;  %v4079_v43 = vpop.f32.mrb[15].mxu0 }
 0x29f   : > { %v4705_v42 = vadd.f32 %v4704_v27, %v4674_v6  ;;  %v5423_v41 = vpack.c.bf16 %v4079_v43, %v4075_v59  ;;  %v4637_v33 = vadd.f32 %v4636_v16, %v4079_v43  ;;  %v4675_v23 = vmul.f32 %v4079_v43, %v4079_v43  ;;  %v7483_v32 = vpop.f32.mrb[0].mxu1 }
 0x2a0   : > { %5487 = vst [vmem:[%s7470_s21 + $0x18] sm:$0xff] %v5343_v26   ;;  %v4437_v11 = vadd.f32 %v4436_v14, %v4406_v18  ;;  %v7486_v46 = vpop.f32.mrb[1].mxu1 }
 0x2a1   : > { %5502 = vst [vmem:[%s7475_s26 + $0x18] sm:$0xff] %v5423_v41   ;;  %v4706_v49 = vadd.f32 %v4705_v42, %v4675_v23  ;;  %v7489_v48 = vpop.f32.mrb[2].mxu1 }
 0x2a2   : > { %v5368_v12 = vpack.c.bf16 %v7489_v48, %v7483_v32  ;;  %v7493_v62 = vpop.f32.mrb[3].mxu1 }
 0x2a3   : > { %v4083_v61 = vpop.f32.mrb[16].mxu0  ;;  %v5448_v1 = vpack.c.bf16 %v7493_v62, %v7486_v46 }
 0x2a4   : > { %v4369_v39 = vadd.f32 %v4368_v19, %v4083_v61  ;;  %v4407_v4 = vmul.f32 %v4083_v61, %v4083_v61  ;;  %v4085_v45 = vpop.f32.mrb[17].mxu0  ;;  %5492 = vst [vmem:[%s7470_s21 + $0x40] sm:$0xff] %v5368_v12  }
 0x2a5   : > { %v4638_v31 = vadd.f32 %v4637_v33, %v4085_v45  ;;  %v4676_v5 = vmul.f32 %v4085_v45, %v4085_v45  ;;  %v4087_v52 = vpop.f32.mrb[18].mxu0  ;;  %5507 = vst [vmem:[%s7475_s26 + $0x40] sm:$0xff] %v5448_v1  }
 0x2a6   : > { %v4438_v24 = vadd.f32 %v4437_v11, %v4407_v4  ;;  %v5348_v13 = vpack.c.bf16 %v4087_v52, %v4083_v61  ;;  %v4370_v44 = vadd.f32 %v4369_v39, %v4087_v52  ;;  %v4408_v53 = vmul.f32 %v4087_v52, %v4087_v52  ;;  %v4089_v17 = vpop.f32.mrb[19].mxu0 }
 0x2a7   : > { %v4707_v7 = vadd.f32 %v4706_v49, %v4676_v5  ;;  %v5428_v10 = vpack.c.bf16 %v4089_v17, %v4085_v45  ;;  %v4639_v25 = vadd.f32 %v4638_v31, %v4089_v17  ;;  %v4677_v56 = vmul.f32 %v4089_v17, %v4089_v17 }
 0x2a8   : > { %5488 = vst [vmem:[%s7470_s21 + $0x20] sm:$0xff] %v5348_v13   ;;  %v4439_v2 = vadd.f32 %v4438_v24, %v4408_v53 }
 0x2a9   : > { %5503 = vst [vmem:[%s7475_s26 + $0x20] sm:$0xff] %v5428_v10   ;;  %v4708_v15 = vadd.f32 %v4707_v7, %v4677_v56 }
 0x2af   : > { %v7501_v47 = vpop.f32.mrb[4].mxu1 }
 0x2b0   : > { %v7503_v34 = vpop.f32.mrb[5].mxu1 }
 0x2b1   : > { %v7505_v55 = vpop.f32.mrb[6].mxu1 }
 0x2b2   : > { %v4093_v30 = vpop.f32.mrb[20].mxu0  ;;  %v5373_v40 = vpack.c.bf16 %v7505_v55, %v7501_v47  ;;  %v7509_v50 = vpop.f32.mrb[7].mxu1 }
 0x2b3   : > { %v4371_v58 = vadd.f32 %v4370_v44, %v4093_v30  ;;  %v4409_v22 = vmul.f32 %v4093_v30, %v4093_v30  ;;  %v4095_v60 = vpop.f32.mrb[21].mxu0  ;;  %v5453_v9 = vpack.c.bf16 %v7509_v50, %v7503_v34 }
 0x2b4   : > { %v4640_v51 = vadd.f32 %v4639_v25, %v4095_v60  ;;  %v4678_v63 = vmul.f32 %v4095_v60, %v4095_v60  ;;  %v4097_v28 = vpop.f32.mrb[22].mxu0  ;;  %5493 = vst [vmem:[%s7470_s21 + $0x48] sm:$0xff] %v5373_v40  }
 0x2b5   : > { %v4440_v8 = vadd.f32 %v4439_v2, %v4409_v22  ;;  %v5353_v38 = vpack.c.bf16 %v4097_v28, %v4093_v30  ;;  %v4372_v57 = vadd.f32 %v4371_v58, %v4097_v28  ;;  %v4410_v37 = vmul.f32 %v4097_v28, %v4097_v28  ;;  %v4099_v3 = vpop.f32.mrb[23].mxu0  ;;  %5508 = vst [vmem:[%s7475_s26 + $0x48] sm:$0xff] %v5453_v9  }
 0x2b6   : > { %v4709_v29 = vadd.f32 %v4708_v15, %v4678_v63  ;;  %v5433_v54 = vpack.c.bf16 %v4099_v3, %v4095_v60  ;;  %v4641_v36 = vadd.f32 %v4640_v51, %v4099_v3  ;;  %v4679_v27 = vmul.f32 %v4099_v3, %v4099_v3 }
 0x2b7   : > { %5489 = vst [vmem:[%s7470_s21 + $0x28] sm:$0xff] %v5353_v38   ;;  %v4441_v20 = vadd.f32 %v4440_v8, %v4410_v37  ;;  %v4415_v38 = vmul.f32 %v7483_v32, %v7483_v32  ;;  %v4684_v3 = vmul.f32 %v7486_v46, %v7486_v46 }
 0x2b8   : > { %5504 = vst [vmem:[%s7475_s26 + $0x28] sm:$0xff] %v5433_v54   ;;  %v4710_v0 = vadd.f32 %v4709_v29, %v4679_v27 }
 0x2bf   : > { %v7517_v21 = vpop.f32.mrb[8].mxu1 }
 0x2c0   : > { %v7519_v59 = vpop.f32.mrb[9].mxu1 }
 0x2c1   : > { %v7521_v16 = vpop.f32.mrb[10].mxu1 }
 0x2c2   : > { %v4103_v6 = vpop.f32.mrb[24].mxu0  ;;  %v5378_v35 = vpack.c.bf16 %v7521_v16, %v7517_v21  ;;  %v7525_v14 = vpop.f32.mrb[11].mxu1 }
 0x2c3   : > { %v4373_v26 = vadd.f32 %v4372_v57, %v4103_v6  ;;  %v4411_v19 = vmul.f32 %v4103_v6, %v4103_v6  ;;  %v4105_v18 = vpop.f32.mrb[25].mxu0  ;;  %v5458_v43 = vpack.c.bf16 %v7525_v14, %v7519_v59 }
 0x2c4   : > { %v4642_v42 = vadd.f32 %v4641_v36, %v4105_v18  ;;  %v4680_v41 = vmul.f32 %v4105_v18, %v4105_v18  ;;  %v4107_v33 = vpop.f32.mrb[26].mxu0  ;;  %5494 = vst [vmem:[%s7470_s21 + $0x50] sm:$0xff] %v5378_v35   ;;  %v4416_v36 = vmul.f32 %v7489_v48, %v7489_v48  ;;  %v4417_v35 = vmul.f32 %v7501_v47, %v7501_v47 }
 0x2c5   : > { %v4442_v23 = vadd.f32 %v4441_v20, %v4411_v19  ;;  %v5358_v11 = vpack.c.bf16 %v4107_v33, %v4103_v6  ;;  %v4374_v49 = vadd.f32 %v4373_v26, %v4107_v33  ;;  %v4412_v12 = vmul.f32 %v4107_v33, %v4107_v33  ;;  %v4109_v61 = vpop.f32.mrb[27].mxu0  ;;  %5509 = vst [vmem:[%s7475_s26 + $0x50] sm:$0xff] %v5458_v43  }
 0x2c6   : > { %v4711_v1 = vadd.f32 %v4710_v0, %v4680_v41  ;;  %v5438_v39 = vpack.c.bf16 %v4109_v61, %v4105_v18  ;;  %v4643_v4 = vadd.f32 %v4642_v42, %v4109_v61  ;;  %v4681_v45 = vmul.f32 %v4109_v61, %v4109_v61 }
 0x2c7   : > { %5490 = vst [vmem:[%s7470_s21 + $0x30] sm:$0xff] %v5358_v11   ;;  %v4443_v31 = vadd.f32 %v4442_v23, %v4412_v12  ;;  %v4685_v0 = vmul.f32 %v7493_v62, %v7493_v62  ;;  %v4686_v18 = vmul.f32 %v7503_v34, %v7503_v34  ;;  %v4418_v41 = vmul.f32 %v7505_v55, %v7505_v55 }
 0x2c8   : > { %5505 = vst [vmem:[%s7475_s26 + $0x30] sm:$0xff] %v5438_v39   ;;  %v4712_v5 = vadd.f32 %v4711_v1, %v4681_v45 }
 0x2cf   : > { %v7533_v52 = vpop.f32.mrb[12].mxu1 }
 0x2d0   : > { %v7535_v24 = vpop.f32.mrb[13].mxu1 }
 0x2d1   : > { %v7537_v13 = vpop.f32.mrb[14].mxu1 }
 0x2d2   : > { %v4113_v44 = vpop.f32.mrb[28].mxu0  ;;  %v5383_v53 = vpack.c.bf16 %v7537_v13, %v7533_v52  ;;  %v7541_v17 = vpop.f32.mrb[15].mxu1 }
 0x2d3   : > { %v4375_v7 = vadd.f32 %v4374_v49, %v4113_v44  ;;  %v4413_v10 = vmul.f32 %v4113_v44, %v4113_v44  ;;  %v4115_v25 = vpop.f32.mrb[29].mxu0  ;;  %v5463_v56 = vpack.c.bf16 %v7541_v17, %v7535_v24 }
 0x2d4   : > { %v4644_v2 = vadd.f32 %v4643_v4, %v4115_v25  ;;  %v4682_v15 = vmul.f32 %v4115_v25, %v4115_v25  ;;  %v4117_v30 = vpop.f32.mrb[30].mxu0  ;;  %5495 = vst [vmem:[%s7470_s21 + $0x58] sm:$0xff] %v5383_v53   ;;  %v4689_v53 = vmul.f32 %v7525_v14, %v7525_v14 }
 0x2d5   : > { %v4444_v40 = vadd.f32 %v4443_v31, %v4413_v10  ;;  %v5363_v58 = vpack.c.bf16 %v4117_v30, %v4113_v44  ;;  %v4376_v22 = vadd.f32 %v4375_v7, %v4117_v30  ;;  %v4414_v60 = vmul.f32 %v4117_v30, %v4117_v30  ;;  %v4119_v9 = vpop.f32.mrb[31].mxu0  ;;  %5510 = vst [vmem:[%s7475_s26 + $0x58] sm:$0xff] %v5463_v56  }
 0x2d6   : > { %v4713_v51 = vadd.f32 %v4712_v5, %v4682_v15  ;;  %v5443_v63 = vpack.c.bf16 %v4119_v9, %v4115_v25  ;;  %v4645_v28 = vadd.f32 %v4644_v2, %v4119_v9  ;;  %v4683_v8 = vmul.f32 %v4119_v9, %v4119_v9 }
 0x2d7   : > { %5491 = vst [vmem:[%s7470_s21 + $0x38] sm:$0xff] %v5363_v58   ;;  %v4377_v57 = vadd.f32 %v4376_v22, %v7483_v32  ;;  %v4445_v37 = vadd.f32 %v4444_v40, %v4414_v60  ;;  %v4420_v5 = vmul.f32 %v7521_v16, %v7521_v16  ;;  %v4691_v9 = vmul.f32 %v7541_v17, %v7541_v17 }
 0x2d8   : > { %5506 = vst [vmem:[%s7475_s26 + $0x38] sm:$0xff] %v5443_v63   ;;  %v4646_v29 = vadd.f32 %v4645_v28, %v7486_v46  ;;  %v4714_v54 = vadd.f32 %v4713_v51, %v4683_v8 }
 0x2d9   : > { %v4378_v27 = vadd.f32 %v4377_v57, %v7489_v48  ;;  %v4446_v20 = vadd.f32 %v4445_v37, %v4415_v38 }
 0x2da   : > { %v4647_v6 = vadd.f32 %v4646_v29, %v7493_v62  ;;  %v4715_v32 = vadd.f32 %v4714_v54, %v4684_v3 }
 0x2db   : > { %v4379_v26 = vadd.f32 %v4378_v27, %v7501_v47  ;;  %v4447_v19 = vadd.f32 %v4446_v20, %v4416_v36  ;;  %v4163_v46 = vpop.f32.mrb[16].mxu1  ;;  %v4687_v47 = vmul.f32 %v7509_v50, %v7509_v50 }
 0x2dc   : > { %v4648_v43 = vadd.f32 %v4647_v6, %v7503_v34  ;;  %v4716_v48 = vadd.f32 %v4715_v32, %v4685_v0  ;;  %v4165_v42 = vpop.f32.mrb[17].mxu1  ;;  %v4419_v34 = vmul.f32 %v7517_v21, %v7517_v21  ;;  %v4423_v8 = vmul.f32 %v4163_v46, %v4163_v46 }
 0x2dd   : > { %v4448_v62 = vadd.f32 %v4447_v19, %v4417_v35  ;;  %v4380_v33 = vadd.f32 %v4379_v26, %v7505_v55  ;;  %v4167_v23 = vpop.f32.mrb[18].mxu1  ;;  %v4688_v55 = vmul.f32 %v7519_v59, %v7519_v59  ;;  %v4692_v3 = vmul.f32 %v4165_v42, %v4165_v42 }
 0x2de   : > { %v4717_v11 = vadd.f32 %v4716_v48, %v4686_v18  ;;  %v4649_v49 = vadd.f32 %v4648_v43, %v7509_v50  ;;  %v5388_v12 = vpack.c.bf16 %v4167_v23, %v4163_v46  ;;  %v4169_v61 = vpop.f32.mrb[19].mxu1  ;;  %v4424_v54 = vmul.f32 %v4167_v23, %v4167_v23 }
 0x2df   : > { %v4381_v1 = vadd.f32 %v4380_v33, %v7517_v21  ;;  %v4449_v39 = vadd.f32 %v4448_v62, %v4418_v41  ;;  %v5468_v4 = vpack.c.bf16 %v4169_v61, %v4165_v42  ;;  %v4693_v20 = vmul.f32 %v4169_v61, %v4169_v61 }
 0x2e0   : > { %v4650_v45 = vadd.f32 %v4649_v49, %v7519_v59  ;;  %v4718_v31 = vadd.f32 %v4717_v11, %v4687_v47  ;;  %5496 = vst [vmem:[%s7470_s21 + $0x60] sm:$0xff] %v5388_v12   ;;  %v4421_v59 = vmul.f32 %v7533_v52, %v7533_v52 }
 0x2e1   : > { %v4382_v50 = vadd.f32 %v4381_v1, %v7521_v16  ;;  %v4450_v44 = vadd.f32 %v4449_v39, %v4419_v34  ;;  %5511 = vst [vmem:[%s7475_s26 + $0x60] sm:$0xff] %v5468_v4   ;;  %v4690_v16 = vmul.f32 %v7535_v24, %v7535_v24 }
 0x2e2   : > { %v4651_v21 = vadd.f32 %v4650_v45, %v7525_v14  ;;  %v4719_v7 = vadd.f32 %v4718_v31, %v4688_v55  ;;  %v4422_v14 = vmul.f32 %v7537_v13, %v7537_v13 }
 0x2e3   : > { %v4383_v10 = vadd.f32 %v4382_v50, %v7533_v52  ;;  %v4451_v25 = vadd.f32 %v4450_v44, %v4420_v5  ;;  %v4173_v56 = vpop.f32.mrb[20].mxu1 }
 0x2e4   : > { %v4652_v2 = vadd.f32 %v4651_v21, %v7535_v24  ;;  %v4720_v15 = vadd.f32 %v4719_v7, %v4689_v53  ;;  %v4175_v30 = vpop.f32.mrb[21].mxu1 }
 0x2e5   : > { %v4452_v40 = vadd.f32 %v4451_v25, %v4421_v59  ;;  %v4384_v58 = vadd.f32 %v4383_v10, %v7537_v13  ;;  %v4177_v22 = vpop.f32.mrb[22].mxu1  ;;  %v4694_v26 = vmul.f32 %v4175_v30, %v4175_v30 }
 0x2e6   : > { %v4721_v60 = vadd.f32 %v4720_v15, %v4690_v16  ;;  %v4653_v52 = vadd.f32 %v4652_v2, %v7541_v17  ;;  %v5393_v51 = vpack.c.bf16 %v4177_v22, %v4173_v56  ;;  %v4179_v63 = vpop.f32.mrb[23].mxu1  ;;  %v4425_v17 = vmul.f32 %v4173_v56, %v4173_v56 }
 0x2e7   : > { %v4453_v24 = vadd.f32 %v4452_v40, %v4422_v14  ;;  %v4385_v28 = vadd.f32 %v4384_v58, %v4163_v46  ;;  %v5473_v38 = vpack.c.bf16 %v4179_v63, %v4175_v30  ;;  %v4426_v18 = vmul.f32 %v4177_v22, %v4177_v22 }
 0x2e8   : > { %v4722_v57 = vadd.f32 %v4721_v60, %v4691_v9  ;;  %v4654_v37 = vadd.f32 %v4653_v52, %v4165_v42  ;;  %5497 = vst [vmem:[%s7470_s21 + $0x68] sm:$0xff] %v5393_v51   ;;  %v4695_v42 = vmul.f32 %v4179_v63, %v4179_v63 }
 0x2e9   : > { %v4454_v29 = vadd.f32 %v4453_v24, %v4423_v8  ;;  %v4386_v13 = vadd.f32 %v4385_v28, %v4167_v23  ;;  %5512 = vst [vmem:[%s7475_s26 + $0x68] sm:$0xff] %v5473_v38  }
 0x2ea   : > { %v4723_v36 = vadd.f32 %v4722_v57, %v4692_v3  ;;  %v4655_v27 = vadd.f32 %v4654_v37, %v4169_v61 }
 0x2eb   : > { %v4455_v0 = vadd.f32 %v4454_v29, %v4424_v54  ;;  %v4387_v6 = vadd.f32 %v4386_v13, %v4173_v56 }
 0x2ec   : > { %v4724_v32 = vadd.f32 %v4723_v36, %v4693_v20  ;;  %v4656_v35 = vadd.f32 %v4655_v27, %v4175_v30 }
 0x2ed   : > { %v4456_v19 = vadd.f32 %v4455_v0, %v4425_v17  ;;  %v4388_v46 = vadd.f32 %v4387_v6, %v4177_v22 }
 0x2ee   : > { %v4725_v43 = vadd.f32 %v4724_v32, %v4694_v26  ;;  %v4657_v48 = vadd.f32 %v4656_v35, %v4179_v63  ;;  %v4183_v41 = vpop.f32.mrb[24].mxu1 }
 0x2ef   : > { %v4457_v62 = vadd.f32 %v4456_v19, %v4426_v18  ;;  %v4389_v33 = vadd.f32 %v4388_v46, %v4183_v41  ;;  %v4427_v23 = vmul.f32 %v4183_v41, %v4183_v41  ;;  %v4185_v47 = vpop.f32.mrb[25].mxu1 }
 0x2f0   : > { %v4726_v11 = vadd.f32 %v4725_v43, %v4695_v42  ;;  %v4658_v49 = vadd.f32 %v4657_v48, %v4185_v47  ;;  %v4696_v12 = vmul.f32 %v4185_v47, %v4185_v47  ;;  %v4187_v61 = vpop.f32.mrb[26].mxu1 }
 0x2f1   : > { %v4458_v34 = vadd.f32 %v4457_v62, %v4427_v23  ;;  %v5398_v1 = vpack.c.bf16 %v4187_v61, %v4183_v41  ;;  %v4390_v39 = vadd.f32 %v4389_v33, %v4187_v61  ;;  %v4428_v4 = vmul.f32 %v4187_v61, %v4187_v61  ;;  %v4189_v55 = vpop.f32.mrb[27].mxu1 }
 0x2f2   : > { %v4727_v45 = vadd.f32 %v4726_v11, %v4696_v12  ;;  %v5478_v31 = vpack.c.bf16 %v4189_v55, %v4185_v47  ;;  %v4659_v5 = vadd.f32 %v4658_v49, %v4189_v55  ;;  %v4697_v50 = vmul.f32 %v4189_v55, %v4189_v55 }
 0x2f3   : > { %5498 = vst [vmem:[%s7470_s21 + $0x70] sm:$0xff] %v5398_v1   ;;  %v4459_v44 = vadd.f32 %v4458_v34, %v4428_v4 }
 0x2f4   : > { %5513 = vst [vmem:[%s7475_s26 + $0x70] sm:$0xff] %v5478_v31   ;;  %v4728_v53 = vadd.f32 %v4727_v45, %v4697_v50 }
 0x307   : > { %v4193_v21 = vpop.f32.mrb[28].mxu1 }
 0x308   : > { %v4391_v7 = vadd.f32 %v4390_v39, %v4193_v21  ;;  %v4429_v10 = vmul.f32 %v4193_v21, %v4193_v21  ;;  %v4195_v59 = vpop.f32.mrb[29].mxu1 }
 0x309   : > { %v4660_v25 = vadd.f32 %v4659_v5, %v4195_v59  ;;  %v4698_v56 = vmul.f32 %v4195_v59, %v4195_v59  ;;  %v4197_v2 = vpop.f32.mrb[30].mxu1 }
 0x30a   : > { %v4460_v16 = vadd.f32 %v4459_v44, %v4429_v10  ;;  %v5403_v15 = vpack.c.bf16 %v4197_v2, %v4193_v21  ;;  %v4392_v30 = vadd.f32 %v4391_v7, %v4197_v2  ;;  %v4430_v40 = vmul.f32 %v4197_v2, %v4197_v2  ;;  %v4199_v58 = vpop.f32.mrb[31].mxu1 }
 0x30b   : > { %v4729_v14 = vadd.f32 %v4728_v53, %v4698_v56  ;;  %v5483_v22 = vpack.c.bf16 %v4199_v58, %v4195_v59  ;;  %v4661_v60 = vadd.f32 %v4660_v25, %v4199_v58  ;;  %v4699_v52 = vmul.f32 %v4199_v58, %v4199_v58 }
 0x30c   : > { %5499 = vst [vmem:[%s7470_s21 + $0x78] sm:$0xff] %v5403_v15   ;;  %v4393_v9 = vrot.slane %v4392_v30, 4  ;;  %v4461_v51 = vadd.f32 %v4460_v16, %v4430_v40 }
 0x30d   : > { %5514 = vst [vmem:[%s7475_s26 + $0x78] sm:$0xff] %v5483_v22   ;;  %v4662_v63 = vrot.slane %v4661_v60, 4  ;;  %v4730_v24 = vadd.f32 %v4729_v14, %v4699_v52 }
 0x30e   : > { %v4394_v28 = vadd.f32 %v4393_v9, %v4392_v30  ;;  %v4462_v8 = vrot.slane %v4461_v51, 4 }
 0x30f   : > { %v4663_v38 = vadd.f32 %v4662_v63, %v4661_v60  ;;  %v4731_v57 = vrot.slane %v4730_v24, 4 }
 0x310   : > { %v4395_v37 = vrot.slane %v4394_v28, 2  ;;  %v4463_v3 = vadd.f32 %v4462_v8, %v4461_v51 }
 0x311   : > { %v4664_v29 = vrot.slane %v4663_v38, 2  ;;  %v4732_v13 = vadd.f32 %v4731_v57, %v4730_v24 }
 0x312   : > { %v4396_v54 = vadd.f32 %v4395_v37, %v4394_v28  ;;  %v4464_v36 = vrot.slane %v4463_v3, 2 }
 0x313   : > { %v4665_v27 = vadd.f32 %v4664_v29, %v4663_v38  ;;  %v4733_v20 = vrot.slane %v4732_v13, 2 }
 0x314   : > { %v4397_v0 = vrot.slane %v4396_v54, 1  ;;  %v4465_v6 = vadd.f32 %v4464_v36, %v4463_v3 }
 0x315   : > { %v4666_v17 = vrot.slane %v4665_v27, 1  ;;  %v4734_v32 = vadd.f32 %v4733_v20, %v4732_v13 }
 0x316   : > { %v4466_v35 = vrot.slane %v4465_v6, 1  ;;  %v4398_v19 = vadd.f32 %v4397_v0, %v4396_v54 }
 0x317   : > { %v4735_v26 = vrot.slane %v4734_v32, 1  ;;  %v4667_v18 = vadd.f32 %v4666_v17, %v4665_v27 }
 0x318   : > { %v4467_v46 = vadd.f32 %v4466_v35, %v4465_v6 }
 0x319   : > { %v4736_v43 = vadd.f32 %v4735_v26, %v4734_v32 }
 0x31a   : > { %v4469_v48 = vsel %vm4468_vm3, %v4398_v19, %v4467_v46 }
 0x31b   : > { %4470 = vst [vmem:[%s248_s30] sm:$0x3] %v4469_v48  ;;  %v4737_v42 = vsel %vm4468_vm3, %v4667_v18, %v4736_v43 }
 0x31c   : > { %4738 = vst [vmem:[%s257_s8] sm:$0x3] %v4737_v42 }
 0x31d PF: > { %s16_s18 = sadd.s32 1, %s5673_s18  }
 0x31e   : > { %p13_p4 = scmp.ge.s32.totalorder %s16_s18, 4  }
 0x320   :  { %15 = sbr.rel (!%p13_p4) target bundleno = 1 (0x1), region = 97 }

// kernel: basic_block.4
= control target key start
LH: loop header
LB: loop body
LE: loop exit
PB: predicated region body
PF: predicated region fallthrough
CT: control target
= control target key end

     0   :  { %s6980_s18 = smov 0   ;;  %s9090_s0 = inlined_call_operand.vmem [shape: bf16[2,16,16,128], index: 0, kind: input, shape index: {}]   ;;  %s9091_s1 = inlined_call_operand.vmem [shape: f32[1,128], index: 1, kind: input, shape index: {}]   ;;  %s9092_s2 = inlined_call_operand.vmem [shape: f32[1,128], index: 2, kind: input, shape index: {}]   ;;  %s9093_s3 = inlined_call_operand.vmem [shape: bf16[1152,128], index: 3, kind: input, shape index: {}]   ;;  %s9094_s4 = inlined_call_operand.vmem [shape: bf16[2,16,16,128], index: 4, kind: output, shape index: {0}]   ;;  %s9095_s5 = inlined_call_operand.vmem [shape: f32[2,2,128], index: 5, kind: output, shape index: {1}]  }
   0x1 LB: > { %s5448_s19 = sadd.s32 4294967295, %s6947_s18   ;;  %p5452_p0 = scmp.ge.s32.totalorder %s6947_s18, 1  ;;  %s6947_s18 = sphi %s6980_s18, %s16_s18  }
   0x2   : > { %p190_p1 = scmp.lt.s32.totalorder %s6947_s18, 3 }
   0x4   : > { %p191_p2 = pnand %p5452_p0, %p190_p1 }
   0x6   : > { %194 = sbr.rel (%p191_p2) target bundleno = 688 (0x2b0), region = 36 }
   0xd   : > { %v6991_v0 = vld [vmem:[%s9093_s3 + $0x140] sm:$0xff]   ;;  %v7004_v3 = vld [vmem:[%s9093_s3 + $0x148] sm:$0xff]   ;;  %v7016_v6 = vld [vmem:[%s9093_s3 + $0x150] sm:$0xff]   ;;  %v6949_v9 = vmov 0   ;;  %p222_p3 = scmp.lt.s32.totalorder %s5448_s19, 1  ;;  %vm418_vm0 = vcmask 1040384  }
   0xe   : > { %v6768_v1 = vld [vmem:[%s9093_s3 + $0x100] sm:$0xff]   ;;  %6582 = vmatprep.subr.bf16.mxu1 %v6991_v0  ;;  %v6771_v4 = vld [vmem:[%s9093_s3 + $0x108] sm:$0xff]   ;;  %v6774_v7 = vld [vmem:[%s9093_s3 + $0x110] sm:$0xff]   ;;  %411 = vst [vmem:[#allocation2] sm:$0xf] %v6949_v9  ;;  %vm950_vm6 = vcmask 1043456  }
   0xf   : > { %v6769_v2 = vld [vmem:[%s9093_s3 + $0xc0] sm:$0xff]   ;;  %6590 = vmatpush3.bf16.msra.mxu1 %v6991_v0  ;;  %6030 = vmatprep.subr.bf16.mxu0 %v6768_v1  ;;  %v6772_v5 = vld [vmem:[%s9093_s3 + $0xc8] sm:$0xff]   ;;  %v6775_v8 = vld [vmem:[%s9093_s3 + $0xd0] sm:$0xff]   ;;  %412 = vst [vmem:[#allocation2 + $0x4] sm:$0xf] %v6949_v9  ;;  %s9115_s19 = smov (!%p222_p3, %s5448_s19), 1 }
  0x10   : > { %6031 = vmatpush3.bf16.msra.mxu0 %v6769_v2  ;;  %6583 = vmatprep.subr.bf16.mxu1 %v7004_v3  ;;  %413 = vst [vmem:[#allocation2 + $0x8] sm:$0x1] %v6949_v9  ;;  %415 = vst [vmem:[#allocation2 + $0xcc] sm:$0xf] %v6949_v9  ;;  %v7029_v10 = vld [vmem:[%s9093_s3 + $0x158] sm:$0xff]   ;;  %v7044_v13 = vld [vmem:[%s9093_s3 + $0x160] sm:$0xff]  }
  0x11   : > { %6032 = vmatprep.subr.bf16.mxu0 %v6771_v4  ;;  %416 = vst [vmem:[#allocation2 + $0xd0] sm:$0xf] %v6949_v9  ;;  %417 = vst [vmem:[#allocation2 + $0xd4] sm:$0x1] %v6949_v9  ;;  %v6777_v11 = vld [vmem:[%s9093_s3 + $0x118] sm:$0xff]   ;;  %v6780_v14 = vld [vmem:[%s9093_s3 + $0x120] sm:$0xff]  }
  0x12   : > { %v6778_v12 = vld [vmem:[%s9093_s3 + $0xd8] sm:$0xff]   ;;  %v6781_v15 = vld [vmem:[%s9093_s3 + $0xe0] sm:$0xff]   ;;  %v6782_v16 = vld [vmem:[%s9093_s3 + $0x168] sm:$0xff]   ;;  %s5790_s6 = sshll.u32 %s9115_s19, 7  ;;  %vm419_vm1 = vsmask.f32 256 }
  0x13   : > { %6591 = vmatpush3.bf16.msra.mxu1 %v7004_v3  ;;  %v6783_v17 = vld [vmem:[%s9093_s3 + $0x128] sm:$0xff]   ;;  %v6785_v19 = vld [vmem:[%s9093_s3 + $0x170] sm:$0xff]   ;;  %s7077_s13 = scalar_lea.vmem %s9090_s0, %s5790_s6  ;;  %v6788_v22 = vld [vmem:[%s9093_s3 + $0x178] sm:$0xff]   ;;  %vm475_vm2 = vsmask.f32 7938  ;;  %vm1563_vm7 = vcmask 1042432   ;;  %s9027_s10 = scalar_lea.vmem %s9094_s4, %s5790_s6 }
  0x14   : > { %6033 = vmatpush3.bf16.msra.mxu0 %v6772_v5  ;;  %6584 = vmatprep.subr.bf16.mxu1 %v7016_v6  ;;  %v6784_v18 = vld [vmem:[%s9093_s3 + $0xe8] sm:$0xff]   ;;  %v6786_v20 = vld [vmem:[%s9093_s3 + $0x130] sm:$0xff]   ;;  %v6789_v23 = vld [vmem:[%s9093_s3 + $0x138] sm:$0xff]   ;;  %vm627_vm5 = vsmask.f32 4368  ;;  %vm1564_vm8 = vcmask 1046532  }
  0x15   : > { %6034 = vmatprep.subr.bf16.mxu0 %v6774_v7  ;;  %v6787_v21 = vld [vmem:[%s9093_s3 + $0xf0] sm:$0xff]   ;;  %v6007_v24 = vld [vmem:[%s7077_s13 + $0x40] sm:$0xff]   ;;  %v448_v29 = vld [vmem:[#allocation2 + $0x6c] sm:$0x1]  ;;  %vm1112_vm12 = vsmask.f32 3328 }
  0x16   : > { %v7095_v25 = vld [vmem:[%s9091_s1] ss:$0 sm:$0xff]  ;;  %v5890_v27 = vunpack.c.l.bf16 %v6007_v24  ;;  %v5891_v28 = vunpack.c.h.bf16 %v6007_v24  ;;  %vm7104_vm3 = vmand %vm418_vm0, %vm419_vm1  ;;  %v504_v31 = vld [vmem:[#allocation2 + $0x74] sm:$0x1]  ;;  %vm1113_vm13 = vsmask.f32 7440 }
  0x17   : > { %6592 = vmatpush3.bf16.msra.mxu1 %v7016_v6  ;;  %v7100_v26 = vld [vmem:[%s9092_s2] ss:$0 sm:$0xff]  ;;  %v449_v34 = vsel %vm7104_vm3, 0, %v448_v29  ;;  %vm7114_vm4 = vmand %vm418_vm0, %vm475_vm2  ;;  %v6008_v37 = vld [vmem:[%s7077_s13 + $0x48] sm:$0xff]   ;;  %s5457_s6 = sshll.u32 %s9115_s19, 1 }
  0x18   : > { %6035 = vmatpush3.bf16.msra.mxu0 %v6775_v8  ;;  %6585 = vmatprep.subr.bf16.mxu1 %v7029_v10  ;;  %v324_v32 = vmul.f32 %v5890_v27, %v7095_v25  ;;  %v325_v33 = vmul.f32 %v5891_v28, %v7095_v25  ;;  %450 = vst [vmem:[#allocation2 + $0x6c] sm:$0x1] %v449_v34  ;;  %v505_v36 = vsel %vm7114_vm4, 0, %v504_v31  ;;  %v451_v38 = vld [vmem:[#allocation2 + $0x78] sm:$0x1]  ;;  %v5894_v42 = vunpack.c.l.bf16 %v6008_v37  ;;  %v6791_v47 = vld [vmem:[%s9093_s3 + $0x40] sm:$0xff]   ;;  %vm7148_vm9 = vmor %vm419_vm1, %vm627_vm5  ;;  %s235_s14 = scalar_lea.vmem %s9095_s5, %s5457_s6 }
  0x19   : > { %6036 = vmatprep.subr.bf16.mxu0 %v6777_v11  ;;  %506 = vst [vmem:[#allocation2 + $0x74] sm:$0x1] %v505_v36  ;;  %v6790_v41 = vld [vmem:[%s9093_s3 + $0xf8] sm:$0xff]   ;;  %v5895_v43 = vunpack.c.h.bf16 %v6008_v37  ;;  %v507_v44 = vld [vmem:[#allocation2 + $0x80] sm:$0x1]  ;;  %v452_v45 = vsel %vm7104_vm3, 0, %v451_v38  ;;  %vm7156_vm10 = vmand %vm950_vm6, %vm475_vm2 }
  0x1a   : > { %v363_v39 = vadd.f32 %v7100_v26, %v324_v32  ;;  %v364_v40 = vadd.f32 %v7100_v26, %v325_v33  ;;  %v508_v46 = vsel %vm7114_vm4, 0, %v507_v44  ;;  %v326_v50 = vmul.f32 %v5894_v42, %v7095_v25  ;;  %453 = vst [vmem:[#allocation2 + $0x78] sm:$0x1] %v452_v45  ;;  %v5857_v52 = vld [vmem:[%s7077_s13] sm:$0xff]   ;;  %v424_v53 = vld [vmem:[#allocation2 + $0xc] sm:$0x1]  ;;  %vm7186_vm11 = vmor %vm1563_vm7, %vm1564_vm8 }
  0x1b   : > { %6593 = vmatpush3.bf16.msra.mxu1 %v7029_v10  ;;  %v327_v51 = vmul.f32 %v5895_v43, %v7095_v25  ;;  %509 = vst [vmem:[#allocation2 + $0x80] sm:$0x1] %v508_v46  ;;  %v480_v54 = vld [vmem:[#allocation2 + $0x14] sm:$0x1]  ;;  %v5858_v59 = vunpack.c.l.bf16 %v5857_v52  ;;  %v5859_v60 = vunpack.c.h.bf16 %v5857_v52  ;;  %v425_v61 = vsel %vm7104_vm3, 0, %v424_v53  ;;  %vm7258_vm14 = vmor %vm1112_vm12, %vm1113_vm13 }
  0x1c   : > { %6037 = vmatpush3.bf16.msra.mxu0 %v6778_v12  ;;  %6586 = vmatprep.subr.bf16.mxu1 %v7044_v13  ;;  %v395_v48 = vmax.f32 %v363_v39, 0.0  ;;  %v396_v49 = vmax.f32 %v364_v40, 0.0  ;;  %v365_v57 = vadd.f32 %v7100_v26, %v326_v50  ;;  %v481_v62 = vsel %vm7114_vm4, 0, %v480_v54  ;;  %426 = vst [vmem:[#allocation2 + $0xc] sm:$0x1] %v425_v61  ;;  %v6009_v11 = vld [vmem:[%s7077_s13 + $0x50] sm:$0xff]  }
  0x1d   : > { %6038 = vmatprep.subr.bf16.mxu0 %v6780_v14  ;;  %v366_v58 = vadd.f32 %v7100_v26, %v327_v51  ;;  %482 = vst [vmem:[#allocation2 + $0x14] sm:$0x1] %v481_v62  ;;  %v308_v8 = vmul.f32 %v5858_v59, %v7095_v25  ;;  %v309_v9 = vmul.f32 %v5859_v60, %v7095_v25  ;;  %v454_v31 = vld [vmem:[#allocation2 + $0x84] sm:$0x1]  ;;  %v510_v32 = vld [vmem:[#allocation2 + $0x8c] sm:$0x1] }
  0x1e   : > { %v5808_v55 = vpack.c.bf16 %v395_v48, %v395_v48  ;;  %v5809_v56 = vpack.c.bf16 %v396_v49, %v396_v49  ;;  %v397_v5 = vmax.f32 %v365_v57, 0.0  ;;  %v455_v51 = vsel %vm7104_vm3, 0, %v454_v31  ;;  %v457_v57 = vld [vmem:[#allocation2 + $0x90] sm:$0x1]  ;;  %v6010_v62 = vld [vmem:[%s7077_s13 + $0x58] sm:$0xff]  }
  0x1f   : > { %6594 = vmatpush3.bf16.msra.mxu1 %v7044_v13  ;;  %v398_v7 = vmax.f32 %v366_v58, 0.0  ;;  %v511_v52 = vsel %vm7114_vm4, 0, %v510_v32  ;;  %456 = vst [vmem:[#allocation2 + $0x84] sm:$0x1] %v455_v51 }
  0x20   : > { %6039 = vmatpush3.bf16.msra.mxu0 %v6781_v15  ;;  %6587 = vmatprep.subr.bf16.mxu1 %v6782_v16  ;;  %v766_v63 = vshrl.u32 %v5808_v55, 16  ;;  %v769_v1 = vshll.u32 %v5808_v55, 16  ;;  %v774_v2 = vshrl.u32 %v5809_v56, 16  ;;  %v777_v4 = vshll.u32 %v5809_v56, 16  ;;  %512 = vst [vmem:[#allocation2 + $0x8c] sm:$0x1] %v511_v52 }
  0x21   : > { %6040 = vmatprep.subr.bf16.mxu0 %v6783_v17  ;;  %v5898_v15 = vunpack.c.l.bf16 %v6009_v11  ;;  %v1015_v45 = vld [vmem:[#allocation2 + $0x78] sm:$0xf] }
  0x22   : > { %v768_v12 = vrot.slane %v766_v63, 7  ;;  %v776_v14 = vrot.slane %v774_v2, 7  ;;  %v1019_v48 = vld [vmem:[#allocation2 + $0x80] sm:$0x1]  ;;  %v7175_v63 = vld [vmem:[%s7077_s13 + $0x8] sm:$0xff]  }
  0x23   : > { %6595 = vmatpush3.bf16.msra.mxu1 %v6782_v16  ;;  %v5899_v16 = vunpack.c.h.bf16 %v6009_v11 }
  0x24   : > { %6041 = vmatpush3.bf16.msra.mxu0 %v6784_v18  ;;  %6588 = vmatprep.subr.bf16.mxu1 %v6785_v19  ;;  %v1008_v18 = vld [vmem:[#allocation2 + $0x6c] sm:$0xf]  ;;  %v771_v24 = vor.u32 %v769_v1, %v768_v12  ;;  %v772_v27 = vrot.slane %v768_v12, 4  ;;  %v779_v28 = vor.u32 %v777_v4, %v776_v14  ;;  %v781_v29 = vrot.slane %v776_v14, 4 }
  0x25   : > { %6042 = vmatprep.subr.bf16.mxu0 %v6786_v20  ;;  %v5810_v20 = vpack.c.bf16 %v397_v5, %v397_v5  ;;  %v329_v50 = vmul.f32 %v5899_v16, %v7095_v25  ;;  %v952_v14 = vld [vmem:[#allocation2 + $0xc] sm:$0xf]  ;;  %v5902_v16 = vunpack.c.l.bf16 %v6010_v62 }
  0x26   : > { %v780_v39 = vsel %vm7148_vm9, %v772_v27, %v779_v28  ;;  %v1009_v40 = vsel %vm7156_vm10, %v771_v24, %v1008_v18  ;;  %v5903_v18 = vunpack.c.h.bf16 %v6010_v62  ;;  %v5862_v27 = vunpack.c.l.bf16 %v7175_v63 }
  0x27   : > { %6596 = vmatpush3.bf16.msra.mxu1 %v6785_v19  ;;  %v1012_v19 = vld [vmem:[#allocation2 + $0x74] sm:$0x1]  ;;  %v783_v34 = vshrl.u32 %v5810_v20, 16  ;;  %v786_v36 = vshll.u32 %v5810_v20, 16  ;;  %1010 = vst [vmem:[#allocation2 + $0x6c] sm:$0xf] %v1009_v40  ;;  %v368_v5 = vadd.f32 %v7100_v26, %v329_v50  ;;  %v5863_v28 = vunpack.c.h.bf16 %v7175_v63 }
  0x28   : > { %6043 = vmatpush3.bf16.msra.mxu0 %v6787_v21  ;;  %6589 = vmatprep.subr.bf16.mxu1 %v6788_v22  ;;  %v5811_v21 = vpack.c.bf16 %v398_v7, %v398_v7  ;;  %1011 = vst [vmem:[#allocation2 + $0x70] sm:$0xf] %v780_v39 }
  0x29   : > { %6044 = vmatprep.subr.bf16.mxu0 %v6789_v23  ;;  %v348_v23 = vadd.f32 %v7100_v26, %v309_v9  ;;  %v785_v43 = vrot.slane %v783_v34, 7 }
  0x2a   : > { %v791_v37 = vshrl.u32 %v5811_v21, 16  ;;  %v794_v38 = vshll.u32 %v5811_v21, 16 }
  0x2b   : > { %6597 = vmatpush3.bf16.msra.mxu1 %v6788_v22  ;;  %v347_v22 = vadd.f32 %v7100_v26, %v308_v8  ;;  %v380_v46 = vmax.f32 %v348_v23, 0.0  ;;  %v788_v53 = vor.u32 %v786_v36, %v785_v43  ;;  %v789_v54 = vrot.slane %v785_v43, 4 }
  0x2c   : > { %6045 = vmatpush3.bf16.msra.mxu0 %v6790_v41  ;;  %6166 = vmatprep.subr.bf16.mxu1 %v6791_v47  ;;  %v1013_v41 = vsel %vm7104_vm3, %v781_v29, %v1012_v19  ;;  %v793_v44 = vrot.slane %v791_v37, 7  ;;  %v328_v47 = vmul.f32 %v5898_v15, %v7095_v25  ;;  %v400_v15 = vmax.f32 %v368_v5, 0.0 }
  0x2d   : > { %6438 = vmatprep.subr.bf16.mxu0 %v6991_v0  ;;  %v379_v42 = vmax.f32 %v347_v22, 0.0  ;;  %1014 = vst [vmem:[#allocation2 + $0x74] sm:$0x1] %v1013_v41  ;;  %v5793_v58 = vpack.c.bf16 %v380_v46, %v380_v46  ;;  %v1016_v2 = vsel %vm7156_vm10, %v788_v53, %v1015_v45  ;;  %v458_v19 = vsel %vm7104_vm3, 0, %v457_v57  ;;  %v956_v46 = vld [vmem:[#allocation2 + $0x14] sm:$0x1] }
  0x2e   : > { %v796_v55 = vor.u32 %v794_v38, %v793_v44  ;;  %v798_v56 = vrot.slane %v793_v44, 4  ;;  %v367_v61 = vadd.f32 %v7100_v26, %v328_v47  ;;  %1017 = vst [vmem:[#allocation2 + $0x78] sm:$0xf] %v1016_v2  ;;  %v2374_v22 = vld [vmem:[#allocation2 + $0x6c] sm:$0xe]  ;;  %v5813_v39 = vpack.c.bf16 %v400_v15, %v400_v15 }
  0x2f   : > { %v5792_v49 = vpack.c.bf16 %v379_v42, %v379_v42  ;;  %v638_v8 = vshrl.u32 %v5793_v58, 16  ;;  %v641_v9 = vshll.u32 %v5793_v58, 16  ;;  %v1951_v20 = vld [vmem:[#allocation2 + $0x70] sm:$0xf]  ;;  %459 = vst [vmem:[#allocation2 + $0x90] sm:$0x1] %v458_v19  ;;  %v330_v53 = vmul.f32 %v5902_v16, %v7095_v25 }
  0x30   : > { %v797_v1 = vsel %vm7148_vm9, %v789_v54, %v796_v55  ;;  %v1020_v4 = vsel %vm7104_vm3, %v798_v56, %v1019_v48  ;;  %v399_v11 = vmax.f32 %v367_v61, 0.0  ;;  %v5564_v31 = vrot.slane %v2374_v22, 9  ;;  %v513_v55 = vld [vmem:[#allocation2 + $0x98] sm:$0x1]  ;;  %v1026_v19 = vld [vmem:[#allocation2 + $0x8c] sm:$0x1] }
  0x31   : > { %v630_v59 = vshrl.u32 %v5792_v49, 16  ;;  %v633_v60 = vshll.u32 %v5792_v49, 16  ;;  %1018 = vst [vmem:[#allocation2 + $0x7c] sm:$0xf] %v797_v1  ;;  %1021 = vst [vmem:[#allocation2 + $0x80] sm:$0x1] %v1020_v4  ;;  %v331_v54 = vmul.f32 %v5903_v18, %v7095_v25  ;;  %v310_v56 = vmul.f32 %v5862_v27, %v7095_v25 }
  0x32   : > { %v5812_v24 = vpack.c.bf16 %v399_v11, %v399_v11  ;;  %v2488_v32 = vrot.slane %v1951_v20, 5  ;;  %v640_v37 = vrot.slane %v638_v8, 7  ;;  %v808_v48 = vshrl.u32 %v5813_v39, 16  ;;  %v1022_v4 = vld [vmem:[#allocation2 + $0x84] sm:$0xf] }
  0x33   : > { %v632_v7 = vrot.slane %v630_v59, 7  ;;  %v6792_v8 = vld [vmem:[%s9093_s3] sm:$0xff]   ;;  %v369_v11 = vadd.f32 %v7100_v26, %v330_v53  ;;  %v370_v20 = vadd.f32 %v7100_v26, %v331_v54 }
  0x34   : > { %v1974_v21 = vld [vmem:[#allocation2 + $0x74] sm:$0x1]  ;;  %v2489_v41 = vsel %vm7186_vm11, %v5564_v31, %v2488_v32  ;;  %v2490_v42 = vrot.slane %v2488_v32, 4  ;;  %v800_v43 = vshrl.u32 %v5812_v24, 16  ;;  %v643_v44 = vor.u32 %v641_v9, %v640_v37 }
  0x35   : > { %v635_v23 = vor.u32 %v633_v60, %v632_v7  ;;  %v2194_v29 = vshll.u32 %v1974_v21, 16  ;;  %v2491_v34 = vrot.slane %v1974_v21, 5  ;;  %v636_v36 = vrot.slane %v632_v7, 4  ;;  %v2375_v52 = vld [vmem:[#allocation2 + $0x78] sm:$0xe] }
  0x36   : > { %v645_v45 = vrot.slane %v640_v37, 4  ;;  %v803_v47 = vshll.u32 %v5812_v24, 16  ;;  %v5565_v58 = vrot.slane %v2375_v52, 9  ;;  %v802_v1 = vrot.slane %v800_v43, 7  ;;  %v427_v21 = vld [vmem:[#allocation2 + $0x18] sm:$0x1] }
  0x37   : > { %v953_v38 = vsel %vm7156_vm10, %v635_v23, %v952_v14  ;;  %v7196_v40 = vrot.slane %v2194_v29, 5  ;;  %v2492_v49 = vsel %vm7186_vm11, %v2490_v42, %v2491_v34  ;;  %v644_v61 = vsel %vm7148_vm9, %v636_v36, %v643_v44  ;;  %v6794_v14 = vld [vmem:[%s9093_s3 + $0x48] sm:$0xff]   ;;  %v483_v42 = vld [vmem:[#allocation2 + $0x20] sm:$0x1] }
  0x38   : > { %954 = vst [vmem:[#allocation2 + $0xc] sm:$0xf] %v953_v38  ;;  %v1953_v50 = vld [vmem:[#allocation2 + $0x7c] sm:$0xf]  ;;  %v1975_v51 = vld [vmem:[#allocation2 + $0x80] sm:$0x1]  ;;  %v5612_v57 = vcombine.low %v2489_v41, %v2492_v49  ;;  %v957_v62 = vsel %vm7104_vm3, %v645_v45, %v956_v46  ;;  %v805_v15 = vor.u32 %v803_v47, %v802_v1  ;;  %v311_v45 = vmul.f32 %v5863_v28, %v7095_v25 }
  0x39   : > { %v2495_v59 = vrot.slane %v1953_v50, 5  ;;  %v2498_v60 = vrot.slane %v1975_v51, 5  ;;  %v810_v2 = vrot.slane %v808_v48, 7  ;;  %955 = vst [vmem:[#allocation2 + $0x10] sm:$0xf] %v644_v61  ;;  %v811_v9 = vshll.u32 %v5813_v39, 16 }
  0x3a   : > { %6470 = vmatprep.mubr.bf16.mxu1 %v5612_v57  ;;  %958 = vst [vmem:[#allocation2 + $0x14] sm:$0x1] %v957_v62  ;;  %v806_v16 = vrot.slane %v802_v1, 4  ;;  %v401_v27 = vmax.f32 %v369_v11, 0.0  ;;  %v514_v29 = vsel %vm7114_vm4, 0, %v513_v55  ;;  %v1023_v36 = vsel %vm7156_vm10, %v805_v15, %v1022_v4  ;;  %v6795_v47 = vld [vmem:[%s9093_s3 + $0x8] sm:$0xff]  }
  0x3b   : > { %v2496_v5 = vsel %vm7186_vm11, %v5565_v58, %v2495_v59  ;;  %v2497_v7 = vrot.slane %v2495_v59, 4  ;;  %v815_v18 = vrot.slane %v810_v2, 4  ;;  %v813_v24 = vor.u32 %v811_v9, %v810_v2  ;;  %515 = vst [vmem:[#allocation2 + $0x98] sm:$0x1] %v514_v29  ;;  %1024 = vst [vmem:[#allocation2 + $0x84] sm:$0xf] %v1023_v36 }
  0x3c   : > { %v402_v39 = vmax.f32 %v370_v20, 0.0  ;;  %v5814_v41 = vpack.c.bf16 %v401_v27, %v401_v27  ;;  %v349_v46 = vadd.f32 %v7100_v26, %v310_v56  ;;  %v6796_v51 = vld [vmem:[%s9093_s3 + $0x50] sm:$0xff]   ;;  %v428_v52 = vsel %vm7104_vm3, 0, %v427_v21  ;;  %v6800_v36 = vld [vmem:[%s9093_s3 + $0x18] sm:$0xff]  }
  0x3d   : > { %v2499_v22 = vsel %vm7186_vm11, %v2497_v7, %v2498_v60  ;;  %v814_v37 = vsel %vm7148_vm9, %v806_v16, %v813_v24  ;;  %v1027_v38 = vsel %vm7104_vm3, %v815_v18, %v1026_v19  ;;  %v350_v54 = vadd.f32 %v7100_v26, %v311_v45  ;;  %429 = vst [vmem:[#allocation2 + $0x18] sm:$0x1] %v428_v52  ;;  %v6797_v7 = vld [vmem:[%s9093_s3 + $0x10] sm:$0xff]  }
  0x3e   : > { %v5613_v31 = vcombine.low %v2496_v5, %v2499_v22  ;;  %1025 = vst [vmem:[#allocation2 + $0x88] sm:$0xf] %v814_v37  ;;  %1028 = vst [vmem:[#allocation2 + $0x8c] sm:$0x1] %v1027_v38  ;;  %v5815_v48 = vpack.c.bf16 %v402_v39, %v402_v39  ;;  %v817_v49 = vshrl.u32 %v5814_v41, 16  ;;  %v820_v50 = vshll.u32 %v5814_v41, 16 }
  0x3f   : > { %v7221_v23 = vld [vmem:[#allocation2 + $0xc] sm:$0xf]  ;;  %v381_v55 = vmax.f32 %v349_v46, 0.0  ;;  %v484_v56 = vsel %vm7114_vm4, 0, %v483_v42  ;;  %v1029_v5 = vld [vmem:[#allocation2 + $0x90] sm:$0xf] }
  0x40   : > { %v1983_v32 = vshrl.u32 %v7221_v23, 16  ;;  %v1986_v34 = vshll.u32 %v7221_v23, 16  ;;  %6471 = vmatmul.mubr.bf16.vlgmr.msra.gmra.mrb[0].mxu1 %v5613_v31  ;;  %v7245_v53 = vld [vmem:[#allocation2 + $0x10] sm:$0xf]  ;;  %485 = vst [vmem:[#allocation2 + $0x20] sm:$0x1] %v484_v56 }
  0x41   : > { %6167 = vmatpush3.bf16.msra.mxu1 %v6792_v8  ;;  %v7247_v63 = vld [vmem:[#allocation2 + $0x14] sm:$0x1]  ;;  %v1992_v57 = vshll.u32 %v7245_v53, 16  ;;  %v1996_v58 = vshrl.u32 %v7245_v53, 16  ;;  %v5572_v1 = vcombine.low %v7221_v23, %v7245_v53  ;;  %v819_v2 = vrot.slane %v817_v49, 7  ;;  %v6799_v22 = vld [vmem:[%s9093_s3 + $0x58] sm:$0xff]  }
  0x42   : > { %v1985_v43 = vrot.slane %v1983_v32, 4  ;;  %v1988_v44 = vrot.slane %v1986_v34, 5  ;;  %6168 = vmatprep.subr.bf16.mxu1 %v6794_v14  ;;  %v2002_v59 = vshll.u32 %v7247_v63, 16  ;;  %v2435_v60 = vrot.slane %v7247_v63, 5  ;;  %v1033_v15 = vld [vmem:[#allocation2 + $0x98] sm:$0x1] }
  0x43   : > { %v825_v4 = vshrl.u32 %v5815_v48, 16  ;;  %v1994_v8 = vrot.slane %v1992_v57, 5  ;;  %v1998_v9 = vrot.slane %v1996_v58, 4  ;;  %v828_v14 = vshll.u32 %v5815_v48, 16  ;;  %v2376_v16 = vld [vmem:[#allocation2 + $0x84] sm:$0xe] }
  0x44   : > { %v1989_v28 = vor.u32 %v1988_v44, %v1985_v43  ;;  %v2004_v11 = vrot.slane %v2002_v59, 5  ;;  %v822_v18 = vor.u32 %v820_v50, %v819_v2  ;;  %v823_v19 = vrot.slane %v819_v2, 4  ;;  %v6011_v42 = vld [vmem:[%s7077_s13 + $0x60] sm:$0xff]   ;;  %v463_v59 = vld [vmem:[#allocation2 + $0xa8] sm:$0x1]  ;;  %v6001_v53 = vld [vmem:[%s7077_s13 + $0x10] sm:$0xff]  }
  0x45   : > { %6169 = vmatpush3.bf16.msra.mxu1 %v6795_v47  ;;  %v827_v20 = vrot.slane %v825_v4, 7  ;;  %v382_v21 = vmax.f32 %v350_v54, 0.0  ;;  %v1999_v27 = vor.u32 %v1998_v9, %v1994_v8  ;;  %v1955_v29 = vld [vmem:[#allocation2 + $0x88] sm:$0xf]  ;;  %v1976_v31 = vld [vmem:[#allocation2 + $0x8c] sm:$0x1]  ;;  %v5794_v34 = vpack.c.bf16 %v381_v55, %v381_v55 }
  0x46   : > { %v1990_v62 = vrot.slane %v1989_v28, 4  ;;  %6170 = vmatprep.subr.bf16.mxu1 %v6796_v51  ;;  %v5566_v32 = vrot.slane %v2376_v16, 9  ;;  %v2502_v37 = vrot.slane %v1955_v29, 5  ;;  %v2505_v38 = vrot.slane %v1976_v31, 5  ;;  %v460_v47 = vld [vmem:[#allocation2 + $0x9c] sm:$0x1] }
  0x47   : > { %v830_v39 = vor.u32 %v828_v14, %v827_v20  ;;  %v832_v41 = vrot.slane %v827_v20, 4  ;;  %v2000_v43 = vrot.slane %v1999_v27, 4  ;;  %v1030_v44 = vsel %vm7156_vm10, %v822_v18, %v1029_v5  ;;  %v516_v48 = vld [vmem:[#allocation2 + $0xa4] sm:$0x1]  ;;  %v6012_v28 = vld [vmem:[%s7077_s13 + $0x68] sm:$0xff]  }
  0x48   : > { %v1995_v24 = vsel %vm7258_vm14, %v1990_v62, %v1994_v8  ;;  %v5795_v45 = vpack.c.bf16 %v382_v21, %v382_v21  ;;  %v647_v46 = vshrl.u32 %v5794_v34, 16  ;;  %v2503_v49 = vsel %vm7186_vm11, %v5566_v32, %v2502_v37  ;;  %1031 = vst [vmem:[#allocation2 + $0x90] sm:$0xf] %v1030_v44  ;;  %v6801_v54 = vld [vmem:[%s9093_s3 + $0x60] sm:$0xff]   ;;  %v519_v9 = vld [vmem:[#allocation2 + $0xb0] sm:$0x1] }
  0x49   : > { %6171 = vmatpush3.bf16.msra.mxu1 %v6797_v7  ;;  %v2504_v50 = vrot.slane %v2502_v37, 4  ;;  %v831_v51 = vsel %vm7148_vm9, %v823_v19, %v830_v39  ;;  %v1034_v52 = vsel %vm7104_vm3, %v832_v41, %v1033_v15  ;;  %v2005_v55 = vsel %vm7258_vm14, %v2000_v43, %v2004_v11  ;;  %v6802_v62 = vld [vmem:[%s9093_s3 + $0x20] sm:$0xff]   ;;  %v959_v7 = vld [vmem:[#allocation2 + $0x18] sm:$0xf]  ;;  %v6804_v11 = vld [vmem:[%s9093_s3 + $0x68] sm:$0xff]  }
  0x4a   : > { %6172 = vmatprep.subr.bf16.mxu1 %v6799_v22  ;;  %1032 = vst [vmem:[#allocation2 + $0x94] sm:$0xf] %v831_v51  ;;  %1035 = vst [vmem:[#allocation2 + $0x98] sm:$0x1] %v1034_v52  ;;  %v649_v56 = vrot.slane %v647_v46, 7  ;;  %v650_v57 = vshll.u32 %v5794_v34, 16  ;;  %v5588_v2 = vcombine.low %v1995_v24, %v2005_v55  ;;  %v5906_v8 = vunpack.c.l.bf16 %v6011_v42 }
  0x4b   : > { %v655_v58 = vshrl.u32 %v5795_v45, 16  ;;  %v2506_v4 = vsel %vm7186_vm11, %v2504_v50, %v2505_v38  ;;  %v658_v5 = vshll.u32 %v5795_v45, 16  ;;  %v963_v19 = vld [vmem:[#allocation2 + $0x20] sm:$0x1]  ;;  %v5907_v20 = vunpack.c.h.bf16 %v6011_v42  ;;  %v6806_v43 = vld [vmem:[%s9093_s3 + $0x70] sm:$0xff]  }
  0x4c   : > { %v5614_v14 = vcombine.low %v2503_v49, %v2506_v4  ;;  %v652_v15 = vor.u32 %v650_v57, %v649_v56  ;;  %v653_v16 = vrot.slane %v649_v56, 4  ;;  %2974 = vmatprep.mubr.bf16.mxu0 %v5588_v2  ;;  %v332_v21 = vmul.f32 %v5906_v8, %v7095_v25  ;;  %v6807_v4 = vld [vmem:[%s9093_s3 + $0x30] sm:$0xff]  }
  0x4d   : > { %v657_v18 = vrot.slane %v655_v58, 7  ;;  %6173 = vmatpush3.bf16.msra.mxu1 %v6800_v36  ;;  %v461_v22 = vsel %vm7104_vm3, 0, %v460_v47  ;;  %v517_v24 = vsel %vm7114_vm4, 0, %v516_v48  ;;  %2975 = vmatmul.mubr.bf16.vlgmr.msra.gmra.mrb[0].mxu0 %v5572_v1  ;;  %v5910_v32 = vunpack.c.l.bf16 %v6012_v28  ;;  %v6805_v1 = vld [vmem:[%s9093_s3 + $0x28] sm:$0xff]  }
  0x4e   : > { %6174 = vmatprep.subr.bf16.mxu1 %v6801_v54  ;;  %6474 = vmatprep.mubr.bf16.mxu1 %v5614_v14  ;;  %v960_v31 = vsel %vm7156_vm10, %v652_v15, %v959_v7  ;;  %462 = vst [vmem:[#allocation2 + $0x9c] sm:$0x1] %v461_v22  ;;  %518 = vst [vmem:[#allocation2 + $0xa4] sm:$0x1] %v517_v24  ;;  %v333_v34 = vmul.f32 %v5907_v20, %v7095_v25  ;;  %v5911_v37 = vunpack.c.h.bf16 %v6012_v28  ;;  %v6810_v22 = vld [vmem:[%s9093_s3 + $0x38] sm:$0xff]   ;;  %v7361_v24 = vld [vmem:[%s9093_s3 + $0x80] sm:$0xff]  }
  0x4f   : > { %v660_v27 = vor.u32 %v658_v5, %v657_v18  ;;  %v662_v29 = vrot.slane %v657_v18, 4  ;;  %6439 = vmatpush3.bf16.msra.mxu0 %v6991_v0  ;;  %961 = vst [vmem:[#allocation2 + $0x18] sm:$0xf] %v960_v31  ;;  %v371_v36 = vadd.f32 %v7100_v26, %v332_v21  ;;  %v464_v23 = vsel %vm7104_vm3, 0, %v463_v59  ;;  %v2377_v38 = vld [vmem:[#allocation2 + $0x90] sm:$0xe] }
  0x50   : > { %v334_v41 = vmul.f32 %v5910_v32, %v7095_v25  ;;  %465 = vst [vmem:[#allocation2 + $0xa8] sm:$0x1] %v464_v23  ;;  %v520_v42 = vsel %vm7114_vm4, 0, %v519_v9  ;;  %6440 = vmatprep.subr.bf16.mxu0 %v7004_v3  ;;  %v5567_v46 = vrot.slane %v2377_v38, 9  ;;  %v372_v47 = vadd.f32 %v7100_v26, %v333_v34 }
  0x51   : > { %v661_v39 = vsel %vm7148_vm9, %v653_v16, %v660_v27  ;;  %v964_v0 = vsel %vm7104_vm3, %v662_v29, %v963_v19  ;;  %6175 = vmatpush3.bf16.msra.mxu1 %v6802_v62  ;;  %v1957_v44 = vld [vmem:[#allocation2 + $0x94] sm:$0xf]  ;;  %v1977_v45 = vld [vmem:[#allocation2 + $0x98] sm:$0x1]  ;;  %v403_v48 = vmax.f32 %v371_v36, 0.0  ;;  %v335_v49 = vmul.f32 %v5911_v37, %v7095_v25 }
  0x52   : > { %962 = vst [vmem:[#allocation2 + $0x1c] sm:$0xf] %v661_v39  ;;  %965 = vst [vmem:[#allocation2 + $0x20] sm:$0x1] %v964_v0  ;;  %6176 = vmatprep.subr.bf16.mxu1 %v6804_v11  ;;  %v2509_v50 = vrot.slane %v1957_v44, 5  ;;  %v2512_v51 = vrot.slane %v1977_v45, 5  ;;  %v373_v52 = vadd.f32 %v7100_v26, %v334_v41  ;;  %v5866_v28 = vunpack.c.l.bf16 %v6001_v53 }
  0x53   : > { %521 = vst [vmem:[#allocation2 + $0xb0] sm:$0x1] %v520_v42  ;;  %v404_v54 = vmax.f32 %v372_v47, 0.0  ;;  %v5816_v55 = vpack.c.bf16 %v403_v48, %v403_v48  ;;  %v374_v56 = vadd.f32 %v7100_v26, %v335_v49  ;;  %v5867_v57 = vunpack.c.h.bf16 %v6001_v53  ;;  %6441 = vmatpush3.bf16.msra.mxu0 %v7004_v3  ;;  %v6809_v3 = vld [vmem:[%s9093_s3 + $0x78] sm:$0xff]  }
  0x54   : > { %v2510_v58 = vsel %vm7186_vm11, %v5567_v46, %v2509_v50  ;;  %v2511_v59 = vrot.slane %v2509_v50, 4  ;;  %v405_v62 = vmax.f32 %v373_v52, 0.0  ;;  %v312_v2 = vmul.f32 %v5866_v28, %v7095_v25  ;;  %6442 = vmatprep.subr.bf16.mxu0 %v7016_v6 }
  0x55   : > { %6177 = vmatpush3.bf16.msra.mxu1 %v6805_v1  ;;  %v5817_v5 = vpack.c.bf16 %v404_v54, %v404_v54  ;;  %v834_v7 = vshrl.u32 %v5816_v55, 16  ;;  %v837_v8 = vshll.u32 %v5816_v55, 16  ;;  %v313_v9 = vmul.f32 %v5867_v57, %v7095_v25  ;;  %v1036_v1 = vld [vmem:[#allocation2 + $0x9c] sm:$0xf]  ;;  %v1040_v48 = vld [vmem:[#allocation2 + $0xa4] sm:$0x1] }
  0x56   : > { %6178 = vmatprep.subr.bf16.mxu1 %v6806_v43  ;;  %v2513_v11 = vsel %vm7186_vm11, %v2511_v59, %v2512_v51  ;;  %v7346_v14 = vld [vmem:[#allocation2 + $0x18] sm:$0xf]  ;;  %v406_v15 = vmax.f32 %v374_v56, 0.0  ;;  %v7348_v16 = vpack.c.bf16 %v405_v62, %v405_v62  ;;  %v7351_v18 = vadd.f32 %v7100_v26, %v312_v2  ;;  %v430_v54 = vld [vmem:[#allocation2 + $0x24] sm:$0x1] }
  0x57   : > { %v5615_v19 = vcombine.low %v2510_v58, %v2513_v11  ;;  %v2007_v20 = vshrl.u32 %v7346_v14, 16  ;;  %v2010_v25 = vshll.u32 %v7346_v14, 16  ;;  %v836_v21 = vrot.slane %v834_v7, 7  ;;  %6443 = vmatpush3.bf16.msra.mxu0 %v7016_v6  ;;  %v486_v55 = vld [vmem:[#allocation2 + $0x2c] sm:$0x1]  ;;  %v6886_v7 = vld [vmem:[%s9093_s3 + $0x160] sm:$0xff]  }
  0x58   : > { %v842_v31 = vshrl.u32 %v5817_v5, 16  ;;  %v845_v32 = vshll.u32 %v5817_v5, 16  ;;  %v5819_v34 = vpack.c.bf16 %v406_v15, %v406_v15  ;;  %v7369_v36 = vadd.f32 %v7100_v26, %v313_v9  ;;  %6444 = vmatprep.subr.bf16.mxu0 %v7029_v10  ;;  %v1043_v2 = vld [vmem:[#allocation2 + $0xa8] sm:$0xf]  ;;  %v466_v5 = vld [vmem:[#allocation2 + $0xb4] sm:$0x1] }
  0x59   : > { %v7364_v27 = vld [vmem:[#allocation2 + $0x1c] sm:$0xf]  ;;  %v7366_v29 = vld [vmem:[#allocation2 + $0x20] sm:$0x1]  ;;  %6179 = vmatpush3.bf16.msra.mxu1 %v6807_v4  ;;  %v2009_v37 = vrot.slane %v2007_v20, 4  ;;  %v2012_v23 = vrot.slane %v2010_v25, 5  ;;  %v839_v0 = vor.u32 %v837_v8, %v836_v21 }
  0x5a   : > { %6475 = vmatmul.mubr.bf16.gmra.mrb[4].mxu1 %v5615_v19  ;;  %v2016_v53 = vshll.u32 %v7364_v27, 16  ;;  %v2020_v6 = vshrl.u32 %v7364_v27, 16  ;;  %6180 = vmatprep.subr.bf16.mxu1 %v6809_v3  ;;  %v2026_v38 = vshll.u32 %v7366_v29, 16  ;;  %v2442_v39 = vrot.slane %v7366_v29, 5  ;;  %v1047_v15 = vld [vmem:[#allocation2 + $0xb0] sm:$0x1] }
  0x5b   : > { %v5573_v26 = vcombine.low %v7346_v14, %v7364_v27  ;;  %v2013_v41 = vor.u32 %v2012_v23, %v2009_v37  ;;  %v840_v44 = vrot.slane %v836_v21, 4  ;;  %6445 = vmatpush3.bf16.msra.mxu0 %v7029_v10  ;;  %v844_v46 = vrot.slane %v842_v31, 7  ;;  %v522_v19 = vld [vmem:[#allocation2 + $0xbc] sm:$0x1] }
  0x5c   : > { %v2018_v42 = vrot.slane %v2016_v53, 5  ;;  %v2022_v43 = vrot.slane %v2020_v6, 4  ;;  %v2028_v45 = vrot.slane %v2026_v38, 5  ;;  %v1037_v47 = vsel %vm7156_vm10, %v839_v0, %v1036_v1  ;;  %6446 = vmatprep.subr.bf16.mxu0 %v7044_v13  ;;  %v7403_v31 = vld [vmem:[%s7077_s13 + $0x78] sm:$0xff]   ;;  %v469_v53 = vld [vmem:[#allocation2 + $0xc0] sm:$0x1] }
  0x5d   : > { %v851_v49 = vshrl.u32 %v7348_v16, 16  ;;  %6181 = vmatpush3.bf16.msra.mxu1 %v6810_v22  ;;  %v2014_v50 = vrot.slane %v2013_v41, 4  ;;  %1038 = vst [vmem:[#allocation2 + $0x9c] sm:$0xf] %v1037_v47  ;;  %v854_v52 = vshll.u32 %v7348_v16, 16  ;;  %v859_v28 = vshrl.u32 %v5819_v34, 16 }
  0x5e   : > { %v2023_v51 = vor.u32 %v2022_v43, %v2018_v42  ;;  %6486 = vmatprep.subr.bf16.mxu1 %v7361_v24  ;;  %v847_v10 = vor.u32 %v845_v32, %v844_v46  ;;  %v849_v56 = vrot.slane %v844_v46, 4  ;;  %v862_v58 = vshll.u32 %v5819_v34, 16  ;;  %v6013_v16 = vld [vmem:[%s7077_s13 + $0x70] sm:$0xff]  }
  0x5f   : > { %v853_v57 = vrot.slane %v851_v49, 7  ;;  %v2019_v59 = vsel %vm7258_vm14, %v2014_v50, %v2018_v42  ;;  %v861_v13 = vrot.slane %v859_v28, 7  ;;  %v383_v4 = vmax.f32 %v7351_v18, 0.0  ;;  %6447 = vmatpush3.bf16.msra.mxu0 %v6886_v7  ;;  %v6887_v18 = vld [vmem:[%s9093_s3 + $0x168] sm:$0xff]  }
  0x60   : > { %v2024_v62 = vrot.slane %v2023_v51, 4  ;;  %v848_v8 = vsel %vm7148_vm9, %v840_v44, %v847_v10  ;;  %v1041_v9 = vsel %vm7104_vm3, %v849_v56, %v1040_v48  ;;  %6448 = vmatprep.subr.bf16.mxu0 %v6887_v18  ;;  %v384_v22 = vmax.f32 %v7369_v36, 0.0  ;;  %v525_v50 = vld [vmem:[#allocation2 + $0xc8] sm:$0x1] }
  0x61   : > { %v856_v3 = vor.u32 %v854_v52, %v853_v57  ;;  %v857_v11 = vrot.slane %v853_v57, 4  ;;  %1039 = vst [vmem:[#allocation2 + $0xa0] sm:$0xf] %v848_v8  ;;  %1042 = vst [vmem:[#allocation2 + $0xa4] sm:$0x1] %v1041_v9  ;;  %v864_v25 = vor.u32 %v862_v58, %v861_v13  ;;  %v866_v21 = vrot.slane %v861_v13, 4 }
  0x62   : > { %v2029_v20 = vsel %vm7258_vm14, %v2024_v62, %v2028_v45  ;;  %v431_v37 = vsel %vm7104_vm3, 0, %v430_v54  ;;  %v487_v23 = vsel %vm7114_vm4, 0, %v486_v55  ;;  %v5796_v1 = vpack.c.bf16 %v383_v4, %v383_v4  ;;  %v6888_v45 = vld [vmem:[%s9093_s3 + $0x170] sm:$0xff]   ;;  %v7428_v52 = vld [vmem:[%s9091_s1] ss:$0 sm:$0xff]  ;;  %v6891_v4 = vld [vmem:[%s9093_s3 + $0x178] sm:$0xff]  }
  0x63   : > { %v5589_v32 = vcombine.low %v2019_v59, %v2029_v20  ;;  %v1044_v34 = vsel %vm7156_vm10, %v856_v3, %v1043_v2  ;;  %v865_v6 = vsel %vm7148_vm9, %v857_v11, %v864_v25  ;;  %v1048_v36 = vsel %vm7104_vm3, %v866_v21, %v1047_v15  ;;  %432 = vst [vmem:[#allocation2 + $0x24] sm:$0x1] %v431_v37  ;;  %v7439_v58 = vld [vmem:[%s9092_s2] ss:$0 sm:$0xff] }
  0x64   : > { %1045 = vst [vmem:[#allocation2 + $0xa8] sm:$0xf] %v1044_v34  ;;  %488 = vst [vmem:[#allocation2 + $0x2c] sm:$0x1] %v487_v23  ;;  %v5797_v38 = vpack.c.bf16 %v384_v22, %v384_v22  ;;  %6449 = vmatpush3.bf16.msra.mxu0 %v6887_v18  ;;  %v2378_v0 = vld [vmem:[#allocation2 + $0x9c] sm:$0xe]  ;;  %v5914_v41 = vunpack.c.l.bf16 %v6013_v16  ;;  %v5915_v42 = vunpack.c.h.bf16 %v6013_v16  ;;  %v5918_v14 = vunpack.c.l.bf16 %v7403_v31 }
  0x65   : > { %2982 = vmatprep.mubr.bf16.mxu0 %v5589_v32  ;;  %1046 = vst [vmem:[#allocation2 + $0xac] sm:$0xf] %v865_v6  ;;  %1049 = vst [vmem:[#allocation2 + $0xb0] sm:$0x1] %v1048_v36  ;;  %v467_v43 = vsel %vm7104_vm3, 0, %v466_v5  ;;  %v523_v44 = vsel %vm7114_vm4, 0, %v522_v19  ;;  %6450 = vmatprep.subr.bf16.mxu0 %v6888_v45  ;;  %v5919_v55 = vunpack.c.h.bf16 %v7403_v31 }
  0x66   : > { %2983 = vmatmul.mubr.bf16.gmra.mrb[4].mxu0 %v5573_v26  ;;  %v5568_v46 = vrot.slane %v2378_v0, 9  ;;  %v664_v47 = vshrl.u32 %v5796_v1, 16  ;;  %v667_v48 = vshll.u32 %v5796_v1, 16  ;;  %v672_v49 = vshrl.u32 %v5797_v38, 16  ;;  %468 = vst [vmem:[#allocation2 + $0xb4] sm:$0x1] %v467_v43 }
  0x67   : > { %524 = vst [vmem:[#allocation2 + $0xbc] sm:$0x1] %v523_v44  ;;  %v675_v51 = vshll.u32 %v5797_v38, 16  ;;  %v336_v28 = vmul.f32 %v7428_v52, %v5914_v41  ;;  %v337_v54 = vmul.f32 %v7428_v52, %v5915_v42  ;;  %v470_v10 = vsel %vm7104_vm3, 0, %v469_v53  ;;  %v7462_v41 = vld [vmem:[%s7077_s13 + $0x18] sm:$0xff]  }
  0x68   : > { %v666_v27 = vrot.slane %v664_v47, 7  ;;  %v674_v26 = vrot.slane %v672_v49, 7  ;;  %6451 = vmatpush3.bf16.msra.mxu0 %v6888_v45  ;;  %v1959_v56 = vld [vmem:[#allocation2 + $0xa0] sm:$0xf]  ;;  %v1978_v57 = vld [vmem:[#allocation2 + $0xa4] sm:$0x1]  ;;  %v338_v13 = vmul.f32 %v7428_v52, %v5918_v14  ;;  %v339_v18 = vmul.f32 %v7428_v52, %v5919_v55 }
  0x69   : > { %v375_v59 = vadd.f32 %v7439_v58, %v336_v28  ;;  %v376_v62 = vadd.f32 %v7439_v58, %v337_v54  ;;  %471 = vst [vmem:[#allocation2 + $0xc0] sm:$0x1] %v470_v10  ;;  %v526_v2 = vsel %vm7114_vm4, 0, %v525_v50  ;;  %6452 = vmatprep.subr.bf16.mxu0 %v6891_v4  ;;  %v2516_v5 = vrot.slane %v1959_v56, 5  ;;  %v433_v50 = vld [vmem:[#allocation2 + $0x30] sm:$0x1] }
  0x6a   : > { %v2519_v7 = vrot.slane %v1978_v57, 5  ;;  %v669_v8 = vor.u32 %v667_v48, %v666_v27  ;;  %v670_v9 = vrot.slane %v666_v27, 4  ;;  %527 = vst [vmem:[#allocation2 + $0xc8] sm:$0x1] %v526_v2  ;;  %v677_v11 = vor.u32 %v675_v51, %v674_v26  ;;  %v966_v16 = vld [vmem:[#allocation2 + $0x24] sm:$0xf] }
  0x6b   : > { %v2379_v3 = vld [vmem:[#allocation2 + $0xa8] sm:$0xe]  ;;  %v679_v15 = vrot.slane %v674_v26, 4  ;;  %v407_v19 = vmax.f32 %v375_v59, 0.0  ;;  %v2517_v20 = vsel %vm7186_vm11, %v5568_v46, %v2516_v5  ;;  %v2518_v25 = vrot.slane %v2516_v5, 4 }
  0x6c   : > { %v1961_v21 = vld [vmem:[#allocation2 + $0xac] sm:$0xf]  ;;  %v1979_v22 = vld [vmem:[#allocation2 + $0xb0] sm:$0x1]  ;;  %v5569_v31 = vrot.slane %v2379_v3, 9  ;;  %v967_v32 = vsel %vm7156_vm10, %v669_v8, %v966_v16  ;;  %6453 = vmatpush3.bf16.msra.mxu0 %v6891_v4  ;;  %v678_v23 = vsel %vm7148_vm9, %v670_v9, %v677_v11  ;;  %v408_v6 = vmax.f32 %v376_v62, 0.0 }
  0x6d   : > { %v2523_v34 = vrot.slane %v1961_v21, 5  ;;  %v2526_v37 = vrot.slane %v1979_v22, 5  ;;  %968 = vst [vmem:[#allocation2 + $0x24] sm:$0xf] %v967_v32  ;;  %v970_v53 = vld [vmem:[#allocation2 + $0x2c] sm:$0x1]  ;;  %v2520_v36 = vsel %vm7186_vm11, %v2518_v25, %v2519_v7  ;;  %v5820_v38 = vpack.c.bf16 %v407_v19, %v407_v19 }
  0x6e   : > { %969 = vst [vmem:[#allocation2 + $0x28] sm:$0xf] %v678_v23  ;;  %v971_v1 = vsel %vm7104_vm3, %v679_v15, %v970_v53  ;;  %v377_v0 = vadd.f32 %v7439_v58, %v338_v13  ;;  %v5616_v42 = vcombine.low %v2517_v20, %v2520_v36  ;;  %v5821_v45 = vpack.c.bf16 %v408_v6, %v408_v6  ;;  %v1050_v14 = vld [vmem:[#allocation2 + $0xb4] sm:$0xf]  ;;  %v1054_v7 = vld [vmem:[#allocation2 + $0xbc] sm:$0x1] }
  0x6f   : > { %v2524_v43 = vsel %vm7186_vm11, %v5569_v31, %v2523_v34  ;;  %v2525_v44 = vrot.slane %v2523_v34, 4  ;;  %972 = vst [vmem:[#allocation2 + $0x2c] sm:$0x1] %v971_v1  ;;  %v868_v46 = vshrl.u32 %v5820_v38, 16  ;;  %v871_v47 = vshll.u32 %v5820_v38, 16 }
  0x70   : > { %v378_v48 = vadd.f32 %v7439_v58, %v339_v18  ;;  %v409_v49 = vmax.f32 %v377_v0, 0.0  ;;  %6478 = vmatprep.mubr.bf16.mxu1 %v5616_v42  ;;  %v876_v28 = vshrl.u32 %v5821_v45, 16  ;;  %v879_v54 = vshll.u32 %v5821_v45, 16  ;;  %v489_v23 = vld [vmem:[#allocation2 + $0x38] sm:$0x1] }
  0x71   : > { %v2527_v51 = vsel %vm7186_vm11, %v2525_v44, %v2526_v37  ;;  %v5870_v27 = vunpack.c.l.bf16 %v7462_v41  ;;  %v870_v55 = vrot.slane %v868_v46, 7  ;;  %v5871_v59 = vunpack.c.h.bf16 %v7462_v41  ;;  %v421_v38 = vld [vmem:[#allocation2] sm:$0x1] }
  0x72   : > { %v5617_v26 = vcombine.low %v2524_v43, %v2527_v51  ;;  %v410_v10 = vmax.f32 %v378_v48, 0.0  ;;  %v5822_v56 = vpack.c.bf16 %v409_v49, %v409_v49  ;;  %v878_v57 = vrot.slane %v876_v28, 7  ;;  %v477_v49 = vld [vmem:[#allocation2 + $0x8] sm:$0x1] }
  0x73   : > { %v314_v62 = vmul.f32 %v7428_v52, %v5870_v27  ;;  %v434_v13 = vsel %vm7104_vm3, 0, %v433_v50  ;;  %v873_v4 = vor.u32 %v871_v47, %v870_v55  ;;  %v874_v5 = vrot.slane %v870_v55, 4  ;;  %v1057_v47 = vld [vmem:[#allocation2 + $0xc0] sm:$0xf]  ;;  %v7492_v27 = vld [vmem:[#allocation2 + $0x4] sm:$0xf] }
  0x74   : > { %6479 = vmatmul.mubr.bf16.gmra.mrb[8].mxu1 %v5617_v26  ;;  %v7474_v2 = vld [vmem:[#allocation2 + $0x24] sm:$0xf]  ;;  %v5823_v8 = vpack.c.bf16 %v410_v10, %v410_v10  ;;  %v885_v9 = vshrl.u32 %v5822_v56, 16  ;;  %435 = vst [vmem:[#allocation2 + $0x30] sm:$0x1] %v434_v13  ;;  %v881_v16 = vor.u32 %v879_v54, %v878_v57  ;;  %v883_v19 = vrot.slane %v878_v57, 4 }
  0x75   : > { %v7476_v3 = vld [vmem:[#allocation2 + $0x28] sm:$0xf]  ;;  %v2031_v11 = vshrl.u32 %v7474_v2, 16  ;;  %v2034_v15 = vshll.u32 %v7474_v2, 16  ;;  %v1051_v22 = vsel %vm7156_vm10, %v873_v4, %v1050_v14  ;;  %v888_v42 = vshll.u32 %v5822_v56, 16 }
  0x76   : > { %v1968_v18 = vld [vmem:[#allocation2 + $0x2c] sm:$0x1]  ;;  %v2040_v20 = vshll.u32 %v7476_v3, 16  ;;  %v2044_v25 = vshrl.u32 %v7476_v3, 16  ;;  %v5574_v21 = vcombine.low %v7474_v2, %v7476_v3  ;;  %v882_v37 = vsel %vm7148_vm9, %v874_v5, %v881_v16  ;;  %1052 = vst [vmem:[#allocation2 + $0xb4] sm:$0xf] %v1051_v22 }
  0x77   : > { %v2033_v31 = vrot.slane %v2031_v11, 4  ;;  %v2036_v32 = vrot.slane %v2034_v15, 5  ;;  %v2050_v34 = vshll.u32 %v1968_v18, 16  ;;  %1053 = vst [vmem:[#allocation2 + $0xb8] sm:$0xf] %v882_v37  ;;  %v1055_v36 = vsel %vm7104_vm3, %v883_v19, %v1054_v7  ;;  %v6003_v11 = vld [vmem:[%s7077_s13 + $0x20] sm:$0xff]  }
  0x78   : > { %v2042_v53 = vrot.slane %v2040_v20, 5  ;;  %v2046_v6 = vrot.slane %v2044_v25, 4  ;;  %v887_v1 = vrot.slane %v885_v9, 7  ;;  %1056 = vst [vmem:[#allocation2 + $0xbc] sm:$0x1] %v1055_v36  ;;  %v893_v43 = vshrl.u32 %v5823_v8, 16 }
  0x79   : > { %v2037_v0 = vor.u32 %v2036_v32, %v2033_v31  ;;  %v2052_v41 = vrot.slane %v2050_v34, 5  ;;  %v896_v46 = vshll.u32 %v5823_v8, 16  ;;  %v315_v48 = vmul.f32 %v7428_v52, %v5871_v59  ;;  %v1061_v54 = vld [vmem:[#allocation2 + $0xc8] sm:$0x1] }
  0x7a   : > { %v2047_v44 = vor.u32 %v2046_v6, %v2042_v53  ;;  %v891_v45 = vrot.slane %v887_v1, 4  ;;  %v890_v51 = vor.u32 %v888_v42, %v887_v1  ;;  %v895_v28 = vrot.slane %v893_v43, 7 }
  0x7b   : > { %v2038_v50 = vrot.slane %v2037_v0, 4  ;;  %v353_v14 = vadd.f32 %v7439_v58, %v314_v62  ;;  %v354_v55 = vadd.f32 %v7439_v58, %v315_v48  ;;  %v490_v10 = vsel %vm7114_vm4, 0, %v489_v23 }
  0x7c   : > { %v2048_v26 = vrot.slane %v2047_v44, 4  ;;  %v422_v56 = vsel %vm7104_vm3, 0, %v421_v38  ;;  %v898_v59 = vor.u32 %v896_v46, %v895_v28  ;;  %v900_v13 = vrot.slane %v895_v28, 4  ;;  %491 = vst [vmem:[#allocation2 + $0x38] sm:$0x1] %v490_v10 }
  0x7d   : > { %v2043_v57 = vsel %vm7258_vm14, %v2038_v50, %v2042_v53  ;;  %v1058_v62 = vsel %vm7156_vm10, %v890_v51, %v1057_v47  ;;  %423 = vst [vmem:[#allocation2] sm:$0x1] %v422_v56  ;;  %v2380_v5 = vld [vmem:[#allocation2 + $0xb4] sm:$0xe]  ;;  %v385_v7 = vmax.f32 %v353_v14, 0.0  ;;  %v386_v8 = vmax.f32 %v354_v55, 0.0 }
  0x7e   : > { %v2053_v4 = vsel %vm7258_vm14, %v2048_v26, %v2052_v41  ;;  %1059 = vst [vmem:[#allocation2 + $0xc0] sm:$0xf] %v1058_v62  ;;  %v478_v9 = vsel %vm7114_vm4, 0, %v477_v49  ;;  %v1963_v16 = vld [vmem:[#allocation2 + $0xb8] sm:$0xf]  ;;  %v5570_v19 = vrot.slane %v2380_v5, 9  ;;  %v899_v18 = vsel %vm7148_vm9, %v891_v45, %v898_v59 }
  0x7f   : > { %v5590_v15 = vcombine.low %v2043_v57, %v2053_v4  ;;  %v1062_v20 = vsel %vm7104_vm3, %v900_v13, %v1061_v54  ;;  %479 = vst [vmem:[#allocation2 + $0x8] sm:$0x1] %v478_v9  ;;  %v1980_v25 = vld [vmem:[#allocation2 + $0xbc] sm:$0x1]  ;;  %v2530_v22 = vrot.slane %v1963_v16, 5  ;;  %v5798_v31 = vpack.c.bf16 %v385_v7, %v385_v7 }
  0x80   : > { %1060 = vst [vmem:[#allocation2 + $0xc4] sm:$0xf] %v899_v18  ;;  %1063 = vst [vmem:[#allocation2 + $0xc8] sm:$0x1] %v1062_v20  ;;  %v5799_v32 = vpack.c.bf16 %v386_v8, %v386_v8  ;;  %v1125_v34 = vshll.u32 %v7492_v27, 16  ;;  %v2533_v37 = vrot.slane %v1980_v25, 5  ;;  %v5874_v53 = vunpack.c.l.bf16 %v6003_v11 }
  0x81   : > { %2990 = vmatprep.mubr.bf16.mxu0 %v5590_v15  ;;  %v1129_v23 = vshrl.u32 %v7492_v27, 16  ;;  %v5875_v6 = vunpack.c.h.bf16 %v6003_v11  ;;  %v2531_v36 = vsel %vm7186_vm11, %v5570_v19, %v2530_v22  ;;  %v2532_v1 = vrot.slane %v2530_v22, 4  ;;  %v973_v47 = vld [vmem:[#allocation2 + $0x30] sm:$0xf]  ;;  %v436_v57 = vld [vmem:[#allocation2 + $0x3c] sm:$0x1] }
  0x82   : > { %2991 = vmatmul.mubr.bf16.gmra.mrb[8].mxu0 %v5574_v21  ;;  %v681_v38 = vshrl.u32 %v5798_v31, 16  ;;  %v684_v0 = vshll.u32 %v5798_v31, 16  ;;  %v689_v41 = vshrl.u32 %v5799_v32, 16  ;;  %v692_v42 = vshll.u32 %v5799_v32, 16  ;;  %v492_v59 = vld [vmem:[#allocation2 + $0x44] sm:$0x1] }
  0x83   : > { %v7519_v43 = vrot.slane %v1125_v34, 5  ;;  %v1131_v44 = vrot.slane %v1129_v23, 4  ;;  %v2534_v45 = vsel %vm7186_vm11, %v2532_v1, %v2533_v37  ;;  %v316_v2 = vmul.f32 %v7428_v52, %v5874_v53  ;;  %v977_v55 = vld [vmem:[#allocation2 + $0x38] sm:$0x1]  ;;  %v7534_v19 = vld [vmem:[#allocation2 + $0xc] sm:$0xf] }
  0x84   : > { %v683_v46 = vrot.slane %v681_v38, 7  ;;  %v7523_v48 = vld [vmem:[#allocation2] sm:$0xf]  ;;  %v317_v3 = vmul.f32 %v7428_v52, %v5875_v6  ;;  %v5618_v21 = vcombine.low %v2531_v36, %v2534_v45  ;;  %v691_v50 = vrot.slane %v689_v41, 7  ;;  %v7543_v23 = vld [vmem:[#allocation2 + $0x10] sm:$0xf] }
  0x85   : > { %v2381_v49 = vld [vmem:[#allocation2 + $0xc0] sm:$0xe]  ;;  %v1116_v51 = vshrl.u32 %v7523_v48, 16  ;;  %v1119_v28 = vshll.u32 %v7523_v48, 16  ;;  %v1132_v56 = vor.u32 %v1131_v44, %v7519_v43  ;;  %v5508_v8 = vcombine.low %v7523_v48, %v7492_v27  ;;  %v7550_v38 = vld [vmem:[#allocation2 + $0x14] sm:$0x1] }
  0x86   : > { %v5571_v54 = vrot.slane %v2381_v49, 9  ;;  %v686_v14 = vor.u32 %v684_v0, %v683_v46  ;;  %v687_v26 = vrot.slane %v683_v46, 4  ;;  %v1096_v10 = vld [vmem:[#allocation2 + $0x8] sm:$0x1]  ;;  %6482 = vmatprep.mubr.bf16.mxu1 %v5618_v21  ;;  %v694_v4 = vor.u32 %v692_v42, %v691_v50 }
  0x87   : > { %v1965_v13 = vld [vmem:[#allocation2 + $0xc4] sm:$0xf]  ;;  %v1981_v62 = vld [vmem:[#allocation2 + $0xc8] sm:$0x1]  ;;  %v696_v5 = vrot.slane %v691_v50, 4  ;;  %v1118_v7 = vrot.slane %v1116_v51, 4  ;;  %v355_v37 = vadd.f32 %v7439_v58, %v316_v2  ;;  %v356_v6 = vadd.f32 %v7439_v58, %v317_v3 }
  0x88   : > { %v2537_v9 = vrot.slane %v1965_v13, 5  ;;  %v2540_v11 = vrot.slane %v1981_v62, 5  ;;  %v974_v15 = vsel %vm7156_vm10, %v686_v14, %v973_v47  ;;  %v1121_v16 = vrot.slane %v1119_v28, 5 }
  0x89   : > { %v695_v18 = vsel %vm7148_vm9, %v687_v26, %v694_v4  ;;  %975 = vst [vmem:[#allocation2 + $0x30] sm:$0xf] %v974_v15  ;;  %v978_v20 = vsel %vm7104_vm3, %v696_v5, %v977_v55  ;;  %v1133_v25 = vrot.slane %v1132_v56, 4  ;;  %v1135_v22 = vshll.u32 %v1096_v10, 16 }
  0x8a   : > { %v2538_v31 = vsel %vm7186_vm11, %v5571_v54, %v2537_v9  ;;  %v2539_v32 = vrot.slane %v2537_v9, 4  ;;  %976 = vst [vmem:[#allocation2 + $0x34] sm:$0xf] %v695_v18  ;;  %979 = vst [vmem:[#allocation2 + $0x38] sm:$0x1] %v978_v20  ;;  %v1122_v34 = vor.u32 %v1121_v16, %v1118_v7  ;;  %v437_v36 = vsel %vm7104_vm3, 0, %v436_v57 }
  0x8b   : > { %v1137_v53 = vrot.slane %v1135_v22, 5  ;;  %v493_v1 = vsel %vm7114_vm4, 0, %v492_v59  ;;  %v387_v42 = vmax.f32 %v355_v37, 0.0  ;;  %438 = vst [vmem:[#allocation2 + $0x3c] sm:$0x1] %v437_v36  ;;  %v1140_v44 = vshrl.u32 %v7534_v19, 16 }
  0x8c   : > { %v2541_v0 = vsel %vm7186_vm11, %v2539_v32, %v2540_v11  ;;  %v1123_v41 = vrot.slane %v1122_v34, 4  ;;  %494 = vst [vmem:[#allocation2 + $0x44] sm:$0x1] %v493_v1  ;;  %v388_v47 = vmax.f32 %v356_v6, 0.0  ;;  %v1143_v2 = vshll.u32 %v7534_v19, 16 }
  0x8d   : > { %v5619_v45 = vcombine.low %v2538_v31, %v2541_v0  ;;  %v1138_v46 = vsel %vm7258_vm14, %v1133_v25, %v1137_v53  ;;  %v5800_v21 = vpack.c.bf16 %v387_v42, %v387_v42  ;;  %v1142_v49 = vrot.slane %v1140_v44, 4  ;;  %v439_v0 = vld [vmem:[#allocation2 + $0x48] sm:$0x1] }
  0x8e   : > { %v1128_v3 = vsel %vm7258_vm14, %v1123_v41, %v7519_v43  ;;  %v1149_v50 = vshll.u32 %v7543_v23, 16  ;;  %v5801_v28 = vpack.c.bf16 %v388_v47, %v388_v47  ;;  %v1145_v54 = vrot.slane %v1143_v2, 5  ;;  %v6817_v41 = vld [vmem:[%s9093_s3 + $0x88] sm:$0xff]  }
  0x8f   : > { %6483 = vmatmul.mubr.bf16.gmra.mrb[12].mxu1 %v5619_v45  ;;  %v5524_v51 = vcombine.low %v1128_v3, %v1138_v46  ;;  %v1153_v14 = vshrl.u32 %v7543_v23, 16  ;;  %v698_v55 = vshrl.u32 %v5800_v21, 16  ;;  %v701_v10 = vshll.u32 %v5800_v21, 16  ;;  %v6004_v2 = vld [vmem:[%s7077_s13 + $0x28] sm:$0xff]   ;;  %v495_v3 = vld [vmem:[#allocation2 + $0x50] sm:$0x1] }
  0x90   : > { %v7563_v26 = vld [vmem:[#allocation2 + $0x30] sm:$0xf]  ;;  %v7565_v56 = vrot.slane %v1149_v50, 5  ;;  %v1159_v57 = vshll.u32 %v7550_v38, 16  ;;  %v1146_v4 = vor.u32 %v1145_v54, %v1142_v49  ;;  %v5509_v5 = vcombine.low %v7534_v19, %v7543_v23  ;;  %v7582_v21 = vld [vmem:[#allocation2 + $0x18] sm:$0xf] }
  0x91   : > { %v7568_v59 = vld [vmem:[#allocation2 + $0x34] sm:$0xf]  ;;  %v1969_v43 = vld [vmem:[#allocation2 + $0x38] sm:$0x1]  ;;  %v2055_v13 = vshrl.u32 %v7563_v26, 16  ;;  %v2058_v62 = vshll.u32 %v7563_v26, 16  ;;  %3440 = vmatprep.mubr.bf16.mxu1 %v5524_v51 }
  0x92   : > { %v2064_v7 = vshll.u32 %v7568_v59, 16  ;;  %v2068_v9 = vshrl.u32 %v7568_v59, 16  ;;  %v2074_v11 = vshll.u32 %v1969_v43, 16  ;;  %v5575_v15 = vcombine.low %v7563_v26, %v7568_v59  ;;  %v980_v37 = vld [vmem:[#allocation2 + $0x3c] sm:$0xf]  ;;  %v6831_v19 = vld [vmem:[%s9093_s3 + $0xa0] sm:$0xff]  }
  0x93   : > { %v2057_v16 = vrot.slane %v2055_v13, 4  ;;  %v2060_v18 = vrot.slane %v2058_v62, 5  ;;  %v700_v20 = vrot.slane %v698_v55, 7  ;;  %v706_v25 = vshrl.u32 %v5801_v28, 16  ;;  %v984_v44 = vld [vmem:[#allocation2 + $0x44] sm:$0x1] }
  0x94   : > { %v2066_v22 = vrot.slane %v2064_v7, 5  ;;  %v2070_v31 = vrot.slane %v2068_v9, 4  ;;  %v2076_v32 = vrot.slane %v2074_v11, 5  ;;  %v709_v34 = vshll.u32 %v5801_v28, 16  ;;  %v7589_v54 = vld [vmem:[#allocation2 + $0x1c] sm:$0xf] }
  0x95   : > { %v2061_v53 = vor.u32 %v2060_v18, %v2057_v16  ;;  %v703_v6 = vor.u32 %v701_v10, %v700_v20  ;;  %v704_v36 = vrot.slane %v700_v20, 4  ;;  %v708_v1 = vrot.slane %v706_v25, 7  ;;  %v1098_v16 = vld [vmem:[#allocation2 + $0x20] sm:$0x1] }
  0x96   : > { %v2071_v42 = vor.u32 %v2070_v31, %v2066_v22  ;;  %v1147_v45 = vrot.slane %v1146_v4, 4  ;;  %v1155_v46 = vrot.slane %v1153_v14, 4  ;;  %v1161_v47 = vrot.slane %v1159_v57, 5  ;;  %v6822_v14 = vld [vmem:[%s9093_s3 + $0x90] sm:$0xff]  }
  0x97   : > { %v2062_v49 = vrot.slane %v2061_v53, 4  ;;  %3441 = vmatmul.mubr.bf16.vlgmr.msra.gmra.mrb[16].mxu1 %v5508_v8  ;;  %v711_v50 = vor.u32 %v709_v34, %v708_v1  ;;  %v713_v51 = vrot.slane %v708_v1, 4  ;;  %v981_v28 = vsel %vm7156_vm10, %v703_v6, %v980_v37  ;;  %v6842_v34 = vld [vmem:[%s9093_s3 + $0x1c0] sm:$0xff]  }
  0x98   : > { %v2072_v55 = vrot.slane %v2071_v42, 4  ;;  %982 = vst [vmem:[#allocation2 + $0x3c] sm:$0xf] %v981_v28  ;;  %6487 = vmatpush3.bf16.msra.mxu1 %v7361_v24  ;;  %v1152_v27 = vsel %vm7258_vm14, %v1147_v45, %v7565_v56  ;;  %v1156_v48 = vor.u32 %v1155_v46, %v7565_v56  ;;  %v1578_v8 = vrot.slane %v7550_v38, 5  ;;  %6302 = vmatprep.subr.bf16.mxu0 %v6842_v34  ;;  %v6836_v34 = vld [vmem:[%s9093_s3 + $0xa8] sm:$0xff]  }
  0x99   : > { %v2067_v10 = vsel %vm7258_vm14, %v2062_v49, %v2066_v22  ;;  %v712_v57 = vsel %vm7148_vm9, %v704_v36, %v711_v50  ;;  %v985_v43 = vsel %vm7104_vm3, %v713_v51, %v984_v44  ;;  %v5878_v13 = vunpack.c.l.bf16 %v6004_v2  ;;  %6488 = vmatprep.subr.bf16.mxu1 %v6817_v41  ;;  %v6826_v44 = vld [vmem:[%s9093_s3 + $0x98] sm:$0xff]  }
  0x9a   : > { %v2077_v24 = vsel %vm7258_vm14, %v2072_v55, %v2076_v32  ;;  %983 = vst [vmem:[#allocation2 + $0x40] sm:$0xf] %v712_v57  ;;  %986 = vst [vmem:[#allocation2 + $0x44] sm:$0x1] %v985_v43  ;;  %v1157_v56 = vrot.slane %v1156_v48, 4  ;;  %v5879_v62 = vunpack.c.h.bf16 %v6004_v2  ;;  %v440_v4 = vsel %vm7104_vm3, 0, %v439_v0 }
  0x9b   : > { %v5591_v7 = vcombine.low %v2067_v10, %v2077_v24  ;;  %v318_v9 = vmul.f32 %v7428_v52, %v5878_v13  ;;  %441 = vst [vmem:[#allocation2 + $0x48] sm:$0x1] %v440_v4  ;;  %v496_v11 = vsel %vm7114_vm4, 0, %v495_v3  ;;  %v1164_v18 = vshrl.u32 %v7582_v21, 16  ;;  %v7620_v32 = vld [vmem:[%s7077_s13 + $0x30] sm:$0xff]  }
  0x9c   : > { %v1162_v20 = vsel %vm7258_vm14, %v1157_v56, %v1161_v47  ;;  %v319_v25 = vmul.f32 %v7428_v52, %v5879_v62  ;;  %497 = vst [vmem:[#allocation2 + $0x50] sm:$0x1] %v496_v11  ;;  %v1167_v22 = vshll.u32 %v7582_v21, 16  ;;  %v1173_v31 = vshll.u32 %v7589_v54, 16  ;;  %6489 = vmatpush3.bf16.msra.mxu1 %v6817_v41 }
  0x9d   : > { %2998 = vmatprep.mubr.bf16.mxu0 %v5591_v7  ;;  %v5525_v37 = vcombine.low %v1152_v27, %v1162_v20  ;;  %v357_v53 = vadd.f32 %v7439_v58, %v318_v9  ;;  %v1166_v6 = vrot.slane %v1164_v18, 4  ;;  %v1177_v36 = vshrl.u32 %v7589_v54, 16  ;;  %6490 = vmatprep.subr.bf16.mxu1 %v6822_v14 }
  0x9e   : > { %2999 = vmatmul.mubr.bf16.gmra.mrb[12].mxu0 %v5575_v15  ;;  %v358_v1 = vadd.f32 %v7439_v58, %v319_v25  ;;  %v1169_v0 = vrot.slane %v1167_v22, 5  ;;  %v7631_v41 = vrot.slane %v1173_v31, 5  ;;  %v1183_v42 = vshll.u32 %v1098_v16, 16 }
  0x9f   : > { %v7636_v45 = vld [vmem:[#allocation2 + $0x3c] sm:$0xf]  ;;  %3448 = vmatprep.mubr.bf16.mxu1 %v5525_v37  ;;  %v389_v46 = vmax.f32 %v357_v53, 0.0  ;;  %v1179_v47 = vrot.slane %v1177_v36, 4  ;;  %v5510_v26 = vcombine.low %v7582_v21, %v7589_v54  ;;  %v5882_v59 = vunpack.c.l.bf16 %v7620_v32 }
  0xa0   : > { %v2079_v15 = vshrl.u32 %v7636_v45, 16  ;;  %v2082_v2 = vshll.u32 %v7636_v45, 16  ;;  %3449 = vmatmul.mubr.bf16.gmra.mrb[20].mxu1 %v5509_v5  ;;  %v390_v3 = vmax.f32 %v358_v1, 0.0  ;;  %v1170_v49 = vor.u32 %v1169_v0, %v1166_v6  ;;  %v442_v1 = vld [vmem:[#allocation2 + $0x54] sm:$0x1] }
  0xa1   : > { %v7646_v50 = vld [vmem:[#allocation2 + $0x40] sm:$0xf]  ;;  %v1970_v51 = vld [vmem:[#allocation2 + $0x44] sm:$0x1]  ;;  %v5802_v28 = vpack.c.bf16 %v389_v46, %v389_v46  ;;  %v1180_v55 = vor.u32 %v1179_v47, %v7631_v41  ;;  %v1185_v27 = vrot.slane %v1183_v42, 5  ;;  %v5883_v48 = vunpack.c.h.bf16 %v7620_v32  ;;  %6491 = vmatpush3.bf16.msra.mxu1 %v6822_v14 }
  0xa2   : > { %v2081_v10 = vrot.slane %v2079_v15, 4  ;;  %v2084_v57 = vrot.slane %v2082_v2, 5  ;;  %v2088_v43 = vshll.u32 %v7646_v50, 16  ;;  %v2092_v13 = vshrl.u32 %v7646_v50, 16  ;;  %6492 = vmatprep.subr.bf16.mxu1 %v6826_v44  ;;  %v987_v22 = vld [vmem:[#allocation2 + $0x48] sm:$0xf] }
  0xa3   : > { %v2098_v23 = vshll.u32 %v1970_v51, 16  ;;  %v5576_v5 = vcombine.low %v7636_v45, %v7646_v50  ;;  %v5803_v24 = vpack.c.bf16 %v390_v3, %v390_v3  ;;  %v715_v56 = vshrl.u32 %v5802_v28, 16  ;;  %v498_v0 = vld [vmem:[#allocation2 + $0x5c] sm:$0x1]  ;;  %v991_v46 = vld [vmem:[#allocation2 + $0x50] sm:$0x1] }
  0xa4   : > { %v2085_v62 = vor.u32 %v2084_v57, %v2081_v10  ;;  %v2090_v4 = vrot.slane %v2088_v43, 5  ;;  %v2094_v14 = vrot.slane %v2092_v13, 4  ;;  %v718_v7 = vshll.u32 %v5802_v28, 16  ;;  %v7668_v2 = vld [vmem:[#allocation2 + $0x24] sm:$0xf]  ;;  %v6841_v43 = vld [vmem:[%s9093_s3 + $0xb0] sm:$0xff]  }
  0xa5   : > { %v2100_v9 = vrot.slane %v2098_v23, 5  ;;  %v717_v11 = vrot.slane %v715_v56, 7  ;;  %v723_v16 = vshrl.u32 %v5803_v24, 16  ;;  %v726_v18 = vshll.u32 %v5803_v24, 16  ;;  %6493 = vmatpush3.bf16.msra.mxu1 %v6826_v44  ;;  %v7678_v10 = vld [vmem:[#allocation2 + $0x28] sm:$0xf] }
  0xa6   : > { %v2086_v20 = vrot.slane %v2085_v62, 4  ;;  %v2095_v25 = vor.u32 %v2094_v14, %v2090_v4  ;;  %v1171_v31 = vrot.slane %v1170_v49, 4  ;;  %v1181_v32 = vrot.slane %v1180_v55, 4  ;;  %6494 = vmatprep.subr.bf16.mxu1 %v6831_v19  ;;  %v1099_v57 = vld [vmem:[#allocation2 + $0x2c] sm:$0x1]  ;;  %v6006_v14 = vld [vmem:[%s7077_s13 + $0x38] sm:$0xff]  }
  0xa7   : > { %v720_v37 = vor.u32 %v718_v7, %v717_v11  ;;  %v721_v53 = vrot.slane %v717_v11, 4  ;;  %v725_v6 = vrot.slane %v723_v16, 7  ;;  %v320_v36 = vmul.f32 %v7428_v52, %v5882_v59  ;;  %v6852_v45 = vld [vmem:[%s9093_s3 + $0xb8] sm:$0xff]  }
  0xa8   : > { %v2091_v42 = vsel %vm7258_vm14, %v2086_v20, %v2090_v4  ;;  %v2096_v44 = vrot.slane %v2095_v25, 4  ;;  %v1176_v47 = vsel %vm7258_vm14, %v1171_v31, %v7631_v41  ;;  %v1186_v15 = vsel %vm7258_vm14, %v1181_v32, %v1185_v27  ;;  %v445_v20 = vld [vmem:[#allocation2 + $0x60] sm:$0x1] }
  0xa9   : > { %v728_v3 = vor.u32 %v726_v18, %v725_v6  ;;  %v730_v49 = vrot.slane %v725_v6, 4  ;;  %v988_v59 = vsel %vm7156_vm10, %v720_v37, %v987_v22  ;;  %v5526_v51 = vcombine.low %v1176_v47, %v1186_v15  ;;  %6495 = vmatpush3.bf16.msra.mxu1 %v6831_v19 }
  0xaa   : > { %v2101_v28 = vsel %vm7258_vm14, %v2096_v44, %v2100_v9  ;;  %989 = vst [vmem:[#allocation2 + $0x48] sm:$0xf] %v988_v59  ;;  %v321_v55 = vmul.f32 %v7428_v52, %v5883_v48  ;;  %v359_v41 = vadd.f32 %v7439_v58, %v320_v36  ;;  %v443_v27 = vsel %vm7104_vm3, 0, %v442_v1  ;;  %6496 = vmatprep.subr.bf16.mxu1 %v6836_v34 }
  0xab   : > { %v5592_v13 = vcombine.low %v2091_v42, %v2101_v28  ;;  %v729_v19 = vsel %vm7148_vm9, %v721_v53, %v728_v3  ;;  %v992_v48 = vsel %vm7104_vm3, %v730_v49, %v991_v46  ;;  %3456 = vmatprep.mubr.bf16.mxu1 %v5526_v51  ;;  %444 = vst [vmem:[#allocation2 + $0x54] sm:$0x1] %v443_v27  ;;  %v499_v23 = vsel %vm7114_vm4, 0, %v498_v0 }
  0xac   : > { %990 = vst [vmem:[#allocation2 + $0x4c] sm:$0xf] %v729_v19  ;;  %993 = vst [vmem:[#allocation2 + $0x50] sm:$0x1] %v992_v48  ;;  %3457 = vmatmul.mubr.bf16.gmra.mrb[24].mxu1 %v5510_v26  ;;  %v360_v24 = vadd.f32 %v7439_v58, %v321_v55  ;;  %v391_v56 = vmax.f32 %v359_v41, 0.0  ;;  %v1188_v62 = vshrl.u32 %v7668_v2, 16  ;;  %v5511_v16 = vcombine.low %v7668_v2, %v7678_v10 }
  0xad   : > { %500 = vst [vmem:[#allocation2 + $0x5c] sm:$0x1] %v499_v23  ;;  %v1191_v4 = vshll.u32 %v7668_v2, 16  ;;  %3006 = vmatprep.mubr.bf16.mxu0 %v5592_v13  ;;  %v1197_v7 = vshll.u32 %v7678_v10, 16  ;;  %v1201_v9 = vshrl.u32 %v7678_v10, 16  ;;  %v1207_v11 = vshll.u32 %v1099_v57, 16  ;;  %6497 = vmatpush3.bf16.msra.mxu1 %v6836_v34 }
  0xae   : > { %3007 = vmatmul.mubr.bf16.gmra.mrb[16].mxu0 %v5576_v5  ;;  %v392_v21 = vmax.f32 %v360_v24, 0.0  ;;  %v5804_v54 = vpack.c.bf16 %v391_v56, %v391_v56  ;;  %v1190_v26 = vrot.slane %v1188_v62, 4  ;;  %6498 = vmatprep.subr.bf16.mxu1 %v6841_v43  ;;  %v5886_v32 = vunpack.c.l.bf16 %v6006_v14  ;;  %v7760_v2 = vld [vmem:[#allocation2 + $0x6c] sm:$0xf] }
  0xaf   : > { %v1193_v18 = vrot.slane %v1191_v4, 5  ;;  %v7703_v25 = vrot.slane %v1197_v7, 5  ;;  %v1203_v22 = vrot.slane %v1201_v9, 4  ;;  %v7705_v31 = vrot.slane %v1207_v11, 5  ;;  %v501_v4 = vld [vmem:[#allocation2 + $0x68] sm:$0x1] }
  0xb0   : > { %v5805_v37 = vpack.c.bf16 %v392_v21, %v392_v21  ;;  %v732_v53 = vshrl.u32 %v5804_v54, 16  ;;  %v735_v6 = vshll.u32 %v5804_v54, 16  ;;  %v5887_v36 = vunpack.c.h.bf16 %v6006_v14 }
  0xb1   : > { %v1194_v34 = vor.u32 %v1193_v18, %v1190_v26  ;;  %v7710_v50 = vld [vmem:[#allocation2 + $0x48] sm:$0xf]  ;;  %v1204_v5 = vor.u32 %v1203_v22, %v7703_v25  ;;  %v322_v1 = vmul.f32 %v7428_v52, %v5886_v32  ;;  %v446_v0 = vsel %vm7104_vm3, 0, %v445_v20  ;;  %6499 = vmatpush3.bf16.msra.mxu1 %v6841_v43  ;;  %v7731_v22 = vld [vmem:[#allocation2 + $0x30] sm:$0xf] }
  0xb2   : > { %v2103_v42 = vshrl.u32 %v7710_v50, 16  ;;  %v2106_v44 = vshll.u32 %v7710_v50, 16  ;;  %v734_v46 = vrot.slane %v732_v53, 7  ;;  %v740_v47 = vshrl.u32 %v5805_v37, 16  ;;  %447 = vst [vmem:[#allocation2 + $0x60] sm:$0x1] %v446_v0  ;;  %6500 = vmatprep.subr.bf16.mxu1 %v6852_v45 }
  0xb3   : > { %v7718_v15 = vld [vmem:[#allocation2 + $0x4c] sm:$0xf]  ;;  %v1971_v3 = vld [vmem:[#allocation2 + $0x50] sm:$0x1]  ;;  %v743_v49 = vshll.u32 %v5805_v37, 16  ;;  %v1195_v59 = vrot.slane %v1194_v34, 4  ;;  %v323_v51 = vmul.f32 %v7428_v52, %v5887_v36  ;;  %v361_v28 = vadd.f32 %v7439_v58, %v322_v1 }
  0xb4   : > { %v2105_v55 = vrot.slane %v2103_v42, 4  ;;  %v2108_v41 = vrot.slane %v2106_v44, 5  ;;  %v2112_v27 = vshll.u32 %v7718_v15, 16  ;;  %v2116_v57 = vshrl.u32 %v7718_v15, 16  ;;  %v994_v43 = vld [vmem:[#allocation2 + $0x54] sm:$0xf] }
  0xb5   : > { %v2122_v13 = vshll.u32 %v1971_v3, 16  ;;  %v5577_v19 = vcombine.low %v7710_v50, %v7718_v15  ;;  %v737_v48 = vor.u32 %v735_v6, %v734_v46  ;;  %v738_v23 = vrot.slane %v734_v46, 4  ;;  %6501 = vmatpush3.bf16.msra.mxu1 %v6852_v45  ;;  %v998_v9 = vld [vmem:[#allocation2 + $0x5c] sm:$0x1]  ;;  %v7739_v34 = vld [vmem:[#allocation2 + $0x34] sm:$0xf] }
  0xb6   : > { %v2109_v24 = vor.u32 %v2108_v41, %v2105_v55  ;;  %v2114_v56 = vrot.slane %v2112_v27, 5  ;;  %v2118_v62 = vrot.slane %v2116_v57, 4  ;;  %v742_v52 = vrot.slane %v740_v47, 7 }
  0xb7   : > { %v2124_v14 = vrot.slane %v2122_v13, 5  ;;  %v995_v7 = vsel %vm7156_vm10, %v737_v48, %v994_v43  ;;  %v1200_v11 = vsel %vm7258_vm14, %v1195_v59, %v7703_v25  ;;  %v1205_v21 = vrot.slane %v1204_v5, 4 }
  0xb8   : > { %v2110_v54 = vrot.slane %v2109_v24, 4  ;;  %v2119_v26 = vor.u32 %v2118_v62, %v2114_v56  ;;  %v745_v18 = vor.u32 %v743_v49, %v742_v52  ;;  %v747_v20 = vrot.slane %v742_v52, 4  ;;  %996 = vst [vmem:[#allocation2 + $0x54] sm:$0xf] %v995_v7  ;;  %v6862_v7 = vld [vmem:[%s9093_s3 + $0x200] sm:$0xff]  }
  0xb9   : > { %v1210_v32 = vsel %vm7258_vm14, %v1205_v21, %v7705_v31  ;;  %v362_v37 = vadd.f32 %v7439_v58, %v323_v51  ;;  %v393_v53 = vmax.f32 %v361_v28, 0.0  ;;  %v502_v6 = vsel %vm7114_vm4, 0, %v501_v4  ;;  %v1100_v31 = vld [vmem:[#allocation2 + $0x38] sm:$0x1]  ;;  %v1001_v4 = vld [vmem:[#allocation2 + $0x60] sm:$0xf]  ;;  %6534 = vmatprep.subr.bf16.mxu1 %v6862_v7 }
  0xba   : > { %v2115_v25 = vsel %vm7258_vm14, %v2110_v54, %v2114_v56  ;;  %v2120_v45 = vrot.slane %v2119_v26, 4  ;;  %v746_v50 = vsel %vm7148_vm9, %v738_v23, %v745_v18  ;;  %v999_v5 = vsel %vm7104_vm3, %v747_v20, %v998_v9  ;;  %503 = vst [vmem:[#allocation2 + $0x68] sm:$0x1] %v502_v6  ;;  %v7769_v26 = vld [vmem:[#allocation2 + $0x70] sm:$0xf] }
  0xbb   : > { %997 = vst [vmem:[#allocation2 + $0x58] sm:$0xf] %v746_v50  ;;  %1000 = vst [vmem:[#allocation2 + $0x5c] sm:$0x1] %v999_v5  ;;  %v5527_v58 = vcombine.low %v1200_v11, %v1210_v32  ;;  %v394_v36 = vmax.f32 %v362_v37, 0.0  ;;  %v5806_v1 = vpack.c.bf16 %v393_v53, %v393_v53  ;;  %v1212_v0 = vshrl.u32 %v7731_v22, 16 }
  0xbc   : > { %v2125_v42 = vsel %vm7258_vm14, %v2120_v45, %v2124_v14  ;;  %v1215_v44 = vshll.u32 %v7731_v22, 16  ;;  %v1221_v46 = vshll.u32 %v7739_v34, 16  ;;  %v1225_v47 = vshrl.u32 %v7739_v34, 16 }
  0xbd   : > { %v5593_v15 = vcombine.low %v2115_v25, %v2125_v42  ;;  %3464 = vmatprep.mubr.bf16.mxu1 %v5527_v58  ;;  %v5807_v3 = vpack.c.bf16 %v394_v36, %v394_v36  ;;  %v749_v49 = vshrl.u32 %v5806_v1, 16  ;;  %v752_v59 = vshll.u32 %v5806_v1, 16 }
  0xbe   : > { %3465 = vmatmul.mubr.bf16.gmra.mrb[28].mxu1 %v5511_v16  ;;  %v1214_v51 = vrot.slane %v1212_v0, 4  ;;  %v1217_v28 = vrot.slane %v1215_v44, 5  ;;  %v1223_v55 = vrot.slane %v1221_v46, 5  ;;  %v1227_v41 = vrot.slane %v1225_v47, 4 }
  0xbf   : > { %3014 = vmatprep.mubr.bf16.mxu0 %v5593_v15  ;;  %v7756_v27 = vld [vmem:[#allocation2 + $0x54] sm:$0xf]  ;;  %v751_v57 = vrot.slane %v749_v49, 7  ;;  %v757_v43 = vshrl.u32 %v5807_v3, 16  ;;  %v760_v13 = vshll.u32 %v5807_v3, 16  ;;  %v1231_v48 = vshll.u32 %v1100_v31, 16 }
  0xc0   : > { %3015 = vmatmul.mubr.bf16.gmra.mrb[20].mxu0 %v5577_v19  ;;  %v2127_v23 = vshrl.u32 %v7756_v27, 16  ;;  %v2130_v24 = vshll.u32 %v7756_v27, 16  ;;  %v1218_v56 = vor.u32 %v1217_v28, %v1214_v51  ;;  %v1228_v62 = vor.u32 %v1227_v41, %v1223_v55  ;;  %v7787_v15 = vld [vmem:[#allocation2 + $0x3c] sm:$0xf]  ;;  %v7795_v51 = vld [vmem:[#allocation2 + $0x40] sm:$0xf] }
  0xc1   : > { %v754_v10 = vor.u32 %v752_v59, %v751_v57  ;;  %v755_v16 = vrot.slane %v751_v57, 4  ;;  %v759_v52 = vrot.slane %v757_v43, 7  ;;  %v1233_v14 = vrot.slane %v1231_v48, 5  ;;  %v1005_v6 = vld [vmem:[#allocation2 + $0x68] sm:$0x1] }
  0xc2   : > { %v7765_v9 = vld [vmem:[#allocation2 + $0x58] sm:$0xf]  ;;  %v1972_v19 = vld [vmem:[#allocation2 + $0x5c] sm:$0x1]  ;;  %v2129_v11 = vrot.slane %v2127_v23, 4  ;;  %v2132_v21 = vrot.slane %v2130_v24, 5  ;;  %v5512_v54 = vcombine.low %v7731_v22, %v7739_v34  ;;  %v5580_v18 = vcombine.low %v7760_v2, %v7769_v26 }
  0xc3   : > { %v2136_v20 = vshll.u32 %v7765_v9, 16  ;;  %v2140_v32 = vshrl.u32 %v7765_v9, 16  ;;  %v2146_v37 = vshll.u32 %v1972_v19, 16  ;;  %v5578_v53 = vcombine.low %v7756_v27, %v7765_v9 }
  0xc4   : > { %v2133_v25 = vor.u32 %v2132_v21, %v2129_v11  ;;  %v762_v45 = vor.u32 %v760_v13, %v759_v52  ;;  %v764_v50 = vrot.slane %v759_v52, 4  ;;  %v1002_v22 = vsel %vm7156_vm10, %v754_v10, %v1001_v4 }
  0xc5   : > { %v2138_v34 = vrot.slane %v2136_v20, 5  ;;  %v2142_v5 = vrot.slane %v2140_v32, 4  ;;  %v2148_v31 = vrot.slane %v2146_v37, 5  ;;  %1003 = vst [vmem:[#allocation2 + $0x60] sm:$0xf] %v1002_v22  ;;  %v1219_v58 = vrot.slane %v1218_v56, 4 }
  0xc6   : > { %v2134_v36 = vrot.slane %v2133_v25, 4  ;;  %v763_v1 = vsel %vm7148_vm9, %v755_v16, %v762_v45  ;;  %v1006_v0 = vsel %vm7104_vm3, %v764_v50, %v1005_v6  ;;  %v1229_v42 = vrot.slane %v1228_v62, 4 }
  0xc7   : > { %v2143_v44 = vor.u32 %v2142_v5, %v2138_v34  ;;  %1004 = vst [vmem:[#allocation2 + $0x64] sm:$0xf] %v763_v1  ;;  %1007 = vst [vmem:[#allocation2 + $0x68] sm:$0x1] %v1006_v0  ;;  %v1224_v33 = vsel %vm7258_vm14, %v1219_v58, %v1223_v55  ;;  %v2175_v46 = vshrl.u32 %v7760_v2, 16  ;;  %v2178_v47 = vshll.u32 %v7760_v2, 16 }
  0xc8   : > { %v2139_v17 = vsel %vm7258_vm14, %v2134_v36, %v2138_v34  ;;  %v1234_v3 = vsel %vm7258_vm14, %v1229_v42, %v1233_v14  ;;  %v2184_v49 = vshll.u32 %v7769_v26, 16  ;;  %v2188_v59 = vshrl.u32 %v7769_v26, 16  ;;  %v1101_v34 = vld [vmem:[#allocation2 + $0x44] sm:$0x1] }
  0xc9   : > { %v2144_v28 = vrot.slane %v2143_v44, 4  ;;  %v5528_v55 = vcombine.low %v1224_v33, %v1234_v3  ;;  %v2177_v41 = vrot.slane %v2175_v46, 4  ;;  %v2180_v27 = vrot.slane %v2178_v47, 5 }
  0xca   : > { %v2186_v57 = vrot.slane %v2184_v49, 5  ;;  %v2190_v43 = vrot.slane %v2188_v59, 4  ;;  %v1236_v13 = vshrl.u32 %v7787_v15, 16  ;;  %v1239_v48 = vshll.u32 %v7787_v15, 16 }
  0xcb   : > { %v2149_v23 = vsel %vm7258_vm14, %v2144_v28, %v2148_v31  ;;  %3472 = vmatprep.mubr.bf16.mxu1 %v5528_v55  ;;  %v2181_v24 = vor.u32 %v2180_v27, %v2177_v41  ;;  %v1245_v56 = vshll.u32 %v7795_v51, 16  ;;  %v1249_v62 = vshrl.u32 %v7795_v51, 16  ;;  %v7831_v41 = vld [vmem:[#allocation2 + $0x7c] sm:$0xf] }
  0xcc   : > { %v5594_v10 = vcombine.low %v2139_v17, %v2149_v23  ;;  %v7803_v16 = vld [vmem:[#allocation2 + $0x60] sm:$0xf]  ;;  %3473 = vmatmul.mubr.bf16.gmra.mrb[32].mxu1 %v5512_v54  ;;  %v2191_v52 = vor.u32 %v2190_v43, %v2186_v57  ;;  %v1238_v4 = vrot.slane %v1236_v13, 4  ;;  %v1241_v14 = vrot.slane %v1239_v48, 5 }
  0xcd   : > { %v2151_v7 = vshrl.u32 %v7803_v16, 16  ;;  %v2154_v9 = vshll.u32 %v7803_v16, 16  ;;  %v2182_v19 = vrot.slane %v2181_v24, 4  ;;  %v1247_v11 = vrot.slane %v1245_v56, 5 }
  0xce   : > { %3022 = vmatprep.mubr.bf16.mxu0 %v5594_v10  ;;  %v7807_v21 = vld [vmem:[#allocation2 + $0x64] sm:$0xf]  ;;  %v7809_v20 = vld [vmem:[#allocation2 + $0x68] sm:$0x1]  ;;  %v2192_v32 = vrot.slane %v2191_v52, 4  ;;  %v1242_v37 = vor.u32 %v1241_v14, %v1238_v4  ;;  %v1251_v6 = vrot.slane %v1249_v62, 4  ;;  %v5513_v54 = vcombine.low %v7787_v15, %v7795_v51 }
  0xcf   : > { %3023 = vmatmul.mubr.bf16.gmra.mrb[24].mxu0 %v5578_v53  ;;  %v2153_v25 = vrot.slane %v2151_v7, 4  ;;  %v2156_v45 = vrot.slane %v2154_v9, 5  ;;  %v2160_v50 = vshll.u32 %v7807_v21, 16  ;;  %v2164_v22 = vshrl.u32 %v7807_v21, 16  ;;  %v7823_v53 = vld [vmem:[#allocation2 + $0x78] sm:$0xf] }
  0xd0   : > { %v2170_v5 = vshll.u32 %v7809_v20, 16  ;;  %v5579_v31 = vcombine.low %v7803_v16, %v7807_v21  ;;  %v2187_v58 = vsel %vm7258_vm14, %v2182_v19, %v2186_v57  ;;  %v2197_v36 = vsel %vm7258_vm14, %v2192_v32, %v7196_v40  ;;  %v7827_v51 = vld [vmem:[#allocation2 + $0x48] sm:$0xf]  ;;  %v6894_v62 = vld [vmem:[#allocation2 + $0x80] sm:$0x1] }
  0xd1   : > { %v2157_v1 = vor.u32 %v2156_v45, %v2153_v25  ;;  %v2162_v0 = vrot.slane %v2160_v50, 5  ;;  %v2166_v42 = vrot.slane %v2164_v22, 4  ;;  %v5596_v44 = vcombine.low %v2187_v58, %v2197_v36  ;;  %v7839_v16 = vld [vmem:[#allocation2 + $0x4c] sm:$0xf]  ;;  %v1102_v9 = vld [vmem:[#allocation2 + $0x50] sm:$0x1] }
  0xd2   : > { %v2172_v33 = vrot.slane %v2170_v5, 5  ;;  %v1243_v46 = vrot.slane %v1242_v37, 4  ;;  %v1252_v47 = vor.u32 %v1251_v6, %v1247_v11  ;;  %v1255_v15 = vshll.u32 %v1101_v34, 16  ;;  %v7849_v22 = vld [vmem:[#allocation2 + $0x84] sm:$0xf] }
  0xd3   : > { %v2158_v17 = vrot.slane %v2157_v1, 4  ;;  %v2167_v3 = vor.u32 %v2166_v42, %v2162_v0  ;;  %v2199_v49 = vshrl.u32 %v7823_v53, 16  ;;  %v2202_v59 = vshll.u32 %v7823_v53, 16 }
  0xd4   : > { %v1248_v40 = vsel %vm7258_vm14, %v1243_v46, %v1247_v11  ;;  %v1253_v28 = vrot.slane %v1252_v47, 4  ;;  %v1257_v55 = vrot.slane %v1255_v15, 5  ;;  %v2208_v27 = vshll.u32 %v7831_v41, 16 }
  0xd5   : > { %v2163_v57 = vsel %vm7258_vm14, %v2158_v17, %v2162_v0  ;;  %v2168_v43 = vrot.slane %v2167_v3, 4  ;;  %v2201_v13 = vrot.slane %v2199_v49, 4  ;;  %v2204_v48 = vrot.slane %v2202_v59, 5  ;;  %v7857_v49 = vld [vmem:[#allocation2 + $0x88] sm:$0xf] }
  0xd6   : > { %v1258_v23 = vsel %vm7258_vm14, %v1253_v28, %v1257_v55  ;;  %v2210_v24 = vrot.slane %v2208_v27, 5  ;;  %v2212_v56 = vshrl.u32 %v7831_v41, 16  ;;  %v2218_v10 = vshll.u32 %v6894_v62, 16  ;;  %v7863_v27 = vld [vmem:[#allocation2 + $0x54] sm:$0xf] }
  0xd7   : > { %v2173_v52 = vsel %vm7258_vm14, %v2168_v43, %v2172_v33  ;;  %v5529_v4 = vcombine.low %v1248_v40, %v1258_v23  ;;  %v2205_v14 = vor.u32 %v2204_v48, %v2201_v13  ;;  %v5581_v7 = vcombine.low %v7823_v53, %v7831_v41  ;;  %v7865_v23 = vld [vmem:[#allocation2 + $0x58] sm:$0xf] }
  0xd8   : > { %v5595_v19 = vcombine.low %v2163_v57, %v2173_v52  ;;  %v2214_v11 = vrot.slane %v2212_v56, 4  ;;  %v2220_v32 = vrot.slane %v2218_v10, 5  ;;  %v1260_v37 = vshrl.u32 %v7827_v51, 16 }
  0xd9   : > { %3480 = vmatprep.mubr.bf16.mxu1 %v5529_v4  ;;  %v2206_v6 = vrot.slane %v2205_v14, 4  ;;  %v1263_v25 = vshll.u32 %v7827_v51, 16  ;;  %v1269_v45 = vshll.u32 %v7839_v16, 16  ;;  %v1273_v50 = vshrl.u32 %v7839_v16, 16 }
  0xda   : > { %3030 = vmatprep.mubr.bf16.mxu0 %v5595_v19  ;;  %3481 = vmatmul.mubr.bf16.gmra.mrb[36].mxu1 %v5513_v54  ;;  %v2215_v34 = vor.u32 %v2214_v11, %v2210_v24  ;;  %v1262_v5 = vrot.slane %v1260_v37, 4  ;;  %v1279_v58 = vshll.u32 %v1102_v9, 16  ;;  %v5514_v36 = vcombine.low %v7827_v51, %v7839_v16  ;;  %v1103_v16 = vld [vmem:[#allocation2 + $0x5c] sm:$0x1] }
  0xdb   : > { %3031 = vmatmul.mubr.bf16.gmra.mrb[28].mxu0 %v5579_v31  ;;  %v2211_v1 = vsel %vm7258_vm14, %v2206_v6, %v2210_v24  ;;  %v1265_v0 = vrot.slane %v1263_v25, 5  ;;  %v1271_v42 = vrot.slane %v1269_v45, 5  ;;  %v1275_v33 = vrot.slane %v1273_v50, 4  ;;  %v7876_v6 = vld [vmem:[#allocation2 + $0x90] sm:$0xf] }
  0xdc   : > { %3038 = vmatprep.mubr.bf16.mxu0 %v5596_v44  ;;  %v2216_v46 = vrot.slane %v2215_v34, 4  ;;  %v1281_v47 = vrot.slane %v1279_v58, 5  ;;  %v2223_v15 = vshrl.u32 %v7849_v22, 16  ;;  %v2226_v54 = vshll.u32 %v7849_v22, 16  ;;  %v6896_v44 = vld [vmem:[#allocation2 + $0x8c] sm:$0x1] }
  0xdd   : > { %v1266_v17 = vor.u32 %v1265_v0, %v1262_v5  ;;  %v1276_v3 = vor.u32 %v1275_v33, %v1271_v42  ;;  %v2232_v59 = vshll.u32 %v7857_v49, 16  ;;  %v2236_v31 = vshrl.u32 %v7857_v49, 16 }
  0xde   : > { %v2221_v51 = vsel %vm7258_vm14, %v2216_v46, %v2220_v32  ;;  %v2225_v40 = vrot.slane %v2223_v15, 4  ;;  %v2228_v28 = vrot.slane %v2226_v54, 5  ;;  %v2242_v55 = vshll.u32 %v6896_v44, 16  ;;  %v6898_v44 = vld [vmem:[#allocation2 + $0x98] sm:$0x1] }
  0xdf   : > { %v5597_v57 = vcombine.low %v2211_v1, %v2221_v51  ;;  %v1267_v43 = vrot.slane %v1266_v17, 4  ;;  %v1277_v13 = vrot.slane %v1276_v3, 4  ;;  %v2234_v48 = vrot.slane %v2232_v59, 5  ;;  %v7894_v17 = vld [vmem:[#allocation2 + $0x60] sm:$0xf] }
  0xe0   : > { %v2229_v24 = vor.u32 %v2228_v28, %v2225_v40  ;;  %v2238_v56 = vrot.slane %v2236_v31, 4  ;;  %v2244_v62 = vrot.slane %v2242_v55, 5  ;;  %v5582_v10 = vcombine.low %v7849_v22, %v7857_v49 }
  0xe1   : > { %v1272_v52 = vsel %vm7258_vm14, %v1267_v43, %v1271_v42  ;;  %v1282_v4 = vsel %vm7258_vm14, %v1277_v13, %v1281_v47  ;;  %v1284_v14 = vshrl.u32 %v7863_v27, 16  ;;  %v1287_v9 = vshll.u32 %v7863_v27, 16  ;;  %v7890_v47 = vld [vmem:[#allocation2 + $0x94] sm:$0xf] }
  0xe2   : > { %v5530_v19 = vcombine.low %v1272_v52, %v1282_v4  ;;  %v2230_v11 = vrot.slane %v2229_v24, 4  ;;  %v2239_v32 = vor.u32 %v2238_v56, %v2234_v48  ;;  %v1293_v37 = vshll.u32 %v7865_v23, 16 }
  0xe3   : > { %3039 = vmatmul.mubr.bf16.gmra.mrb[32].mxu0 %v5580_v18  ;;  %v1286_v25 = vrot.slane %v1284_v14, 4  ;;  %v1289_v45 = vrot.slane %v1287_v9, 5  ;;  %v1297_v50 = vshrl.u32 %v7865_v23, 16  ;;  %v1303_v34 = vshll.u32 %v1103_v16, 16 }
  0xe4   : > { %3046 = vmatprep.mubr.bf16.mxu0 %v5597_v57  ;;  %3488 = vmatprep.mubr.bf16.mxu1 %v5530_v19  ;;  %v2235_v5 = vsel %vm7258_vm14, %v2230_v11, %v2234_v48  ;;  %v2240_v58 = vrot.slane %v2239_v32, 4  ;;  %v1295_v1 = vrot.slane %v1293_v37, 5  ;;  %v5515_v0 = vcombine.low %v7863_v27, %v7865_v23  ;;  %v7896_v27 = vld [vmem:[#allocation2 + $0x64] sm:$0xf]  ;;  %v7911_v19 = vld [vmem:[#allocation2 + $0x9c] sm:$0xf] }
  0xe5   : > { %3489 = vmatmul.mubr.bf16.gmra.mrb[40].mxu1 %v5514_v36  ;;  %v1290_v42 = vor.u32 %v1289_v45, %v1286_v25  ;;  %v1299_v33 = vrot.slane %v1297_v50, 4  ;;  %v1305_v2 = vrot.slane %v1303_v34, 5  ;;  %v2247_v26 = vshrl.u32 %v7876_v6, 16 }
  0xe6   : > { %v2245_v18 = vsel %vm7258_vm14, %v2240_v58, %v2244_v62  ;;  %v2250_v46 = vshll.u32 %v7876_v6, 16  ;;  %v2256_v15 = vshll.u32 %v7890_v47, 16  ;;  %v2260_v54 = vshrl.u32 %v7890_v47, 16  ;;  %v1104_v62 = vld [vmem:[#allocation2 + $0x68] sm:$0x1] }
  0xe7   : > { %v5598_v3 = vcombine.low %v2235_v5, %v2245_v18  ;;  %v1291_v36 = vrot.slane %v1290_v42, 4  ;;  %v1300_v59 = vor.u32 %v1299_v33, %v1295_v1  ;;  %v2249_v31 = vrot.slane %v2247_v26, 4  ;;  %v7921_v26 = vld [vmem:[#allocation2 + $0x6c] sm:$0xf] }
  0xe8   : > { %v2252_v51 = vrot.slane %v2250_v46, 5  ;;  %v2258_v40 = vrot.slane %v2256_v15, 5  ;;  %v2262_v28 = vrot.slane %v2260_v54, 4  ;;  %v2266_v55 = vshll.u32 %v6898_v44, 16  ;;  %v7923_v15 = vld [vmem:[#allocation2 + $0xa0] sm:$0xf] }
  0xe9   : > { %v1296_v57 = vsel %vm7258_vm14, %v1291_v36, %v1295_v1  ;;  %v1301_v43 = vrot.slane %v1300_v59, 4  ;;  %v5583_v13 = vcombine.low %v7876_v6, %v7890_v47  ;;  %v1308_v48 = vshrl.u32 %v7894_v17, 16  ;;  %v6900_v59 = vld [vmem:[#allocation2 + $0xa4] sm:$0x1] }
  0xea   : > { %v2253_v23 = vor.u32 %v2252_v51, %v2249_v31  ;;  %v2263_v24 = vor.u32 %v2262_v28, %v2258_v40  ;;  %v2268_v56 = vrot.slane %v2266_v55, 5  ;;  %v1311_v16 = vshll.u32 %v7894_v17, 16  ;;  %v7929_v51 = vld [vmem:[#allocation2 + $0x70] sm:$0xf]  ;;  %v1105_v55 = vld [vmem:[#allocation2 + $0x74] sm:$0x1] }
  0xeb   : > { %3047 = vmatmul.mubr.bf16.gmra.mrb[36].mxu0 %v5581_v7  ;;  %v1306_v52 = vsel %vm7258_vm14, %v1301_v43, %v1305_v2  ;;  %v1310_v4 = vrot.slane %v1308_v48, 4  ;;  %v1317_v14 = vshll.u32 %v7896_v27, 16  ;;  %v1321_v9 = vshrl.u32 %v7896_v27, 16 }
  0xec   : > { %3054 = vmatprep.mubr.bf16.mxu0 %v5598_v3  ;;  %v5531_v11 = vcombine.low %v1296_v57, %v1306_v52  ;;  %v2254_v32 = vrot.slane %v2253_v23, 4  ;;  %v2264_v37 = vrot.slane %v2263_v24, 4  ;;  %v1313_v25 = vrot.slane %v1311_v16, 5  ;;  %v7940_v24 = vld [vmem:[#allocation2 + $0xa8] sm:$0xf] }
  0xed   : > { %v1319_v45 = vrot.slane %v1317_v14, 5  ;;  %v1323_v50 = vrot.slane %v1321_v9, 4  ;;  %v1327_v34 = vshll.u32 %v1104_v62, 16  ;;  %v5516_v53 = vcombine.low %v7894_v17, %v7896_v27 }
  0xee   : > { %3496 = vmatprep.mubr.bf16.mxu1 %v5531_v11  ;;  %v2259_v41 = vsel %vm7258_vm14, %v2254_v32, %v2258_v40  ;;  %v2269_v7 = vsel %vm7258_vm14, %v2264_v37, %v2268_v56  ;;  %v1314_v5 = vor.u32 %v1313_v25, %v1310_v4  ;;  %v2271_v58 = vshrl.u32 %v7911_v19, 16 }
  0xef   : > { %3497 = vmatmul.mubr.bf16.gmra.mrb[44].mxu1 %v5515_v0  ;;  %v5599_v1 = vcombine.low %v2259_v41, %v2269_v7  ;;  %v1324_v42 = vor.u32 %v1323_v50, %v1319_v45  ;;  %v1329_v33 = vrot.slane %v1327_v34, 5  ;;  %v2274_v2 = vshll.u32 %v7911_v19, 16 }
  0xf0   : > { %v1315_v18 = vrot.slane %v1314_v5, 4  ;;  %v2273_v46 = vrot.slane %v2271_v58, 4  ;;  %v2280_v54 = vshll.u32 %v7923_v15, 16  ;;  %v2284_v17 = vshrl.u32 %v7923_v15, 16  ;;  %v7952_v5 = vld [vmem:[#allocation2 + $0xac] sm:$0xf] }
  0xf1   : > { %v1325_v3 = vrot.slane %v1324_v42, 4  ;;  %v2276_v36 = vrot.slane %v2274_v2, 5  ;;  %v2290_v31 = vshll.u32 %v6900_v59, 16  ;;  %v5584_v0 = vcombine.low %v7911_v19, %v7923_v15 }
  0xf2   : > { %v1320_v40 = vsel %vm7258_vm14, %v1315_v18, %v1319_v45  ;;  %v2282_v28 = vrot.slane %v2280_v54, 5  ;;  %v2286_v44 = vrot.slane %v2284_v17, 4  ;;  %v1332_v27 = vshrl.u32 %v7921_v26, 16  ;;  %v6902_v54 = vld [vmem:[#allocation2 + $0xb0] sm:$0x1] }
  0xf3   : > { %3055 = vmatmul.mubr.bf16.gmra.mrb[40].mxu0 %v5582_v10  ;;  %v1330_v57 = vsel %vm7258_vm14, %v1325_v3, %v1329_v33  ;;  %v2277_v43 = vor.u32 %v2276_v36, %v2273_v46  ;;  %v2292_v48 = vrot.slane %v2290_v31, 5  ;;  %v1335_v23 = vshll.u32 %v7921_v26, 16 }
  0xf4   : > { %3062 = vmatprep.mubr.bf16.mxu0 %v5599_v1  ;;  %v5532_v56 = vcombine.low %v1320_v40, %v1330_v57  ;;  %v2287_v62 = vor.u32 %v2286_v44, %v2282_v28  ;;  %v1334_v16 = vrot.slane %v1332_v27, 4  ;;  %v1341_v52 = vshll.u32 %v7929_v51, 16  ;;  %v7955_v1 = vld [vmem:[#allocation2 + $0x78] sm:$0xf]  ;;  %v1106_v44 = vld [vmem:[#allocation2 + $0x80] sm:$0x1] }
  0xf5   : > { %v2278_v4 = vrot.slane %v2277_v43, 4  ;;  %v1337_v14 = vrot.slane %v1335_v23, 5  ;;  %v1345_v22 = vshrl.u32 %v7929_v51, 16  ;;  %v1351_v49 = vshll.u32 %v1105_v55, 16  ;;  %v7973_v43 = vld [vmem:[#allocation2 + $0xb4] sm:$0xf] }
  0xf6   : > { %3504 = vmatprep.mubr.bf16.mxu1 %v5532_v56  ;;  %v2288_v10 = vrot.slane %v2287_v62, 4  ;;  %v1343_v9 = vrot.slane %v1341_v52, 5  ;;  %v5517_v11 = vcombine.low %v7921_v26, %v7929_v51  ;;  %v2295_v32 = vshrl.u32 %v7940_v24, 16  ;;  %v7958_v26 = vld [vmem:[#allocation2 + $0x7c] sm:$0xf] }
  0xf7   : > { %3505 = vmatmul.mubr.bf16.gmra.mrb[48].mxu1 %v5516_v53  ;;  %v2283_v37 = vsel %vm7258_vm14, %v2278_v4, %v2282_v28  ;;  %v1338_v25 = vor.u32 %v1337_v14, %v1334_v16  ;;  %v1347_v45 = vrot.slane %v1345_v22, 4  ;;  %v1353_v50 = vrot.slane %v1351_v49, 5 }
  0xf8   : > { %v2293_v34 = vsel %vm7258_vm14, %v2288_v10, %v2292_v48  ;;  %v2297_v41 = vrot.slane %v2295_v32, 4  ;;  %v2298_v7 = vshll.u32 %v7940_v24, 16  ;;  %v2304_v58 = vshll.u32 %v7952_v5, 16 }
  0xf9   : > { %v5600_v42 = vcombine.low %v2283_v37, %v2293_v34  ;;  %v1339_v53 = vrot.slane %v1338_v25, 4  ;;  %v1348_v33 = vor.u32 %v1347_v45, %v1343_v9  ;;  %v2308_v2 = vshrl.u32 %v7952_v5, 16  ;;  %v7983_v45 = vld [vmem:[#allocation2 + $0xb8] sm:$0xf]  ;;  %v7986_v34 = vld [vmem:[#allocation2 + $0x84] sm:$0xf] }
  0xfa   : > { %v2300_v18 = vrot.slane %v2298_v7, 5  ;;  %v2306_v46 = vrot.slane %v2304_v58, 5  ;;  %v2314_v17 = vshll.u32 %v6902_v54, 16  ;;  %v5585_v3 = vcombine.low %v7940_v24, %v7952_v5 }
  0xfb   : > { %3063 = vmatmul.mubr.bf16.gmra.mrb[44].mxu0 %v5583_v13  ;;  %v1344_v36 = vsel %vm7258_vm14, %v1339_v53, %v1343_v9  ;;  %v1349_v59 = vrot.slane %v1348_v33, 4  ;;  %v2310_v31 = vrot.slane %v2308_v2, 4  ;;  %v1356_v51 = vshrl.u32 %v7955_v1, 16  ;;  %v6904_v33 = vld [vmem:[#allocation2 + $0xbc] sm:$0x1] }
  0xfc   : > { %3070 = vmatprep.mubr.bf16.mxu0 %v5600_v42  ;;  %v2301_v40 = vor.u32 %v2300_v18, %v2297_v41  ;;  %v2316_v28 = vrot.slane %v2314_v17, 5  ;;  %v1359_v55 = vshll.u32 %v7955_v1, 16  ;;  %v1365_v27 = vshll.u32 %v7958_v26, 16  ;;  %v7998_v17 = vld [vmem:[#allocation2 + $0x8c] sm:$0x1] }
  0xfd   : > { %v1354_v57 = vsel %vm7258_vm14, %v1349_v59, %v1353_v50  ;;  %v2311_v6 = vor.u32 %v2310_v31, %v2306_v46  ;;  %v1358_v47 = vrot.slane %v1356_v51, 4  ;;  %v1369_v13 = vshrl.u32 %v7958_v26, 16  ;;  %v8004_v31 = vld [vmem:[#allocation2 + $0xc0] sm:$0xf] }
  0xfe   : > { %v5533_v48 = vcombine.low %v1344_v36, %v1354_v57  ;;  %v2302_v23 = vrot.slane %v2301_v40, 4  ;;  %v1361_v56 = vrot.slane %v1359_v55, 5  ;;  %v1367_v62 = vrot.slane %v1365_v27, 5 }
  0xff   : > { %v2312_v16 = vrot.slane %v2311_v6, 4  ;;  %v1371_v52 = vrot.slane %v1369_v13, 4  ;;  %v1375_v4 = vshll.u32 %v1106_v44, 16  ;;  %v5518_v14 = vcombine.low %v7955_v1, %v7958_v26  ;;  %v7992_v26 = vld [vmem:[#allocation2 + $0x88] sm:$0xf] }
 0x100   : > { %3512 = vmatprep.mubr.bf16.mxu1 %v5533_v48  ;;  %v2307_v22 = vsel %vm7258_vm14, %v2302_v23, %v2306_v46  ;;  %v1362_v49 = vor.u32 %v1361_v56, %v1358_v47  ;;  %v2319_v10 = vshrl.u32 %v7973_v43, 16  ;;  %v2322_v9 = vshll.u32 %v7973_v43, 16 }
 0x101   : > { %3513 = vmatmul.mubr.bf16.gmra.mrb[52].mxu1 %v5517_v11  ;;  %v2317_v32 = vsel %vm7258_vm14, %v2312_v16, %v2316_v28  ;;  %v1372_v37 = vor.u32 %v1371_v52, %v1367_v62  ;;  %v1377_v25 = vrot.slane %v1375_v4, 5  ;;  %v2328_v50 = vshll.u32 %v7983_v45, 16 }
 0x102   : > { %v5601_v41 = vcombine.low %v2307_v22, %v2317_v32  ;;  %v1363_v7 = vrot.slane %v1362_v49, 4  ;;  %v2321_v58 = vrot.slane %v2319_v10, 4  ;;  %v2324_v1 = vrot.slane %v2322_v9, 5  ;;  %v8015_v49 = vld [vmem:[#allocation2 + $0xc4] sm:$0xf] }
 0x103   : > { %3071 = vmatmul.mubr.bf16.gmra.mrb[48].mxu0 %v5584_v0  ;;  %v1373_v11 = vrot.slane %v1372_v37, 4  ;;  %v2330_v42 = vrot.slane %v2328_v50, 5  ;;  %v2332_v53 = vshrl.u32 %v7983_v45, 16  ;;  %v2338_v2 = vshll.u32 %v6904_v33, 16 }
 0x104   : > { %3078 = vmatprep.mubr.bf16.mxu0 %v5601_v41  ;;  %v1368_v18 = vsel %vm7258_vm14, %v1363_v7, %v1367_v62  ;;  %v2325_v46 = vor.u32 %v2324_v1, %v2321_v58  ;;  %v5586_v54 = vcombine.low %v7973_v43, %v7983_v45  ;;  %v1380_v19 = vshrl.u32 %v7986_v34, 16  ;;  %v8026_v41 = vld [vmem:[#allocation2 + $0x94] sm:$0xf] }
 0x105   : > { %v1378_v15 = vsel %vm7258_vm14, %v1373_v11, %v1377_v25  ;;  %v2334_v0 = vrot.slane %v2332_v53, 4  ;;  %v2340_v36 = vrot.slane %v2338_v2, 5  ;;  %v1383_v59 = vshll.u32 %v7986_v34, 16  ;;  %v6906_v25 = vld [vmem:[#allocation2 + $0xc8] sm:$0x1] }
 0x106   : > { %v5534_v51 = vcombine.low %v1368_v18, %v1378_v15  ;;  %v2326_v40 = vrot.slane %v2325_v46, 4  ;;  %v1382_v28 = vrot.slane %v1380_v19, 4  ;;  %v1389_v44 = vshll.u32 %v7992_v26, 16 }
 0x107   : > { %v2335_v55 = vor.u32 %v2334_v0, %v2330_v42  ;;  %v1385_v27 = vrot.slane %v1383_v59, 5  ;;  %v1393_v57 = vshrl.u32 %v7992_v26, 16  ;;  %v1399_v6 = vshll.u32 %v7998_v17, 16  ;;  %v2366_v59 = vld [vmem:[#allocation2 + $0xc] sm:$0xe] }
 0x108   : > { %3520 = vmatprep.mubr.bf16.mxu1 %v5534_v51  ;;  %v2331_v47 = vsel %vm7258_vm14, %v2326_v40, %v2330_v42  ;;  %v1391_v13 = vrot.slane %v1389_v44, 5  ;;  %v5519_v48 = vcombine.low %v7986_v34, %v7992_v26  ;;  %v2343_v23 = vshrl.u32 %v8004_v31, 16  ;;  %v8024_v34 = vld [vmem:[#allocation2 + $0x90] sm:$0xf]  ;;  %v8028_v42 = vld [vmem:[#allocation2 + $0x98] sm:$0x1] }
 0x109   : > { %3521 = vmatmul.mubr.bf16.gmra.mrb[56].mxu1 %v5518_v14  ;;  %v2336_v56 = vrot.slane %v2335_v55, 4  ;;  %v1386_v62 = vor.u32 %v1385_v27, %v1382_v28  ;;  %v1395_v16 = vrot.slane %v1393_v57, 4  ;;  %v1401_v52 = vrot.slane %v1399_v6, 5  ;;  %v8041_v55 = vld [vmem:[#allocation2 + $0x9c] sm:$0xf] }
 0x10a   : > { %v2345_v4 = vrot.slane %v2343_v23, 4  ;;  %v2346_v22 = vshll.u32 %v8004_v31, 16  ;;  %v2352_v10 = vshll.u32 %v8015_v49, 16  ;;  %v2356_v9 = vshrl.u32 %v8015_v49, 16 }
 0x10b   : > { %3079 = vmatmul.mubr.bf16.gmra.mrb[52].mxu0 %v5585_v3  ;;  %v2341_v14 = vsel %vm7258_vm14, %v2336_v56, %v2340_v36  ;;  %v1387_v32 = vrot.slane %v1386_v62, 4  ;;  %v1396_v37 = vor.u32 %v1395_v16, %v1391_v13  ;;  %v2362_v50 = vshll.u32 %v6906_v25, 16  ;;  %v8052_v25 = vld [vmem:[#allocation2 + $0xa0] sm:$0xf] }
 0x10c   : > { %v5602_v7 = vcombine.low %v2331_v47, %v2341_v14  ;;  %v2348_v58 = vrot.slane %v2346_v22, 5  ;;  %v2354_v1 = vrot.slane %v2352_v10, 5  ;;  %v2358_v11 = vrot.slane %v2356_v9, 4  ;;  %v6907_v10 = vld [vmem:[#allocation2 + $0x10] sm:$0xf] }
 0x10d   : > { %v1392_v24 = vsel %vm7258_vm14, %v1387_v32, %v1391_v13  ;;  %v1397_v5 = vrot.slane %v1396_v37, 4  ;;  %v2364_v3 = vrot.slane %v2362_v50, 5  ;;  %v5587_v53 = vcombine.low %v8004_v31, %v8015_v49  ;;  %v2367_v13 = vld [vmem:[#allocation2 + $0x18] sm:$0xe]  ;;  %v6908_v32 = vld [vmem:[#allocation2 + $0x1c] sm:$0xf] }
 0x10e   : > { %3086 = vmatprep.mubr.bf16.mxu0 %v5602_v7  ;;  %v2349_v33 = vor.u32 %v2348_v58, %v2345_v4  ;;  %v2359_v2 = vor.u32 %v2358_v11, %v2354_v1  ;;  %v1404_v18 = vshrl.u32 %v8024_v34, 16  ;;  %v1407_v46 = vshll.u32 %v8024_v34, 16 }
 0x10f   : > { %v1402_v19 = vsel %vm7258_vm14, %v1397_v5, %v1401_v52  ;;  %v1413_v15 = vshll.u32 %v8026_v41, 16  ;;  %v1417_v0 = vshrl.u32 %v8026_v41, 16  ;;  %v1423_v36 = vshll.u32 %v8028_v42, 16 }
 0x110   : > { %v5535_v51 = vcombine.low %v1392_v24, %v1402_v19  ;;  %v2350_v40 = vrot.slane %v2349_v33, 4  ;;  %v2360_v28 = vrot.slane %v2359_v2, 4  ;;  %v1406_v44 = vrot.slane %v1404_v18, 4  ;;  %v2368_v18 = vld [vmem:[#allocation2 + $0x24] sm:$0xe] }
 0x111   : > { %v1409_v27 = vrot.slane %v1407_v46, 5  ;;  %v1415_v57 = vrot.slane %v1413_v15, 5  ;;  %v1419_v6 = vrot.slane %v1417_v0, 4  ;;  %v1425_v47 = vrot.slane %v1423_v36, 5  ;;  %v2369_v36 = vld [vmem:[#allocation2 + $0x30] sm:$0xe] }
 0x112   : > { %3528 = vmatprep.mubr.bf16.mxu1 %v5535_v51  ;;  %v2355_v23 = vsel %vm7258_vm14, %v2350_v40, %v2354_v1  ;;  %v2365_v56 = vsel %vm7258_vm14, %v2360_v28, %v2364_v3  ;;  %v5520_v62 = vcombine.low %v8024_v34, %v8026_v41  ;;  %v5556_v16 = vrot.slane %v2366_v59, 9  ;;  %v8062_v1 = vld [vmem:[#allocation2 + $0xa4] sm:$0x1] }
 0x113   : > { %3087 = vmatmul.mubr.bf16.gmra.mrb[56].mxu0 %v5586_v54  ;;  %3529 = vmatmul.mubr.bf16.gmra.mrb[60].mxu1 %v5519_v48  ;;  %v5603_v52 = vcombine.low %v2355_v23, %v2365_v56  ;;  %v1410_v4 = vor.u32 %v1409_v27, %v1406_v44  ;;  %v1420_v22 = vor.u32 %v1419_v6, %v1415_v57  ;;  %v2432_v9 = vrot.slane %v6907_v10, 5  ;;  %v6909_v27 = vld [vmem:[#allocation2 + $0x28] sm:$0xf]  ;;  %v8087_v56 = vld [vmem:[#allocation2 + $0xac] sm:$0xf] }
 0x114   : > { %v5557_v14 = vrot.slane %v2367_v13, 9  ;;  %v2439_v37 = vrot.slane %v6908_v32, 5  ;;  %v1428_v50 = vshrl.u32 %v8041_v55, 16  ;;  %v1431_v34 = vshll.u32 %v8041_v55, 16  ;;  %v8095_v10 = vld [vmem:[#allocation2 + $0xb0] sm:$0x1] }
 0x115   : > { %3094 = vmatprep.mubr.bf16.mxu0 %v5603_v52  ;;  %v1411_v7 = vrot.slane %v1410_v4, 4  ;;  %v1421_v58 = vrot.slane %v1420_v22, 4  ;;  %v2433_v43 = vsel %vm7186_vm11, %v5556_v16, %v2432_v9  ;;  %v2434_v45 = vrot.slane %v2432_v9, 4  ;;  %v6911_v22 = vld [vmem:[#allocation2 + $0x34] sm:$0xf] }
 0x116   : > { %v8060_v54 = vsel %vm7186_vm11, %v5557_v14, %v2439_v37  ;;  %v2441_v48 = vrot.slane %v2439_v37, 4  ;;  %v1430_v11 = vrot.slane %v1428_v50, 4  ;;  %v1433_v24 = vrot.slane %v1431_v34, 5 }
 0x117   : > { %v1416_v5 = vsel %vm7258_vm14, %v1411_v7, %v1415_v57  ;;  %v1426_v3 = vsel %vm7258_vm14, %v1421_v58, %v1425_v47  ;;  %v2436_v33 = vsel %vm7186_vm11, %v2434_v45, %v2435_v60  ;;  %v1437_v2 = vshll.u32 %v8052_v25, 16  ;;  %v8082_v57 = vld [vmem:[#allocation2 + $0xa8] sm:$0xf]  ;;  %v6910_v47 = vld [vmem:[#allocation2 + $0x2c] sm:$0x1] }
 0x118   : > { %v5536_v46 = vcombine.low %v1416_v5, %v1426_v3  ;;  %v5604_v19 = vcombine.low %v2433_v43, %v2436_v33  ;;  %v2443_v15 = vsel %vm7186_vm11, %v2441_v48, %v2442_v39  ;;  %v1434_v0 = vor.u32 %v1433_v24, %v1430_v11  ;;  %v6843_v48 = vld [vmem:[%s9093_s3 + $0x180] sm:$0xff]   ;;  %v2371_v33 = vld [vmem:[#allocation2 + $0x48] sm:$0xe] }
 0x119   : > { %v5605_v59 = vcombine.low %v8060_v54, %v2443_v15  ;;  %v1439_v51 = vrot.slane %v1437_v2, 5  ;;  %v1441_v63 = vshrl.u32 %v8052_v25, 16  ;;  %v1447_v40 = vshll.u32 %v8062_v1, 16  ;;  %v2370_v54 = vld [vmem:[#allocation2 + $0x3c] sm:$0xe] }
 0x11a   : > { %3536 = vmatprep.mubr.bf16.mxu1 %v5536_v46  ;;  %v1435_v60 = vrot.slane %v1434_v0, 4  ;;  %v5521_v28 = vcombine.low %v8041_v55, %v8052_v25  ;;  %v5558_v44 = vrot.slane %v2368_v18, 9  ;;  %v2446_v29 = vrot.slane %v6909_v27, 5  ;;  %v6844_v18 = vld [vmem:[%s9093_s3 + $0x1c8] sm:$0xff]   ;;  %v8125_v0 = vld [vmem:[#allocation2 + $0xb4] sm:$0xf] }
 0x11b   : > { %3095 = vmatmul.mubr.bf16.gmra.mrb[60].mxu0 %v5587_v53  ;;  %3537 = vmatmul.mubr.bf16.gmra.mrb[64].mxu1 %v5520_v62  ;;  %v1443_v39 = vrot.slane %v1441_v63, 4  ;;  %v1449_v6 = vrot.slane %v1447_v40, 5  ;;  %v2449_v13 = vrot.slane %v6910_v47, 5  ;;  %v5559_v23 = vrot.slane %v2369_v36, 9  ;;  %v6912_v53 = vld [vmem:[#allocation2 + $0x38] sm:$0x1] }
 0x11c   : > { %6454 = vmatprep.mubr.bf16.mxu0 %v5604_v19  ;;  %v1440_v16 = vsel %vm7258_vm14, %v1435_v60, %v1439_v51  ;;  %v8093_v52 = vsel %vm7186_vm11, %v5558_v44, %v2446_v29  ;;  %v2448_v4 = vrot.slane %v2446_v29, 4  ;;  %v2453_v31 = vrot.slane %v6911_v22, 5  ;;  %v6846_v44 = vld [vmem:[%s9093_s3 + $0x188] sm:$0xff]   ;;  %v6913_v29 = vld [vmem:[#allocation2 + $0x40] sm:$0xf] }
 0x11d   : > { %v1444_v49 = vor.u32 %v1443_v39, %v1439_v51  ;;  %v2456_v62 = vrot.slane %v6912_v53, 5  ;;  %v1452_v9 = vshrl.u32 %v8082_v57, 16  ;;  %v1455_v14 = vshll.u32 %v8082_v57, 16  ;;  %v6916_v22 = vld [vmem:[#allocation2 + $0x50] sm:$0x1] }
 0x11e   : > { %v2450_v32 = vsel %vm7186_vm11, %v2448_v4, %v2449_v13  ;;  %v8103_v37 = vsel %vm7186_vm11, %v5559_v23, %v2453_v31  ;;  %v2455_v50 = vrot.slane %v2453_v31, 4  ;;  %v1461_v34 = vshll.u32 %v8087_v56, 16 }
 0x11f   : > { %v1445_v7 = vrot.slane %v1444_v49, 4  ;;  %v5606_v58 = vcombine.low %v8093_v52, %v2450_v32  ;;  %v1454_v43 = vrot.slane %v1452_v9, 4  ;;  %v1457_v45 = vrot.slane %v1455_v14, 5  ;;  %v6915_v52 = vld [vmem:[#allocation2 + $0x4c] sm:$0xf] }
 0x120   : > { %v8112_v11 = vsel %vm7186_vm11, %v2455_v50, %v2456_v62  ;;  %v1463_v24 = vrot.slane %v1461_v34, 5  ;;  %v1465_v5 = vshrl.u32 %v8087_v56, 16  ;;  %v1471_v3 = vshll.u32 %v8095_v10, 16  ;;  %v8127_v60 = vpop.f32.mrb[0].mxu0  ;;  %v6847_v62 = vld [vmem:[%s9093_s3 + $0x1d0] sm:$0xff]  }
 0x121   : > { %v1450_v2 = vsel %vm7258_vm14, %v1445_v7, %v1449_v6  ;;  %v5607_v46 = vcombine.low %v8103_v37, %v8112_v11  ;;  %v1458_v19 = vor.u32 %v1457_v45, %v1454_v43  ;;  %v5522_v15 = vcombine.low %v8082_v57, %v8087_v56  ;;  %v6914_v6 = vld [vmem:[#allocation2 + $0x44] sm:$0x1]  ;;  %v8132_v23 = vpop.f32.mrb[1].mxu0  ;;  %v8149_v50 = vld [vmem:[#allocation2 + $0xbc] sm:$0x1] }
 0x122   : > { %v5537_v36 = vcombine.low %v1440_v16, %v1450_v2  ;;  %v1467_v51 = vrot.slane %v1465_v5, 4  ;;  %v1473_v63 = vrot.slane %v1471_v3, 5  ;;  %v5560_v40 = vrot.slane %v2370_v54, 9  ;;  %v8137_v53 = vpop.f32.mrb[2].mxu0  ;;  %v2372_v3 = vld [vmem:[#allocation2 + $0x54] sm:$0xe] }
 0x123   : > { %6455 = vmatmul.mubr.bf16.vlgmr.msra.gmra.mrb[64].mxu0 %v5605_v59  ;;  %v1459_v27 = vrot.slane %v1458_v19, 4  ;;  %v2460_v39 = vrot.slane %v6913_v29, 5  ;;  %v2463_v47 = vrot.slane %v6914_v6, 5  ;;  %v5561_v13 = vrot.slane %v2371_v33, 9  ;;  %v8134_v59 = vld [vmem:[#allocation2 + $0xb8] sm:$0xf] }
 0x124   : > { %6303 = vmatpush3.bf16.msra.mxu0 %v6843_v48  ;;  %3544 = vmatprep.mubr.bf16.mxu1 %v5537_v36  ;;  %v1468_v16 = vor.u32 %v1467_v51, %v1463_v24  ;;  %v2467_v4 = vrot.slane %v6915_v52, 5  ;;  %v2470_v31 = vrot.slane %v6916_v22, 5  ;;  %v1476_v49 = vshrl.u32 %v8125_v0, 16  ;;  %v8152_v7 = vpop.f32.mrb[3].mxu0  ;;  %v2373_v36 = vld [vmem:[#allocation2 + $0x60] sm:$0xe] }
 0x125   : > { %6304 = vmatprep.subr.bf16.mxu0 %v6844_v18  ;;  %3545 = vmatmul.mubr.bf16.gmra.mrb[68].mxu1 %v5521_v28  ;;  %v1464_v9 = vsel %vm7258_vm14, %v1459_v27, %v1463_v24  ;;  %v2461_v14 = vsel %vm7186_vm11, %v5560_v40, %v2460_v39  ;;  %v2462_v32 = vrot.slane %v2460_v39, 4  ;;  %v1479_v34 = vshll.u32 %v8125_v0, 16  ;;  %v6849_v40 = vld [vmem:[%s9093_s3 + $0x1d8] sm:$0xff]   ;;  %v1500_v11 = vld [vmem:[#allocation2 + $0xc] sm:$0xe] }
 0x126   : > { %6458 = vmatprep.mubr.bf16.mxu0 %v5606_v58  ;;  %v1469_v55 = vrot.slane %v1468_v16, 4  ;;  %v8156_v28 = vsel %vm7186_vm11, %v5561_v13, %v2467_v4  ;;  %v2469_v43 = vrot.slane %v2467_v4, 4  ;;  %v1478_v45 = vrot.slane %v1476_v49, 4  ;;  %v6848_v58 = vld [vmem:[%s9093_s3 + $0x190] sm:$0xff]   ;;  %v6917_v52 = vld [vmem:[#allocation2 + $0x58] sm:$0xf] }
 0x127   : > { %v2464_v54 = vsel %vm7186_vm11, %v2462_v32, %v2463_v47  ;;  %v1481_v48 = vrot.slane %v1479_v34, 5  ;;  %v1485_v24 = vshll.u32 %v8134_v59, 16  ;;  %v1489_v5 = vshrl.u32 %v8134_v59, 16  ;;  %v6918_v22 = vld [vmem:[#allocation2 + $0x5c] sm:$0x1] }
 0x128   : > { %6305 = vmatpush3.bf16.msra.mxu0 %v6846_v44  ;;  %v1474_v33 = vsel %vm7258_vm14, %v1469_v55, %v1473_v63  ;;  %v5608_v2 = vcombine.low %v2461_v14, %v2464_v54  ;;  %v8169_v18 = vsel %vm7186_vm11, %v2469_v43, %v2470_v31  ;;  %v1495_v19 = vshll.u32 %v8149_v50, 16  ;;  %v1499_v63 = vld [vmem:[#allocation2] sm:$0xe] }
 0x129   : > { %6306 = vmatprep.subr.bf16.mxu0 %v6847_v62  ;;  %v5538_v51 = vcombine.low %v1464_v9, %v1474_v33  ;;  %v5609_v44 = vcombine.low %v8156_v28, %v8169_v18  ;;  %v1482_v27 = vor.u32 %v1481_v48, %v1478_v45  ;;  %v1487_v29 = vrot.slane %v1485_v24, 5  ;;  %v6851_v62 = vld [vmem:[%s9093_s3 + $0x198] sm:$0xff]   ;;  %v6919_v28 = vld [vmem:[#allocation2 + $0x4] sm:$0xf] }
 0x12a   : > { %v1491_v39 = vrot.slane %v1489_v5, 4  ;;  %v1497_v6 = vrot.slane %v1495_v19, 5  ;;  %v5523_v47 = vcombine.low %v8125_v0, %v8134_v59  ;;  %v5562_v13 = vrot.slane %v2372_v3, 9  ;;  %v8201_v48 = vld [vmem:[#allocation2 + $0x18] sm:$0xf]  ;;  %v6854_v33 = vld [vmem:[%s9093_s3 + $0x1a0] sm:$0xff]  }
 0x12b   : > { %6459 = vmatmul.mubr.bf16.gmra.mrb[68].mxu0 %v5607_v46  ;;  %3552 = vmatprep.mubr.bf16.mxu1 %v5538_v51  ;;  %v1483_v16 = vrot.slane %v1482_v27, 4  ;;  %v2474_v4 = vrot.slane %v6917_v52, 5  ;;  %v2477_v31 = vrot.slane %v6918_v22, 5  ;;  %v5563_v49 = vrot.slane %v2373_v36, 9  ;;  %v6853_v46 = vld [vmem:[%s9093_s3 + $0x1e0] sm:$0xff]  }
 0x12c   : > { %6307 = vmatpush3.bf16.msra.mxu0 %v6848_v58  ;;  %6462 = vmatprep.mubr.bf16.mxu0 %v5608_v2  ;;  %v1492_v9 = vor.u32 %v1491_v39, %v1487_v29  ;;  %v2481_v14 = vrot.slane %v7807_v21, 5  ;;  %v2484_v32 = vrot.slane %v7809_v20, 5  ;;  %v5492_v37 = vrot.slane %v1499_v63, 9  ;;  %v6921_v36 = vld [vmem:[#allocation2 + $0x10] sm:$0xf]  ;;  %v6855_v63 = vld [vmem:[%s9093_s3 + $0x1e8] sm:$0xff]  }
 0x12d   : > { %6308 = vmatprep.subr.bf16.mxu0 %v6849_v40  ;;  %3553 = vmatmul.mubr.bf16.gmra.mrb[72].mxu1 %v5522_v15  ;;  %v1488_v34 = vsel %vm7258_vm14, %v1483_v16, %v1487_v29  ;;  %v2475_v55 = vsel %vm7186_vm11, %v5562_v13, %v2474_v4  ;;  %v2476_v21 = vrot.slane %v2474_v4, 4  ;;  %v1568_v20 = vrot.slane %v6919_v28, 5  ;;  %v6920_v15 = vld [vmem:[#allocation2 + $0x8] sm:$0x1]  ;;  %v8216_v40 = vld [vmem:[#allocation2 + $0x1c] sm:$0xf] }
 0x12e   : > { %v1493_v43 = vrot.slane %v1492_v9, 4  ;;  %v8199_v45 = vsel %vm7186_vm11, %v5563_v49, %v2481_v14  ;;  %v2483_v57 = vrot.slane %v2481_v14, 4  ;;  %v1571_v54 = vrot.slane %v6920_v15, 5  ;;  %v8218_v27 = vld [vmem:[#allocation2 + $0x20] sm:$0x1] }
 0x12f   : > { %v2478_v24 = vsel %vm7186_vm11, %v2476_v21, %v2477_v31  ;;  %v1569_v5 = vsel %vm7186_vm11, %v5492_v37, %v1568_v20  ;;  %v1570_v3 = vrot.slane %v1568_v20, 4  ;;  %v5493_v58 = vrot.slane %v1500_v11, 9  ;;  %v1501_v16 = vld [vmem:[#allocation2 + $0x18] sm:$0xe]  ;;  %v6857_v37 = vld [vmem:[%s9093_s3 + $0x1a8] sm:$0xff]   ;;  %v6858_v21 = vld [vmem:[%s9093_s3 + $0x1f0] sm:$0xff]  }
 0x130   : > { %6309 = vmatpush3.bf16.msra.mxu0 %v6851_v62  ;;  %v1498_v2 = vsel %vm7258_vm14, %v1493_v43, %v1497_v6  ;;  %v5610_v18 = vcombine.low %v2475_v55, %v2478_v24  ;;  %v8214_v19 = vsel %vm7186_vm11, %v2483_v57, %v2484_v32  ;;  %v1575_v51 = vrot.slane %v6921_v36, 5  ;;  %v1502_v32 = vld [vmem:[#allocation2 + $0x24] sm:$0xe]  ;;  %v6923_v15 = vld [vmem:[#allocation2 + $0x20] sm:$0x1] }
 0x131   : > { %6310 = vmatprep.subr.bf16.mxu0 %v6853_v46  ;;  %v5539_v29 = vcombine.low %v1488_v34, %v1498_v2  ;;  %v5611_v39 = vcombine.low %v8199_v45, %v8214_v19  ;;  %v1572_v6 = vsel %vm7186_vm11, %v1570_v3, %v1571_v54  ;;  %v3780_v13 = vshrl.u32 %v8201_v48, 16  ;;  %v8245_v55 = vld [vmem:[#allocation2 + $0x24] sm:$0xf]  ;;  %v6922_v45 = vld [vmem:[#allocation2 + $0x1c] sm:$0xf] }
 0x132   : > { %v5540_v52 = vcombine.low %v1569_v5, %v1572_v6  ;;  %v8230_v4 = vsel %vm7186_vm11, %v5493_v58, %v1575_v51  ;;  %v1577_v22 = vrot.slane %v1575_v51, 4  ;;  %v3783_v31 = vshll.u32 %v8201_v48, 16  ;;  %v6924_v3 = vld [vmem:[#allocation2 + $0x28] sm:$0xf] }
 0x133   : > { %6463 = vmatmul.mubr.bf16.gmra.mrb[72].mxu0 %v5609_v44  ;;  %3560 = vmatprep.mubr.bf16.mxu1 %v5539_v29  ;;  %v3782_v49 = vrot.slane %v3780_v13, 4  ;;  %v3789_v62 = vshll.u32 %v8216_v40, 16  ;;  %v3793_v9 = vshrl.u32 %v8216_v40, 16  ;;  %v3799_v14 = vshll.u32 %v8218_v27, 16 }
 0x134   : > { %6311 = vmatpush3.bf16.msra.mxu0 %v6854_v33  ;;  %6466 = vmatprep.mubr.bf16.mxu0 %v5610_v18  ;;  %v1579_v44 = vsel %vm7186_vm11, %v1577_v22, %v1578_v8  ;;  %v3785_v11 = vrot.slane %v3783_v31, 5  ;;  %v5684_v46 = vcombine.low %v8201_v48, %v8216_v40  ;;  %v5494_v34 = vrot.slane %v1501_v16, 9  ;;  %v8254_v33 = vld [vmem:[#allocation2 + $0x28] sm:$0xf]  ;;  %v6859_v18 = vld [vmem:[%s9093_s3 + $0x1b0] sm:$0xff]   ;;  %v6868_v48 = vld [vmem:[%s9093_s3 + $0x218] sm:$0xff]  }
 0x135   : > { %6312 = vmatprep.subr.bf16.mxu0 %v6855_v63  ;;  %3561 = vmatmul.mubr.bf16.gmra.mrb[76].mxu1 %v5523_v47  ;;  %v5541_v38 = vcombine.low %v8230_v4, %v1579_v44  ;;  %v3791_v28 = vrot.slane %v3789_v62, 5  ;;  %v3795_v8 = vrot.slane %v3793_v9, 4  ;;  %v3801_v20 = vrot.slane %v3799_v14, 5  ;;  %v6925_v47 = vld [vmem:[#allocation2 + $0x2c] sm:$0x1]  ;;  %v6860_v63 = vld [vmem:[%s9093_s3 + $0x1f8] sm:$0xff]  }
 0x136   : > { %6502 = vmatprep.mubr.bf16.mxu1 %v5540_v52  ;;  %v3786_v43 = vor.u32 %v3785_v11, %v3782_v49  ;;  %v1582_v57 = vrot.slane %v6922_v45, 5  ;;  %v1585_v54 = vrot.slane %v6923_v15, 5  ;;  %v5495_v24 = vrot.slane %v1502_v32, 9  ;;  %v8276_v49 = vld [vmem:[#allocation2 + $0x2c] sm:$0x1] }
 0x137   : > { %v3796_v5 = vor.u32 %v3795_v8, %v3791_v28  ;;  %v1589_v0 = vrot.slane %v6924_v3, 5  ;;  %v1592_v58 = vrot.slane %v6925_v47, 5  ;;  %v3804_v2 = vshrl.u32 %v8245_v55, 16 }
 0x138   : > { %6313 = vmatpush3.bf16.msra.mxu0 %v6857_v37  ;;  %v3787_v19 = vrot.slane %v3786_v43, 4  ;;  %v1583_v36 = vsel %vm7186_vm11, %v5494_v34, %v1582_v57  ;;  %v1584_v51 = vrot.slane %v1582_v57, 4  ;;  %v3807_v29 = vshll.u32 %v8245_v55, 16  ;;  %v6864_v34 = vld [vmem:[%s9093_s3 + $0x208] sm:$0xff]   ;;  %v1504_v57 = vld [vmem:[#allocation2 + $0x3c] sm:$0xe] }
 0x139   : > { %6314 = vmatprep.subr.bf16.mxu0 %v6858_v21  ;;  %v3797_v6 = vrot.slane %v3796_v5, 4  ;;  %v8268_v13 = vsel %vm7186_vm11, %v5495_v24, %v1589_v0  ;;  %v1591_v16 = vrot.slane %v1589_v0, 4  ;;  %v3806_v52 = vrot.slane %v3804_v2, 4  ;;  %v8270_v4 = vpop.f32.mrb[4].mxu0  ;;  %v1503_v21 = vld [vmem:[#allocation2 + $0x30] sm:$0xe] }
 0x13a   : > { %v3792_v22 = vsel %vm7258_vm14, %v3787_v19, %v3791_v28  ;;  %v1586_v31 = vsel %vm7186_vm11, %v1584_v51, %v1585_v54  ;;  %v3809_v62 = vrot.slane %v3807_v29, 5  ;;  %v3813_v9 = vshll.u32 %v8254_v33, 16  ;;  %v8279_v14 = vpop.f32.mrb[5].mxu0  ;;  %v6926_v0 = vld [vmem:[%s9093_s3 + $0x200] sm:$0xff]   ;;  %v6927_v2 = vld [vmem:[#allocation2 + $0x34] sm:$0xf] }
 0x13b   : > { %6467 = vmatmul.mubr.bf16.gmra.mrb[76].mxu0 %v5611_v39  ;;  %v3802_v32 = vsel %vm7258_vm14, %v3797_v6, %v3801_v20  ;;  %v5542_v37 = vcombine.low %v1583_v36, %v1586_v31  ;;  %v8285_v44 = vsel %vm7186_vm11, %v1591_v16, %v1592_v58  ;;  %v3817_v11 = vshrl.u32 %v8254_v33, 16  ;;  %v8291_v28 = vpop.f32.mrb[6].mxu0  ;;  %v6861_v39 = vld [vmem:[%s9093_s3 + $0x1b8] sm:$0xff]   ;;  %v8307_v36 = vld [vmem:[#allocation2 + $0x30] sm:$0xf] }
 0x13c   : > { %6315 = vmatpush3.bf16.msra.mxu0 %v6859_v18  ;;  %v5700_v8 = vcombine.low %v3792_v22, %v3802_v32  ;;  %v5543_v20 = vcombine.low %v8268_v13, %v8285_v44  ;;  %v3810_v43 = vor.u32 %v3809_v62, %v3806_v52  ;;  %v3815_v45 = vrot.slane %v3813_v9, 5  ;;  %v8298_v15 = vpop.f32.mrb[7].mxu0  ;;  %v6928_v19 = vld [vmem:[#allocation2 + $0x38] sm:$0x1]  ;;  %v6929_v6 = vld [vmem:[#allocation2 + $0x40] sm:$0xf] }
 0x13d   : > { %6316 = vmatprep.subr.bf16.mxu0 %v6860_v63  ;;  %6503 = vmatmul.mubr.bf16.vlgmr.msra.gmra.mrb[80].mxu1 %v5541_v38  ;;  %v3819_v54 = vrot.slane %v3817_v11, 4  ;;  %v3823_v24 = vshll.u32 %v8276_v49, 16  ;;  %v5685_v3 = vcombine.low %v8245_v55, %v8254_v33  ;;  %v5496_v58 = vrot.slane %v1503_v21, 9  ;;  %v8309_v16 = vld [vmem:[#allocation2 + $0x34] sm:$0xf]  ;;  %v6872_v55 = vld [vmem:[%s9093_s3 + $0x228] sm:$0xff]  }
 0x13e   : > { %4771 = vmatprep.mubr.bf16.mxu0 %v5700_v8  ;;  %6535 = vmatpush3.bf16.msra.mxu1 %v6926_v0  ;;  %v3811_v47 = vrot.slane %v3810_v43, 4  ;;  %v1596_v18 = vrot.slane %v6927_v2, 5  ;;  %v1599_v38 = vrot.slane %v6928_v19, 5  ;;  %v5497_v63 = vrot.slane %v1504_v57, 9  ;;  %v6866_v52 = vld [vmem:[%s9093_s3 + $0x210] sm:$0xff]  }
 0x13f   : > { %6506 = vmatprep.mubr.bf16.mxu1 %v5542_v37  ;;  %v3820_v51 = vor.u32 %v3819_v54, %v3815_v45  ;;  %v3825_v29 = vrot.slane %v3823_v24, 5  ;;  %6536 = vmatprep.subr.bf16.mxu1 %v6864_v34  ;;  %v1603_v13 = vrot.slane %v6929_v6, 5  ;;  %v6930_v9 = vld [vmem:[#allocation2 + $0x44] sm:$0x1]  ;;  %v8322_v21 = vld [vmem:[#allocation2 + $0x38] sm:$0x1] }
 0x140   : > { %6317 = vmatpush3.bf16.msra.mxu0 %v6861_v39  ;;  %v3816_v22 = vsel %vm7258_vm14, %v3811_v47, %v3815_v45  ;;  %v1597_v31 = vsel %vm7186_vm11, %v5496_v58, %v1596_v18  ;;  %v1598_v62 = vrot.slane %v1596_v18, 4  ;;  %v1606_v32 = vrot.slane %v6930_v9, 5  ;;  %v1505_v54 = vld [vmem:[#allocation2 + $0x48] sm:$0xe]  ;;  %v1506_v58 = vld [vmem:[#allocation2 + $0x54] sm:$0xe] }
 0x141   : > { %v3821_v37 = vrot.slane %v3820_v51, 4  ;;  %v8320_v44 = vsel %vm7186_vm11, %v5497_v63, %v1603_v13  ;;  %v1605_v11 = vrot.slane %v1603_v13, 4  ;;  %v3828_v8 = vshrl.u32 %v8307_v36, 16  ;;  %v8344_v6 = vld [vmem:[#allocation2 + $0x3c] sm:$0xf] }
 0x142   : > { %6537 = vmatpush3.bf16.msra.mxu1 %v6864_v34  ;;  %v1600_v39 = vsel %vm7186_vm11, %v1598_v62, %v1599_v38  ;;  %v3831_v43 = vshll.u32 %v8307_v36, 16  ;;  %v3837_v45 = vshll.u32 %v8309_v16, 16  ;;  %v3841_v57 = vshrl.u32 %v8309_v16, 16  ;;  %v6932_v62 = vld [vmem:[#allocation2 + $0x50] sm:$0x1] }
 0x143   : > { %4772 = vmatmul.mubr.bf16.vlgmr.msra.gmra.mrb[80].mxu0 %v5684_v46  ;;  %v3826_v24 = vsel %vm7258_vm14, %v3821_v37, %v3825_v29  ;;  %v5544_v0 = vcombine.low %v1597_v31, %v1600_v39  ;;  %v1607_v34 = vsel %vm7186_vm11, %v1605_v11, %v1606_v32  ;;  %v3830_v47 = vrot.slane %v3828_v8, 4  ;;  %6538 = vmatprep.subr.bf16.mxu1 %v6866_v52  ;;  %v6934_v8 = vld [vmem:[#allocation2 + $0x5c] sm:$0x1] }
 0x144   : > { %v5701_v2 = vcombine.low %v3816_v22, %v3826_v24  ;;  %v5545_v18 = vcombine.low %v8320_v44, %v1607_v34  ;;  %v3833_v19 = vrot.slane %v3831_v43, 5  ;;  %v3839_v38 = vrot.slane %v3837_v45, 5  ;;  %v6931_v22 = vld [vmem:[#allocation2 + $0x4c] sm:$0xf]  ;;  %v8346_v43 = vld [vmem:[#allocation2 + $0x40] sm:$0xf] }
 0x145   : > { %6507 = vmatmul.mubr.bf16.gmra.mrb[84].mxu1 %v5543_v20  ;;  %v3843_v46 = vrot.slane %v3841_v57, 4  ;;  %v3847_v51 = vshll.u32 %v8322_v21, 16  ;;  %v5686_v29 = vcombine.low %v8307_v36, %v8309_v16  ;;  %v5498_v63 = vrot.slane %v1505_v54, 9  ;;  %v6933_v20 = vld [vmem:[#allocation2 + $0x58] sm:$0xf] }
 0x146   : > { %4779 = vmatprep.mubr.bf16.mxu0 %v5701_v2  ;;  %6510 = vmatprep.mubr.bf16.mxu1 %v5544_v0  ;;  %v3834_v13 = vor.u32 %v3833_v19, %v3830_v47  ;;  %v1610_v31 = vrot.slane %v6931_v22, 5  ;;  %v1613_v9 = vrot.slane %v6932_v62, 5  ;;  %v5499_v32 = vrot.slane %v1506_v58, 9  ;;  %v6870_v0 = vld [vmem:[%s9093_s3 + $0x220] sm:$0xff]   ;;  %v6876_v36 = vld [vmem:[%s9093_s3 + $0x238] sm:$0xff]  }
 0x147   : > { %v3844_v37 = vor.u32 %v3843_v46, %v3839_v38  ;;  %v3849_v44 = vrot.slane %v3847_v51, 5  ;;  %6539 = vmatpush3.bf16.msra.mxu1 %v6866_v52  ;;  %v1617_v11 = vrot.slane %v6933_v20, 5  ;;  %v1620_v39 = vrot.slane %v6934_v8, 5  ;;  %v8363_v46 = vld [vmem:[#allocation2 + $0x44] sm:$0x1] }
 0x148   : > { %v3835_v45 = vrot.slane %v3834_v13, 4  ;;  %v1611_v57 = vsel %vm7186_vm11, %v5498_v63, %v1610_v31  ;;  %v1612_v54 = vrot.slane %v1610_v31, 4  ;;  %v3852_v24 = vshrl.u32 %v8344_v6, 16  ;;  %6540 = vmatprep.subr.bf16.mxu1 %v6868_v48  ;;  %v1507_v13 = vld [vmem:[#allocation2 + $0x60] sm:$0xe] }
 0x149   : > { %v3845_v34 = vrot.slane %v3844_v37, 4  ;;  %v8356_v52 = vsel %vm7186_vm11, %v5499_v32, %v1617_v11  ;;  %v1619_v47 = vrot.slane %v1617_v11, 4  ;;  %v3855_v58 = vshll.u32 %v8344_v6, 16 }
 0x14a   : > { %v3840_v2 = vsel %vm7258_vm14, %v3835_v45, %v3839_v38  ;;  %v1614_v19 = vsel %vm7186_vm11, %v1612_v54, %v1613_v9  ;;  %v3854_v51 = vrot.slane %v3852_v24, 4  ;;  %v3861_v63 = vshll.u32 %v8346_v43, 16  ;;  %v1508_v9 = vld [vmem:[#allocation2 + $0x6c] sm:$0xe]  ;;  %v6936_v24 = vld [vmem:[#allocation2 + $0x68] sm:$0x1] }
 0x14b   : > { %4780 = vmatmul.mubr.bf16.gmra.mrb[84].mxu0 %v5685_v3  ;;  %v3850_v22 = vsel %vm7258_vm14, %v3845_v34, %v3849_v44  ;;  %v5546_v31 = vcombine.low %v1611_v57, %v1614_v19  ;;  %v1621_v38 = vsel %vm7186_vm11, %v1619_v47, %v1620_v39  ;;  %v3857_v62 = vrot.slane %v3855_v58, 5  ;;  %6541 = vmatpush3.bf16.msra.mxu1 %v6868_v48  ;;  %v8381_v39 = vld [vmem:[#allocation2 + $0x48] sm:$0xf]  ;;  %v6935_v57 = vld [vmem:[#allocation2 + $0x64] sm:$0xf] }
 0x14c   : > { %v5702_v32 = vcombine.low %v3840_v2, %v3850_v22  ;;  %v5547_v37 = vcombine.low %v8356_v52, %v1621_v38  ;;  %v3863_v20 = vrot.slane %v3861_v63, 5  ;;  %v3865_v11 = vshrl.u32 %v8346_v43, 16  ;;  %6542 = vmatprep.subr.bf16.mxu1 %v6870_v0  ;;  %v6938_v19 = vld [vmem:[#allocation2 + $0x74] sm:$0x1]  ;;  %v8383_v63 = vld [vmem:[#allocation2 + $0x4c] sm:$0xf] }
 0x14d   : > { %6511 = vmatmul.mubr.bf16.gmra.mrb[88].mxu1 %v5545_v18  ;;  %v3858_v3 = vor.u32 %v3857_v62, %v3854_v51  ;;  %v3871_v44 = vshll.u32 %v8363_v46, 16  ;;  %v5687_v8 = vcombine.low %v8344_v6, %v8346_v43  ;;  %v5500_v48 = vrot.slane %v1507_v13, 9  ;;  %v6937_v18 = vld [vmem:[#allocation2 + $0x70] sm:$0xf] }
 0x14e   : > { %4787 = vmatprep.mubr.bf16.mxu0 %v5702_v32  ;;  %6514 = vmatprep.mubr.bf16.mxu1 %v5546_v31  ;;  %v3867_v45 = vrot.slane %v3865_v11, 4  ;;  %v1624_v54 = vrot.slane %v6935_v57, 5  ;;  %v1627_v34 = vrot.slane %v6936_v24, 5  ;;  %v5501_v52 = vrot.slane %v1508_v9, 9  ;;  %v6874_v62 = vld [vmem:[%s9093_s3 + $0x230] sm:$0xff]  }
 0x14f   : > { %v3859_v47 = vrot.slane %v3858_v3, 4  ;;  %v3873_v58 = vrot.slane %v3871_v44, 5  ;;  %v1631_v2 = vrot.slane %v6937_v18, 5  ;;  %v1634_v51 = vrot.slane %v6938_v19, 5  ;;  %6543 = vmatpush3.bf16.msra.mxu1 %v6870_v0  ;;  %v8397_v11 = vld [vmem:[#allocation2 + $0x50] sm:$0x1] }
 0x150   : > { %v3868_v13 = vor.u32 %v3867_v45, %v3863_v20  ;;  %v1625_v22 = vsel %vm7186_vm11, %v5500_v48, %v1624_v54  ;;  %v1626_v31 = vrot.slane %v1624_v54, 4  ;;  %v3876_v38 = vshrl.u32 %v8381_v39, 16  ;;  %6544 = vmatprep.subr.bf16.mxu1 %v6872_v55 }
 0x151   : > { %v3864_v9 = vsel %vm7258_vm14, %v3859_v47, %v3863_v20  ;;  %v8395_v32 = vsel %vm7186_vm11, %v5501_v52, %v1631_v2  ;;  %v1633_v0 = vrot.slane %v1631_v2, 4  ;;  %v3879_v3 = vshll.u32 %v8381_v39, 16  ;;  %v1509_v47 = vld [vmem:[#allocation2 + $0x78] sm:$0xe] }
 0x152   : > { %v3869_v44 = vrot.slane %v3868_v13, 4  ;;  %v1628_v48 = vsel %vm7186_vm11, %v1626_v31, %v1627_v34  ;;  %v3878_v45 = vrot.slane %v3876_v38, 4  ;;  %v3885_v57 = vshll.u32 %v8383_v63, 16  ;;  %v1510_v13 = vld [vmem:[#allocation2 + $0x84] sm:$0xe] }
 0x153   : > { %4788 = vmatmul.mubr.bf16.gmra.mrb[88].mxu0 %v5686_v29  ;;  %v5548_v20 = vcombine.low %v1625_v22, %v1628_v48  ;;  %v1635_v54 = vsel %vm7186_vm11, %v1633_v0, %v1634_v51  ;;  %v3881_v24 = vrot.slane %v3879_v3, 5  ;;  %v3889_v52 = vshrl.u32 %v8383_v63, 16  ;;  %6545 = vmatpush3.bf16.msra.mxu1 %v6872_v55  ;;  %v8418_v31 = vld [vmem:[#allocation2 + $0x54] sm:$0xf]  ;;  %v6939_v0 = vld [vmem:[#allocation2 + $0x7c] sm:$0xf] }
 0x154   : > { %v3874_v18 = vsel %vm7258_vm14, %v3869_v44, %v3873_v58  ;;  %v5549_v34 = vcombine.low %v8395_v32, %v1635_v54  ;;  %v3887_v2 = vrot.slane %v3885_v57, 5  ;;  %v3895_v19 = vshll.u32 %v8397_v11, 16  ;;  %6546 = vmatprep.subr.bf16.mxu1 %v6874_v62  ;;  %v6940_v44 = vld [vmem:[#allocation2 + $0x80] sm:$0x1] }
 0x155   : > { %6515 = vmatmul.mubr.bf16.gmra.mrb[92].mxu1 %v5547_v37  ;;  %v5703_v29 = vcombine.low %v3864_v9, %v3874_v18  ;;  %v3882_v51 = vor.u32 %v3881_v24, %v3878_v45  ;;  %v3891_v22 = vrot.slane %v3889_v52, 4  ;;  %v8420_v58 = vpop.f32.mrb[8].mxu0  ;;  %v5502_v32 = vrot.slane %v1509_v47, 9  ;;  %v8425_v24 = vld [vmem:[#allocation2 + $0x58] sm:$0xf] }
 0x156   : > { %6518 = vmatprep.mubr.bf16.mxu1 %v5548_v20  ;;  %v3897_v38 = vrot.slane %v3895_v19, 5  ;;  %v1638_v3 = vrot.slane %v6939_v0, 5  ;;  %v1641_v48 = vrot.slane %v6940_v44, 5  ;;  %v8422_v57 = vpop.f32.mrb[9].mxu0  ;;  %v5503_v45 = vrot.slane %v1510_v13, 9 }
 0x157   : > { %4795 = vmatprep.mubr.bf16.mxu0 %v5703_v29  ;;  %v3883_v37 = vrot.slane %v3882_v51, 4  ;;  %v3892_v9 = vor.u32 %v3891_v22, %v3887_v2  ;;  %v1645_v54 = vrot.slane %v7992_v26, 5  ;;  %6547 = vmatpush3.bf16.msra.mxu1 %v6874_v62  ;;  %v8427_v52 = vpop.f32.mrb[10].mxu0  ;;  %v1648_v18 = vrot.slane %v7998_v17, 5  ;;  %v8439_v22 = vld [vmem:[#allocation2 + $0x5c] sm:$0x1] }
 0x158   : > { %v1639_v20 = vsel %vm7186_vm11, %v5502_v32, %v1638_v3  ;;  %v1640_v47 = vrot.slane %v1638_v3, 4  ;;  %v3900_v19 = vshrl.u32 %v8418_v31, 16  ;;  %6548 = vmatprep.subr.bf16.mxu1 %v6876_v36  ;;  %v8433_v29 = vpop.f32.mrb[11].mxu0  ;;  %v3903_v17 = vshll.u32 %v8418_v31, 16  ;;  %v1511_v44 = vld [vmem:[#allocation2 + $0x90] sm:$0xe] }
 0x159   : > { %v3888_v13 = vsel %vm7258_vm14, %v3883_v37, %v3887_v2  ;;  %v3893_v26 = vrot.slane %v3892_v9, 4  ;;  %v1646_v62 = vsel %vm7186_vm11, %v5503_v45, %v1645_v54  ;;  %v1647_v51 = vrot.slane %v1645_v54, 4 }
 0x15a   : > { %v1642_v32 = vsel %vm7186_vm11, %v1640_v47, %v1641_v48  ;;  %v3902_v0 = vrot.slane %v3900_v19, 4  ;;  %v3909_v3 = vshll.u32 %v8425_v24, 16  ;;  %v3913_v45 = vshrl.u32 %v8425_v24, 16  ;;  %v1512_v48 = vld [vmem:[#allocation2 + $0x9c] sm:$0xe] }
 0x15b   : > { %4796 = vmatmul.mubr.bf16.gmra.mrb[92].mxu0 %v5687_v8  ;;  %v3898_v2 = vsel %vm7258_vm14, %v3893_v26, %v3897_v38  ;;  %v5550_v37 = vcombine.low %v1639_v20, %v1642_v32  ;;  %v1649_v9 = vsel %vm7186_vm11, %v1647_v51, %v1648_v18  ;;  %6549 = vmatpush3.bf16.msra.mxu1 %v6876_v36  ;;  %v3905_v19 = vrot.slane %v3903_v17, 5  ;;  %v8456_v20 = vld [vmem:[#allocation2 + $0x60] sm:$0xf]  ;;  %v8462_v17 = vld [vmem:[#allocation2 + $0x64] sm:$0xf] }
 0x15c   : > { %v5704_v54 = vcombine.low %v3888_v13, %v3898_v2  ;;  %v5551_v47 = vcombine.low %v1646_v62, %v1649_v9  ;;  %v3911_v5 = vrot.slane %v3909_v3, 5  ;;  %v3915_v55 = vrot.slane %v3913_v45, 4  ;;  %v8474_v9 = vld [vmem:[#allocation2 + $0x68] sm:$0x1] }
 0x15d   : > { %6519 = vmatmul.mubr.bf16.gmra.mrb[0].mxu1 %v5549_v34  ;;  %v3919_v6 = vshll.u32 %v8439_v22, 16  ;;  %v5689_v8 = vcombine.low %v8418_v31, %v8425_v24  ;;  %v5504_v38 = vrot.slane %v1511_v44, 9  ;;  %v3906_v18 = vor.u32 %v3905_v19, %v3902_v0 }
 0x15e   : > { %4803 = vmatprep.mubr.bf16.mxu0 %v5704_v54  ;;  %6522 = vmatprep.mubr.bf16.mxu1 %v5550_v37  ;;  %v1652_v26 = vrot.slane %v8026_v41, 5  ;;  %v1655_v36 = vrot.slane %v8028_v42, 5  ;;  %v5505_v13 = vrot.slane %v1512_v48, 9  ;;  %v3916_v62 = vor.u32 %v3915_v55, %v3911_v5  ;;  %v1513_v54 = vld [vmem:[#allocation2 + $0xa8] sm:$0xe] }
 0x15f   : > { %v3921_v51 = vrot.slane %v3919_v6, 5  ;;  %v1659_v34 = vrot.slane %v8052_v25, 5  ;;  %v1662_v32 = vrot.slane %v8062_v1, 5  ;;  %v3907_v3 = vrot.slane %v3906_v18, 4 }
 0x160   : > { %v1653_v44 = vsel %vm7186_vm11, %v5504_v38, %v1652_v26  ;;  %v1654_v2 = vrot.slane %v1652_v26, 4  ;;  %v3924_v0 = vshrl.u32 %v8456_v20, 16  ;;  %v3917_v37 = vrot.slane %v3916_v62, 4 }
 0x161   : > { %v1660_v41 = vsel %vm7186_vm11, %v5505_v13, %v1659_v34  ;;  %v1661_v42 = vrot.slane %v1659_v34, 4  ;;  %v3927_v55 = vshll.u32 %v8456_v20, 16  ;;  %v3912_v25 = vsel %vm7258_vm14, %v3907_v3, %v3911_v5  ;;  %v1514_v34 = vld [vmem:[#allocation2 + $0xb4] sm:$0xe] }
 0x162   : > { %v1656_v1 = vsel %vm7186_vm11, %v1654_v2, %v1655_v36  ;;  %v3926_v45 = vrot.slane %v3924_v0, 4  ;;  %v3933_v48 = vshll.u32 %v8462_v17, 16  ;;  %v9108_v19 = vcombine.low %v8381_v39, %v8383_v63 }
 0x163   : > { %v3922_v6 = vsel %vm7258_vm14, %v3917_v37, %v3921_v51  ;;  %v5552_v38 = vcombine.low %v1653_v44, %v1656_v1  ;;  %v1663_v5 = vsel %vm7186_vm11, %v1661_v42, %v1662_v32  ;;  %v3929_v18 = vrot.slane %v3927_v55, 5 }
 0x164   : > { %4804 = vmatmul.mubr.bf16.gmra.mrb[96].mxu0 %v9108_v19  ;;  %v5705_v26 = vcombine.low %v3912_v25, %v3922_v6  ;;  %v5553_v36 = vcombine.low %v1660_v41, %v1663_v5  ;;  %v3935_v13 = vrot.slane %v3933_v48, 5  ;;  %v3937_v62 = vshrl.u32 %v8462_v17, 16  ;;  %v8495_v25 = vld [vmem:[#allocation2 + $0x6c] sm:$0xf] }
 0x165   : > { %6523 = vmatmul.mubr.bf16.gmra.mrb[4].mxu1 %v5551_v47  ;;  %v3930_v3 = vor.u32 %v3929_v18, %v3926_v45  ;;  %v3943_v2 = vshll.u32 %v8474_v9, 16  ;;  %v5690_v39 = vcombine.low %v8456_v20, %v8462_v17  ;;  %v5506_v0 = vrot.slane %v1513_v54, 9  ;;  %v8500_v54 = vld [vmem:[#allocation2 + $0x70] sm:$0xf] }
 0x166   : > { %4811 = vmatprep.mubr.bf16.mxu0 %v5705_v26  ;;  %6526 = vmatprep.mubr.bf16.mxu1 %v5552_v38  ;;  %v3939_v51 = vrot.slane %v3937_v62, 4  ;;  %v1666_v32 = vrot.slane %v8087_v56, 5  ;;  %v1669_v44 = vrot.slane %v8095_v10, 5  ;;  %v8492_v37 = vadd.f32 %v8132_v23, %v8127_v60  ;;  %v8514_v38 = vld [vmem:[#allocation2 + $0x74] sm:$0x1] }
 0x167   : > { %v3931_v41 = vrot.slane %v3930_v3, 4  ;;  %v3945_v47 = vrot.slane %v3943_v2, 5  ;;  %v5507_v42 = vrot.slane %v1514_v34, 9  ;;  %v1673_v55 = vrot.slane %v8134_v59, 5  ;;  %v4163_v62 = vld [vmem:[#allocation2 + $0x18] sm:$0xe] }
 0x168   : > { %v3940_v1 = vor.u32 %v3939_v51, %v3935_v13  ;;  %v1667_v45 = vsel %vm7186_vm11, %v5506_v0, %v1666_v32  ;;  %v1668_v48 = vrot.slane %v1666_v32, 4  ;;  %v1676_v56 = vrot.slane %v8149_v50, 5 }
 0x169   : > { %v3936_v10 = vsel %vm7258_vm14, %v3931_v41, %v3935_v13  ;;  %v8506_v60 = vsel %vm7186_vm11, %v5507_v42, %v1673_v55  ;;  %v1675_v23 = vrot.slane %v1673_v55, 4  ;;  %v8510_v59 = vadd.f32 %v8152_v7, %v8137_v53  ;;  %v4164_v42 = vld [vmem:[#allocation2 + $0x24] sm:$0xe] }
 0x16a   : > { %v3941_v19 = vrot.slane %v3940_v1, 4  ;;  %v1670_v6 = vsel %vm7186_vm11, %v1668_v48, %v1669_v44  ;;  %v3948_v50 = vshrl.u32 %v8495_v25, 16  ;;  %v3951_v5 = vshll.u32 %v8495_v25, 16  ;;  %v8518_v18 = vpop.f32.mrb[16].mxu1 }
 0x16b   : > { %v5554_v26 = vcombine.low %v1667_v45, %v1670_v6  ;;  %v1677_v53 = vsel %vm7186_vm11, %v1675_v23, %v1676_v56  ;;  %v3957_v7 = vshll.u32 %v8500_v54, 16  ;;  %v3961_v13 = vshrl.u32 %v8500_v54, 16  ;;  %v8527_v34 = vpop.f32.mrb[17].mxu1  ;;  %v8540_v56 = vld [vmem:[#allocation2 + $0x78] sm:$0xf] }
 0x16c   : > { %4812 = vmatmul.mubr.bf16.gmra.mrb[100].mxu0 %v5689_v8  ;;  %v3946_v3 = vsel %vm7258_vm14, %v3941_v19, %v3945_v47  ;;  %v5555_v2 = vcombine.low %v8506_v60, %v1677_v53  ;;  %v3950_v0 = vrot.slane %v3948_v50, 4  ;;  %v3953_v51 = vrot.slane %v3951_v5, 5  ;;  %v8532_v31 = vpop.f32.mrb[18].mxu1  ;;  %v8547_v19 = vld [vmem:[#allocation2 + $0x7c] sm:$0xf] }
 0x16d   : > { %6527 = vmatmul.mubr.bf16.gmra.mrb[8].mxu1 %v5553_v36  ;;  %v5706_v8 = vcombine.low %v3936_v10, %v3946_v3  ;;  %v3959_v32 = vrot.slane %v3957_v7, 5  ;;  %v3963_v44 = vrot.slane %v3961_v13, 4  ;;  %v3967_v41 = vshll.u32 %v8514_v38, 16  ;;  %v8535_v55 = vpop.f32.mrb[19].mxu1 }
 0x16e   : > { %6530 = vmatprep.mubr.bf16.mxu1 %v5554_v26  ;;  %v3954_v1 = vor.u32 %v3953_v51, %v3950_v0  ;;  %v5691_v47 = vcombine.low %v8495_v25, %v8500_v54  ;;  %v5668_v45 = vrot.slane %v4163_v62, 9  ;;  %v4229_v48 = vrot.slane %v8216_v40, 5  ;;  %v8563_v62 = vld [vmem:[#allocation2 + $0x80] sm:$0x1] }
 0x16f   : > { %4819 = vmatprep.mubr.bf16.mxu0 %v5706_v8  ;;  %v3964_v36 = vor.u32 %v3963_v44, %v3959_v32  ;;  %v3969_v10 = vrot.slane %v3967_v41, 5  ;;  %v4232_v60 = vrot.slane %v8218_v27, 5  ;;  %v8545_v23 = vadd.f32 %v8279_v14, %v8270_v4 }
 0x170   : > { %v3955_v6 = vrot.slane %v3954_v1, 4  ;;  %v4230_v50 = vsel %vm7186_vm11, %v5668_v45, %v4229_v48  ;;  %v4231_v5 = vrot.slane %v4229_v48, 4  ;;  %v5669_v26 = vrot.slane %v4164_v42, 9 }
 0x171   : > { %v3965_v40 = vrot.slane %v3964_v36, 4  ;;  %v4236_v53 = vrot.slane %v8254_v33, 5  ;;  %v8554_v7 = vadd.f32 %v8298_v15, %v8291_v28  ;;  %v3972_v27 = vshrl.u32 %v8540_v56, 16  ;;  %v8557_v13 = vpop.f32.mrb[12].mxu0 }
 0x172   : > { %v3960_v4 = vsel %vm7258_vm14, %v3955_v6, %v3959_v32  ;;  %v4233_v14 = vsel %vm7186_vm11, %v4231_v5, %v4232_v60  ;;  %v3975_v3 = vshll.u32 %v8540_v56, 16  ;;  %v3981_v33 = vshll.u32 %v8547_v19, 16  ;;  %v8567_v0 = vpop.f32.mrb[13].mxu0  ;;  %v4165_v32 = vld [vmem:[#allocation2 + $0x30] sm:$0xe] }
 0x173   : > { %v3970_v28 = vsel %vm7258_vm14, %v3965_v40, %v3969_v10  ;;  %v5716_v15 = vcombine.low %v4230_v50, %v4233_v14  ;;  %v4237_v51 = vsel %vm7186_vm11, %v5669_v26, %v4236_v53  ;;  %v4238_v8 = vrot.slane %v4236_v53, 4  ;;  %v8576_v44 = vpop.f32.mrb[14].mxu0  ;;  %v8578_v41 = vpop.f32.mrb[20].mxu1  ;;  %v4166_v5 = vld [vmem:[#allocation2 + $0x3c] sm:$0xe] }
 0x174   : > { %4820 = vmatmul.mubr.bf16.gmra.mrb[104].mxu0 %v5690_v39  ;;  %v5707_v42 = vcombine.low %v3960_v4, %v3970_v28  ;;  %v3974_v1 = vrot.slane %v3972_v27, 4  ;;  %v3977_v45 = vrot.slane %v3975_v3, 5  ;;  %v3983_v48 = vrot.slane %v3981_v33, 5  ;;  %v8580_v36 = vpop.f32.mrb[15].mxu0  ;;  %v8582_v20 = vpop.f32.mrb[21].mxu1 }
 0x175   : > { %6531 = vmatmul.mubr.bf16.gmra.mrb[12].mxu1 %v5555_v2  ;;  %v9109_v39 = vrot.slane %v8276_v49, 5  ;;  %v3985_v60 = vshrl.u32 %v8547_v19, 16  ;;  %v3991_v6 = vshll.u32 %v8563_v62, 16  ;;  %v5692_v50 = vcombine.low %v8540_v56, %v8547_v19  ;;  %v8592_v26 = vpop.f32.mrb[22].mxu1  ;;  %v8602_v28 = vld [vmem:[#allocation2 + $0x84] sm:$0xf] }
 0x176   : > { %4827 = vmatprep.mubr.bf16.mxu0 %v5707_v42  ;;  %6550 = vmatprep.mubr.bf16.mxu1 %v5716_v15  ;;  %v3978_v53 = vor.u32 %v3977_v45, %v3974_v1  ;;  %v5670_v2 = vrot.slane %v4165_v32, 9  ;;  %v4243_v49 = vrot.slane %v8309_v16, 5  ;;  %v8595_v27 = vpop.f32.mrb[23].mxu1  ;;  %v4246_v3 = vrot.slane %v8322_v21, 5  ;;  %v8612_v45 = vld [vmem:[#allocation2 + $0x88] sm:$0xf] }
 0x177   : > { %v4240_v10 = vsel %vm7186_vm11, %v4238_v8, %v9109_v39  ;;  %v3987_v4 = vrot.slane %v3985_v60, 4  ;;  %v3993_v14 = vrot.slane %v3991_v6, 5  ;;  %v8600_v33 = vadd.f32 %v8422_v57, %v8420_v58  ;;  %v8618_v39 = vld [vmem:[#allocation2 + $0x8c] sm:$0x1] }
 0x178   : > { %v5717_v40 = vcombine.low %v4237_v51, %v4240_v10  ;;  %v3979_v8 = vrot.slane %v3978_v53, 4  ;;  %v4244_v15 = vsel %vm7186_vm11, %v5670_v2, %v4243_v49  ;;  %v4245_v51 = vrot.slane %v4243_v49, 4  ;;  %v4167_v2 = vld [vmem:[#allocation2 + $0x48] sm:$0xe] }
 0x179   : > { %v5671_v32 = vrot.slane %v4166_v5, 9  ;;  %v3988_v42 = vor.u32 %v3987_v4, %v3983_v48  ;;  %v4250_v16 = vrot.slane %v8346_v43, 5  ;;  %v4253_v1 = vrot.slane %v8363_v46, 5 }
 0x17a   : > { %v8610_v21 = vadd.f32 %v8433_v29, %v8427_v52  ;;  %v3984_v58 = vsel %vm7258_vm14, %v3979_v8, %v3983_v48  ;;  %v4247_v57 = vsel %vm7186_vm11, %v4245_v51, %v4246_v3  ;;  %v3996_v10 = vshrl.u32 %v8602_v28, 16  ;;  %v4168_v3 = vld [vmem:[#allocation2 + $0x54] sm:$0xe] }
 0x17b   : > { %v3999_v43 = vshll.u32 %v8602_v28, 16  ;;  %v3989_v46 = vrot.slane %v3988_v42, 4  ;;  %v5718_v52 = vcombine.low %v4244_v15, %v4247_v57  ;;  %v4251_v29 = vsel %vm7186_vm11, %v5671_v32, %v4250_v16  ;;  %v8636_v42 = vld [vmem:[#allocation2 + $0x90] sm:$0xf] }
 0x17c   : > { %4828 = vmatmul.mubr.bf16.gmra.mrb[108].mxu0 %v5691_v47  ;;  %v4252_v60 = vrot.slane %v4250_v16, 4  ;;  %v3998_v48 = vrot.slane %v3996_v10, 4  ;;  %v4005_v5 = vshll.u32 %v8612_v45, 16  ;;  %v4009_v53 = vshrl.u32 %v8612_v45, 16 }
 0x17d   : > { %v4001_v6 = vrot.slane %v3999_v43, 5  ;;  %6551 = vmatmul.mubr.bf16.vlgmr.msra.gmra.mrb[80].mxu1 %v5717_v40  ;;  %v3994_v49 = vsel %vm7258_vm14, %v3989_v46, %v3993_v14  ;;  %v4015_v47 = vshll.u32 %v8618_v39, 16  ;;  %v5693_v4 = vcombine.low %v8602_v28, %v8612_v45 }
 0x17e   : > { %v4254_v25 = vsel %vm7186_vm11, %v4252_v60, %v4253_v1  ;;  %v5708_v8 = vcombine.low %v3984_v58, %v3994_v49  ;;  %6554 = vmatprep.mubr.bf16.mxu1 %v5718_v52  ;;  %v4007_v32 = vrot.slane %v4005_v5, 5  ;;  %v4011_v40 = vrot.slane %v4009_v53, 4 }
 0x17f   : > { %v5719_v15 = vcombine.low %v4251_v29, %v4254_v25  ;;  %v4002_v51 = vor.u32 %v4001_v6, %v3998_v48  ;;  %v4017_v16 = vrot.slane %v4015_v47, 5  ;;  %v5672_v57 = vrot.slane %v4167_v2, 9  ;;  %v8639_v10 = vpop.f32.mrb[24].mxu1  ;;  %v8651_v6 = vld [vmem:[#allocation2 + $0x94] sm:$0xf] }
 0x180   : > { %v4257_v14 = vrot.slane %v8383_v63, 5  ;;  %4835 = vmatprep.mubr.bf16.mxu0 %v5708_v8  ;;  %v4260_v43 = vrot.slane %v8397_v11, 5  ;;  %v8644_v58 = vadd.f32 %v8567_v0, %v8557_v13  ;;  %v5673_v46 = vrot.slane %v4168_v3, 9  ;;  %v8646_v52 = vpop.f32.mrb[25].mxu1  ;;  %v8662_v2 = vld [vmem:[#allocation2 + $0x98] sm:$0x1] }
 0x181   : > { %v4003_v1 = vrot.slane %v4002_v51, 4  ;;  %v4012_v29 = vor.u32 %v4011_v40, %v4007_v32  ;;  %v4264_v63 = vrot.slane %v8425_v24, 5  ;;  %v6070_v5 = vpop.f32.mrb[16].mxu0  ;;  %v8653_v53 = vpop.f32.mrb[26].mxu1  ;;  %v4267_v13 = vrot.slane %v8439_v22, 5 }
 0x182   : > { %v4258_v60 = vsel %vm7186_vm11, %v5672_v57, %v4257_v14  ;;  %v4259_v48 = vrot.slane %v4257_v14, 4  ;;  %v8660_v0 = vadd.f32 %v8580_v36, %v8576_v44  ;;  %v4020_v49 = vshrl.u32 %v8636_v42, 16  ;;  %v6071_v25 = vpop.f32.mrb[17].mxu0  ;;  %v8665_v24 = vpop.f32.mrb[27].mxu1 }
 0x183   : > { %v4008_v11 = vsel %vm7258_vm14, %v4003_v1, %v4007_v32  ;;  %v4013_v47 = vrot.slane %v4012_v29, 4  ;;  %v4265_v22 = vsel %vm7186_vm11, %v5673_v46, %v4264_v63  ;;  %v4266_v44 = vrot.slane %v4264_v63, 4  ;;  %v6073_v36 = vpop.f32.mrb[18].mxu0  ;;  %v4170_v63 = vld [vmem:[#allocation2 + $0x6c] sm:$0xe] }
 0x184   : > { %4836 = vmatmul.mubr.bf16.gmra.mrb[112].mxu0 %v5692_v50  ;;  %v4261_v3 = vsel %vm7186_vm11, %v4259_v48, %v4260_v43  ;;  %v4022_v51 = vrot.slane %v4020_v49, 4  ;;  %v4023_v32 = vshll.u32 %v8636_v42, 16  ;;  %v4029_v40 = vshll.u32 %v8651_v6, 16  ;;  %v6074_v57 = vpop.f32.mrb[19].mxu0  ;;  %v4169_v43 = vld [vmem:[#allocation2 + $0x60] sm:$0xe] }
 0x185   : > { %v5720_v8 = vcombine.low %v4258_v60, %v4261_v3  ;;  %6555 = vmatmul.mubr.bf16.gmra.mrb[84].mxu1 %v5719_v15  ;;  %v4018_v56 = vsel %vm7258_vm14, %v4013_v47, %v4017_v16  ;;  %v4268_v50 = vsel %vm7186_vm11, %v4266_v44, %v4267_v13  ;;  %v4033_v14 = vshrl.u32 %v8651_v6, 16  ;;  %v8693_v44 = vld [vmem:[#allocation2 + $0x9c] sm:$0xf] }
 0x186   : > { %v4039_v1 = vshll.u32 %v8662_v2, 16  ;;  %v5709_v46 = vcombine.low %v4008_v11, %v4018_v56  ;;  %v5721_v29 = vcombine.low %v4265_v22, %v4268_v50  ;;  %v4025_v60 = vrot.slane %v4023_v32, 5 }
 0x187   : > { %6558 = vmatprep.mubr.bf16.mxu1 %v5720_v8  ;;  %v4031_v48 = vrot.slane %v4029_v40, 5  ;;  %v4035_v49 = vrot.slane %v4033_v14, 4  ;;  %v5694_v15 = vcombine.low %v8636_v42, %v8651_v6  ;;  %v8686_v16 = vadd.f32 %v8527_v34, %v8518_v18 }
 0x188   : > { %v4041_v3 = vrot.slane %v4039_v1, 5  ;;  %4843 = vmatprep.mubr.bf16.mxu0 %v5709_v46  ;;  %v4026_v13 = vor.u32 %v4025_v60, %v4022_v51  ;;  %v8690_v47 = vadd.f32 %v8535_v55, %v8532_v31  ;;  %v5674_v11 = vrot.slane %v4169_v43, 9 }
 0x189   : > { %v4271_v22 = vrot.slane %v8462_v17, 5  ;;  %v4036_v8 = vor.u32 %v4035_v49, %v4031_v48  ;;  %v4274_v32 = vrot.slane %v8474_v9, 5  ;;  %v8696_v40 = vadd.f32 %v6071_v25, %v6070_v5  ;;  %v8707_v9 = vld [vmem:[#allocation2 + $0xa0] sm:$0xf] }
 0x18a   : > { %v5675_v42 = vrot.slane %v4170_v63, 9  ;;  %v4027_v56 = vrot.slane %v4026_v13, 4  ;;  %v4278_v51 = vrot.slane %v8500_v54, 5  ;;  %v4281_v31 = vrot.slane %v8514_v38, 5  ;;  %v4172_v13 = vld [vmem:[#allocation2 + $0x84] sm:$0xe] }
 0x18b   : > { %v4272_v18 = vsel %vm7186_vm11, %v5674_v11, %v4271_v22  ;;  %v4273_v34 = vrot.slane %v4271_v22, 4  ;;  %v4037_v17 = vrot.slane %v4036_v8, 4  ;;  %v8705_v55 = vadd.f32 %v6074_v57, %v6073_v36 }
 0x18c   : > { %4844 = vmatmul.mubr.bf16.gmra.mrb[116].mxu0 %v5693_v4  ;;  %v4044_v5 = vshrl.u32 %v8693_v44, 16  ;;  %v4032_v25 = vsel %vm7258_vm14, %v4027_v56, %v4031_v48  ;;  %v4279_v54 = vsel %vm7186_vm11, %v5675_v42, %v4278_v51  ;;  %v4280_v28 = vrot.slane %v4278_v51, 4  ;;  %v8716_v4 = vld [vmem:[#allocation2 + $0xa4] sm:$0x1]  ;;  %v4171_v48 = vld [vmem:[#allocation2 + $0x78] sm:$0xe] }
 0x18d   : > { %v4275_v50 = vsel %vm7186_vm11, %v4273_v34, %v4274_v32  ;;  %6559 = vmatmul.mubr.bf16.gmra.mrb[88].mxu1 %v5721_v29  ;;  %v4042_v38 = vsel %vm7258_vm14, %v4037_v17, %v4041_v3  ;;  %v4047_v14 = vshll.u32 %v8693_v44, 16  ;;  %v4053_v46 = vshll.u32 %v8707_v9, 16  ;;  %v8737_v51 = vld [vmem:[#allocation2 + $0xa8] sm:$0xf] }
 0x18e   : > { %v5722_v36 = vcombine.low %v4272_v18, %v4275_v50  ;;  %v4046_v57 = vrot.slane %v4044_v5, 4  ;;  %v5710_v1 = vcombine.low %v4032_v25, %v4042_v38  ;;  %v4282_v43 = vsel %vm7186_vm11, %v4280_v28, %v4281_v31 }
 0x18f   : > { %v4057_v60 = vshrl.u32 %v8707_v9, 16  ;;  %v5723_v63 = vcombine.low %v4279_v54, %v4282_v43  ;;  %v4049_v49 = vrot.slane %v4047_v14, 5  ;;  %v4063_v29 = vshll.u32 %v8716_v4, 16 }
 0x190   : > { %6562 = vmatprep.mubr.bf16.mxu1 %v5722_v36  ;;  %v5695_v3 = vcombine.low %v8693_v44, %v8707_v9  ;;  %4851 = vmatprep.mubr.bf16.mxu0 %v5710_v1  ;;  %v4055_v11 = vrot.slane %v4053_v46, 5  ;;  %v8730_v8 = vadd.f32 %v8582_v20, %v8578_v41  ;;  %v8734_v32 = vadd.f32 %v8595_v27, %v8592_v26  ;;  %v8761_v46 = vld [vmem:[#allocation2 + $0xac] sm:$0xf] }
 0x191   : > { %v4059_v22 = vrot.slane %v4057_v60, 4  ;;  %v4050_v42 = vor.u32 %v4049_v49, %v4046_v57  ;;  %v4065_v56 = vrot.slane %v4063_v29, 5  ;;  %v5676_v18 = vrot.slane %v4171_v48, 9  ;;  %v8739_v17 = vpop.f32.mrb[28].mxu1  ;;  %v8763_v60 = vld [vmem:[#allocation2 + $0xb0] sm:$0x1] }
 0x192   : > { %v4285_v34 = vrot.slane %v8547_v19, 5  ;;  %v4288_v5 = vrot.slane %v8563_v62, 5  ;;  %v5677_v25 = vrot.slane %v4172_v13, 9  ;;  %v4292_v41 = vrot.slane %v8612_v45, 5  ;;  %v8743_v20 = vpop.f32.mrb[29].mxu1 }
 0x193   : > { %v4060_v31 = vor.u32 %v4059_v22, %v4055_v11  ;;  %v4051_v26 = vrot.slane %v4050_v42, 4  ;;  %v6076_v27 = vpop.f32.mrb[20].mxu0  ;;  %v4295_v19 = vrot.slane %v8618_v39, 5  ;;  %v8748_v28 = vpop.f32.mrb[30].mxu1  ;;  %v4068_v45 = vshrl.u32 %v8737_v51, 16 }
 0x194   : > { %4852 = vmatmul.mubr.bf16.gmra.mrb[120].mxu0 %v5694_v15  ;;  %v4286_v50 = vsel %vm7186_vm11, %v5676_v18, %v4285_v34  ;;  %v4287_v54 = vrot.slane %v4285_v34, 4  ;;  %v6077_v36 = vpop.f32.mrb[21].mxu0  ;;  %v4293_v62 = vsel %vm7186_vm11, %v5677_v25, %v4292_v41  ;;  %v4294_v57 = vrot.slane %v4292_v41, 4  ;;  %v8753_v14 = vpop.f32.mrb[31].mxu1  ;;  %v4173_v22 = vld [vmem:[#allocation2 + $0x90] sm:$0xe] }
 0x195   : > { %v4061_v38 = vrot.slane %v4060_v31, 4  ;;  %6563 = vmatmul.mubr.bf16.gmra.mrb[92].mxu1 %v5723_v63  ;;  %v4056_v15 = vsel %vm7258_vm14, %v4051_v26, %v4055_v11  ;;  %v8759_v39 = vadd.f32 %v6077_v36, %v6076_v27  ;;  %v6079_v43 = vpop.f32.mrb[22].mxu0  ;;  %v4071_v48 = vshll.u32 %v8737_v51, 16  ;;  %v4174_v26 = vld [vmem:[#allocation2 + $0x9c] sm:$0xe] }
 0x196   : > { %v4289_v1 = vsel %vm7186_vm11, %v4287_v54, %v4288_v5  ;;  %v4296_v63 = vsel %vm7186_vm11, %v4294_v57, %v4295_v19  ;;  %v6080_v13 = vpop.f32.mrb[23].mxu0  ;;  %v4070_v11 = vrot.slane %v4068_v45, 4  ;;  %v4077_v5 = vshll.u32 %v8761_v46, 16  ;;  %v8786_v45 = vld [vmem:[#allocation2 + $0xb4] sm:$0xf] }
 0x197   : > { %v4066_v49 = vsel %vm7258_vm14, %v4061_v38, %v4065_v56  ;;  %v5724_v29 = vcombine.low %v4286_v50, %v4289_v1  ;;  %v5725_v18 = vcombine.low %v4293_v62, %v4296_v63  ;;  %v8770_v34 = vadd.f32 %v6080_v13, %v6079_v43 }
 0x198   : > { %v5711_v42 = vcombine.low %v4056_v15, %v4066_v49  ;;  %v4073_v31 = vrot.slane %v4071_v48, 5  ;;  %v4081_v25 = vshrl.u32 %v8761_v46, 16  ;;  %v4087_v41 = vshll.u32 %v8763_v60, 16 }
 0x199   : > { %6566 = vmatprep.mubr.bf16.mxu1 %v5724_v29  ;;  %v5696_v56 = vcombine.low %v8737_v51, %v8761_v46  ;;  %v8779_v50 = vadd.f32 %v8646_v52, %v8639_v10  ;;  %v8783_v54 = vadd.f32 %v8665_v24, %v8653_v53  ;;  %v5678_v19 = vrot.slane %v4173_v22, 9  ;;  %v8793_v53 = vld [vmem:[#allocation2 + $0xb8] sm:$0xf]  ;;  %v3776_v29 = vld [vmem:[#allocation2 + $0xbc] sm:$0x1] }
 0x19a   : > { %4859 = vmatprep.mubr.bf16.mxu0 %v5711_v42  ;;  %v4074_v27 = vor.u32 %v4073_v31, %v4070_v11  ;;  %v4079_v38 = vrot.slane %v4077_v5, 5  ;;  %v4083_v36 = vrot.slane %v4081_v25, 4  ;;  %v4089_v62 = vrot.slane %v4087_v41, 5 }
 0x19b   : > { %v4299_v57 = vrot.slane %v8651_v6, 5  ;;  %v4302_v10 = vrot.slane %v8662_v2, 5  ;;  %v5679_v52 = vrot.slane %v4174_v26, 9  ;;  %v4306_v15 = vrot.slane %v8707_v9, 5 }
 0x19c   : > { %4860 = vmatmul.mubr.bf16.gmra.mrb[124].mxu0 %v5695_v3  ;;  %v4075_v51 = vrot.slane %v4074_v27, 4  ;;  %v4084_v24 = vor.u32 %v4083_v36, %v4079_v38  ;;  %v4309_v6 = vrot.slane %v8716_v4, 5  ;;  %v4092_v48 = vshrl.u32 %v8786_v45, 16 }
 0x19d   : > { %v4300_v1 = vsel %vm7186_vm11, %v5678_v19, %v4299_v57  ;;  %v4301_v43 = vrot.slane %v4299_v57, 4  ;;  %6567 = vmatmul.mubr.bf16.gmra.mrb[0].mxu1 %v5725_v18  ;;  %v4307_v3 = vsel %vm7186_vm11, %v5679_v52, %v4306_v15  ;;  %v4308_v2 = vrot.slane %v4306_v15, 4  ;;  %v4175_v18 = vld [vmem:[#allocation2 + $0xa8] sm:$0xe] }
 0x19e   : > { %v4080_v44 = vsel %vm7258_vm14, %v4075_v51, %v4079_v38  ;;  %v4085_v9 = vrot.slane %v4084_v24, 4  ;;  %v4095_v63 = vshll.u32 %v8786_v45, 16  ;;  %v4101_v13 = vshll.u32 %v8793_v53, 16  ;;  %v4176_v51 = vld [vmem:[#allocation2 + $0xb4] sm:$0xe] }
 0x19f   : > { %v4303_v49 = vsel %vm7186_vm11, %v4301_v43, %v4302_v10  ;;  %v4310_v11 = vsel %vm7186_vm11, %v4308_v2, %v4309_v6  ;;  %v4094_v22 = vrot.slane %v4092_v48, 4  ;;  %v4105_v42 = vshrl.u32 %v8793_v53, 16  ;;  %v6206_v31 = vpop.f32.mrb[32].mxu1 }
 0x1a0   : > { %v5726_v4 = vcombine.low %v4300_v1, %v4303_v49  ;;  %v4090_v5 = vsel %vm7258_vm14, %v4085_v9, %v4089_v62  ;;  %v5727_v25 = vcombine.low %v4307_v3, %v4310_v11  ;;  %v4097_v41 = vrot.slane %v4095_v63, 5  ;;  %v6207_v27 = vpop.f32.mrb[33].mxu1  ;;  %v8831_v11 = vld [vmem:[#allocation2 + $0xc4] sm:$0xf] }
 0x1a1   : > { %v4103_v26 = vrot.slane %v4101_v13, 5  ;;  %v5712_v19 = vcombine.low %v4080_v44, %v4090_v5  ;;  %v4107_v38 = vrot.slane %v4105_v42, 4  ;;  %v4111_v36 = vshll.u32 %v3776_v29, 16  ;;  %v6209_v10 = vpop.f32.mrb[34].mxu1  ;;  %v3777_v5 = vld [vmem:[#allocation2 + $0xc8] sm:$0x1] }
 0x1a2   : > { %6570 = vmatprep.mubr.bf16.mxu1 %v5726_v4  ;;  %v5697_v57 = vcombine.low %v8786_v45, %v8793_v53  ;;  %v6082_v52 = vpop.f32.mrb[24].mxu0  ;;  %v4098_v15 = vor.u32 %v4097_v41, %v4094_v22  ;;  %v8816_v24 = vadd.f32 %v8743_v20, %v8739_v17  ;;  %v8820_v62 = vadd.f32 %v8753_v14, %v8748_v28  ;;  %v6210_v43 = vpop.f32.mrb[35].mxu1  ;;  %v8827_v28 = vld [vmem:[#allocation2 + $0xc0] sm:$0xf] }
 0x1a3   : > { %v5680_v1 = vrot.slane %v4175_v18, 9  ;;  %4867 = vmatprep.mubr.bf16.mxu0 %v5712_v19  ;;  %v6083_v6 = vpop.f32.mrb[25].mxu0  ;;  %v4108_v44 = vor.u32 %v4107_v38, %v4103_v26  ;;  %v4113_v3 = vrot.slane %v4111_v36, 5  ;;  %v4313_v45 = vrot.slane %v8761_v46, 5  ;;  %v4177_v36 = vld [vmem:[#allocation2 + $0xc0] sm:$0xe] }
 0x1a4   : > { %v4316_v2 = vrot.slane %v8763_v60, 5  ;;  %4868 = vmatmul.mubr.bf16.gmra.mrb[128].mxu0 %v5696_v56  ;;  %v8824_v48 = vadd.f32 %v6083_v6, %v6082_v52  ;;  %v6085_v9 = vpop.f32.mrb[26].mxu0  ;;  %v4099_v17 = vrot.slane %v4098_v15, 4  ;;  %v5681_v20 = vrot.slane %v4176_v51, 9  ;;  %v472_v6 = vld [vmem:[#allocation2 + $0xcc] sm:$0x1] }
 0x1a5   : > { %v4320_v49 = vrot.slane %v8793_v53, 5  ;;  %6571 = vmatmul.mubr.bf16.gmra.mrb[4].mxu1 %v5727_v25  ;;  %v6086_v14 = vpop.f32.mrb[27].mxu0  ;;  %v4109_v63 = vrot.slane %v4108_v44, 4  ;;  %v4314_v13 = vsel %vm7186_vm11, %v5680_v1, %v4313_v45  ;;  %v4315_v4 = vrot.slane %v4313_v45, 4 }
 0x1a6   : > { %v4323_v46 = vrot.slane %v3776_v29, 5  ;;  %v8833_v60 = vadd.f32 %v6086_v14, %v6085_v9  ;;  %v4104_v56 = vsel %vm7258_vm14, %v4099_v17, %v4103_v26  ;;  %v4116_v29 = vshrl.u32 %v8827_v28, 16  ;;  %v8853_v14 = vld [vmem:[#allocation2 + $0xd0] sm:$0xf] }
 0x1a7   : > { %v4321_v53 = vsel %vm7186_vm11, %v5681_v20, %v4320_v49  ;;  %v4322_v22 = vrot.slane %v4320_v49, 4  ;;  %v4114_v42 = vsel %vm7258_vm14, %v4109_v63, %v4113_v3  ;;  %v4317_v18 = vsel %vm7186_vm11, %v4315_v4, %v4316_v2  ;;  %v528_v2 = vld [vmem:[#allocation2 + $0xd4] sm:$0x1] }
 0x1a8   : > { %v4119_v25 = vshll.u32 %v8827_v28, 16  ;;  %v5713_v41 = vcombine.low %v4104_v56, %v4114_v42  ;;  %v5728_v19 = vcombine.low %v4314_v13, %v4317_v18  ;;  %v4125_v38 = vshll.u32 %v8831_v11, 16 }
 0x1a9   : > { %v4324_v26 = vsel %vm7186_vm11, %v4322_v22, %v4323_v46  ;;  %v4118_v52 = vrot.slane %v4116_v29, 4  ;;  %v4129_v1 = vshrl.u32 %v8831_v11, 16  ;;  %v4135_v3 = vshll.u32 %v3777_v5, 16  ;;  %v4178_v29 = vld [vmem:[#allocation2 + $0xcc] sm:$0xe] }
 0x1aa   : > { %v5729_v51 = vcombine.low %v4321_v53, %v4324_v26  ;;  %v4121_v15 = vrot.slane %v4119_v25, 5  ;;  %4875 = vmatprep.mubr.bf16.mxu0 %v5713_v41  ;;  %6574 = vmatprep.mubr.bf16.mxu1 %v5728_v19  ;;  %v4127_v44 = vrot.slane %v4125_v38, 5  ;;  %v8849_v45 = vadd.f32 %v6207_v27, %v6206_v31 }
 0x1ab   : > { %v4131_v17 = vrot.slane %v4129_v1, 4  ;;  %v8851_v20 = vadd.f32 %v6210_v43, %v6209_v10  ;;  %v5682_v49 = vrot.slane %v4177_v36, 9  ;;  %v4327_v63 = vrot.slane %v8831_v11, 5 }
 0x1ac   : > { %v4122_v9 = vor.u32 %v4121_v15, %v4118_v52  ;;  %4876 = vmatmul.mubr.bf16.gmra.mrb[132].mxu0 %v5697_v57  ;;  %v4330_v13 = vrot.slane %v3777_v5, 5  ;;  %v473_v4 = vsel %vm7104_vm3, 0, %v472_v6  ;;  %v4137_v31 = vrot.slane %v4135_v3, 5 }
 0x1ad   : > { %6575 = vmatmul.mubr.bf16.gmra.mrb[8].mxu1 %v5729_v51  ;;  %v4132_v56 = vor.u32 %v4131_v17, %v4127_v44  ;;  %474 = vst [vmem:[#allocation2 + $0xcc] sm:$0x1] %v473_v4  ;;  %v529_v27 = vsel %vm7114_vm4, 0, %v528_v2  ;;  %v6212_v10 = vpop.f32.mrb[36].mxu1  ;;  %v4328_v53 = vsel %vm7186_vm11, %v5682_v49, %v4327_v63  ;;  %v4329_v57 = vrot.slane %v4327_v63, 4 }
 0x1ae   : > { %v4123_v46 = vrot.slane %v4122_v9, 4  ;;  %v6088_v43 = vpop.f32.mrb[28].mxu0  ;;  %530 = vst [vmem:[#allocation2 + $0xd4] sm:$0x1] %v529_v27  ;;  %v4149_v22 = vshll.u32 %v8853_v14, 16  ;;  %v6213_v42 = vpop.f32.mrb[37].mxu1  ;;  %v5698_v38 = vcombine.low %v8827_v28, %v8831_v11 }
 0x1af   : > { %v6089_v30 = vpop.f32.mrb[29].mxu0  ;;  %v4133_v5 = vrot.slane %v4132_v56, 4  ;;  %v4153_v25 = vshrl.u32 %v8853_v14, 16  ;;  %v8866_v35 = vadd.f32 %v6213_v42, %v6212_v10  ;;  %v6215_v41 = vpop.f32.mrb[38].mxu1  ;;  %v4331_v36 = vsel %vm7186_vm11, %v4329_v57, %v4330_v13 }
 0x1b0   : > { %v4128_v18 = vsel %vm7258_vm14, %v4123_v46, %v4127_v44  ;;  %v8868_v19 = vadd.f32 %v6089_v30, %v6088_v43  ;;  %v6091_v26 = vpop.f32.mrb[30].mxu0  ;;  %v4334_v51 = vrot.slane %v8853_v14, 5  ;;  %v6216_v52 = vpop.f32.mrb[39].mxu1  ;;  %v5730_v6 = vcombine.low %v4328_v53, %v4331_v36 }
 0x1b1   : > { %v6092_v15 = vpop.f32.mrb[31].mxu0  ;;  %v4138_v1 = vsel %vm7258_vm14, %v4133_v5, %v4137_v31  ;;  %v4151_v44 = vrot.slane %v4149_v22, 5  ;;  %v4155_v3 = vrot.slane %v4153_v25, 4  ;;  %v5683_v17 = vrot.slane %v4178_v29, 9 }
 0x1b2   : > { %v8877_v2 = vadd.f32 %v6092_v15, %v6091_v26  ;;  %v5714_v9 = vcombine.low %v4128_v18, %v4138_v1  ;;  %v8879_v49 = vadd.f32 %v6216_v52, %v6215_v41  ;;  %6578 = vmatprep.mubr.bf16.mxu1 %v5730_v6  ;;  %v4336_v11 = vrot.slane %v4334_v51, 4 }
 0x1b3   : > { %v4156_v28 = vor.u32 %v4155_v3, %v4151_v44  ;;  %v4335_v31 = vsel %vm7186_vm11, %v5683_v17, %v4334_v51 }
 0x1b4   : > { %4883 = vmatprep.mubr.bf16.mxu0 %v5714_v9  ;;  %v3761_v63 = vld [vmem:[#allocation2 + $0xcc] sm:$0xf] }
 0x1b5   : > { %4884 = vmatmul.mubr.bf16.gmra.mrb[136].mxu0 %v5698_v38  ;;  %v3778_v13 = vld [vmem:[#allocation2 + $0xd4] sm:$0x1]  ;;  %v4140_v4 = vshrl.u32 %v3761_v63, 16  ;;  %v4143_v46 = vshll.u32 %v3761_v63, 16  ;;  %v4157_v22 = vrot.slane %v4156_v28, 4  ;;  %v5699_v9 = vcombine.low %v3761_v63, %v8853_v14 }
 0x1b6   : > { %v6094_v56 = vpop.f32.mrb[32].mxu0  ;;  %v4337_v27 = vrot.slane %v3778_v13, 5  ;;  %v4159_v10 = vshll.u32 %v3778_v13, 16 }
 0x1b7   : > { %v6095_v43 = vpop.f32.mrb[33].mxu0  ;;  %v4142_v53 = vrot.slane %v4140_v4, 4  ;;  %v4145_v57 = vrot.slane %v4143_v46, 5 }
 0x1b8   : > { %v6096_v42 = vadd.f32 %v6095_v43, %v6094_v56  ;;  %v4338_v30 = vsel %vm7186_vm11, %v4336_v11, %v4337_v27  ;;  %v6097_v18 = vpop.f32.mrb[34].mxu0  ;;  %v4161_v5 = vrot.slane %v4159_v10, 5  ;;  %v6218_v29 = vpop.f32.mrb[40].mxu1 }
 0x1b9   : > { %v5731_v25 = vcombine.low %v4335_v31, %v4338_v30  ;;  %v6098_v41 = vpop.f32.mrb[35].mxu0  ;;  %v4146_v26 = vor.u32 %v4145_v57, %v4142_v53  ;;  %v6219_v38 = vpop.f32.mrb[41].mxu1 }
 0x1ba   : > { %v6099_v36 = vadd.f32 %v6098_v41, %v6097_v18  ;;  %v8885_v52 = vadd.f32 %v6219_v38, %v6218_v29  ;;  %v6221_v51 = vpop.f32.mrb[42].mxu1  ;;  %v4162_v1 = vsel %vm7258_vm14, %v4157_v22, %v4161_v5 }
 0x1bb   : > { %6579 = vmatmul.mubr.bf16.gmra.mrb[12].mxu1 %v5731_v25  ;;  %v4147_v15 = vrot.slane %v4146_v26, 4  ;;  %v6222_v6 = vpop.f32.mrb[43].mxu1 }
 0x1bc   : > { %v8889_v3 = vadd.f32 %v6222_v6, %v6221_v51 }
 0x1bd   : > { %v4152_v12 = vsel %vm7258_vm14, %v4147_v15, %v4151_v44 }
 0x1be   : > { %v5715_v17 = vcombine.low %v4152_v12, %v4162_v1  ;;  %v6100_v28 = vpop.f32.mrb[36].mxu0 }
 0x1bf   : > { %v6101_v11 = vpop.f32.mrb[37].mxu0 }
 0x1c0   : > { %4891 = vmatprep.mubr.bf16.mxu0 %v5715_v17  ;;  %v6102_v13 = vadd.f32 %v6101_v11, %v6100_v28  ;;  %v6103_v4 = vpop.f32.mrb[38].mxu0 }
 0x1c1   : > { %4892 = vmatmul.mubr.bf16.gmra.mrb[140].mxu0 %v5699_v9  ;;  %v6104_v46 = vpop.f32.mrb[39].mxu0 }
 0x1c2   : > { %v6105_v56 = vadd.f32 %v6104_v46, %v6103_v4  ;;  %v6224_v31 = vpop.f32.mrb[44].mxu1 }
 0x1c3   : > { %v6225_v27 = vpop.f32.mrb[45].mxu1 }
 0x1c4   : > { %v8894_v10 = vadd.f32 %v6225_v27, %v6224_v31  ;;  %v6227_v43 = vpop.f32.mrb[46].mxu1 }
 0x1c5   : > { %v6228_v53 = vpop.f32.mrb[47].mxu1 }
 0x1c6   : > { %v6106_v57 = vpop.f32.mrb[40].mxu0  ;;  %v8896_v61 = vadd.f32 %v6228_v53, %v6227_v43 }
 0x1c7   : > { %v6107_v44 = vpop.f32.mrb[41].mxu0 }
 0x1c8   : > { %v6108_v14 = vadd.f32 %v6107_v44, %v6106_v57  ;;  %v6109_v63 = vpop.f32.mrb[42].mxu0 }
 0x1c9   : > { %v6110_v22 = vpop.f32.mrb[43].mxu0 }
 0x1ca   : > { %v6111_v30 = vadd.f32 %v6110_v22, %v6109_v63  ;;  %v6230_v18 = vpop.f32.mrb[48].mxu1 }
 0x1cb   : > { %v6231_v5 = vpop.f32.mrb[49].mxu1 }
 0x1cc   : > { %v6232_v29 = vadd.f32 %v6231_v5, %v6230_v18  ;;  %v6233_v25 = vpop.f32.mrb[50].mxu1 }
 0x1cd   : > { %v6234_v41 = vpop.f32.mrb[51].mxu1 }
 0x1ce   : > { %v6112_v26 = vpop.f32.mrb[44].mxu0  ;;  %v8898_v38 = vadd.f32 %v6232_v29, %v6096_v42  ;;  %v6235_v51 = vadd.f32 %v6234_v41, %v6233_v25 }
 0x1cf   : > { %v6113_v15 = vpop.f32.mrb[45].mxu0 }
 0x1d0   : > { %v6114_v1 = vadd.f32 %v6113_v15, %v6112_v26  ;;  %v6115_v6 = vpop.f32.mrb[46].mxu0  ;;  %v8900_v12 = vadd.f32 %v6235_v51, %v6099_v36 }
 0x1d1   : > { %v6116_v9 = vpop.f32.mrb[47].mxu0 }
 0x1d2   : > { %v6117_v17 = vadd.f32 %v6116_v9, %v6115_v6 }
 0x1d4   : > { %v6236_v28 = vpop.f32.mrb[52].mxu1 }
 0x1d5   : > { %v6237_v11 = vpop.f32.mrb[53].mxu1 }
 0x1d6   : > { %v6118_v4 = vpop.f32.mrb[48].mxu0  ;;  %v6238_v46 = vadd.f32 %v6237_v11, %v6236_v28  ;;  %v6239_v31 = vpop.f32.mrb[54].mxu1 }
 0x1d7   : > { %v6119_v27 = vpop.f32.mrb[49].mxu0  ;;  %v6240_v43 = vpop.f32.mrb[55].mxu1 }
 0x1d8   : > { %v6120_v53 = vadd.f32 %v6119_v27, %v6118_v4  ;;  %v6121_v57 = vpop.f32.mrb[50].mxu0  ;;  %v8902_v44 = vadd.f32 %v6238_v46, %v6102_v13  ;;  %v6241_v42 = vadd.f32 %v6240_v43, %v6239_v31 }
 0x1d9   : > { %v6122_v63 = vpop.f32.mrb[51].mxu0 }
 0x1da   : > { %v6123_v22 = vadd.f32 %v6122_v63, %v6121_v57  ;;  %v8904_v18 = vadd.f32 %v6241_v42, %v6105_v56 }
 0x1dc   : > { %9110 = vst [vmem:[#allocation3_spill] sm:$0xff] %v8904_v18  ;;  %v6242_v36 = vpop.f32.mrb[56].mxu1 }
 0x1dd   : > { %v6243_v5 = vpop.f32.mrb[57].mxu1 }
 0x1de   : > { %v6124_v29 = vpop.f32.mrb[52].mxu0  ;;  %v6244_v25 = vadd.f32 %v6243_v5, %v6242_v36  ;;  %v6245_v41 = vpop.f32.mrb[58].mxu1 }
 0x1df   : > { %v6125_v26 = vpop.f32.mrb[53].mxu0  ;;  %v6246_v51 = vpop.f32.mrb[59].mxu1 }
 0x1e0   : > { %v6126_v15 = vadd.f32 %v6125_v26, %v6124_v29  ;;  %v6127_v6 = vpop.f32.mrb[54].mxu0  ;;  %v8906_v9 = vadd.f32 %v6244_v25, %v6108_v14  ;;  %v6247_v28 = vadd.f32 %v6246_v51, %v6245_v41 }
 0x1e1   : > { %v6128_v11 = vpop.f32.mrb[55].mxu0 }
 0x1e2   : > { %v6129_v13 = vadd.f32 %v6128_v11, %v6127_v6  ;;  %v8908_v4 = vadd.f32 %v6247_v28, %v6111_v30 }
 0x1e4   : > { %9111 = vst [vmem:[#allocation4_spill] sm:$0xff] %v8908_v4 }
 0x1e6   : > { %v6130_v46 = vpop.f32.mrb[56].mxu0  ;;  %v6248_v31 = vpop.f32.mrb[60].mxu1 }
 0x1e7   : > { %v6131_v56 = vpop.f32.mrb[57].mxu0  ;;  %v6249_v27 = vpop.f32.mrb[61].mxu1 }
 0x1e8   : > { %v6132_v43 = vadd.f32 %v6131_v56, %v6130_v46  ;;  %v6133_v57 = vpop.f32.mrb[58].mxu0  ;;  %v6250_v42 = vadd.f32 %v6249_v27, %v6248_v31  ;;  %v6251_v63 = vpop.f32.mrb[62].mxu1 }
 0x1e9   : > { %v6134_v36 = vpop.f32.mrb[59].mxu0  ;;  %v6252_v5 = vpop.f32.mrb[63].mxu1 }
 0x1ea   : > { %v6135_v18 = vadd.f32 %v6134_v36, %v6133_v57  ;;  %v8910_v29 = vadd.f32 %v6250_v42, %v6114_v1  ;;  %v6253_v14 = vadd.f32 %v6252_v5, %v6251_v63 }
 0x1ec   : > { %v8912_v25 = vadd.f32 %v6253_v14, %v6117_v17 }
 0x1ee   : > { %v6136_v41 = vpop.f32.mrb[60].mxu0  ;;  %v6254_v26 = vpop.f32.mrb[64].mxu1 }
 0x1ef   : > { %v6137_v30 = vpop.f32.mrb[61].mxu0  ;;  %v6255_v51 = vpop.f32.mrb[65].mxu1 }
 0x1f0   : > { %v8914_v6 = vadd.f32 %v6137_v30, %v6136_v41  ;;  %v6139_v28 = vpop.f32.mrb[62].mxu0  ;;  %v6256_v11 = vadd.f32 %v6255_v51, %v6254_v26  ;;  %v6257_v46 = vpop.f32.mrb[66].mxu1 }
 0x1f1   : > { %v6140_v56 = vpop.f32.mrb[63].mxu0  ;;  %v6258_v31 = vpop.f32.mrb[67].mxu1 }
 0x1f2   : > { %v8916_v27 = vadd.f32 %v6140_v56, %v6139_v28  ;;  %v8918_v4 = vadd.f32 %v6256_v11, %v6120_v53  ;;  %v6259_v1 = vadd.f32 %v6258_v31, %v6257_v46 }
 0x1f4   : > { %v8920_v57 = vadd.f32 %v6259_v1, %v6123_v22 }
 0x1f6   : > { %v6456_v17 = vpop.f32.mrb[64].mxu0 }
 0x1f7   : > { %v3146_v42 = vadd.f32 %v6456_v17, %v8545_v23  ;;  %v3137_v63 = vpop.f32.mrb[65].mxu0 }
 0x1f8   : > { %v3138_v36 = vadd.f32 %v8492_v37, %v3137_v63  ;;  %v6457_v5 = vpop.f32.mrb[66].mxu0  ;;  %v6260_v14 = vpop.f32.mrb[68].mxu1 }
 0x1f9   : > { %v8925_v41 = vadd.f32 %v8730_v8, %v3146_v42  ;;  %v3149_v26 = vadd.f32 %v6457_v5, %v8554_v7  ;;  %v3140_v30 = vpop.f32.mrb[67].mxu0  ;;  %v6261_v51 = vpop.f32.mrb[69].mxu1 }
 0x1fa   : > { %v8929_v53 = vadd.f32 %v8686_v16, %v3138_v36  ;;  %v3141_v22 = vadd.f32 %v8510_v59, %v3140_v30  ;;  %v6262_v28 = vadd.f32 %v6261_v51, %v6260_v14  ;;  %v6263_v11 = vpop.f32.mrb[70].mxu1 }
 0x1fb   : > { %v8933_v23 = vadd.f32 %v8734_v32, %v3149_v26  ;;  %v6264_v37 = vpop.f32.mrb[71].mxu1 }
 0x1fc   : > { %v8936_v46 = vadd.f32 %v8690_v47, %v3141_v22  ;;  %v8938_v8 = vadd.f32 %v6262_v28, %v6126_v15  ;;  %v6265_v56 = vadd.f32 %v6264_v37, %v6263_v11 }
 0x1fe   : > { %v8940_v7 = vadd.f32 %v6265_v56, %v6129_v13  ;;  %v6460_v31 = vpop.f32.mrb[68].mxu0 }
 0x1ff   : > { %v3162_v16 = vadd.f32 %v6460_v31, %v8644_v58  ;;  %v3153_v1 = vpop.f32.mrb[69].mxu0 }
 0x200   : > { %v3154_v59 = vadd.f32 %v8600_v33, %v3153_v1  ;;  %v6461_v17 = vpop.f32.mrb[70].mxu0  ;;  %v6266_v42 = vpop.f32.mrb[72].mxu1 }
 0x201   : > { %v8945_v32 = vadd.f32 %v8816_v24, %v3162_v16  ;;  %v3165_v63 = vadd.f32 %v6461_v17, %v8660_v0  ;;  %v3156_v47 = vpop.f32.mrb[71].mxu0  ;;  %v6267_v36 = vpop.f32.mrb[73].mxu1 }
 0x202   : > { %v8949_v15 = vadd.f32 %v8779_v50, %v3154_v59  ;;  %v3157_v13 = vadd.f32 %v8610_v21, %v3156_v47  ;;  %v6268_v5 = vadd.f32 %v6267_v36, %v6266_v42  ;;  %v6269_v14 = vpop.f32.mrb[74].mxu1 }
 0x203   : > { %v8953_v58 = vadd.f32 %v8820_v62, %v3165_v63  ;;  %v6270_v33 = vpop.f32.mrb[75].mxu1 }
 0x204   : > { %v3462_v26 = vadd.f32 %v8783_v54, %v3157_v13  ;;  %v8956_v30 = vadd.f32 %v6268_v5, %v6132_v43  ;;  %v6271_v24 = vadd.f32 %v6270_v33, %v6269_v14 }
 0x206   : > { %v8958_v51 = vadd.f32 %v6271_v24, %v6135_v18  ;;  %v6464_v0 = vpop.f32.mrb[72].mxu0 }
 0x207   : > { %v3178_v22 = vadd.f32 %v6464_v0, %v8759_v39  ;;  %v3169_v50 = vpop.f32.mrb[73].mxu0 }
 0x208   : > { %v3170_v28 = vadd.f32 %v8696_v40, %v3169_v50  ;;  %v6465_v21 = vpop.f32.mrb[74].mxu0  ;;  %v6272_v11 = vpop.f32.mrb[76].mxu1 }
 0x209   : > { %v8963_v37 = vadd.f32 %v8866_v35, %v3178_v22  ;;  %v3181_v62 = vadd.f32 %v6465_v21, %v8770_v34  ;;  %v3172_v56 = vpop.f32.mrb[75].mxu0  ;;  %v6273_v54 = vpop.f32.mrb[77].mxu1 }
 0x20a   : > { %v3475_v43 = vadd.f32 %v8849_v45, %v3170_v28  ;;  %v3173_v18 = vadd.f32 %v8705_v55, %v3172_v56  ;;  %v6274_v31 = vadd.f32 %v6273_v54, %v6272_v11  ;;  %v6275_v16 = vpop.f32.mrb[78].mxu1 }
 0x20b   : > { %v8969_v39 = vadd.f32 %v8879_v49, %v3181_v62  ;;  %v6276_v1 = vpop.f32.mrb[79].mxu1 }
 0x20c   : > { %v3478_v40 = vadd.f32 %v8851_v20, %v3173_v18  ;;  %v8973_v59 = vadd.f32 %v6274_v31, %v8914_v6  ;;  %v6277_v35 = vadd.f32 %v6276_v1, %v6275_v16 }
 0x20e   : > { %v8976_v34 = vadd.f32 %v6277_v35, %v8916_v27  ;;  %v6468_v17 = vpop.f32.mrb[76].mxu0 }
 0x20f   : > { %v3194_v45 = vadd.f32 %v6468_v17, %v8868_v19  ;;  %v3185_v42 = vpop.f32.mrb[77].mxu0 }
 0x210   : > { %v3186_v55 = vadd.f32 %v8824_v48, %v3185_v42  ;;  %v6469_v63 = vpop.f32.mrb[78].mxu0 }
 0x211   : > { %v8981_v49 = vadd.f32 %v8894_v10, %v3194_v45  ;;  %v3197_v47 = vadd.f32 %v6469_v63, %v8877_v2  ;;  %v3188_v20 = vpop.f32.mrb[79].mxu0 }
 0x212   : > { %v3491_v6 = vadd.f32 %v8885_v52, %v3186_v55  ;;  %v3189_v36 = vadd.f32 %v8833_v60, %v3188_v20 }
 0x213   : > { %v8987_v27 = vadd.f32 %v8896_v61, %v3197_v47 }
 0x214   : > { %v3494_v13 = vadd.f32 %v8889_v3, %v3189_v36 }
 0x216   : > { %v6318_v19 = vpop.f32.mrb[80].mxu0 }
 0x217   : > { %v6319_v5 = vpop.f32.mrb[81].mxu0 }
 0x218   : > { %v6320_v14 = vadd.f32 %v6319_v5, %v6318_v19  ;;  %v6321_v48 = vpop.f32.mrb[82].mxu0 }
 0x219   : > { %v6322_v33 = vpop.f32.mrb[83].mxu0 }
 0x21a   : > { %v6323_v24 = vadd.f32 %v6322_v33, %v6321_v48  ;;  %v6604_v10 = vadd.f32 %v6320_v14, %v8929_v53 }
 0x21c   : > { %v8992_v2 = vadd.f32 %v6323_v24, %v8936_v46 }
 0x21e   : > { %v6324_v0 = vpop.f32.mrb[84].mxu0 }
 0x21f   : > { %v6325_v52 = vpop.f32.mrb[85].mxu0 }
 0x220   : > { %v6326_v22 = vadd.f32 %v6325_v52, %v6324_v0  ;;  %v6327_v60 = vpop.f32.mrb[86].mxu0 }
 0x221   : > { %v6328_v50 = vpop.f32.mrb[87].mxu0 }
 0x222   : > { %v6329_v61 = vadd.f32 %v6328_v50, %v6327_v60  ;;  %v6600_v28 = vadd.f32 %v6326_v22, %v8925_v41 }
 0x224   : > { %v6608_v3 = vadd.f32 %v6329_v61, %v8933_v23 }
 0x226   : > { %v6330_v21 = vpop.f32.mrb[88].mxu0 }
 0x227   : > { %v6331_v11 = vpop.f32.mrb[89].mxu0 }
 0x228   : > { %v6332_v62 = vadd.f32 %v6331_v11, %v6330_v21  ;;  %v6333_v56 = vpop.f32.mrb[90].mxu0 }
 0x229   : > { %v6334_v54 = vpop.f32.mrb[91].mxu0 }
 0x22a   : > { %v6335_v18 = vadd.f32 %v6334_v54, %v6333_v56  ;;  %v8997_v53 = vadd.f32 %v6332_v62, %v8949_v15 }
 0x22c   : > { %v8999_v46 = vadd.f32 %v6335_v18, %v3462_v26 }
 0x22e   : > { %v6336_v31 = vpop.f32.mrb[92].mxu0 }
 0x22f   : > { %v6337_v16 = vpop.f32.mrb[93].mxu0 }
 0x230   : > { %v6338_v1 = vadd.f32 %v6337_v16, %v6336_v31  ;;  %v6339_v35 = vpop.f32.mrb[94].mxu0 }
 0x231   : > { %v6340_v17 = vpop.f32.mrb[95].mxu0 }
 0x232   : > { %v6341_v45 = vadd.f32 %v6340_v17, %v6339_v35  ;;  %v6616_v41 = vadd.f32 %v6338_v1, %v8945_v32 }
 0x234   : > { %v9003_v23 = vadd.f32 %v6341_v45, %v8953_v58 }
 0x237   : > { %v6342_v42 = vpop.f32.mrb[96].mxu0 }
 0x238   : > { %v6343_v55 = vpop.f32.mrb[97].mxu0 }
 0x239   : > { %v6344_v63 = vadd.f32 %v6343_v55, %v6342_v42  ;;  %v6345_v47 = vpop.f32.mrb[98].mxu0 }
 0x23a   : > { %v6346_v20 = vpop.f32.mrb[99].mxu0 }
 0x23b   : > { %v6347_v15 = vadd.f32 %v6346_v20, %v6345_v47  ;;  %v9005_v36 = vadd.f32 %v6344_v63, %v3475_v43 }
 0x23d   : > { %v9007_v26 = vadd.f32 %v6347_v15, %v3478_v40 }
 0x23f   : > { %v6348_v19 = vpop.f32.mrb[100].mxu0 }
 0x240   : > { %v6349_v5 = vpop.f32.mrb[101].mxu0 }
 0x241   : > { %v6350_v14 = vadd.f32 %v6349_v5, %v6348_v19  ;;  %v6351_v48 = vpop.f32.mrb[102].mxu0 }
 0x242   : > { %v6352_v33 = vpop.f32.mrb[103].mxu0 }
 0x243   : > { %v6353_v24 = vadd.f32 %v6352_v33, %v6351_v48  ;;  %v9010_v32 = vadd.f32 %v6350_v14, %v8963_v37 }
 0x245   : > { %v9013_v58 = vadd.f32 %v6353_v24, %v8969_v39 }
 0x247   : > { %v6354_v0 = vpop.f32.mrb[104].mxu0 }
 0x248   : > { %v6355_v52 = vpop.f32.mrb[105].mxu0 }
 0x249   : > { %v6356_v22 = vadd.f32 %v6355_v52, %v6354_v0  ;;  %v6357_v60 = vpop.f32.mrb[106].mxu0 }
 0x24a   : > { %v6358_v43 = vpop.f32.mrb[107].mxu0 }
 0x24b   : > { %v6359_v50 = vadd.f32 %v6358_v43, %v6357_v60  ;;  %v9015_v40 = vadd.f32 %v6356_v22, %v3491_v6 }
 0x24d   : > { %v9017_v61 = vadd.f32 %v6359_v50, %v3494_v13 }
 0x24f   : > { %v6360_v21 = vpop.f32.mrb[108].mxu0 }
 0x250   : > { %v6361_v11 = vpop.f32.mrb[109].mxu0  ;;  %v6552_v37 = vpop.f32.mrb[80].mxu1 }
 0x251   : > { %v6362_v62 = vadd.f32 %v6361_v11, %v6360_v21  ;;  %v6363_v56 = vpop.f32.mrb[110].mxu0  ;;  %v6601_v18 = vadd.f32 %v6600_v28, %v6552_v37  ;;  %v4934_v39 = vpop.f32.mrb[81].mxu1 }
 0x252   : > { %v6364_v54 = vpop.f32.mrb[111].mxu0  ;;  %v6605_v16 = vadd.f32 %v6604_v10, %v4934_v39  ;;  %v6553_v1 = vpop.f32.mrb[82].mxu1 }
 0x253   : > { %v6365_v31 = vadd.f32 %v6364_v54, %v6363_v56  ;;  %v9020_v35 = vadd.f32 %v6362_v62, %v8981_v49  ;;  %v6609_v17 = vadd.f32 %v6608_v3, %v6553_v1  ;;  %v4937_v6 = vpop.f32.mrb[83].mxu1  ;;  %v5292_v47 = vmul.f32 %v6601_v18, %v6601_v18 }
 0x254   : > { %v6613_v13 = vadd.f32 %v8992_v2, %v4937_v6  ;;  %v5290_v45 = vmul.f32 %v6605_v16, %v6605_v16 }
 0x255   : > { %v9031_v28 = vadd.f32 %v6365_v31, %v8987_v27  ;;  %v5928_v10 = vpack.c.bf16 %v6609_v17, %v6601_v18  ;;  %v5293_v48 = vmul.f32 %v6609_v17, %v6609_v17 }
 0x256   : > { %v5923_v42 = vpack.c.bf16 %v6613_v13, %v6605_v16  ;;  %v5253_v49 = vadd.f32 %v6613_v13, %v6605_v16  ;;  %v5291_v55 = vmul.f32 %v6613_v13, %v6613_v13 }
 0x257   : > { %v6366_v3 = vpop.f32.mrb[112].mxu0  ;;  %6015 = vst [vmem:[%s9027_s10 + $0x8] sm:$0xff] %v5928_v10  }
 0x258   : > { %v6367_v63 = vpop.f32.mrb[113].mxu0  ;;  %5924 = vst [vmem:[%s9027_s10] sm:$0xff] %v5923_v42   ;;  %v5254_v20 = vadd.f32 %v6601_v18, %v5253_v49  ;;  %v5322_v15 = vadd.f32 %v5291_v55, %v5290_v45  ;;  %v6556_v14 = vpop.f32.mrb[84].mxu1 }
 0x259   : > { %v6368_v19 = vadd.f32 %v6367_v63, %v6366_v3  ;;  %v6369_v5 = vpop.f32.mrb[114].mxu0  ;;  %v6617_v33 = vadd.f32 %v6616_v41, %v6556_v14  ;;  %v4950_v27 = vpop.f32.mrb[85].mxu1 }
 0x25a   : > { %v6370_v2 = vpop.f32.mrb[115].mxu0  ;;  %v5323_v24 = vadd.f32 %v5322_v15, %v5292_v47  ;;  %v6621_v52 = vadd.f32 %v8997_v53, %v4950_v27  ;;  %v5255_v22 = vadd.f32 %v6609_v17, %v5254_v20  ;;  %v6557_v60 = vpop.f32.mrb[86].mxu1 }
 0x25b   : > { %v6371_v0 = vadd.f32 %v6370_v2, %v6369_v5  ;;  %v6625_v43 = vadd.f32 %v9003_v23, %v6557_v60  ;;  %v4953_v50 = vpop.f32.mrb[87].mxu1  ;;  %v9038_v21 = vadd.f32 %v8898_v38, %v6368_v19  ;;  %v5296_v1 = vmul.f32 %v6617_v33, %v6617_v33 }
 0x25c   : > { %v5256_v11 = vadd.f32 %v6621_v52, %v5255_v22  ;;  %v5294_v62 = vmul.f32 %v6621_v52, %v6621_v52  ;;  %v5324_v56 = vadd.f32 %v5323_v24, %v5293_v48  ;;  %v6629_v41 = vadd.f32 %v8999_v46, %v4953_v50 }
 0x25d   : > { %v5938_v37 = vpack.c.bf16 %v6625_v43, %v6617_v33  ;;  %v9042_v54 = vadd.f32 %v8900_v12, %v6371_v0  ;;  %v5297_v45 = vmul.f32 %v6625_v43, %v6625_v43 }
 0x25e   : > { %v5325_v53 = vadd.f32 %v5324_v56, %v5294_v62  ;;  %v5933_v18 = vpack.c.bf16 %v6629_v41, %v6621_v52  ;;  %v5257_v39 = vadd.f32 %v6629_v41, %v5256_v11  ;;  %v5295_v31 = vmul.f32 %v6629_v41, %v6629_v41 }
 0x25f   : > { %v6372_v16 = vpop.f32.mrb[116].mxu0  ;;  %6017 = vst [vmem:[%s9027_s10 + $0x18] sm:$0xff] %v5938_v37  }
 0x260   : > { %v6373_v23 = vpop.f32.mrb[117].mxu0  ;;  %6016 = vst [vmem:[%s9027_s10 + $0x10] sm:$0xff] %v5933_v18   ;;  %v5258_v38 = vadd.f32 %v6617_v33, %v5257_v39  ;;  %v5326_v17 = vadd.f32 %v5325_v53, %v5295_v31  ;;  %v6560_v10 = vpop.f32.mrb[88].mxu1  ;;  %v9112_v33 = vld [vmem:[#allocation3_spill] sm:$0xff] }
 0x261   : > { %v6374_v6 = vadd.f32 %v6373_v23, %v6372_v16  ;;  %v6375_v13 = vpop.f32.mrb[118].mxu0  ;;  %v6633_v42 = vadd.f32 %v9010_v32, %v6560_v10  ;;  %v4966_v12 = vpop.f32.mrb[89].mxu1 }
 0x262   : > { %v6376_v46 = vpop.f32.mrb[119].mxu0  ;;  %v5327_v49 = vadd.f32 %v5326_v17, %v5296_v1  ;;  %v6637_v3 = vadd.f32 %v9005_v36, %v4966_v12  ;;  %v5259_v63 = vadd.f32 %v6625_v43, %v5258_v38  ;;  %v6561_v47 = vpop.f32.mrb[90].mxu1 }
 0x263   : > { %v6377_v55 = vadd.f32 %v6376_v46, %v6375_v13  ;;  %v6641_v20 = vadd.f32 %v9013_v58, %v6561_v47  ;;  %v4969_v15 = vpop.f32.mrb[91].mxu1  ;;  %v6663_v19 = vadd.f32 %v8902_v44, %v6374_v6  ;;  %v5300_v58 = vmul.f32 %v6633_v42, %v6633_v42 }
 0x264   : > { %v5260_v5 = vadd.f32 %v6637_v3, %v5259_v63  ;;  %v5298_v14 = vmul.f32 %v6637_v3, %v6637_v3  ;;  %v5328_v48 = vadd.f32 %v5327_v49, %v5297_v45  ;;  %v6645_v2 = vadd.f32 %v9007_v26, %v4969_v15  ;;  %v9113_v45 = vld [vmem:[#allocation4_spill] sm:$0xff] }
 0x265   : > { %v5948_v32 = vpack.c.bf16 %v6641_v20, %v6633_v42  ;;  %v6669_v27 = vadd.f32 %v9112_v33, %v6377_v55  ;;  %v5301_v56 = vmul.f32 %v6641_v20, %v6641_v20 }
 0x266   : > { %v5329_v24 = vadd.f32 %v5328_v48, %v5298_v14  ;;  %v5943_v0 = vpack.c.bf16 %v6645_v2, %v6637_v3  ;;  %v5261_v36 = vadd.f32 %v6645_v2, %v5260_v5  ;;  %v5299_v52 = vmul.f32 %v6645_v2, %v6645_v2 }
 0x267   : > { %v6378_v22 = vpop.f32.mrb[120].mxu0  ;;  %6019 = vst [vmem:[%s9027_s10 + $0x28] sm:$0xff] %v5948_v32  }
 0x268   : > { %v6379_v60 = vpop.f32.mrb[121].mxu0  ;;  %6018 = vst [vmem:[%s9027_s10 + $0x20] sm:$0xff] %v5943_v0   ;;  %v5262_v43 = vadd.f32 %v6633_v42, %v5261_v36  ;;  %v5330_v50 = vadd.f32 %v5329_v24, %v5299_v52  ;;  %v6564_v62 = vpop.f32.mrb[92].mxu1 }
 0x269   : > { %v6380_v44 = vadd.f32 %v6379_v60, %v6378_v22  ;;  %v6381_v11 = vpop.f32.mrb[122].mxu0  ;;  %v6649_v26 = vadd.f32 %v9020_v35, %v6564_v62  ;;  %v4982_v37 = vpop.f32.mrb[93].mxu1 }
 0x26a   : > { %v6382_v41 = vpop.f32.mrb[123].mxu0  ;;  %v5331_v53 = vadd.f32 %v5330_v50, %v5300_v58  ;;  %v6653_v39 = vadd.f32 %v9015_v40, %v4982_v37  ;;  %v5263_v31 = vadd.f32 %v6641_v20, %v5262_v43  ;;  %v6565_v16 = vpop.f32.mrb[94].mxu1 }
 0x26b   : > { %v6383_v18 = vadd.f32 %v6382_v41, %v6381_v11  ;;  %v6657_v23 = vadd.f32 %v9031_v28, %v6565_v16  ;;  %v4985_v1 = vpop.f32.mrb[95].mxu1  ;;  %v6678_v38 = vadd.f32 %v8906_v9, %v6380_v44  ;;  %v5304_v28 = vmul.f32 %v6649_v26, %v6649_v26 }
 0x26c   : > { %v5264_v17 = vadd.f32 %v6653_v39, %v5263_v31  ;;  %v5302_v6 = vmul.f32 %v6653_v39, %v6653_v39  ;;  %v5332_v13 = vadd.f32 %v5331_v53, %v5301_v56  ;;  %v6661_v10 = vadd.f32 %v9017_v61, %v4985_v1 }
 0x26d   : > { %v5958_v35 = vpack.c.bf16 %v6657_v23, %v6649_v26  ;;  %v6684_v46 = vadd.f32 %v9113_v45, %v6383_v18  ;;  %v5305_v5 = vmul.f32 %v6657_v23, %v6657_v23 }
 0x26e   : > { %v5333_v42 = vadd.f32 %v5332_v13, %v5302_v6  ;;  %v5953_v12 = vpack.c.bf16 %v6661_v10, %v6653_v39  ;;  %v5265_v40 = vadd.f32 %v6661_v10, %v5264_v17  ;;  %v5303_v49 = vmul.f32 %v6661_v10, %v6661_v10 }
 0x26f   : > { %v6384_v55 = vpop.f32.mrb[124].mxu0  ;;  %6021 = vst [vmem:[%s9027_s10 + $0x38] sm:$0xff] %v5958_v35  }
 0x270   : > { %v6385_v3 = vpop.f32.mrb[125].mxu0  ;;  %6020 = vst [vmem:[%s9027_s10 + $0x30] sm:$0xff] %v5953_v12   ;;  %v5266_v63 = vadd.f32 %v6649_v26, %v5265_v40  ;;  %v5334_v47 = vadd.f32 %v5333_v42, %v5303_v49  ;;  %v6568_v15 = vpop.f32.mrb[0].mxu1 }
 0x271   : > { %v6386_v9 = vadd.f32 %v6385_v3, %v6384_v55  ;;  %v6387_v20 = vpop.f32.mrb[126].mxu0  ;;  %v6664_v61 = vadd.f32 %v6663_v19, %v6568_v15  ;;  %v4998_v48 = vpop.f32.mrb[1].mxu1 }
 0x272   : > { %v6388_v14 = vpop.f32.mrb[127].mxu0  ;;  %v5335_v2 = vadd.f32 %v5334_v47, %v5304_v28  ;;  %v6667_v33 = vadd.f32 %v9038_v21, %v4998_v48  ;;  %v5267_v24 = vadd.f32 %v6657_v23, %v5266_v63  ;;  %v6569_v0 = vpop.f32.mrb[2].mxu1 }
 0x273   : > { %v6389_v32 = vadd.f32 %v6388_v14, %v6387_v20  ;;  %v6670_v36 = vadd.f32 %v6669_v27, %v6569_v0  ;;  %v5001_v52 = vpop.f32.mrb[3].mxu1  ;;  %v6675_v22 = vadd.f32 %v8910_v29, %v6386_v9  ;;  %v5308_v26 = vmul.f32 %v6664_v61, %v6664_v61 }
 0x274   : > { %v5268_v60 = vadd.f32 %v6667_v33, %v5267_v24  ;;  %v5306_v58 = vmul.f32 %v6667_v33, %v6667_v33  ;;  %v5336_v43 = vadd.f32 %v5335_v2, %v5305_v5  ;;  %v6673_v50 = vadd.f32 %v9042_v54, %v5001_v52 }
 0x275   : > { %v5968_v44 = vpack.c.bf16 %v6670_v36, %v6664_v61  ;;  %v6681_v19 = vadd.f32 %v8912_v25, %v6389_v32  ;;  %v5309_v54 = vmul.f32 %v6670_v36, %v6670_v36 }
 0x276   : > { %v5337_v11 = vadd.f32 %v5336_v43, %v5306_v58  ;;  %v5963_v62 = vpack.c.bf16 %v6673_v50, %v6667_v33  ;;  %v5269_v56 = vadd.f32 %v6673_v50, %v5268_v60  ;;  %v5307_v21 = vmul.f32 %v6673_v50, %v6673_v50 }
 0x277   : > { %6023 = vst [vmem:[%s9027_s10 + $0x48] sm:$0xff] %v5968_v44   ;;  %v6390_v41 = vpop.f32.mrb[128].mxu0 }
 0x278   : > { %6022 = vst [vmem:[%s9027_s10 + $0x40] sm:$0xff] %v5963_v62   ;;  %v5270_v27 = vadd.f32 %v6664_v61, %v5269_v56  ;;  %v5338_v37 = vadd.f32 %v5337_v11, %v5307_v21  ;;  %v6391_v53 = vpop.f32.mrb[129].mxu0  ;;  %v6572_v29 = vpop.f32.mrb[4].mxu1 }
 0x279   : > { %v6392_v18 = vadd.f32 %v6391_v53, %v6390_v41  ;;  %v6393_v39 = vpop.f32.mrb[130].mxu0  ;;  %v6676_v31 = vadd.f32 %v6675_v22, %v6572_v29  ;;  %v5014_v16 = vpop.f32.mrb[5].mxu1 }
 0x27a   : > { %v5339_v23 = vadd.f32 %v5338_v37, %v5308_v26  ;;  %v6394_v1 = vpop.f32.mrb[131].mxu0  ;;  %v6679_v25 = vadd.f32 %v6678_v38, %v5014_v16  ;;  %v5271_v17 = vadd.f32 %v6670_v36, %v5270_v27  ;;  %v6573_v6 = vpop.f32.mrb[6].mxu1 }
 0x27b   : > { %v6395_v13 = vadd.f32 %v6394_v1, %v6393_v39  ;;  %v6682_v10 = vadd.f32 %v6681_v19, %v6573_v6  ;;  %v5017_v35 = vpop.f32.mrb[7].mxu1  ;;  %v6690_v45 = vadd.f32 %v8918_v4, %v6392_v18  ;;  %v5312_v20 = vmul.f32 %v6676_v31, %v6676_v31 }
 0x27c   : > { %v5272_v42 = vadd.f32 %v6679_v25, %v5271_v17  ;;  %v5310_v12 = vmul.f32 %v6679_v25, %v6679_v25  ;;  %v5340_v40 = vadd.f32 %v5339_v23, %v5309_v54  ;;  %v6685_v49 = vadd.f32 %v6684_v46, %v5017_v35 }
 0x27d   : > { %v5978_v55 = vpack.c.bf16 %v6682_v10, %v6676_v31  ;;  %v6696_v3 = vadd.f32 %v8920_v57, %v6395_v13  ;;  %v5313_v32 = vmul.f32 %v6682_v10, %v6682_v10 }
 0x27e   : > { %v5341_v28 = vadd.f32 %v5340_v40, %v5310_v12  ;;  %v5973_v63 = vpack.c.bf16 %v6685_v49, %v6679_v25  ;;  %v5273_v47 = vadd.f32 %v6685_v49, %v5272_v42  ;;  %v5311_v38 = vmul.f32 %v6685_v49, %v6685_v49 }
 0x27f   : > { %6025 = vst [vmem:[%s9027_s10 + $0x58] sm:$0xff] %v5978_v55   ;;  %v6396_v9 = vpop.f32.mrb[132].mxu0 }
 0x280   : > { %6024 = vst [vmem:[%s9027_s10 + $0x50] sm:$0xff] %v5973_v63   ;;  %v5274_v15 = vadd.f32 %v6676_v31, %v5273_v47  ;;  %v5342_v5 = vadd.f32 %v5341_v28, %v5311_v38  ;;  %v6397_v14 = vpop.f32.mrb[133].mxu0  ;;  %v6576_v61 = vpop.f32.mrb[8].mxu1 }
 0x281   : > { %v6398_v4 = vadd.f32 %v6397_v14, %v6396_v9  ;;  %v6399_v48 = vpop.f32.mrb[134].mxu0  ;;  %v5030_v2 = vpop.f32.mrb[9].mxu1 }
 0x282   : > { %v5343_v46 = vadd.f32 %v5342_v5, %v5312_v20  ;;  %v6400_v33 = vpop.f32.mrb[135].mxu0  ;;  %v6691_v24 = vadd.f32 %v6690_v45, %v5030_v2  ;;  %v5275_v57 = vadd.f32 %v6682_v10, %v5274_v15  ;;  %v6577_v0 = vpop.f32.mrb[10].mxu1 }
 0x283   : > { %v6401_v36 = vadd.f32 %v6400_v33, %v6399_v48  ;;  %v6687_v52 = vadd.f32 %v8938_v8, %v6398_v4  ;;  %v5033_v22 = vpop.f32.mrb[11].mxu1 }
 0x284   : > { %v5276_v60 = vadd.f32 %v6691_v24, %v5275_v57  ;;  %v5314_v58 = vmul.f32 %v6691_v24, %v6691_v24  ;;  %v5344_v43 = vadd.f32 %v5343_v46, %v5313_v32  ;;  %v6697_v50 = vadd.f32 %v6696_v3, %v5033_v22 }
 0x285   : > { %v6688_v44 = vadd.f32 %v6687_v52, %v6576_v61  ;;  %v6693_v19 = vadd.f32 %v8940_v7, %v6401_v36 }
 0x286   : > { %v5345_v11 = vadd.f32 %v5344_v43, %v5314_v58  ;;  %v5983_v62 = vpack.c.bf16 %v6697_v50, %v6691_v24  ;;  %v5277_v56 = vadd.f32 %v6697_v50, %v5276_v60  ;;  %v5315_v21 = vmul.f32 %v6697_v50, %v6697_v50 }
 0x287   : > { %v6694_v41 = vadd.f32 %v6693_v19, %v6577_v0  ;;  %v5316_v26 = vmul.f32 %v6688_v44, %v6688_v44 }
 0x288   : > { %6026 = vst [vmem:[%s9027_s10 + $0x60] sm:$0xff] %v5983_v62   ;;  %v5278_v27 = vadd.f32 %v6688_v44, %v5277_v56  ;;  %v5346_v37 = vadd.f32 %v5345_v11, %v5315_v21  ;;  %v6402_v53 = vpop.f32.mrb[136].mxu0 }
 0x289   : > { %v5988_v8 = vpack.c.bf16 %v6694_v41, %v6688_v44  ;;  %v6403_v29 = vpop.f32.mrb[137].mxu0  ;;  %v5317_v18 = vmul.f32 %v6694_v41, %v6694_v41 }
 0x28a   : > { %v5347_v39 = vadd.f32 %v5346_v37, %v5316_v26  ;;  %v6404_v31 = vadd.f32 %v6403_v29, %v6402_v53  ;;  %v6405_v16 = vpop.f32.mrb[138].mxu0  ;;  %v5279_v54 = vadd.f32 %v6694_v41, %v5278_v27 }
 0x28b   : > { %6027 = vst [vmem:[%s9027_s10 + $0x68] sm:$0xff] %v5988_v8   ;;  %v6406_v7 = vpop.f32.mrb[139].mxu0 }
 0x28c   : > { %v6407_v23 = vadd.f32 %v6406_v7, %v6405_v16  ;;  %v6702_v1 = vadd.f32 %v8956_v30, %v6404_v31  ;;  %v5348_v25 = vadd.f32 %v5347_v39, %v5317_v18 }
 0x28e   : > { %v6580_v17 = vpop.f32.mrb[12].mxu1  ;;  %v6708_v6 = vadd.f32 %v8958_v51, %v6407_v23 }
 0x28f   : > { %v5046_v13 = vpop.f32.mrb[13].mxu1 }
 0x290   : > { %v6703_v10 = vadd.f32 %v6702_v1, %v5046_v13  ;;  %v6581_v35 = vpop.f32.mrb[14].mxu1 }
 0x291   : > { %v5049_v45 = vpop.f32.mrb[15].mxu1 }
 0x292   : > { %v5280_v42 = vadd.f32 %v6703_v10, %v5279_v54  ;;  %v5318_v12 = vmul.f32 %v6703_v10, %v6703_v10  ;;  %v6709_v40 = vadd.f32 %v6708_v6, %v5049_v45 }
 0x294   : > { %v5349_v49 = vadd.f32 %v5348_v25, %v5318_v12  ;;  %v5993_v55 = vpack.c.bf16 %v6709_v40, %v6703_v10  ;;  %v5281_v3 = vadd.f32 %v6709_v40, %v5280_v42  ;;  %v5319_v28 = vmul.f32 %v6709_v40, %v6709_v40  ;;  %v6408_v63 = vpop.f32.mrb[140].mxu0 }
 0x295   : > { %v6409_v47 = vpop.f32.mrb[141].mxu0 }
 0x296   : > { %6028 = vst [vmem:[%s9027_s10 + $0x70] sm:$0xff] %v5993_v55   ;;  %v5350_v30 = vadd.f32 %v5349_v49, %v5319_v28  ;;  %v6410_v38 = vadd.f32 %v6409_v47, %v6408_v63  ;;  %v6411_v9 = vpop.f32.mrb[142].mxu0 }
 0x297   : > { %v6412_v20 = vpop.f32.mrb[143].mxu0 }
 0x298   : > { %v6699_v51 = vadd.f32 %v8973_v59, %v6410_v38  ;;  %v6413_v15 = vadd.f32 %v6412_v20, %v6411_v9 }
 0x29a   : > { %v6700_v5 = vadd.f32 %v6699_v51, %v6580_v17  ;;  %v6705_v14 = vadd.f32 %v8976_v34, %v6413_v15 }
 0x29c   : > { %v5282_v61 = vadd.f32 %v6700_v5, %v5281_v3  ;;  %v5320_v4 = vmul.f32 %v6700_v5, %v6700_v5  ;;  %v6706_v48 = vadd.f32 %v6705_v14, %v6581_v35 }
 0x29e   : > { %v5351_v2 = vadd.f32 %v5350_v30, %v5320_v4  ;;  %v5998_v32 = vpack.c.bf16 %v6706_v48, %v6700_v5  ;;  %v5283_v46 = vadd.f32 %v6706_v48, %v5282_v61  ;;  %v5321_v33 = vmul.f32 %v6706_v48, %v6706_v48 }
 0x2a0   : > { %6029 = vst [vmem:[%s9027_s10 + $0x78] sm:$0xff] %v5998_v32   ;;  %v5284_v24 = vrot.slane %v5283_v46, 4  ;;  %v5352_v57 = vadd.f32 %v5351_v2, %v5321_v33 }
 0x2a2   : > { %v5285_v0 = vadd.f32 %v5284_v24, %v5283_v46  ;;  %v5353_v36 = vrot.slane %v5352_v57, 4 }
 0x2a4   : > { %v5286_v52 = vrot.slane %v5285_v0, 2  ;;  %v5354_v22 = vadd.f32 %v5353_v36, %v5352_v57 }
 0x2a6   : > { %v5287_v59 = vadd.f32 %v5286_v52, %v5285_v0  ;;  %v5355_v60 = vrot.slane %v5354_v22, 2 }
 0x2a8   : > { %v5288_v58 = vrot.slane %v5287_v59, 1  ;;  %v5356_v43 = vadd.f32 %v5355_v60, %v5354_v22 }
 0x2aa   : > { %v5357_v34 = vrot.slane %v5356_v43, 1  ;;  %v5289_v50 = vadd.f32 %v5288_v58, %v5287_v59 }
 0x2ac   : > { %v5358_v44 = vadd.f32 %v5357_v34, %v5356_v43 }
 0x2ae   : > { %v5360_v19 = vsel %vm418_vm0, %v5289_v50, %v5358_v44 }
 0x2af   : > { %5361 = vst [vmem:[%s235_s14] sm:$0x3] %v5360_v19 }
 0x2b0 PF: > { %s16_s18 = sadd.s32 1, %s6947_s18  }
 0x2b1   : > { %p13_p4 = scmp.ge.s32.totalorder %s16_s18, 4  }
 0x2b3   :  { %15 = sbr.rel (!%p13_p4) target bundleno = 1 (0x1), region = 81 }

</bundles_post_ra>
